<compile_context>
chip_gen: v7x
topology: tpu7x:2x2x1
jax: 0.10.0
libtpu: 0.0.40
codegen_flags: <defaults>
</compile_context>

<pallas_src>
import jax
import jax.numpy as jnp
from jax import lax
from jax.experimental import pallas as pl
from jax.experimental.pallas import tpu as pltpu

NEG_SLOPE = 0.2            # LeakyReLU slope used throughout the module
BN_EPS = 1e-5
ROW_CHUNK_DW = 8           # output rows per depthwise-3x3 chunk (VPU stage)
ROW_CHUNK_ADJ = 16         # output rows per conv_adjust chunk (MXU stage)
MM_DTYPE = jnp.bfloat16    # MXU operand dtype (accumulation stays f32)


def _leaky(y):
    return jnp.where(y > 0, y, NEG_SLOPE * y)


def _chunk_rows(h, target):
    """Largest divisor of h that is <= target (bounds accumulator vreg use)."""
    for c in range(min(target, h), 0, -1):
        if h % c == 0:
            return c
    return h


# ---------------------------------------------------------------------------
# Fused kernel: loops over FusionBlocks with the activation resident in VMEM.
# Per block: MBConv (expand -> dw3x3 -> SE -> project + skip), mamba identity,
# ChannelAttention, conv_adjust 3x3 + skip.
# ---------------------------------------------------------------------------
def _dic_kernel(
    # inputs
    x_ref,                       # (1, H, W, C)  module input (NHWC)
    exp_w_ref, exp_s_ref,        # (L, C, E) bf16 (rows >= C//2 zero), (L, 1, E)
    dw_w_ref, dw_s_ref,          # (L, 9, E) f32, (L, 1, E) f32
    se_w1_ref, se_b1_ref,        # (L, E, E//4) f32, (L, 1, E//4) f32
    se_w2_ref, se_b2_ref,        # (L, E//4, E) f32, (L, 1, E) f32
    proj_w_ref, proj_s_ref,      # (L, E, C) bf16 (cols >= C//2 zero), (L, 1, C)
    ca_w1_ref, ca_w2_ref,        # (L, C, C//16) f32, (L, C//16, C) f32
    adj_w_ref, adj_b_ref,        # (L, 9, C, C) bf16, (L, 1, C) f32
    # output
    o_ref,                       # (1, H, W, C)
    # VMEM scratch
    act_ref,                     # (H*W, C)      f32 : block-resident activation
    hpad_ref,                    # ((H+2)*W, E)  f32 : expand output + zero halo
    dw_ref,                      # (H*W, E)      bf16: depthwise output
    cpad_ref,                    # ((H+2)*W, C)  f32 : attention feat + zero halo
    pool_ref,                    # (1, E)        f32 : SE average-pool accumulator
):
    _, H, W, C = x_ref.shape
    L = exp_w_ref.shape[0]
    E = dw_w_ref.shape[2]
    f32 = jnp.float32

    ch_dw = _chunk_rows(H, ROW_CHUNK_DW)
    ch_adj = _chunk_rows(H, ROW_CHUNK_ADJ)
    n_dw = H // ch_dw
    n_adj = H // ch_adj

    # Column-edge keep masks for the +-1 column taps, computed ONCE and reused
    # by every chunk of every block (replaces per-tap iota/mod/compare/select
    # with a single broadcast multiply).
    def _edge_masks(nrows):
        col = lax.broadcasted_iota(jnp.int32, (nrows, 1), 0) % W
        keep_pos = (col != W - 1).astype(f32)      # dx = +1
        keep_neg = (col != 0).astype(f32)          # dx = -1
        return keep_pos, keep_neg

    dw_masks = _edge_masks((ch_dw + 2) * W)
    adj_masks = _edge_masks((ch_adj + 2) * W)

    def _tap_shift(rows, dx, masks):
        # s[i, :] = rows[i + dx, :] when column (i % W) + dx stays in [0, W),
        # else 0.  XLU sublane roll + cached edge mask (no unaligned-slice
        # relayout copies, no per-tap VALU mask construction).
        if dx == 0:
            return rows
        n = rows.shape[0]
        shifted = pltpu.roll(rows, shift=(-dx) % n, axis=0)
        return shifted * (masks[0] if dx > 0 else masks[1])

    # Module input -> VMEM-resident activation; zero halo rows once (they are
    # never overwritten, so this holds for every block).
    act_ref[...] = x_ref[0].astype(f32).reshape(H * W, C)
    hpad_ref[pl.ds(0, W), :] = jnp.zeros((W, E), f32)
    hpad_ref[pl.ds((H + 1) * W, W), :] = jnp.zeros((W, E), f32)
    cpad_ref[pl.ds(0, W), :] = jnp.zeros((W, C), f32)
    cpad_ref[pl.ds((H + 1) * W, W), :] = jnp.zeros((W, C), f32)

    for blk in range(L):                       # static unroll over FusionBlocks
        last = blk == L - 1

        # ---- MBConv expand: 1x1 conv (BN folded; mamba-half weight rows are
        #      zero so the unsplit activation feeds the matmul directly) -------
        h = jnp.dot(act_ref[...].astype(MM_DTYPE), exp_w_ref[blk],
                    preferred_element_type=f32)
        hpad_ref[pl.ds(W, H * W), :] = _leaky(h + exp_s_ref[blk])

        # ---- MBConv depthwise 3x3 (BN folded) + LeakyReLU, row-chunked;
        #      SE global-average pool accumulated per chunk in f32 -------------
        pool_ref[...] = jnp.zeros((1, E), f32)
        w9 = dw_w_ref[blk]                                   # (9, E)
        w_taps = [w9[k:k + 1, :] for k in range(9)]          # hoisted (1, E)
        dw_shift = dw_s_ref[blk]                             # (1, E)
        for ci in range(n_dw):
            base = ci * ch_dw * W
            slab = hpad_ref[pl.ds(base, (ch_dw + 2) * W), :]   # 1 load / chunk
            acc = jnp.zeros((ch_dw * W, E), f32)
            for dx in (-1, 0, 1):
                rows = _tap_shift(slab, dx, dw_masks)
                for dyi in range(3):
                    k = dyi * 3 + (dx + 1)
                    acc = acc + rows[dyi * W:(dyi + ch_dw) * W, :] * w_taps[k]
            dw_act = _leaky(acc + dw_shift)
            pool_ref[...] += jnp.sum(dw_act, axis=0, keepdims=True)
            dw_ref[pl.ds(base, ch_dw * W), :] = dw_act.astype(dw_ref.dtype)

        # ---- SEModule: pool -> 1x1 -> LeakyReLU -> 1x1 -> sigmoid ------------
        pooled = pool_ref[...] * (1.0 / (H * W))
        s_hid = _leaky(jnp.dot(pooled, se_w1_ref[blk],
                               preferred_element_type=f32) + se_b1_ref[blk])
        se_gate = jax.nn.sigmoid(jnp.dot(s_hid, se_w2_ref[blk],
                                         preferred_element_type=f32)
                                 + se_b2_ref[blk])            # (1, E) f32

        # ---- SE gate + MBConv project: 1x1 conv (BN folded, LeakyReLU).
        #      proj weights are zero-padded to C output columns, so the MBConv
        #      residual + cnn/mamba concat collapse to one add below. ----------
        gated = dw_ref[...] * se_gate.astype(MM_DTYPE)        # (H*W, E) bf16
        proj = jnp.dot(gated, proj_w_ref[blk], preferred_element_type=f32)
        proj = _leaky(proj + proj_s_ref[blk])                 # mamba half stays 0

        # TODO(synk): VSSBlock (Mamba SS2D) source was not provided with the
        # module; that branch is an identity pass-through (upper half of act).
        combined = act_ref[...] + proj                        # (H*W, C) f32

        # ---- ChannelAttention: pool -> 1x1 -> LeakyReLU -> 1x1 -> sigmoid ----
        cpool = jnp.mean(combined, axis=0, keepdims=True)     # (1, C)
        ca_hid = _leaky(jnp.dot(cpool, ca_w1_ref[blk],
                                preferred_element_type=f32))
        ca_gate = jax.nn.sigmoid(jnp.dot(ca_hid, ca_w2_ref[blk],
                                         preferred_element_type=f32))
        cpad_ref[pl.ds(W, H * W), :] = combined * ca_gate

        # ---- conv_adjust 3x3 (+bias) + residual with the block input ---------
        adj_b = adj_b_ref[blk]                                # (1, C)
        for ci in range(n_adj):
            r0 = ci * ch_adj
            base = r0 * W
            slab = cpad_ref[pl.ds(base, (ch_adj + 2) * W), :]   # 1 load / chunk
            acc = jnp.zeros((ch_adj * W, C), f32)
            for dx in (-1, 0, 1):
                rows = _tap_shift(slab, dx, adj_masks).astype(MM_DTYPE)
                for dyi in range(3):
                    k = dyi * 3 + (dx + 1)
                    acc = acc + jnp.dot(rows[dyi * W:(dyi + ch_adj) * W, :],
                                        adj_w_ref[blk, k],
                                        preferred_element_type=f32)
            y = acc + adj_b + act_ref[pl.ds(base, ch_adj * W), :]
            if last:
                o_ref[0, pl.ds(r0, ch_adj), :, :] = (
                    y.reshape(ch_adj, W, C).astype(o_ref.dtype))
            else:
                act_ref[pl.ds(base, ch_adj * W), :] = y


# ---------------------------------------------------------------------------
# Wrapper: BN folding, branch-split folding into zero-padded weights, weight
# stacking over blocks, specs, VMEM limit and cost estimate.
# ---------------------------------------------------------------------------
def _rep_spec(shape):
    nd = len(shape)
    return pl.BlockSpec(shape, lambda b, nd=nd: (0,) * nd)


def dic_feature_extractor_nhwc(x, params_list):
    """All FusionBlocks in one pallas_call.  x: (B, H, W, C) NHWC."""
    B, H, W, C = x.shape
    L = len(params_list)
    half = C // 2
    E = params_list[0]["dw_w"].shape[1]      # expanded channels = 4 * (C // 2)
    cr = params_list[0]["se_w1"].shape[1]    # SE hidden width
    c16 = params_list[0]["ca_w1"].shape[1]   # CA hidden width
    f32 = jnp.float32
    assert C % 2 == 0 and W % 8 == 0, "demo assumes even C and sublane-aligned W"

    # Eval-mode BatchNorm fold (running_mean=0, running_var=1, gamma=1, beta=0).
    # TODO(synk): fold real running stats / affine params for a trained ckpt.
    bn_scale = 1.0 / jnp.sqrt(jnp.asarray(1.0 + BN_EPS, f32))

    def fold(p):
        exp_w = jnp.zeros((C, E), f32).at[:half].set(p["exp_w"] * bn_scale)
        exp_s = (p["exp_b"] * bn_scale).reshape(1, E)
        dw_w = (p["dw_w"] * bn_scale).astype(f32)
        dw_s = (p["dw_b"] * bn_scale).reshape(1, E)
        proj_w = jnp.zeros((E, C), f32).at[:, :half].set(p["proj_w"] * bn_scale)
        proj_s = jnp.zeros((1, C), f32).at[:, :half].set(
            (p["proj_b"] * bn_scale).reshape(1, half))
        return (exp_w.astype(MM_DTYPE), exp_s.astype(f32),
                dw_w, dw_s.astype(f32),
                p["se_w1"].astype(f32), p["se_b1"].reshape(1, cr).astype(f32),
                p["se_w2"].astype(f32), p["se_b2"].reshape(1, E).astype(f32),
                proj_w.astype(MM_DTYPE), proj_s,
                p["ca_w1"].astype(f32), p["ca_w2"].astype(f32),
                p["adj_w"].astype(MM_DTYPE), p["adj_b"].reshape(1, C).astype(f32))

    folded = [fold(p) for p in params_list]
    stacked = tuple(jnp.stack([f[i] for f in folded], axis=0)
                    for i in range(len(folded[0])))

    in_specs = [pl.BlockSpec((1, H, W, C), lambda b: (b, 0, 0, 0))]
    in_specs += [_rep_spec(a.shape) for a in stacked]

    scratch_shapes = [
        pltpu.VMEM((H * W, C), f32),            # block-resident activation
        pltpu.VMEM(((H + 2) * W, E), f32),      # padded expand output
        pltpu.VMEM((H * W, E), MM_DTYPE),       # depthwise output (bf16)
        pltpu.VMEM(((H + 2) * W, C), f32),      # padded attention features
        pltpu.VMEM((1, E), f32),                # SE pool accumulator
    ]

    hw = H * W
    weight_bytes = int(sum(a.size * a.dtype.itemsize for a in stacked))
    flops_blk = 2 * hw * (C * E + 9 * E + E * C + 9 * C * C) \
        + 4 * (E * cr + C * c16)
    cost = pl.CostEstimate(
        flops=int(B * L * flops_blk),
        transcendentals=int(B * L * (E + cr + C + c16)),
        bytes_accessed=int(2 * B * hw * C * 4 + weight_bytes))

    scratch_bytes = ((hw * C + (H + 2) * W * E + (H + 2) * W * C + E) * 4
                     + hw * E * 2)
    io_bytes = 4 * hw * C * 4                  # double-buffered in + out blocks
    vmem_limit = int(min(max(4 * (scratch_bytes + io_bytes + weight_bytes),
                             32 << 20), 64 << 20))
    # TODO(synk): for production feature maps (large H*W) add a row-tile grid
    # axis with pooled-stat carry so scratch stays inside v7x's 64 MiB VMEM.

    return pl.pallas_call(
        _dic_kernel,
        out_shape=jax.ShapeDtypeStruct((B, H, W, C), x.dtype),
        grid=(B,),
        in_specs=in_specs,
        out_specs=pl.BlockSpec((1, H, W, C), lambda b: (b, 0, 0, 0)),
        scratch_shapes=scratch_shapes,
        compiler_params=pltpu.CompilerParams(
            dimension_semantics=("parallel",),   # v7x: one image per TensorCore
            vmem_limit_bytes=vmem_limit),
        cost_estimate=cost,
    )(x, *stacked)


def dic_feature_extractor(x_nchw, params_list):
    # NCHW -> NHWC for the kernel (channels on lanes), back to NCHW on output.
    x = jnp.transpose(x_nchw, (0, 2, 3, 1))
    y = dic_feature_extractor_nhwc(x, params_list)
    return jnp.transpose(y, (0, 3, 1, 2))


# ---------------------------------------------------------------------------
# Parameter init (kernel-friendly layouts) and driver.
# ---------------------------------------------------------------------------
def init_fusion_block_params(key, channels):
    half = channels // 2
    exp = half * 4
    ks = jax.random.split(key, 14)
    w = lambda k, shape, s=0.05: jax.random.normal(k, shape, jnp.float32) * s
    return {
        # MBConv expand: 1x1 half -> exp (+BN, LeakyReLU)
        "exp_w": w(ks[0], (half, exp)), "exp_b": w(ks[1], (exp,)),
        # MBConv depthwise 3x3 (+BN, LeakyReLU); taps stored as (9, exp)
        "dw_w": w(ks[2], (9, exp)), "dw_b": w(ks[3], (exp,)),
        # SEModule (reduction=4), with biases
        "se_w1": w(ks[4], (exp, exp // 4)), "se_b1": w(ks[5], (exp // 4,)),
        "se_w2": w(ks[6], (exp // 4, exp)), "se_b2": w(ks[7], (exp,)),
        # MBConv project: 1x1 exp -> half (+BN, LeakyReLU)
        "proj_w": w(ks[8], (exp, half)), "proj_b": w(ks[9], (half,)),
        # ChannelAttention (no biases)
        "ca_w1": w(ks[10], (channels, channels // 16)),
        "ca_w2": w(ks[11], (channels // 16, channels)),
        # conv_adjust: 3x3 channels -> channels with bias; taps as (9, Cin, Cout)
        "adj_w": w(ks[12], (9, channels, channels)),
        "adj_b": w(ks[13], (channels,)),
    }


if __name__ == "__main__":
    # C must be a multiple of 16 (ChannelAttention uses C//16); W a multiple of
    # 8 keeps all in-kernel row slices sublane-aligned.
    B, C, H, W = 2, 64, 16, 16
    NUM_BLOCKS = 2

    root = jax.random.PRNGKey(0)
    kx, kp = jax.random.split(root)
    x = jax.random.normal(kx, (B, C, H, W), jnp.float32)
    params = [init_fusion_block_params(k, C)
              for k in jax.random.split(kp, NUM_BLOCKS)]

    fn = jax.jit(lambda inp: dic_feature_extractor(inp, params))
    out = fn(x)
    jax.block_until_ready(out)
    assert out.shape == (B, C, H, W) and out.dtype == jnp.float32
    assert bool(jnp.isfinite(out).all())
    print("KERNEL_OK")
</pallas_src>

<mosaic_0001>
module attributes {stable_mosaic.version = 11 : i64} {
  func.func @_dic_kernel(%arg0: i32, %arg1: memref<1x16x16x64xf32, #tpu.memory_space<vmem>>, %arg2: memref<2x64x128xbf16, #tpu.memory_space<vmem>>, %arg3: memref<2x1x128xf32, #tpu.memory_space<vmem>>, %arg4: memref<2x9x128xf32, #tpu.memory_space<vmem>>, %arg5: memref<2x1x128xf32, #tpu.memory_space<vmem>>, %arg6: memref<2x128x32xf32, #tpu.memory_space<vmem>>, %arg7: memref<2x1x32xf32, #tpu.memory_space<vmem>>, %arg8: memref<2x32x128xf32, #tpu.memory_space<vmem>>, %arg9: memref<2x1x128xf32, #tpu.memory_space<vmem>>, %arg10: memref<2x128x64xbf16, #tpu.memory_space<vmem>>, %arg11: memref<2x1x64xf32, #tpu.memory_space<vmem>>, %arg12: memref<2x64x4xf32, #tpu.memory_space<vmem>>, %arg13: memref<2x4x64xf32, #tpu.memory_space<vmem>>, %arg14: memref<2x9x64x64xbf16, #tpu.memory_space<vmem>>, %arg15: memref<2x1x64xf32, #tpu.memory_space<vmem>>, %arg16: memref<1x16x16x64xf32, #tpu.memory_space<vmem>>, %arg17: memref<256x64xf32, #tpu.memory_space<vmem>>, %arg18: memref<288x128xf32, #tpu.memory_space<vmem>>, %arg19: memref<256x128xbf16, #tpu.memory_space<vmem>>, %arg20: memref<288x64xf32, #tpu.memory_space<vmem>>, %arg21: memref<1x128xf32, #tpu.memory_space<vmem>>) attributes {dimension_semantics = [#tpu.dimension_semantics<parallel>], iteration_bounds = array<i64: 2>, scalar_prefetch = 0 : i64, scratch_operands = 5 : i64, tpu.core_type = #tpu.core_type<tc>, window_params = [{transform_indices = @transform_0, window_bounds = array<i64: 1, 16, 16, 64>}, {pipeline_mode = #tpu.pipeline_mode<synchronous>, transform_indices = @transform_1, window_bounds = array<i64: 2, 64, 128>}, {pipeline_mode = #tpu.pipeline_mode<synchronous>, transform_indices = @transform_2, window_bounds = array<i64: 2, 1, 128>}, {pipeline_mode = #tpu.pipeline_mode<synchronous>, transform_indices = @transform_3, window_bounds = array<i64: 2, 9, 128>}, {pipeline_mode = #tpu.pipeline_mode<synchronous>, transform_indices = @transform_4, window_bounds = array<i64: 2, 1, 128>}, {pipeline_mode = #tpu.pipeline_mode<synchronous>, transform_indices = @transform_5, window_bounds = array<i64: 2, 128, 32>}, {pipeline_mode = #tpu.pipeline_mode<synchronous>, transform_indices = @transform_6, window_bounds = array<i64: 2, 1, 32>}, {pipeline_mode = #tpu.pipeline_mode<synchronous>, transform_indices = @transform_7, window_bounds = array<i64: 2, 32, 128>}, {pipeline_mode = #tpu.pipeline_mode<synchronous>, transform_indices = @transform_8, window_bounds = array<i64: 2, 1, 128>}, {pipeline_mode = #tpu.pipeline_mode<synchronous>, transform_indices = @transform_9, window_bounds = array<i64: 2, 128, 64>}, {pipeline_mode = #tpu.pipeline_mode<synchronous>, transform_indices = @transform_10, window_bounds = array<i64: 2, 1, 64>}, {pipeline_mode = #tpu.pipeline_mode<synchronous>, transform_indices = @transform_11, window_bounds = array<i64: 2, 64, 4>}, {pipeline_mode = #tpu.pipeline_mode<synchronous>, transform_indices = @transform_12, window_bounds = array<i64: 2, 4, 64>}, {pipeline_mode = #tpu.pipeline_mode<synchronous>, transform_indices = @transform_13, window_bounds = array<i64: 2, 9, 64, 64>}, {pipeline_mode = #tpu.pipeline_mode<synchronous>, transform_indices = @transform_14, window_bounds = array<i64: 2, 1, 64>}, {transform_indices = @transform_15, window_bounds = array<i64: 1, 16, 16, 64>}]} {
    %0 = tpu.iota {dimensions = array<i32: 0>} : vector<160x1xi32>
    %c16_i32 = arith.constant 16 : i32
    %c0_i32 = arith.constant 0 : i32
    %1 = arith.cmpi eq, %c16_i32, %c0_i32 : i32
    %c1_i32 = arith.constant 1 : i32
    %2 = arith.select %1, %c1_i32, %c16_i32 : i32
    %3 = vector.broadcast %2 : i32 to vector<160x1xi32>
    %4 = arith.remsi %0, %3 : vector<160x1xi32>
    %c0_i32_0 = arith.constant 0 : i32
    %5 = vector.broadcast %c0_i32_0 : i32 to vector<160x1xi32>
    %6 = arith.cmpi ne, %4, %5 : vector<160x1xi32>
    %c0_i32_1 = arith.constant 0 : i32
    %7 = vector.broadcast %c0_i32_1 : i32 to vector<160x1xi32>
    %8 = arith.cmpi slt, %4, %7 : vector<160x1xi32>
    %c0_i32_2 = arith.constant 0 : i32
    %9 = arith.cmpi slt, %2, %c0_i32_2 : i32
    %10 = vector.broadcast %9 : i1 to vector<160x1xi1>
    %11 = vector.broadcast %10 : vector<160x1xi1> to vector<160x1xi1>
    %12 = arith.xori %8, %11 : vector<160x1xi1>
    %13 = arith.andi %12, %6 : vector<160x1xi1>
    %14 = vector.broadcast %2 : i32 to vector<160x1xi32>
    %15 = arith.addi %4, %14 : vector<160x1xi32>
    %16 = arith.select %13, %15, %4 : vector<160x1xi1>, vector<160x1xi32>
    %c15_i32 = arith.constant 15 : i32
    %17 = vector.broadcast %c15_i32 : i32 to vector<160x1xi32>
    %18 = arith.cmpi ne, %16, %17 : vector<160x1xi32>
    %19 = arith.extui %18 : vector<160x1xi1> to vector<160x1xi32>
    %20 = arith.sitofp %19 : vector<160x1xi32> to vector<160x1xf32>
    %c0_i32_3 = arith.constant 0 : i32
    %21 = vector.broadcast %c0_i32_3 : i32 to vector<160x1xi32>
    %22 = arith.cmpi ne, %16, %21 : vector<160x1xi32>
    %23 = arith.extui %22 : vector<160x1xi1> to vector<160x1xi32>
    %24 = arith.sitofp %23 : vector<160x1xi32> to vector<160x1xf32>
    %25 = tpu.iota {dimensions = array<i32: 0>} : vector<288x1xi32>
    %c16_i32_4 = arith.constant 16 : i32
    %c0_i32_5 = arith.constant 0 : i32
    %26 = arith.cmpi eq, %c16_i32_4, %c0_i32_5 : i32
    %c1_i32_6 = arith.constant 1 : i32
    %27 = arith.select %26, %c1_i32_6, %c16_i32_4 : i32
    %28 = vector.broadcast %27 : i32 to vector<288x1xi32>
    %29 = arith.remsi %25, %28 : vector<288x1xi32>
    %c0_i32_7 = arith.constant 0 : i32
    %30 = vector.broadcast %c0_i32_7 : i32 to vector<288x1xi32>
    %31 = arith.cmpi ne, %29, %30 : vector<288x1xi32>
    %c0_i32_8 = arith.constant 0 : i32
    %32 = vector.broadcast %c0_i32_8 : i32 to vector<288x1xi32>
    %33 = arith.cmpi slt, %29, %32 : vector<288x1xi32>
    %c0_i32_9 = arith.constant 0 : i32
    %34 = arith.cmpi slt, %27, %c0_i32_9 : i32
    %35 = vector.broadcast %34 : i1 to vector<288x1xi1>
    %36 = vector.broadcast %35 : vector<288x1xi1> to vector<288x1xi1>
    %37 = arith.xori %33, %36 : vector<288x1xi1>
    %38 = arith.andi %37, %31 : vector<288x1xi1>
    %39 = vector.broadcast %27 : i32 to vector<288x1xi32>
    %40 = arith.addi %29, %39 : vector<288x1xi32>
    %41 = arith.select %38, %40, %29 : vector<288x1xi1>, vector<288x1xi32>
    %c15_i32_10 = arith.constant 15 : i32
    %42 = vector.broadcast %c15_i32_10 : i32 to vector<288x1xi32>
    %43 = arith.cmpi ne, %41, %42 : vector<288x1xi32>
    %44 = arith.extui %43 : vector<288x1xi1> to vector<288x1xi32>
    %45 = arith.sitofp %44 : vector<288x1xi32> to vector<288x1xf32>
    %c0_i32_11 = arith.constant 0 : i32
    %46 = vector.broadcast %c0_i32_11 : i32 to vector<288x1xi32>
    %47 = arith.cmpi ne, %41, %46 : vector<288x1xi32>
    %48 = arith.extui %47 : vector<288x1xi1> to vector<288x1xi32>
    %49 = arith.sitofp %48 : vector<288x1xi32> to vector<288x1xf32>
    %c0 = arith.constant 0 : index
    %c0_12 = arith.constant 0 : index
    %c0_13 = arith.constant 0 : index
    %c0_14 = arith.constant 0 : index
    %50 = vector.load %arg1[%c0, %c0_12, %c0_13, %c0_14] : memref<1x16x16x64xf32, #tpu.memory_space<vmem>>, vector<1x16x16x64xf32>
    %51 = vector.shape_cast %50 : vector<1x16x16x64xf32> to vector<16x16x64xf32>
    %52 = vector.shape_cast %51 : vector<16x16x64xf32> to vector<256x64xf32>
    %c0_15 = arith.constant 0 : index
    %c0_16 = arith.constant 0 : index
    %53 = vector.load %arg17[%c0_15, %c0_16] : memref<256x64xf32, #tpu.memory_space<vmem>>, vector<256x64xf32>
    tpu.vector_store %arg17[%c0_15, %c0_16], %52 {strides = array<i32>} : memref<256x64xf32, #tpu.memory_space<vmem>>, vector<256x64xf32>,
    %cst = arith.constant 0.000000e+00 : f32
    %54 = vector.broadcast %cst : f32 to vector<16x128xf32>
    %c0_17 = arith.constant 0 : index
    %c0_18 = arith.constant 0 : index
    %55 = vector.load %arg18[%c0_17, %c0_18] : memref<288x128xf32, #tpu.memory_space<vmem>>, vector<16x128xf32>
    tpu.vector_store %arg18[%c0_17, %c0_18], %54 {strides = array<i32>} : memref<288x128xf32, #tpu.memory_space<vmem>>, vector<16x128xf32>,
    %cst_19 = arith.constant 0.000000e+00 : f32
    %56 = vector.broadcast %cst_19 : f32 to vector<16x128xf32>
    %c272 = arith.constant 272 : index
    %c0_20 = arith.constant 0 : index
    %57 = vector.load %arg18[%c272, %c0_20] : memref<288x128xf32, #tpu.memory_space<vmem>>, vector<16x128xf32>
    tpu.vector_store %arg18[%c272, %c0_20], %56 {strides = array<i32>} : memref<288x128xf32, #tpu.memory_space<vmem>>, vector<16x128xf32>,
    %cst_21 = arith.constant 0.000000e+00 : f32
    %58 = vector.broadcast %cst_21 : f32 to vector<16x64xf32>
    %c0_22 = arith.constant 0 : index
    %c0_23 = arith.constant 0 : index
    %59 = vector.load %arg20[%c0_22, %c0_23] : memref<288x64xf32, #tpu.memory_space<vmem>>, vector<16x64xf32>
    tpu.vector_store %arg20[%c0_22, %c0_23], %58 {strides = array<i32>} : memref<288x64xf32, #tpu.memory_space<vmem>>, vector<16x64xf32>,
    %cst_24 = arith.constant 0.000000e+00 : f32
    %60 = vector.broadcast %cst_24 : f32 to vector<16x64xf32>
    %c272_25 = arith.constant 272 : index
    %c0_26 = arith.constant 0 : index
    %61 = vector.load %arg20[%c272_25, %c0_26] : memref<288x64xf32, #tpu.memory_space<vmem>>, vector<16x64xf32>
    tpu.vector_store %arg20[%c272_25, %c0_26], %60 {strides = array<i32>} : memref<288x64xf32, #tpu.memory_space<vmem>>, vector<16x64xf32>,
    %c0_27 = arith.constant 0 : index
    %c0_28 = arith.constant 0 : index
    %62 = vector.load %arg17[%c0_27, %c0_28] : memref<256x64xf32, #tpu.memory_space<vmem>>, vector<256x64xf32>
    %63 = arith.truncf %62 : vector<256x64xf32> to vector<256x64xbf16>
    %c0_29 = arith.constant 0 : index
    %c0_30 = arith.constant 0 : index
    %c0_31 = arith.constant 0 : index
    %64 = vector.load %arg2[%c0_29, %c0_30, %c0_31] : memref<2x64x128xbf16, #tpu.memory_space<vmem>>, vector<1x64x128xbf16>
    %65 = vector.shape_cast %64 : vector<1x64x128xbf16> to vector<64x128xbf16>
    %cst_32 = arith.constant dense<0.000000e+00> : vector<256x128xf32>
    %66 = tpu.matmul %63, %65, %cst_32 {dimension_numbers = #tpu.dot_dimension_numbers<[1], [0], [0], [1], [0, 0, 1, 1], [], []>} : vector<256x64xbf16>, vector<64x128xbf16>, vector<256x128xf32> -> vector<256x128xf32>
    %c0_33 = arith.constant 0 : index
    %c0_34 = arith.constant 0 : index
    %c0_35 = arith.constant 0 : index
    %67 = vector.load %arg3[%c0_33, %c0_34, %c0_35] : memref<2x1x128xf32, #tpu.memory_space<vmem>>, vector<1x1x128xf32>
    %68 = vector.shape_cast %67 : vector<1x1x128xf32> to vector<1x128xf32>
    %69 = vector.broadcast %68 : vector<1x128xf32> to vector<256x128xf32>
    %70 = arith.addf %66, %69 : vector<256x128xf32>
    %cst_36 = arith.constant 0.000000e+00 : f32
    %71 = vector.broadcast %cst_36 : f32 to vector<256x128xf32>
    %72 = arith.cmpf ogt, %70, %71 : vector<256x128xf32>
    %cst_37 = arith.constant 2.000000e-01 : f32
    %73 = vector.broadcast %cst_37 : f32 to vector<256x128xf32>
    %74 = arith.mulf %73, %70 : vector<256x128xf32>
    %75 = arith.select %72, %70, %74 : vector<256x128xi1>, vector<256x128xf32>
    %c16 = arith.constant 16 : index
    %c0_38 = arith.constant 0 : index
    %76 = vector.load %arg18[%c16, %c0_38] : memref<288x128xf32, #tpu.memory_space<vmem>>, vector<256x128xf32>
    tpu.vector_store %arg18[%c16, %c0_38], %75 {strides = array<i32>} : memref<288x128xf32, #tpu.memory_space<vmem>>, vector<256x128xf32>,
    %cst_39 = arith.constant 0.000000e+00 : f32
    %77 = vector.broadcast %cst_39 : f32 to vector<1x128xf32>
    %c0_40 = arith.constant 0 : index
    %c0_41 = arith.constant 0 : index
    %78 = vector.load %arg21[%c0_40, %c0_41] : memref<1x128xf32, #tpu.memory_space<vmem>>, vector<1x128xf32>
    tpu.vector_store %arg21[%c0_40, %c0_41], %77 {strides = array<i32>} : memref<1x128xf32, #tpu.memory_space<vmem>>, vector<1x128xf32>,
    %c0_42 = arith.constant 0 : index
    %c0_43 = arith.constant 0 : index
    %c0_44 = arith.constant 0 : index
    %79 = vector.load %arg4[%c0_42, %c0_43, %c0_44] : memref<2x9x128xf32, #tpu.memory_space<vmem>>, vector<1x9x128xf32>
    %80 = vector.shape_cast %79 : vector<1x9x128xf32> to vector<9x128xf32>
    %81 = vector.extract_strided_slice %80 {offsets = [0, 0], sizes = [1, 128], strides = [1, 1]} : vector<9x128xf32> to vector<1x128xf32>
    %82 = vector.extract_strided_slice %80 {offsets = [1, 0], sizes = [1, 128], strides = [1, 1]} : vector<9x128xf32> to vector<1x128xf32>
    %83 = vector.extract_strided_slice %80 {offsets = [2, 0], sizes = [1, 128], strides = [1, 1]} : vector<9x128xf32> to vector<1x128xf32>
    %84 = vector.extract_strided_slice %80 {offsets = [3, 0], sizes = [1, 128], strides = [1, 1]} : vector<9x128xf32> to vector<1x128xf32>
    %85 = vector.extract_strided_slice %80 {offsets = [4, 0], sizes = [1, 128], strides = [1, 1]} : vector<9x128xf32> to vector<1x128xf32>
    %86 = vector.extract_strided_slice %80 {offsets = [5, 0], sizes = [1, 128], strides = [1, 1]} : vector<9x128xf32> to vector<1x128xf32>
    %87 = vector.extract_strided_slice %80 {offsets = [6, 0], sizes = [1, 128], strides = [1, 1]} : vector<9x128xf32> to vector<1x128xf32>
    %88 = vector.extract_strided_slice %80 {offsets = [7, 0], sizes = [1, 128], strides = [1, 1]} : vector<9x128xf32> to vector<1x128xf32>
    %89 = vector.extract_strided_slice %80 {offsets = [8, 0], sizes = [1, 128], strides = [1, 1]} : vector<9x128xf32> to vector<1x128xf32>
    %c0_45 = arith.constant 0 : index
    %c0_46 = arith.constant 0 : index
    %c0_47 = arith.constant 0 : index
    %90 = vector.load %arg5[%c0_45, %c0_46, %c0_47] : memref<2x1x128xf32, #tpu.memory_space<vmem>>, vector<1x1x128xf32>
    %91 = vector.shape_cast %90 : vector<1x1x128xf32> to vector<1x128xf32>
    %c0_48 = arith.constant 0 : index
    %c0_49 = arith.constant 0 : index
    %92 = vector.load %arg18[%c0_48, %c0_49] : memref<288x128xf32, #tpu.memory_space<vmem>>, vector<160x128xf32>
    %cst_50 = arith.constant 0.000000e+00 : f32
    %93 = vector.broadcast %cst_50 : f32 to vector<128x128xf32>
    %c1_i32_51 = arith.constant 1 : i32
    %94 = tpu.dynamic_rotate %92 by %c1_i32_51 dim 0 : vector<160x128xf32>, i32 -> vector<160x128xf32>
    %95 = vector.broadcast %24 : vector<160x1xf32> to vector<160x128xf32>
    %96 = arith.mulf %94, %95 : vector<160x128xf32>
    %97 = vector.extract_strided_slice %96 {offsets = [0, 0], sizes = [128, 128], strides = [1, 1]} : vector<160x128xf32> to vector<128x128xf32>
    %98 = vector.broadcast %81 : vector<1x128xf32> to vector<128x128xf32>
    %99 = arith.mulf %97, %98 : vector<128x128xf32>
    %100 = arith.addf %93, %99 : vector<128x128xf32>
    %101 = vector.extract_strided_slice %96 {offsets = [16, 0], sizes = [128, 128], strides = [1, 1]} : vector<160x128xf32> to vector<128x128xf32>
    %102 = vector.broadcast %84 : vector<1x128xf32> to vector<128x128xf32>
    %103 = arith.mulf %101, %102 : vector<128x128xf32>
    %104 = arith.addf %100, %103 : vector<128x128xf32>
    %105 = vector.extract_strided_slice %96 {offsets = [32, 0], sizes = [128, 128], strides = [1, 1]} : vector<160x128xf32> to vector<128x128xf32>
    %106 = vector.broadcast %87 : vector<1x128xf32> to vector<128x128xf32>
    %107 = arith.mulf %105, %106 : vector<128x128xf32>
    %108 = arith.addf %104, %107 : vector<128x128xf32>
    %109 = vector.extract_strided_slice %92 {offsets = [0, 0], sizes = [128, 128], strides = [1, 1]} : vector<160x128xf32> to vector<128x128xf32>
    %110 = vector.broadcast %82 : vector<1x128xf32> to vector<128x128xf32>
    %111 = arith.mulf %109, %110 : vector<128x128xf32>
    %112 = arith.addf %108, %111 : vector<128x128xf32>
    %113 = vector.extract_strided_slice %92 {offsets = [16, 0], sizes = [128, 128], strides = [1, 1]} : vector<160x128xf32> to vector<128x128xf32>
    %114 = vector.broadcast %85 : vector<1x128xf32> to vector<128x128xf32>
    %115 = arith.mulf %113, %114 : vector<128x128xf32>
    %116 = arith.addf %112, %115 : vector<128x128xf32>
    %117 = vector.extract_strided_slice %92 {offsets = [32, 0], sizes = [128, 128], strides = [1, 1]} : vector<160x128xf32> to vector<128x128xf32>
    %118 = vector.broadcast %88 : vector<1x128xf32> to vector<128x128xf32>
    %119 = arith.mulf %117, %118 : vector<128x128xf32>
    %120 = arith.addf %116, %119 : vector<128x128xf32>
    %c159_i32 = arith.constant 159 : i32
    %121 = tpu.dynamic_rotate %92 by %c159_i32 dim 0 : vector<160x128xf32>, i32 -> vector<160x128xf32>
    %122 = vector.broadcast %20 : vector<160x1xf32> to vector<160x128xf32>
    %123 = arith.mulf %121, %122 : vector<160x128xf32>
    %124 = vector.extract_strided_slice %123 {offsets = [0, 0], sizes = [128, 128], strides = [1, 1]} : vector<160x128xf32> to vector<128x128xf32>
    %125 = vector.broadcast %83 : vector<1x128xf32> to vector<128x128xf32>
    %126 = arith.mulf %124, %125 : vector<128x128xf32>
    %127 = arith.addf %120, %126 : vector<128x128xf32>
    %128 = vector.extract_strided_slice %123 {offsets = [16, 0], sizes = [128, 128], strides = [1, 1]} : vector<160x128xf32> to vector<128x128xf32>
    %129 = vector.broadcast %86 : vector<1x128xf32> to vector<128x128xf32>
    %130 = arith.mulf %128, %129 : vector<128x128xf32>
    %131 = arith.addf %127, %130 : vector<128x128xf32>
    %132 = vector.extract_strided_slice %123 {offsets = [32, 0], sizes = [128, 128], strides = [1, 1]} : vector<160x128xf32> to vector<128x128xf32>
    %133 = vector.broadcast %89 : vector<1x128xf32> to vector<128x128xf32>
    %134 = arith.mulf %132, %133 : vector<128x128xf32>
    %135 = arith.addf %131, %134 : vector<128x128xf32>
    %136 = vector.broadcast %91 : vector<1x128xf32> to vector<128x128xf32>
    %137 = arith.addf %135, %136 : vector<128x128xf32>
    %cst_52 = arith.constant 0.000000e+00 : f32
    %138 = vector.broadcast %cst_52 : f32 to vector<128x128xf32>
    %139 = arith.cmpf ogt, %137, %138 : vector<128x128xf32>
    %cst_53 = arith.constant 2.000000e-01 : f32
    %140 = vector.broadcast %cst_53 : f32 to vector<128x128xf32>
    %141 = arith.mulf %140, %137 : vector<128x128xf32>
    %142 = arith.select %139, %137, %141 : vector<128x128xi1>, vector<128x128xf32>
    %c0_54 = arith.constant 0 : index
    %c0_55 = arith.constant 0 : index
    %143 = vector.load %arg21[%c0_54, %c0_55] : memref<1x128xf32, #tpu.memory_space<vmem>>, vector<1x128xf32>
    %cst_56 = arith.constant dense<0.000000e+00> : vector<128xf32>
    %144 = vector.multi_reduction <add>, %142, %cst_56 [0] : vector<128x128xf32> to vector<128xf32>
    %145 = vector.shape_cast %144 : vector<128xf32> to vector<1x128xf32>
    %146 = arith.addf %143, %145 : vector<1x128xf32>
    %c0_57 = arith.constant 0 : index
    %c0_58 = arith.constant 0 : index
    %147 = vector.load %arg21[%c0_57, %c0_58] : memref<1x128xf32, #tpu.memory_space<vmem>>, vector<1x128xf32>
    tpu.vector_store %arg21[%c0_57, %c0_58], %146 {strides = array<i32>} : memref<1x128xf32, #tpu.memory_space<vmem>>, vector<1x128xf32>,
    %148 = arith.truncf %142 : vector<128x128xf32> to vector<128x128xbf16>
    %c0_59 = arith.constant 0 : index
    %c0_60 = arith.constant 0 : index
    %149 = vector.load %arg19[%c0_59, %c0_60] : memref<256x128xbf16, #tpu.memory_space<vmem>>, vector<128x128xbf16>
    tpu.vector_store %arg19[%c0_59, %c0_60], %148 {strides = array<i32>} : memref<256x128xbf16, #tpu.memory_space<vmem>>, vector<128x128xbf16>,
    %c128 = arith.constant 128 : index
    %c0_61 = arith.constant 0 : index
    %150 = vector.load %arg18[%c128, %c0_61] : memref<288x128xf32, #tpu.memory_space<vmem>>, vector<160x128xf32>
    %cst_62 = arith.constant 0.000000e+00 : f32
    %151 = vector.broadcast %cst_62 : f32 to vector<128x128xf32>
    %c1_i32_63 = arith.constant 1 : i32
    %152 = tpu.dynamic_rotate %150 by %c1_i32_63 dim 0 : vector<160x128xf32>, i32 -> vector<160x128xf32>
    %153 = vector.broadcast %24 : vector<160x1xf32> to vector<160x128xf32>
    %154 = arith.mulf %152, %153 : vector<160x128xf32>
    %155 = vector.extract_strided_slice %154 {offsets = [0, 0], sizes = [128, 128], strides = [1, 1]} : vector<160x128xf32> to vector<128x128xf32>
    %156 = vector.broadcast %81 : vector<1x128xf32> to vector<128x128xf32>
    %157 = arith.mulf %155, %156 : vector<128x128xf32>
    %158 = arith.addf %151, %157 : vector<128x128xf32>
    %159 = vector.extract_strided_slice %154 {offsets = [16, 0], sizes = [128, 128], strides = [1, 1]} : vector<160x128xf32> to vector<128x128xf32>
    %160 = vector.broadcast %84 : vector<1x128xf32> to vector<128x128xf32>
    %161 = arith.mulf %159, %160 : vector<128x128xf32>
    %162 = arith.addf %158, %161 : vector<128x128xf32>
    %163 = vector.extract_strided_slice %154 {offsets = [32, 0], sizes = [128, 128], strides = [1, 1]} : vector<160x128xf32> to vector<128x128xf32>
    %164 = vector.broadcast %87 : vector<1x128xf32> to vector<128x128xf32>
    %165 = arith.mulf %163, %164 : vector<128x128xf32>
    %166 = arith.addf %162, %165 : vector<128x128xf32>
    %167 = vector.extract_strided_slice %150 {offsets = [0, 0], sizes = [128, 128], strides = [1, 1]} : vector<160x128xf32> to vector<128x128xf32>
    %168 = vector.broadcast %82 : vector<1x128xf32> to vector<128x128xf32>
    %169 = arith.mulf %167, %168 : vector<128x128xf32>
    %170 = arith.addf %166, %169 : vector<128x128xf32>
    %171 = vector.extract_strided_slice %150 {offsets = [16, 0], sizes = [128, 128], strides = [1, 1]} : vector<160x128xf32> to vector<128x128xf32>
    %172 = vector.broadcast %85 : vector<1x128xf32> to vector<128x128xf32>
    %173 = arith.mulf %171, %172 : vector<128x128xf32>
    %174 = arith.addf %170, %173 : vector<128x128xf32>
    %175 = vector.extract_strided_slice %150 {offsets = [32, 0], sizes = [128, 128], strides = [1, 1]} : vector<160x128xf32> to vector<128x128xf32>
    %176 = vector.broadcast %88 : vector<1x128xf32> to vector<128x128xf32>
    %177 = arith.mulf %175, %176 : vector<128x128xf32>
    %178 = arith.addf %174, %177 : vector<128x128xf32>
    %c159_i32_64 = arith.constant 159 : i32
    %179 = tpu.dynamic_rotate %150 by %c159_i32_64 dim 0 : vector<160x128xf32>, i32 -> vector<160x128xf32>
    %180 = vector.broadcast %20 : vector<160x1xf32> to vector<160x128xf32>
    %181 = arith.mulf %179, %180 : vector<160x128xf32>
    %182 = vector.extract_strided_slice %181 {offsets = [0, 0], sizes = [128, 128], strides = [1, 1]} : vector<160x128xf32> to vector<128x128xf32>
    %183 = vector.broadcast %83 : vector<1x128xf32> to vector<128x128xf32>
    %184 = arith.mulf %182, %183 : vector<128x128xf32>
    %185 = arith.addf %178, %184 : vector<128x128xf32>
    %186 = vector.extract_strided_slice %181 {offsets = [16, 0], sizes = [128, 128], strides = [1, 1]} : vector<160x128xf32> to vector<128x128xf32>
    %187 = vector.broadcast %86 : vector<1x128xf32> to vector<128x128xf32>
    %188 = arith.mulf %186, %187 : vector<128x128xf32>
    %189 = arith.addf %185, %188 : vector<128x128xf32>
    %190 = vector.extract_strided_slice %181 {offsets = [32, 0], sizes = [128, 128], strides = [1, 1]} : vector<160x128xf32> to vector<128x128xf32>
    %191 = vector.broadcast %89 : vector<1x128xf32> to vector<128x128xf32>
    %192 = arith.mulf %190, %191 : vector<128x128xf32>
    %193 = arith.addf %189, %192 : vector<128x128xf32>
    %194 = vector.broadcast %91 : vector<1x128xf32> to vector<128x128xf32>
    %195 = arith.addf %193, %194 : vector<128x128xf32>
    %cst_65 = arith.constant 0.000000e+00 : f32
    %196 = vector.broadcast %cst_65 : f32 to vector<128x128xf32>
    %197 = arith.cmpf ogt, %195, %196 : vector<128x128xf32>
    %cst_66 = arith.constant 2.000000e-01 : f32
    %198 = vector.broadcast %cst_66 : f32 to vector<128x128xf32>
    %199 = arith.mulf %198, %195 : vector<128x128xf32>
    %200 = arith.select %197, %195, %199 : vector<128x128xi1>, vector<128x128xf32>
    %c0_67 = arith.constant 0 : index
    %c0_68 = arith.constant 0 : index
    %201 = vector.load %arg21[%c0_67, %c0_68] : memref<1x128xf32, #tpu.memory_space<vmem>>, vector<1x128xf32>
    %cst_69 = arith.constant dense<0.000000e+00> : vector<128xf32>
    %202 = vector.multi_reduction <add>, %200, %cst_69 [0] : vector<128x128xf32> to vector<128xf32>
    %203 = vector.shape_cast %202 : vector<128xf32> to vector<1x128xf32>
    %204 = arith.addf %201, %203 : vector<1x128xf32>
    %c0_70 = arith.constant 0 : index
    %c0_71 = arith.constant 0 : index
    %205 = vector.load %arg21[%c0_70, %c0_71] : memref<1x128xf32, #tpu.memory_space<vmem>>, vector<1x128xf32>
    tpu.vector_store %arg21[%c0_70, %c0_71], %204 {strides = array<i32>} : memref<1x128xf32, #tpu.memory_space<vmem>>, vector<1x128xf32>,
    %206 = arith.truncf %200 : vector<128x128xf32> to vector<128x128xbf16>
    %c128_72 = arith.constant 128 : index
    %c0_73 = arith.constant 0 : index
    %207 = vector.load %arg19[%c128_72, %c0_73] : memref<256x128xbf16, #tpu.memory_space<vmem>>, vector<128x128xbf16>
    tpu.vector_store %arg19[%c128_72, %c0_73], %206 {strides = array<i32>} : memref<256x128xbf16, #tpu.memory_space<vmem>>, vector<128x128xbf16>,
    %c0_74 = arith.constant 0 : index
    %c0_75 = arith.constant 0 : index
    %208 = vector.load %arg21[%c0_74, %c0_75] : memref<1x128xf32, #tpu.memory_space<vmem>>, vector<1x128xf32>
    %cst_76 = arith.constant 3.906250e-03 : f32
    %209 = vector.broadcast %cst_76 : f32 to vector<1x128xf32>
    %210 = arith.mulf %208, %209 : vector<1x128xf32>
    %c0_77 = arith.constant 0 : index
    %c0_78 = arith.constant 0 : index
    %c0_79 = arith.constant 0 : index
    %211 = vector.load %arg6[%c0_77, %c0_78, %c0_79] : memref<2x128x32xf32, #tpu.memory_space<vmem>>, vector<1x128x32xf32>
    %212 = vector.shape_cast %211 : vector<1x128x32xf32> to vector<128x32xf32>
    %cst_80 = arith.constant dense<0.000000e+00> : vector<1x32xf32>
    %213 = tpu.matmul %210, %212, %cst_80 {dimension_numbers = #tpu.dot_dimension_numbers<[1], [0], [0], [1], [0, 0, 1, 1], [], []>} : vector<1x128xf32>, vector<128x32xf32>, vector<1x32xf32> -> vector<1x32xf32>
    %c0_81 = arith.constant 0 : index
    %c0_82 = arith.constant 0 : index
    %c0_83 = arith.constant 0 : index
    %214 = vector.load %arg7[%c0_81, %c0_82, %c0_83] : memref<2x1x32xf32, #tpu.memory_space<vmem>>, vector<1x1x32xf32>
    %215 = vector.shape_cast %214 : vector<1x1x32xf32> to vector<1x32xf32>
    %216 = arith.addf %213, %215 : vector<1x32xf32>
    %cst_84 = arith.constant 0.000000e+00 : f32
    %217 = vector.broadcast %cst_84 : f32 to vector<1x32xf32>
    %218 = arith.cmpf ogt, %216, %217 : vector<1x32xf32>
    %cst_85 = arith.constant 2.000000e-01 : f32
    %219 = vector.broadcast %cst_85 : f32 to vector<1x32xf32>
    %220 = arith.mulf %219, %216 : vector<1x32xf32>
    %221 = arith.select %218, %216, %220 : vector<1x32xi1>, vector<1x32xf32>
    %c0_86 = arith.constant 0 : index
    %c0_87 = arith.constant 0 : index
    %c0_88 = arith.constant 0 : index
    %222 = vector.load %arg8[%c0_86, %c0_87, %c0_88] : memref<2x32x128xf32, #tpu.memory_space<vmem>>, vector<1x32x128xf32>
    %223 = vector.shape_cast %222 : vector<1x32x128xf32> to vector<32x128xf32>
    %cst_89 = arith.constant dense<0.000000e+00> : vector<1x128xf32>
    %224 = tpu.matmul %221, %223, %cst_89 {dimension_numbers = #tpu.dot_dimension_numbers<[1], [0], [0], [1], [0, 0, 1, 1], [], []>} : vector<1x32xf32>, vector<32x128xf32>, vector<1x128xf32> -> vector<1x128xf32>
    %c0_90 = arith.constant 0 : index
    %c0_91 = arith.constant 0 : index
    %c0_92 = arith.constant 0 : index
    %225 = vector.load %arg9[%c0_90, %c0_91, %c0_92] : memref<2x1x128xf32, #tpu.memory_space<vmem>>, vector<1x1x128xf32>
    %226 = vector.shape_cast %225 : vector<1x1x128xf32> to vector<1x128xf32>
    %227 = arith.addf %224, %226 : vector<1x128xf32>
    %228 = arith.negf %227 : vector<1x128xf32>
    %229 = math.exp %228 : vector<1x128xf32>
    %cst_93 = arith.constant 1.000000e+00 : f32
    %230 = vector.broadcast %cst_93 : f32 to vector<1x128xf32>
    %231 = arith.addf %230, %229 : vector<1x128xf32>
    %232 = arith.divf %230, %231 : vector<1x128xf32>
    %c0_94 = arith.constant 0 : index
    %c0_95 = arith.constant 0 : index
    %233 = vector.load %arg19[%c0_94, %c0_95] : memref<256x128xbf16, #tpu.memory_space<vmem>>, vector<256x128xbf16>
    %234 = arith.truncf %232 : vector<1x128xf32> to vector<1x128xbf16>
    %235 = vector.broadcast %234 : vector<1x128xbf16> to vector<256x128xbf16>
    %236 = arith.mulf %233, %235 : vector<256x128xbf16>
    %c0_96 = arith.constant 0 : index
    %c0_97 = arith.constant 0 : index
    %c0_98 = arith.constant 0 : index
    %237 = vector.load %arg10[%c0_96, %c0_97, %c0_98] : memref<2x128x64xbf16, #tpu.memory_space<vmem>>, vector<1x128x64xbf16>
    %238 = vector.shape_cast %237 : vector<1x128x64xbf16> to vector<128x64xbf16>
    %cst_99 = arith.constant dense<0.000000e+00> : vector<256x64xf32>
    %239 = tpu.matmul %236, %238, %cst_99 {dimension_numbers = #tpu.dot_dimension_numbers<[1], [0], [0], [1], [0, 0, 1, 1], [], []>} : vector<256x128xbf16>, vector<128x64xbf16>, vector<256x64xf32> -> vector<256x64xf32>
    %c0_100 = arith.constant 0 : index
    %c0_101 = arith.constant 0 : index
    %c0_102 = arith.constant 0 : index
    %240 = vector.load %arg11[%c0_100, %c0_101, %c0_102] : memref<2x1x64xf32, #tpu.memory_space<vmem>>, vector<1x1x64xf32>
    %241 = vector.shape_cast %240 : vector<1x1x64xf32> to vector<1x64xf32>
    %242 = vector.broadcast %241 : vector<1x64xf32> to vector<256x64xf32>
    %243 = arith.addf %239, %242 : vector<256x64xf32>
    %cst_103 = arith.constant 0.000000e+00 : f32
    %244 = vector.broadcast %cst_103 : f32 to vector<256x64xf32>
    %245 = arith.cmpf ogt, %243, %244 : vector<256x64xf32>
    %cst_104 = arith.constant 2.000000e-01 : f32
    %246 = vector.broadcast %cst_104 : f32 to vector<256x64xf32>
    %247 = arith.mulf %246, %243 : vector<256x64xf32>
    %248 = arith.select %245, %243, %247 : vector<256x64xi1>, vector<256x64xf32>
    %c0_105 = arith.constant 0 : index
    %c0_106 = arith.constant 0 : index
    %249 = vector.load %arg17[%c0_105, %c0_106] : memref<256x64xf32, #tpu.memory_space<vmem>>, vector<256x64xf32>
    %250 = arith.addf %249, %248 : vector<256x64xf32>
    %cst_107 = arith.constant dense<0.000000e+00> : vector<64xf32>
    %251 = vector.multi_reduction <add>, %250, %cst_107 [0] : vector<256x64xf32> to vector<64xf32>
    %252 = vector.shape_cast %251 : vector<64xf32> to vector<1x64xf32>
    %cst_108 = arith.constant 2.560000e+02 : f32
    %253 = vector.broadcast %cst_108 : f32 to vector<1x64xf32>
    %254 = arith.divf %252, %253 : vector<1x64xf32>
    %c0_109 = arith.constant 0 : index
    %c0_110 = arith.constant 0 : index
    %c0_111 = arith.constant 0 : index
    %255 = vector.load %arg12[%c0_109, %c0_110, %c0_111] : memref<2x64x4xf32, #tpu.memory_space<vmem>>, vector<1x64x4xf32>
    %256 = vector.shape_cast %255 : vector<1x64x4xf32> to vector<64x4xf32>
    %cst_112 = arith.constant dense<0.000000e+00> : vector<1x4xf32>
    %257 = tpu.matmul %254, %256, %cst_112 {dimension_numbers = #tpu.dot_dimension_numbers<[1], [0], [0], [1], [0, 0, 1, 1], [], []>} : vector<1x64xf32>, vector<64x4xf32>, vector<1x4xf32> -> vector<1x4xf32>
    %cst_113 = arith.constant 0.000000e+00 : f32
    %258 = vector.broadcast %cst_113 : f32 to vector<1x4xf32>
    %259 = arith.cmpf ogt, %257, %258 : vector<1x4xf32>
    %cst_114 = arith.constant 2.000000e-01 : f32
    %260 = vector.broadcast %cst_114 : f32 to vector<1x4xf32>
    %261 = arith.mulf %260, %257 : vector<1x4xf32>
    %262 = arith.select %259, %257, %261 : vector<1x4xi1>, vector<1x4xf32>
    %c0_115 = arith.constant 0 : index
    %c0_116 = arith.constant 0 : index
    %c0_117 = arith.constant 0 : index
    %263 = vector.load %arg13[%c0_115, %c0_116, %c0_117] : memref<2x4x64xf32, #tpu.memory_space<vmem>>, vector<1x4x64xf32>
    %264 = vector.shape_cast %263 : vector<1x4x64xf32> to vector<4x64xf32>
    %cst_118 = arith.constant dense<0.000000e+00> : vector<1x64xf32>
    %265 = tpu.matmul %262, %264, %cst_118 {dimension_numbers = #tpu.dot_dimension_numbers<[1], [0], [0], [1], [0, 0, 1, 1], [], []>} : vector<1x4xf32>, vector<4x64xf32>, vector<1x64xf32> -> vector<1x64xf32>
    %266 = arith.negf %265 : vector<1x64xf32>
    %267 = math.exp %266 : vector<1x64xf32>
    %cst_119 = arith.constant 1.000000e+00 : f32
    %268 = vector.broadcast %cst_119 : f32 to vector<1x64xf32>
    %269 = arith.addf %268, %267 : vector<1x64xf32>
    %270 = arith.divf %268, %269 : vector<1x64xf32>
    %271 = vector.broadcast %270 : vector<1x64xf32> to vector<256x64xf32>
    %272 = arith.mulf %250, %271 : vector<256x64xf32>
    %c16_120 = arith.constant 16 : index
    %c0_121 = arith.constant 0 : index
    %273 = vector.load %arg20[%c16_120, %c0_121] : memref<288x64xf32, #tpu.memory_space<vmem>>, vector<256x64xf32>
    tpu.vector_store %arg20[%c16_120, %c0_121], %272 {strides = array<i32>} : memref<288x64xf32, #tpu.memory_space<vmem>>, vector<256x64xf32>,
    %c0_122 = arith.constant 0 : index
    %c0_123 = arith.constant 0 : index
    %c0_124 = arith.constant 0 : index
    %274 = vector.load %arg15[%c0_122, %c0_123, %c0_124] : memref<2x1x64xf32, #tpu.memory_space<vmem>>, vector<1x1x64xf32>
    %275 = vector.shape_cast %274 : vector<1x1x64xf32> to vector<1x64xf32>
    %c0_125 = arith.constant 0 : index
    %c0_126 = arith.constant 0 : index
    %276 = vector.load %arg20[%c0_125, %c0_126] : memref<288x64xf32, #tpu.memory_space<vmem>>, vector<288x64xf32>
    %cst_127 = arith.constant 0.000000e+00 : f32
    %277 = vector.broadcast %cst_127 : f32 to vector<256x64xf32>
    %c1_i32_128 = arith.constant 1 : i32
    %278 = tpu.dynamic_rotate %276 by %c1_i32_128 dim 0 : vector<288x64xf32>, i32 -> vector<288x64xf32>
    %279 = vector.broadcast %49 : vector<288x1xf32> to vector<288x64xf32>
    %280 = arith.mulf %278, %279 : vector<288x64xf32>
    %281 = arith.truncf %280 : vector<288x64xf32> to vector<288x64xbf16>
    %282 = vector.extract_strided_slice %281 {offsets = [0, 0], sizes = [256, 64], strides = [1, 1]} : vector<288x64xbf16> to vector<256x64xbf16>
    %c0_129 = arith.constant 0 : index
    %c0_130 = arith.constant 0 : index
    %c0_131 = arith.constant 0 : index
    %c0_132 = arith.constant 0 : index
    %283 = vector.load %arg14[%c0_129, %c0_130, %c0_131, %c0_132] : memref<2x9x64x64xbf16, #tpu.memory_space<vmem>>, vector<1x1x64x64xbf16>
    %284 = vector.shape_cast %283 : vector<1x1x64x64xbf16> to vector<64x64xbf16>
    %cst_133 = arith.constant dense<0.000000e+00> : vector<256x64xf32>
    %285 = tpu.matmul %282, %284, %cst_133 {dimension_numbers = #tpu.dot_dimension_numbers<[1], [0], [0], [1], [0, 0, 1, 1], [], []>} : vector<256x64xbf16>, vector<64x64xbf16>, vector<256x64xf32> -> vector<256x64xf32>
    %286 = arith.addf %277, %285 : vector<256x64xf32>
    %287 = vector.extract_strided_slice %281 {offsets = [16, 0], sizes = [256, 64], strides = [1, 1]} : vector<288x64xbf16> to vector<256x64xbf16>
    %c0_134 = arith.constant 0 : index
    %c3 = arith.constant 3 : index
    %c0_135 = arith.constant 0 : index
    %c0_136 = arith.constant 0 : index
    %288 = vector.load %arg14[%c0_134, %c3, %c0_135, %c0_136] : memref<2x9x64x64xbf16, #tpu.memory_space<vmem>>, vector<1x1x64x64xbf16>
    %289 = vector.shape_cast %288 : vector<1x1x64x64xbf16> to vector<64x64xbf16>
    %cst_137 = arith.constant dense<0.000000e+00> : vector<256x64xf32>
    %290 = tpu.matmul %287, %289, %cst_137 {dimension_numbers = #tpu.dot_dimension_numbers<[1], [0], [0], [1], [0, 0, 1, 1], [], []>} : vector<256x64xbf16>, vector<64x64xbf16>, vector<256x64xf32> -> vector<256x64xf32>
    %291 = arith.addf %286, %290 : vector<256x64xf32>
    %292 = vector.extract_strided_slice %281 {offsets = [32, 0], sizes = [256, 64], strides = [1, 1]} : vector<288x64xbf16> to vector<256x64xbf16>
    %c0_138 = arith.constant 0 : index
    %c6 = arith.constant 6 : index
    %c0_139 = arith.constant 0 : index
    %c0_140 = arith.constant 0 : index
    %293 = vector.load %arg14[%c0_138, %c6, %c0_139, %c0_140] : memref<2x9x64x64xbf16, #tpu.memory_space<vmem>>, vector<1x1x64x64xbf16>
    %294 = vector.shape_cast %293 : vector<1x1x64x64xbf16> to vector<64x64xbf16>
    %cst_141 = arith.constant dense<0.000000e+00> : vector<256x64xf32>
    %295 = tpu.matmul %292, %294, %cst_141 {dimension_numbers = #tpu.dot_dimension_numbers<[1], [0], [0], [1], [0, 0, 1, 1], [], []>} : vector<256x64xbf16>, vector<64x64xbf16>, vector<256x64xf32> -> vector<256x64xf32>
    %296 = arith.addf %291, %295 : vector<256x64xf32>
    %297 = arith.truncf %276 : vector<288x64xf32> to vector<288x64xbf16>
    %298 = vector.extract_strided_slice %297 {offsets = [0, 0], sizes = [256, 64], strides = [1, 1]} : vector<288x64xbf16> to vector<256x64xbf16>
    %c0_142 = arith.constant 0 : index
    %c1 = arith.constant 1 : index
    %c0_143 = arith.constant 0 : index
    %c0_144 = arith.constant 0 : index
    %299 = vector.load %arg14[%c0_142, %c1, %c0_143, %c0_144] : memref<2x9x64x64xbf16, #tpu.memory_space<vmem>>, vector<1x1x64x64xbf16>
    %300 = vector.shape_cast %299 : vector<1x1x64x64xbf16> to vector<64x64xbf16>
    %cst_145 = arith.constant dense<0.000000e+00> : vector<256x64xf32>
    %301 = tpu.matmul %298, %300, %cst_145 {dimension_numbers = #tpu.dot_dimension_numbers<[1], [0], [0], [1], [0, 0, 1, 1], [], []>} : vector<256x64xbf16>, vector<64x64xbf16>, vector<256x64xf32> -> vector<256x64xf32>
    %302 = arith.addf %296, %301 : vector<256x64xf32>
    %303 = vector.extract_strided_slice %297 {offsets = [16, 0], sizes = [256, 64], strides = [1, 1]} : vector<288x64xbf16> to vector<256x64xbf16>
    %c0_146 = arith.constant 0 : index
    %c4 = arith.constant 4 : index
    %c0_147 = arith.constant 0 : index
    %c0_148 = arith.constant 0 : index
    %304 = vector.load %arg14[%c0_146, %c4, %c0_147, %c0_148] : memref<2x9x64x64xbf16, #tpu.memory_space<vmem>>, vector<1x1x64x64xbf16>
    %305 = vector.shape_cast %304 : vector<1x1x64x64xbf16> to vector<64x64xbf16>
    %cst_149 = arith.constant dense<0.000000e+00> : vector<256x64xf32>
    %306 = tpu.matmul %303, %305, %cst_149 {dimension_numbers = #tpu.dot_dimension_numbers<[1], [0], [0], [1], [0, 0, 1, 1], [], []>} : vector<256x64xbf16>, vector<64x64xbf16>, vector<256x64xf32> -> vector<256x64xf32>
    %307 = arith.addf %302, %306 : vector<256x64xf32>
    %308 = vector.extract_strided_slice %297 {offsets = [32, 0], sizes = [256, 64], strides = [1, 1]} : vector<288x64xbf16> to vector<256x64xbf16>
    %c0_150 = arith.constant 0 : index
    %c7 = arith.constant 7 : index
    %c0_151 = arith.constant 0 : index
    %c0_152 = arith.constant 0 : index
    %309 = vector.load %arg14[%c0_150, %c7, %c0_151, %c0_152] : memref<2x9x64x64xbf16, #tpu.memory_space<vmem>>, vector<1x1x64x64xbf16>
    %310 = vector.shape_cast %309 : vector<1x1x64x64xbf16> to vector<64x64xbf16>
    %cst_153 = arith.constant dense<0.000000e+00> : vector<256x64xf32>
    %311 = tpu.matmul %308, %310, %cst_153 {dimension_numbers = #tpu.dot_dimension_numbers<[1], [0], [0], [1], [0, 0, 1, 1], [], []>} : vector<256x64xbf16>, vector<64x64xbf16>, vector<256x64xf32> -> vector<256x64xf32>
    %312 = arith.addf %307, %311 : vector<256x64xf32>
    %c287_i32 = arith.constant 287 : i32
    %313 = tpu.dynamic_rotate %276 by %c287_i32 dim 0 : vector<288x64xf32>, i32 -> vector<288x64xf32>
    %314 = vector.broadcast %45 : vector<288x1xf32> to vector<288x64xf32>
    %315 = arith.mulf %313, %314 : vector<288x64xf32>
    %316 = arith.truncf %315 : vector<288x64xf32> to vector<288x64xbf16>
    %317 = vector.extract_strided_slice %316 {offsets = [0, 0], sizes = [256, 64], strides = [1, 1]} : vector<288x64xbf16> to vector<256x64xbf16>
    %c0_154 = arith.constant 0 : index
    %c2 = arith.constant 2 : index
    %c0_155 = arith.constant 0 : index
    %c0_156 = arith.constant 0 : index
    %318 = vector.load %arg14[%c0_154, %c2, %c0_155, %c0_156] : memref<2x9x64x64xbf16, #tpu.memory_space<vmem>>, vector<1x1x64x64xbf16>
    %319 = vector.shape_cast %318 : vector<1x1x64x64xbf16> to vector<64x64xbf16>
    %cst_157 = arith.constant dense<0.000000e+00> : vector<256x64xf32>
    %320 = tpu.matmul %317, %319, %cst_157 {dimension_numbers = #tpu.dot_dimension_numbers<[1], [0], [0], [1], [0, 0, 1, 1], [], []>} : vector<256x64xbf16>, vector<64x64xbf16>, vector<256x64xf32> -> vector<256x64xf32>
    %321 = arith.addf %312, %320 : vector<256x64xf32>
    %322 = vector.extract_strided_slice %316 {offsets = [16, 0], sizes = [256, 64], strides = [1, 1]} : vector<288x64xbf16> to vector<256x64xbf16>
    %c0_158 = arith.constant 0 : index
    %c5 = arith.constant 5 : index
    %c0_159 = arith.constant 0 : index
    %c0_160 = arith.constant 0 : index
    %323 = vector.load %arg14[%c0_158, %c5, %c0_159, %c0_160] : memref<2x9x64x64xbf16, #tpu.memory_space<vmem>>, vector<1x1x64x64xbf16>
    %324 = vector.shape_cast %323 : vector<1x1x64x64xbf16> to vector<64x64xbf16>
    %cst_161 = arith.constant dense<0.000000e+00> : vector<256x64xf32>
    %325 = tpu.matmul %322, %324, %cst_161 {dimension_numbers = #tpu.dot_dimension_numbers<[1], [0], [0], [1], [0, 0, 1, 1], [], []>} : vector<256x64xbf16>, vector<64x64xbf16>, vector<256x64xf32> -> vector<256x64xf32>
    %326 = arith.addf %321, %325 : vector<256x64xf32>
    %327 = vector.extract_strided_slice %316 {offsets = [32, 0], sizes = [256, 64], strides = [1, 1]} : vector<288x64xbf16> to vector<256x64xbf16>
    %c0_162 = arith.constant 0 : index
    %c8 = arith.constant 8 : index
    %c0_163 = arith.constant 0 : index
    %c0_164 = arith.constant 0 : index
    %328 = vector.load %arg14[%c0_162, %c8, %c0_163, %c0_164] : memref<2x9x64x64xbf16, #tpu.memory_space<vmem>>, vector<1x1x64x64xbf16>
    %329 = vector.shape_cast %328 : vector<1x1x64x64xbf16> to vector<64x64xbf16>
    %cst_165 = arith.constant dense<0.000000e+00> : vector<256x64xf32>
    %330 = tpu.matmul %327, %329, %cst_165 {dimension_numbers = #tpu.dot_dimension_numbers<[1], [0], [0], [1], [0, 0, 1, 1], [], []>} : vector<256x64xbf16>, vector<64x64xbf16>, vector<256x64xf32> -> vector<256x64xf32>
    %331 = arith.addf %326, %330 : vector<256x64xf32>
    %332 = vector.broadcast %275 : vector<1x64xf32> to vector<256x64xf32>
    %333 = arith.addf %331, %332 : vector<256x64xf32>
    %c0_166 = arith.constant 0 : index
    %c0_167 = arith.constant 0 : index
    %334 = vector.load %arg17[%c0_166, %c0_167] : memref<256x64xf32, #tpu.memory_space<vmem>>, vector<256x64xf32>
    %335 = arith.addf %333, %334 : vector<256x64xf32>
    %c0_168 = arith.constant 0 : index
    %c0_169 = arith.constant 0 : index
    %336 = vector.load %arg17[%c0_168, %c0_169] : memref<256x64xf32, #tpu.memory_space<vmem>>, vector<256x64xf32>
    tpu.vector_store %arg17[%c0_168, %c0_169], %335 {strides = array<i32>} : memref<256x64xf32, #tpu.memory_space<vmem>>, vector<256x64xf32>,
    %c0_170 = arith.constant 0 : index
    %c0_171 = arith.constant 0 : index
    %337 = vector.load %arg17[%c0_170, %c0_171] : memref<256x64xf32, #tpu.memory_space<vmem>>, vector<256x64xf32>
    %338 = arith.truncf %337 : vector<256x64xf32> to vector<256x64xbf16>
    %c1_172 = arith.constant 1 : index
    %c0_173 = arith.constant 0 : index
    %c0_174 = arith.constant 0 : index
    %339 = vector.load %arg2[%c1_172, %c0_173, %c0_174] : memref<2x64x128xbf16, #tpu.memory_space<vmem>>, vector<1x64x128xbf16>
    %340 = vector.shape_cast %339 : vector<1x64x128xbf16> to vector<64x128xbf16>
    %cst_175 = arith.constant dense<0.000000e+00> : vector<256x128xf32>
    %341 = tpu.matmul %338, %340, %cst_175 {dimension_numbers = #tpu.dot_dimension_numbers<[1], [0], [0], [1], [0, 0, 1, 1], [], []>} : vector<256x64xbf16>, vector<64x128xbf16>, vector<256x128xf32> -> vector<256x128xf32>
    %c1_176 = arith.constant 1 : index
    %c0_177 = arith.constant 0 : index
    %c0_178 = arith.constant 0 : index
    %342 = vector.load %arg3[%c1_176, %c0_177, %c0_178] : memref<2x1x128xf32, #tpu.memory_space<vmem>>, vector<1x1x128xf32>
    %343 = vector.shape_cast %342 : vector<1x1x128xf32> to vector<1x128xf32>
    %344 = vector.broadcast %343 : vector<1x128xf32> to vector<256x128xf32>
    %345 = arith.addf %341, %344 : vector<256x128xf32>
    %cst_179 = arith.constant 0.000000e+00 : f32
    %346 = vector.broadcast %cst_179 : f32 to vector<256x128xf32>
    %347 = arith.cmpf ogt, %345, %346 : vector<256x128xf32>
    %cst_180 = arith.constant 2.000000e-01 : f32
    %348 = vector.broadcast %cst_180 : f32 to vector<256x128xf32>
    %349 = arith.mulf %348, %345 : vector<256x128xf32>
    %350 = arith.select %347, %345, %349 : vector<256x128xi1>, vector<256x128xf32>
    %c16_181 = arith.constant 16 : index
    %c0_182 = arith.constant 0 : index
    %351 = vector.load %arg18[%c16_181, %c0_182] : memref<288x128xf32, #tpu.memory_space<vmem>>, vector<256x128xf32>
    tpu.vector_store %arg18[%c16_181, %c0_182], %350 {strides = array<i32>} : memref<288x128xf32, #tpu.memory_space<vmem>>, vector<256x128xf32>,
    %cst_183 = arith.constant 0.000000e+00 : f32
    %352 = vector.broadcast %cst_183 : f32 to vector<1x128xf32>
    %c0_184 = arith.constant 0 : index
    %c0_185 = arith.constant 0 : index
    %353 = vector.load %arg21[%c0_184, %c0_185] : memref<1x128xf32, #tpu.memory_space<vmem>>, vector<1x128xf32>
    tpu.vector_store %arg21[%c0_184, %c0_185], %352 {strides = array<i32>} : memref<1x128xf32, #tpu.memory_space<vmem>>, vector<1x128xf32>,
    %c1_186 = arith.constant 1 : index
    %c0_187 = arith.constant 0 : index
    %c0_188 = arith.constant 0 : index
    %354 = vector.load %arg4[%c1_186, %c0_187, %c0_188] : memref<2x9x128xf32, #tpu.memory_space<vmem>>, vector<1x9x128xf32>
    %355 = vector.shape_cast %354 : vector<1x9x128xf32> to vector<9x128xf32>
    %356 = vector.extract_strided_slice %355 {offsets = [0, 0], sizes = [1, 128], strides = [1, 1]} : vector<9x128xf32> to vector<1x128xf32>
    %357 = vector.extract_strided_slice %355 {offsets = [1, 0], sizes = [1, 128], strides = [1, 1]} : vector<9x128xf32> to vector<1x128xf32>
    %358 = vector.extract_strided_slice %355 {offsets = [2, 0], sizes = [1, 128], strides = [1, 1]} : vector<9x128xf32> to vector<1x128xf32>
    %359 = vector.extract_strided_slice %355 {offsets = [3, 0], sizes = [1, 128], strides = [1, 1]} : vector<9x128xf32> to vector<1x128xf32>
    %360 = vector.extract_strided_slice %355 {offsets = [4, 0], sizes = [1, 128], strides = [1, 1]} : vector<9x128xf32> to vector<1x128xf32>
    %361 = vector.extract_strided_slice %355 {offsets = [5, 0], sizes = [1, 128], strides = [1, 1]} : vector<9x128xf32> to vector<1x128xf32>
    %362 = vector.extract_strided_slice %355 {offsets = [6, 0], sizes = [1, 128], strides = [1, 1]} : vector<9x128xf32> to vector<1x128xf32>
    %363 = vector.extract_strided_slice %355 {offsets = [7, 0], sizes = [1, 128], strides = [1, 1]} : vector<9x128xf32> to vector<1x128xf32>
    %364 = vector.extract_strided_slice %355 {offsets = [8, 0], sizes = [1, 128], strides = [1, 1]} : vector<9x128xf32> to vector<1x128xf32>
    %c1_189 = arith.constant 1 : index
    %c0_190 = arith.constant 0 : index
    %c0_191 = arith.constant 0 : index
    %365 = vector.load %arg5[%c1_189, %c0_190, %c0_191] : memref<2x1x128xf32, #tpu.memory_space<vmem>>, vector<1x1x128xf32>
    %366 = vector.shape_cast %365 : vector<1x1x128xf32> to vector<1x128xf32>
    %c0_192 = arith.constant 0 : index
    %c0_193 = arith.constant 0 : index
    %367 = vector.load %arg18[%c0_192, %c0_193] : memref<288x128xf32, #tpu.memory_space<vmem>>, vector<160x128xf32>
    %cst_194 = arith.constant 0.000000e+00 : f32
    %368 = vector.broadcast %cst_194 : f32 to vector<128x128xf32>
    %c1_i32_195 = arith.constant 1 : i32
    %369 = tpu.dynamic_rotate %367 by %c1_i32_195 dim 0 : vector<160x128xf32>, i32 -> vector<160x128xf32>
    %370 = vector.broadcast %24 : vector<160x1xf32> to vector<160x128xf32>
    %371 = arith.mulf %369, %370 : vector<160x128xf32>
    %372 = vector.extract_strided_slice %371 {offsets = [0, 0], sizes = [128, 128], strides = [1, 1]} : vector<160x128xf32> to vector<128x128xf32>
    %373 = vector.broadcast %356 : vector<1x128xf32> to vector<128x128xf32>
    %374 = arith.mulf %372, %373 : vector<128x128xf32>
    %375 = arith.addf %368, %374 : vector<128x128xf32>
    %376 = vector.extract_strided_slice %371 {offsets = [16, 0], sizes = [128, 128], strides = [1, 1]} : vector<160x128xf32> to vector<128x128xf32>
    %377 = vector.broadcast %359 : vector<1x128xf32> to vector<128x128xf32>
    %378 = arith.mulf %376, %377 : vector<128x128xf32>
    %379 = arith.addf %375, %378 : vector<128x128xf32>
    %380 = vector.extract_strided_slice %371 {offsets = [32, 0], sizes = [128, 128], strides = [1, 1]} : vector<160x128xf32> to vector<128x128xf32>
    %381 = vector.broadcast %362 : vector<1x128xf32> to vector<128x128xf32>
    %382 = arith.mulf %380, %381 : vector<128x128xf32>
    %383 = arith.addf %379, %382 : vector<128x128xf32>
    %384 = vector.extract_strided_slice %367 {offsets = [0, 0], sizes = [128, 128], strides = [1, 1]} : vector<160x128xf32> to vector<128x128xf32>
    %385 = vector.broadcast %357 : vector<1x128xf32> to vector<128x128xf32>
    %386 = arith.mulf %384, %385 : vector<128x128xf32>
    %387 = arith.addf %383, %386 : vector<128x128xf32>
    %388 = vector.extract_strided_slice %367 {offsets = [16, 0], sizes = [128, 128], strides = [1, 1]} : vector<160x128xf32> to vector<128x128xf32>
    %389 = vector.broadcast %360 : vector<1x128xf32> to vector<128x128xf32>
    %390 = arith.mulf %388, %389 : vector<128x128xf32>
    %391 = arith.addf %387, %390 : vector<128x128xf32>
    %392 = vector.extract_strided_slice %367 {offsets = [32, 0], sizes = [128, 128], strides = [1, 1]} : vector<160x128xf32> to vector<128x128xf32>
    %393 = vector.broadcast %363 : vector<1x128xf32> to vector<128x128xf32>
    %394 = arith.mulf %392, %393 : vector<128x128xf32>
    %395 = arith.addf %391, %394 : vector<128x128xf32>
    %c159_i32_196 = arith.constant 159 : i32
    %396 = tpu.dynamic_rotate %367 by %c159_i32_196 dim 0 : vector<160x128xf32>, i32 -> vector<160x128xf32>
    %397 = vector.broadcast %20 : vector<160x1xf32> to vector<160x128xf32>
    %398 = arith.mulf %396, %397 : vector<160x128xf32>
    %399 = vector.extract_strided_slice %398 {offsets = [0, 0], sizes = [128, 128], strides = [1, 1]} : vector<160x128xf32> to vector<128x128xf32>
    %400 = vector.broadcast %358 : vector<1x128xf32> to vector<128x128xf32>
    %401 = arith.mulf %399, %400 : vector<128x128xf32>
    %402 = arith.addf %395, %401 : vector<128x128xf32>
    %403 = vector.extract_strided_slice %398 {offsets = [16, 0], sizes = [128, 128], strides = [1, 1]} : vector<160x128xf32> to vector<128x128xf32>
    %404 = vector.broadcast %361 : vector<1x128xf32> to vector<128x128xf32>
    %405 = arith.mulf %403, %404 : vector<128x128xf32>
    %406 = arith.addf %402, %405 : vector<128x128xf32>
    %407 = vector.extract_strided_slice %398 {offsets = [32, 0], sizes = [128, 128], strides = [1, 1]} : vector<160x128xf32> to vector<128x128xf32>
    %408 = vector.broadcast %364 : vector<1x128xf32> to vector<128x128xf32>
    %409 = arith.mulf %407, %408 : vector<128x128xf32>
    %410 = arith.addf %406, %409 : vector<128x128xf32>
    %411 = vector.broadcast %366 : vector<1x128xf32> to vector<128x128xf32>
    %412 = arith.addf %410, %411 : vector<128x128xf32>
    %cst_197 = arith.constant 0.000000e+00 : f32
    %413 = vector.broadcast %cst_197 : f32 to vector<128x128xf32>
    %414 = arith.cmpf ogt, %412, %413 : vector<128x128xf32>
    %cst_198 = arith.constant 2.000000e-01 : f32
    %415 = vector.broadcast %cst_198 : f32 to vector<128x128xf32>
    %416 = arith.mulf %415, %412 : vector<128x128xf32>
    %417 = arith.select %414, %412, %416 : vector<128x128xi1>, vector<128x128xf32>
    %c0_199 = arith.constant 0 : index
    %c0_200 = arith.constant 0 : index
    %418 = vector.load %arg21[%c0_199, %c0_200] : memref<1x128xf32, #tpu.memory_space<vmem>>, vector<1x128xf32>
    %cst_201 = arith.constant dense<0.000000e+00> : vector<128xf32>
    %419 = vector.multi_reduction <add>, %417, %cst_201 [0] : vector<128x128xf32> to vector<128xf32>
    %420 = vector.shape_cast %419 : vector<128xf32> to vector<1x128xf32>
    %421 = arith.addf %418, %420 : vector<1x128xf32>
    %c0_202 = arith.constant 0 : index
    %c0_203 = arith.constant 0 : index
    %422 = vector.load %arg21[%c0_202, %c0_203] : memref<1x128xf32, #tpu.memory_space<vmem>>, vector<1x128xf32>
    tpu.vector_store %arg21[%c0_202, %c0_203], %421 {strides = array<i32>} : memref<1x128xf32, #tpu.memory_space<vmem>>, vector<1x128xf32>,
    %423 = arith.truncf %417 : vector<128x128xf32> to vector<128x128xbf16>
    %c0_204 = arith.constant 0 : index
    %c0_205 = arith.constant 0 : index
    %424 = vector.load %arg19[%c0_204, %c0_205] : memref<256x128xbf16, #tpu.memory_space<vmem>>, vector<128x128xbf16>
    tpu.vector_store %arg19[%c0_204, %c0_205], %423 {strides = array<i32>} : memref<256x128xbf16, #tpu.memory_space<vmem>>, vector<128x128xbf16>,
    %c128_206 = arith.constant 128 : index
    %c0_207 = arith.constant 0 : index
    %425 = vector.load %arg18[%c128_206, %c0_207] : memref<288x128xf32, #tpu.memory_space<vmem>>, vector<160x128xf32>
    %cst_208 = arith.constant 0.000000e+00 : f32
    %426 = vector.broadcast %cst_208 : f32 to vector<128x128xf32>
    %c1_i32_209 = arith.constant 1 : i32
    %427 = tpu.dynamic_rotate %425 by %c1_i32_209 dim 0 : vector<160x128xf32>, i32 -> vector<160x128xf32>
    %428 = vector.broadcast %24 : vector<160x1xf32> to vector<160x128xf32>
    %429 = arith.mulf %427, %428 : vector<160x128xf32>
    %430 = vector.extract_strided_slice %429 {offsets = [0, 0], sizes = [128, 128], strides = [1, 1]} : vector<160x128xf32> to vector<128x128xf32>
    %431 = vector.broadcast %356 : vector<1x128xf32> to vector<128x128xf32>
    %432 = arith.mulf %430, %431 : vector<128x128xf32>
    %433 = arith.addf %426, %432 : vector<128x128xf32>
    %434 = vector.extract_strided_slice %429 {offsets = [16, 0], sizes = [128, 128], strides = [1, 1]} : vector<160x128xf32> to vector<128x128xf32>
    %435 = vector.broadcast %359 : vector<1x128xf32> to vector<128x128xf32>
    %436 = arith.mulf %434, %435 : vector<128x128xf32>
    %437 = arith.addf %433, %436 : vector<128x128xf32>
    %438 = vector.extract_strided_slice %429 {offsets = [32, 0], sizes = [128, 128], strides = [1, 1]} : vector<160x128xf32> to vector<128x128xf32>
    %439 = vector.broadcast %362 : vector<1x128xf32> to vector<128x128xf32>
    %440 = arith.mulf %438, %439 : vector<128x128xf32>
    %441 = arith.addf %437, %440 : vector<128x128xf32>
    %442 = vector.extract_strided_slice %425 {offsets = [0, 0], sizes = [128, 128], strides = [1, 1]} : vector<160x128xf32> to vector<128x128xf32>
    %443 = vector.broadcast %357 : vector<1x128xf32> to vector<128x128xf32>
    %444 = arith.mulf %442, %443 : vector<128x128xf32>
    %445 = arith.addf %441, %444 : vector<128x128xf32>
    %446 = vector.extract_strided_slice %425 {offsets = [16, 0], sizes = [128, 128], strides = [1, 1]} : vector<160x128xf32> to vector<128x128xf32>
    %447 = vector.broadcast %360 : vector<1x128xf32> to vector<128x128xf32>
    %448 = arith.mulf %446, %447 : vector<128x128xf32>
    %449 = arith.addf %445, %448 : vector<128x128xf32>
    %450 = vector.extract_strided_slice %425 {offsets = [32, 0], sizes = [128, 128], strides = [1, 1]} : vector<160x128xf32> to vector<128x128xf32>
    %451 = vector.broadcast %363 : vector<1x128xf32> to vector<128x128xf32>
    %452 = arith.mulf %450, %451 : vector<128x128xf32>
    %453 = arith.addf %449, %452 : vector<128x128xf32>
    %c159_i32_210 = arith.constant 159 : i32
    %454 = tpu.dynamic_rotate %425 by %c159_i32_210 dim 0 : vector<160x128xf32>, i32 -> vector<160x128xf32>
    %455 = vector.broadcast %20 : vector<160x1xf32> to vector<160x128xf32>
    %456 = arith.mulf %454, %455 : vector<160x128xf32>
    %457 = vector.extract_strided_slice %456 {offsets = [0, 0], sizes = [128, 128], strides = [1, 1]} : vector<160x128xf32> to vector<128x128xf32>
    %458 = vector.broadcast %358 : vector<1x128xf32> to vector<128x128xf32>
    %459 = arith.mulf %457, %458 : vector<128x128xf32>
    %460 = arith.addf %453, %459 : vector<128x128xf32>
    %461 = vector.extract_strided_slice %456 {offsets = [16, 0], sizes = [128, 128], strides = [1, 1]} : vector<160x128xf32> to vector<128x128xf32>
    %462 = vector.broadcast %361 : vector<1x128xf32> to vector<128x128xf32>
    %463 = arith.mulf %461, %462 : vector<128x128xf32>
    %464 = arith.addf %460, %463 : vector<128x128xf32>
    %465 = vector.extract_strided_slice %456 {offsets = [32, 0], sizes = [128, 128], strides = [1, 1]} : vector<160x128xf32> to vector<128x128xf32>
    %466 = vector.broadcast %364 : vector<1x128xf32> to vector<128x128xf32>
    %467 = arith.mulf %465, %466 : vector<128x128xf32>
    %468 = arith.addf %464, %467 : vector<128x128xf32>
    %469 = vector.broadcast %366 : vector<1x128xf32> to vector<128x128xf32>
    %470 = arith.addf %468, %469 : vector<128x128xf32>
    %cst_211 = arith.constant 0.000000e+00 : f32
    %471 = vector.broadcast %cst_211 : f32 to vector<128x128xf32>
    %472 = arith.cmpf ogt, %470, %471 : vector<128x128xf32>
    %cst_212 = arith.constant 2.000000e-01 : f32
    %473 = vector.broadcast %cst_212 : f32 to vector<128x128xf32>
    %474 = arith.mulf %473, %470 : vector<128x128xf32>
    %475 = arith.select %472, %470, %474 : vector<128x128xi1>, vector<128x128xf32>
    %c0_213 = arith.constant 0 : index
    %c0_214 = arith.constant 0 : index
    %476 = vector.load %arg21[%c0_213, %c0_214] : memref<1x128xf32, #tpu.memory_space<vmem>>, vector<1x128xf32>
    %cst_215 = arith.constant dense<0.000000e+00> : vector<128xf32>
    %477 = vector.multi_reduction <add>, %475, %cst_215 [0] : vector<128x128xf32> to vector<128xf32>
    %478 = vector.shape_cast %477 : vector<128xf32> to vector<1x128xf32>
    %479 = arith.addf %476, %478 : vector<1x128xf32>
    %c0_216 = arith.constant 0 : index
    %c0_217 = arith.constant 0 : index
    %480 = vector.load %arg21[%c0_216, %c0_217] : memref<1x128xf32, #tpu.memory_space<vmem>>, vector<1x128xf32>
    tpu.vector_store %arg21[%c0_216, %c0_217], %479 {strides = array<i32>} : memref<1x128xf32, #tpu.memory_space<vmem>>, vector<1x128xf32>,
    %481 = arith.truncf %475 : vector<128x128xf32> to vector<128x128xbf16>
    %c128_218 = arith.constant 128 : index
    %c0_219 = arith.constant 0 : index
    %482 = vector.load %arg19[%c128_218, %c0_219] : memref<256x128xbf16, #tpu.memory_space<vmem>>, vector<128x128xbf16>
    tpu.vector_store %arg19[%c128_218, %c0_219], %481 {strides = array<i32>} : memref<256x128xbf16, #tpu.memory_space<vmem>>, vector<128x128xbf16>,
    %c0_220 = arith.constant 0 : index
    %c0_221 = arith.constant 0 : index
    %483 = vector.load %arg21[%c0_220, %c0_221] : memref<1x128xf32, #tpu.memory_space<vmem>>, vector<1x128xf32>
    %cst_222 = arith.constant 3.906250e-03 : f32
    %484 = vector.broadcast %cst_222 : f32 to vector<1x128xf32>
    %485 = arith.mulf %483, %484 : vector<1x128xf32>
    %c1_223 = arith.constant 1 : index
    %c0_224 = arith.constant 0 : index
    %c0_225 = arith.constant 0 : index
    %486 = vector.load %arg6[%c1_223, %c0_224, %c0_225] : memref<2x128x32xf32, #tpu.memory_space<vmem>>, vector<1x128x32xf32>
    %487 = vector.shape_cast %486 : vector<1x128x32xf32> to vector<128x32xf32>
    %cst_226 = arith.constant dense<0.000000e+00> : vector<1x32xf32>
    %488 = tpu.matmul %485, %487, %cst_226 {dimension_numbers = #tpu.dot_dimension_numbers<[1], [0], [0], [1], [0, 0, 1, 1], [], []>} : vector<1x128xf32>, vector<128x32xf32>, vector<1x32xf32> -> vector<1x32xf32>
    %c1_227 = arith.constant 1 : index
    %c0_228 = arith.constant 0 : index
    %c0_229 = arith.constant 0 : index
    %489 = vector.load %arg7[%c1_227, %c0_228, %c0_229] : memref<2x1x32xf32, #tpu.memory_space<vmem>>, vector<1x1x32xf32>
    %490 = vector.shape_cast %489 : vector<1x1x32xf32> to vector<1x32xf32>
    %491 = arith.addf %488, %490 : vector<1x32xf32>
    %cst_230 = arith.constant 0.000000e+00 : f32
    %492 = vector.broadcast %cst_230 : f32 to vector<1x32xf32>
    %493 = arith.cmpf ogt, %491, %492 : vector<1x32xf32>
    %cst_231 = arith.constant 2.000000e-01 : f32
    %494 = vector.broadcast %cst_231 : f32 to vector<1x32xf32>
    %495 = arith.mulf %494, %491 : vector<1x32xf32>
    %496 = arith.select %493, %491, %495 : vector<1x32xi1>, vector<1x32xf32>
    %c1_232 = arith.constant 1 : index
    %c0_233 = arith.constant 0 : index
    %c0_234 = arith.constant 0 : index
    %497 = vector.load %arg8[%c1_232, %c0_233, %c0_234] : memref<2x32x128xf32, #tpu.memory_space<vmem>>, vector<1x32x128xf32>
    %498 = vector.shape_cast %497 : vector<1x32x128xf32> to vector<32x128xf32>
    %cst_235 = arith.constant dense<0.000000e+00> : vector<1x128xf32>
    %499 = tpu.matmul %496, %498, %cst_235 {dimension_numbers = #tpu.dot_dimension_numbers<[1], [0], [0], [1], [0, 0, 1, 1], [], []>} : vector<1x32xf32>, vector<32x128xf32>, vector<1x128xf32> -> vector<1x128xf32>
    %c1_236 = arith.constant 1 : index
    %c0_237 = arith.constant 0 : index
    %c0_238 = arith.constant 0 : index
    %500 = vector.load %arg9[%c1_236, %c0_237, %c0_238] : memref<2x1x128xf32, #tpu.memory_space<vmem>>, vector<1x1x128xf32>
    %501 = vector.shape_cast %500 : vector<1x1x128xf32> to vector<1x128xf32>
    %502 = arith.addf %499, %501 : vector<1x128xf32>
    %503 = arith.negf %502 : vector<1x128xf32>
    %504 = math.exp %503 : vector<1x128xf32>
    %cst_239 = arith.constant 1.000000e+00 : f32
    %505 = vector.broadcast %cst_239 : f32 to vector<1x128xf32>
    %506 = arith.addf %505, %504 : vector<1x128xf32>
    %507 = arith.divf %505, %506 : vector<1x128xf32>
    %c0_240 = arith.constant 0 : index
    %c0_241 = arith.constant 0 : index
    %508 = vector.load %arg19[%c0_240, %c0_241] : memref<256x128xbf16, #tpu.memory_space<vmem>>, vector<256x128xbf16>
    %509 = arith.truncf %507 : vector<1x128xf32> to vector<1x128xbf16>
    %510 = vector.broadcast %509 : vector<1x128xbf16> to vector<256x128xbf16>
    %511 = arith.mulf %508, %510 : vector<256x128xbf16>
    %c1_242 = arith.constant 1 : index
    %c0_243 = arith.constant 0 : index
    %c0_244 = arith.constant 0 : index
    %512 = vector.load %arg10[%c1_242, %c0_243, %c0_244] : memref<2x128x64xbf16, #tpu.memory_space<vmem>>, vector<1x128x64xbf16>
    %513 = vector.shape_cast %512 : vector<1x128x64xbf16> to vector<128x64xbf16>
    %cst_245 = arith.constant dense<0.000000e+00> : vector<256x64xf32>
    %514 = tpu.matmul %511, %513, %cst_245 {dimension_numbers = #tpu.dot_dimension_numbers<[1], [0], [0], [1], [0, 0, 1, 1], [], []>} : vector<256x128xbf16>, vector<128x64xbf16>, vector<256x64xf32> -> vector<256x64xf32>
    %c1_246 = arith.constant 1 : index
    %c0_247 = arith.constant 0 : index
    %c0_248 = arith.constant 0 : index
    %515 = vector.load %arg11[%c1_246, %c0_247, %c0_248] : memref<2x1x64xf32, #tpu.memory_space<vmem>>, vector<1x1x64xf32>
    %516 = vector.shape_cast %515 : vector<1x1x64xf32> to vector<1x64xf32>
    %517 = vector.broadcast %516 : vector<1x64xf32> to vector<256x64xf32>
    %518 = arith.addf %514, %517 : vector<256x64xf32>
    %cst_249 = arith.constant 0.000000e+00 : f32
    %519 = vector.broadcast %cst_249 : f32 to vector<256x64xf32>
    %520 = arith.cmpf ogt, %518, %519 : vector<256x64xf32>
    %cst_250 = arith.constant 2.000000e-01 : f32
    %521 = vector.broadcast %cst_250 : f32 to vector<256x64xf32>
    %522 = arith.mulf %521, %518 : vector<256x64xf32>
    %523 = arith.select %520, %518, %522 : vector<256x64xi1>, vector<256x64xf32>
    %c0_251 = arith.constant 0 : index
    %c0_252 = arith.constant 0 : index
    %524 = vector.load %arg17[%c0_251, %c0_252] : memref<256x64xf32, #tpu.memory_space<vmem>>, vector<256x64xf32>
    %525 = arith.addf %524, %523 : vector<256x64xf32>
    %cst_253 = arith.constant dense<0.000000e+00> : vector<64xf32>
    %526 = vector.multi_reduction <add>, %525, %cst_253 [0] : vector<256x64xf32> to vector<64xf32>
    %527 = vector.shape_cast %526 : vector<64xf32> to vector<1x64xf32>
    %cst_254 = arith.constant 2.560000e+02 : f32
    %528 = vector.broadcast %cst_254 : f32 to vector<1x64xf32>
    %529 = arith.divf %527, %528 : vector<1x64xf32>
    %c1_255 = arith.constant 1 : index
    %c0_256 = arith.constant 0 : index
    %c0_257 = arith.constant 0 : index
    %530 = vector.load %arg12[%c1_255, %c0_256, %c0_257] : memref<2x64x4xf32, #tpu.memory_space<vmem>>, vector<1x64x4xf32>
    %531 = vector.shape_cast %530 : vector<1x64x4xf32> to vector<64x4xf32>
    %cst_258 = arith.constant dense<0.000000e+00> : vector<1x4xf32>
    %532 = tpu.matmul %529, %531, %cst_258 {dimension_numbers = #tpu.dot_dimension_numbers<[1], [0], [0], [1], [0, 0, 1, 1], [], []>} : vector<1x64xf32>, vector<64x4xf32>, vector<1x4xf32> -> vector<1x4xf32>
    %cst_259 = arith.constant 0.000000e+00 : f32
    %533 = vector.broadcast %cst_259 : f32 to vector<1x4xf32>
    %534 = arith.cmpf ogt, %532, %533 : vector<1x4xf32>
    %cst_260 = arith.constant 2.000000e-01 : f32
    %535 = vector.broadcast %cst_260 : f32 to vector<1x4xf32>
    %536 = arith.mulf %535, %532 : vector<1x4xf32>
    %537 = arith.select %534, %532, %536 : vector<1x4xi1>, vector<1x4xf32>
    %c1_261 = arith.constant 1 : index
    %c0_262 = arith.constant 0 : index
    %c0_263 = arith.constant 0 : index
    %538 = vector.load %arg13[%c1_261, %c0_262, %c0_263] : memref<2x4x64xf32, #tpu.memory_space<vmem>>, vector<1x4x64xf32>
    %539 = vector.shape_cast %538 : vector<1x4x64xf32> to vector<4x64xf32>
    %cst_264 = arith.constant dense<0.000000e+00> : vector<1x64xf32>
    %540 = tpu.matmul %537, %539, %cst_264 {dimension_numbers = #tpu.dot_dimension_numbers<[1], [0], [0], [1], [0, 0, 1, 1], [], []>} : vector<1x4xf32>, vector<4x64xf32>, vector<1x64xf32> -> vector<1x64xf32>
    %541 = arith.negf %540 : vector<1x64xf32>
    %542 = math.exp %541 : vector<1x64xf32>
    %cst_265 = arith.constant 1.000000e+00 : f32
    %543 = vector.broadcast %cst_265 : f32 to vector<1x64xf32>
    %544 = arith.addf %543, %542 : vector<1x64xf32>
    %545 = arith.divf %543, %544 : vector<1x64xf32>
    %546 = vector.broadcast %545 : vector<1x64xf32> to vector<256x64xf32>
    %547 = arith.mulf %525, %546 : vector<256x64xf32>
    %c16_266 = arith.constant 16 : index
    %c0_267 = arith.constant 0 : index
    %548 = vector.load %arg20[%c16_266, %c0_267] : memref<288x64xf32, #tpu.memory_space<vmem>>, vector<256x64xf32>
    tpu.vector_store %arg20[%c16_266, %c0_267], %547 {strides = array<i32>} : memref<288x64xf32, #tpu.memory_space<vmem>>, vector<256x64xf32>,
    %c1_268 = arith.constant 1 : index
    %c0_269 = arith.constant 0 : index
    %c0_270 = arith.constant 0 : index
    %549 = vector.load %arg15[%c1_268, %c0_269, %c0_270] : memref<2x1x64xf32, #tpu.memory_space<vmem>>, vector<1x1x64xf32>
    %550 = vector.shape_cast %549 : vector<1x1x64xf32> to vector<1x64xf32>
    %c0_271 = arith.constant 0 : index
    %c0_272 = arith.constant 0 : index
    %551 = vector.load %arg20[%c0_271, %c0_272] : memref<288x64xf32, #tpu.memory_space<vmem>>, vector<288x64xf32>
    %cst_273 = arith.constant 0.000000e+00 : f32
    %552 = vector.broadcast %cst_273 : f32 to vector<256x64xf32>
    %c1_i32_274 = arith.constant 1 : i32
    %553 = tpu.dynamic_rotate %551 by %c1_i32_274 dim 0 : vector<288x64xf32>, i32 -> vector<288x64xf32>
    %554 = vector.broadcast %49 : vector<288x1xf32> to vector<288x64xf32>
    %555 = arith.mulf %553, %554 : vector<288x64xf32>
    %556 = arith.truncf %555 : vector<288x64xf32> to vector<288x64xbf16>
    %557 = vector.extract_strided_slice %556 {offsets = [0, 0], sizes = [256, 64], strides = [1, 1]} : vector<288x64xbf16> to vector<256x64xbf16>
    %c1_275 = arith.constant 1 : index
    %c0_276 = arith.constant 0 : index
    %c0_277 = arith.constant 0 : index
    %c0_278 = arith.constant 0 : index
    %558 = vector.load %arg14[%c1_275, %c0_276, %c0_277, %c0_278] : memref<2x9x64x64xbf16, #tpu.memory_space<vmem>>, vector<1x1x64x64xbf16>
    %559 = vector.shape_cast %558 : vector<1x1x64x64xbf16> to vector<64x64xbf16>
    %cst_279 = arith.constant dense<0.000000e+00> : vector<256x64xf32>
    %560 = tpu.matmul %557, %559, %cst_279 {dimension_numbers = #tpu.dot_dimension_numbers<[1], [0], [0], [1], [0, 0, 1, 1], [], []>} : vector<256x64xbf16>, vector<64x64xbf16>, vector<256x64xf32> -> vector<256x64xf32>
    %561 = arith.addf %552, %560 : vector<256x64xf32>
    %562 = vector.extract_strided_slice %556 {offsets = [16, 0], sizes = [256, 64], strides = [1, 1]} : vector<288x64xbf16> to vector<256x64xbf16>
    %c1_280 = arith.constant 1 : index
    %c3_281 = arith.constant 3 : index
    %c0_282 = arith.constant 0 : index
    %c0_283 = arith.constant 0 : index
    %563 = vector.load %arg14[%c1_280, %c3_281, %c0_282, %c0_283] : memref<2x9x64x64xbf16, #tpu.memory_space<vmem>>, vector<1x1x64x64xbf16>
    %564 = vector.shape_cast %563 : vector<1x1x64x64xbf16> to vector<64x64xbf16>
    %cst_284 = arith.constant dense<0.000000e+00> : vector<256x64xf32>
    %565 = tpu.matmul %562, %564, %cst_284 {dimension_numbers = #tpu.dot_dimension_numbers<[1], [0], [0], [1], [0, 0, 1, 1], [], []>} : vector<256x64xbf16>, vector<64x64xbf16>, vector<256x64xf32> -> vector<256x64xf32>
    %566 = arith.addf %561, %565 : vector<256x64xf32>
    %567 = vector.extract_strided_slice %556 {offsets = [32, 0], sizes = [256, 64], strides = [1, 1]} : vector<288x64xbf16> to vector<256x64xbf16>
    %c1_285 = arith.constant 1 : index
    %c6_286 = arith.constant 6 : index
    %c0_287 = arith.constant 0 : index
    %c0_288 = arith.constant 0 : index
    %568 = vector.load %arg14[%c1_285, %c6_286, %c0_287, %c0_288] : memref<2x9x64x64xbf16, #tpu.memory_space<vmem>>, vector<1x1x64x64xbf16>
    %569 = vector.shape_cast %568 : vector<1x1x64x64xbf16> to vector<64x64xbf16>
    %cst_289 = arith.constant dense<0.000000e+00> : vector<256x64xf32>
    %570 = tpu.matmul %567, %569, %cst_289 {dimension_numbers = #tpu.dot_dimension_numbers<[1], [0], [0], [1], [0, 0, 1, 1], [], []>} : vector<256x64xbf16>, vector<64x64xbf16>, vector<256x64xf32> -> vector<256x64xf32>
    %571 = arith.addf %566, %570 : vector<256x64xf32>
    %572 = arith.truncf %551 : vector<288x64xf32> to vector<288x64xbf16>
    %573 = vector.extract_strided_slice %572 {offsets = [0, 0], sizes = [256, 64], strides = [1, 1]} : vector<288x64xbf16> to vector<256x64xbf16>
    %c1_290 = arith.constant 1 : index
    %c1_291 = arith.constant 1 : index
    %c0_292 = arith.constant 0 : index
    %c0_293 = arith.constant 0 : index
    %574 = vector.load %arg14[%c1_290, %c1_291, %c0_292, %c0_293] : memref<2x9x64x64xbf16, #tpu.memory_space<vmem>>, vector<1x1x64x64xbf16>
    %575 = vector.shape_cast %574 : vector<1x1x64x64xbf16> to vector<64x64xbf16>
    %cst_294 = arith.constant dense<0.000000e+00> : vector<256x64xf32>
    %576 = tpu.matmul %573, %575, %cst_294 {dimension_numbers = #tpu.dot_dimension_numbers<[1], [0], [0], [1], [0, 0, 1, 1], [], []>} : vector<256x64xbf16>, vector<64x64xbf16>, vector<256x64xf32> -> vector<256x64xf32>
    %577 = arith.addf %571, %576 : vector<256x64xf32>
    %578 = vector.extract_strided_slice %572 {offsets = [16, 0], sizes = [256, 64], strides = [1, 1]} : vector<288x64xbf16> to vector<256x64xbf16>
    %c1_295 = arith.constant 1 : index
    %c4_296 = arith.constant 4 : index
    %c0_297 = arith.constant 0 : index
    %c0_298 = arith.constant 0 : index
    %579 = vector.load %arg14[%c1_295, %c4_296, %c0_297, %c0_298] : memref<2x9x64x64xbf16, #tpu.memory_space<vmem>>, vector<1x1x64x64xbf16>
    %580 = vector.shape_cast %579 : vector<1x1x64x64xbf16> to vector<64x64xbf16>
    %cst_299 = arith.constant dense<0.000000e+00> : vector<256x64xf32>
    %581 = tpu.matmul %578, %580, %cst_299 {dimension_numbers = #tpu.dot_dimension_numbers<[1], [0], [0], [1], [0, 0, 1, 1], [], []>} : vector<256x64xbf16>, vector<64x64xbf16>, vector<256x64xf32> -> vector<256x64xf32>
    %582 = arith.addf %577, %581 : vector<256x64xf32>
    %583 = vector.extract_strided_slice %572 {offsets = [32, 0], sizes = [256, 64], strides = [1, 1]} : vector<288x64xbf16> to vector<256x64xbf16>
    %c1_300 = arith.constant 1 : index
    %c7_301 = arith.constant 7 : index
    %c0_302 = arith.constant 0 : index
    %c0_303 = arith.constant 0 : index
    %584 = vector.load %arg14[%c1_300, %c7_301, %c0_302, %c0_303] : memref<2x9x64x64xbf16, #tpu.memory_space<vmem>>, vector<1x1x64x64xbf16>
    %585 = vector.shape_cast %584 : vector<1x1x64x64xbf16> to vector<64x64xbf16>
    %cst_304 = arith.constant dense<0.000000e+00> : vector<256x64xf32>
    %586 = tpu.matmul %583, %585, %cst_304 {dimension_numbers = #tpu.dot_dimension_numbers<[1], [0], [0], [1], [0, 0, 1, 1], [], []>} : vector<256x64xbf16>, vector<64x64xbf16>, vector<256x64xf32> -> vector<256x64xf32>
    %587 = arith.addf %582, %586 : vector<256x64xf32>
    %c287_i32_305 = arith.constant 287 : i32
    %588 = tpu.dynamic_rotate %551 by %c287_i32_305 dim 0 : vector<288x64xf32>, i32 -> vector<288x64xf32>
    %589 = vector.broadcast %45 : vector<288x1xf32> to vector<288x64xf32>
    %590 = arith.mulf %588, %589 : vector<288x64xf32>
    %591 = arith.truncf %590 : vector<288x64xf32> to vector<288x64xbf16>
    %592 = vector.extract_strided_slice %591 {offsets = [0, 0], sizes = [256, 64], strides = [1, 1]} : vector<288x64xbf16> to vector<256x64xbf16>
    %c1_306 = arith.constant 1 : index
    %c2_307 = arith.constant 2 : index
    %c0_308 = arith.constant 0 : index
    %c0_309 = arith.constant 0 : index
    %593 = vector.load %arg14[%c1_306, %c2_307, %c0_308, %c0_309] : memref<2x9x64x64xbf16, #tpu.memory_space<vmem>>, vector<1x1x64x64xbf16>
    %594 = vector.shape_cast %593 : vector<1x1x64x64xbf16> to vector<64x64xbf16>
    %cst_310 = arith.constant dense<0.000000e+00> : vector<256x64xf32>
    %595 = tpu.matmul %592, %594, %cst_310 {dimension_numbers = #tpu.dot_dimension_numbers<[1], [0], [0], [1], [0, 0, 1, 1], [], []>} : vector<256x64xbf16>, vector<64x64xbf16>, vector<256x64xf32> -> vector<256x64xf32>
    %596 = arith.addf %587, %595 : vector<256x64xf32>
    %597 = vector.extract_strided_slice %591 {offsets = [16, 0], sizes = [256, 64], strides = [1, 1]} : vector<288x64xbf16> to vector<256x64xbf16>
    %c1_311 = arith.constant 1 : index
    %c5_312 = arith.constant 5 : index
    %c0_313 = arith.constant 0 : index
    %c0_314 = arith.constant 0 : index
    %598 = vector.load %arg14[%c1_311, %c5_312, %c0_313, %c0_314] : memref<2x9x64x64xbf16, #tpu.memory_space<vmem>>, vector<1x1x64x64xbf16>
    %599 = vector.shape_cast %598 : vector<1x1x64x64xbf16> to vector<64x64xbf16>
    %cst_315 = arith.constant dense<0.000000e+00> : vector<256x64xf32>
    %600 = tpu.matmul %597, %599, %cst_315 {dimension_numbers = #tpu.dot_dimension_numbers<[1], [0], [0], [1], [0, 0, 1, 1], [], []>} : vector<256x64xbf16>, vector<64x64xbf16>, vector<256x64xf32> -> vector<256x64xf32>
    %601 = arith.addf %596, %600 : vector<256x64xf32>
    %602 = vector.extract_strided_slice %591 {offsets = [32, 0], sizes = [256, 64], strides = [1, 1]} : vector<288x64xbf16> to vector<256x64xbf16>
    %c1_316 = arith.constant 1 : index
    %c8_317 = arith.constant 8 : index
    %c0_318 = arith.constant 0 : index
    %c0_319 = arith.constant 0 : index
    %603 = vector.load %arg14[%c1_316, %c8_317, %c0_318, %c0_319] : memref<2x9x64x64xbf16, #tpu.memory_space<vmem>>, vector<1x1x64x64xbf16>
    %604 = vector.shape_cast %603 : vector<1x1x64x64xbf16> to vector<64x64xbf16>
    %cst_320 = arith.constant dense<0.000000e+00> : vector<256x64xf32>
    %605 = tpu.matmul %602, %604, %cst_320 {dimension_numbers = #tpu.dot_dimension_numbers<[1], [0], [0], [1], [0, 0, 1, 1], [], []>} : vector<256x64xbf16>, vector<64x64xbf16>, vector<256x64xf32> -> vector<256x64xf32>
    %606 = arith.addf %601, %605 : vector<256x64xf32>
    %607 = vector.broadcast %550 : vector<1x64xf32> to vector<256x64xf32>
    %608 = arith.addf %606, %607 : vector<256x64xf32>
    %c0_321 = arith.constant 0 : index
    %c0_322 = arith.constant 0 : index
    %609 = vector.load %arg17[%c0_321, %c0_322] : memref<256x64xf32, #tpu.memory_space<vmem>>, vector<256x64xf32>
    %610 = arith.addf %608, %609 : vector<256x64xf32>
    %611 = vector.shape_cast %610 : vector<256x64xf32> to vector<16x16x64xf32>
    %c0_323 = arith.constant 0 : index
    %c0_324 = arith.constant 0 : index
    %c0_325 = arith.constant 0 : index
    %c0_326 = arith.constant 0 : index
    %612 = vector.load %arg16[%c0_323, %c0_324, %c0_325, %c0_326] : memref<1x16x16x64xf32, #tpu.memory_space<vmem>>, vector<1x16x16x64xf32>
    %613 = vector.shape_cast %612 : vector<1x16x16x64xf32> to vector<16x16x64xf32>
    %614 = vector.shape_cast %611 : vector<16x16x64xf32> to vector<1x16x16x64xf32>
    tpu.vector_store %arg16[%c0_323, %c0_324, %c0_325, %c0_326], %614 {strides = array<i32>} : memref<1x16x16x64xf32, #tpu.memory_space<vmem>>, vector<1x16x16x64xf32>,
    return
  }
  func.func @transform_0(%arg0: i32) -> (i32, i32, i32, i32) {
    %c0_i32 = arith.constant 0 : i32
    %c0_i32_0 = arith.constant 0 : i32
    %c0_i32_1 = arith.constant 0 : i32
    %c0_i32_2 = arith.constant 0 : i32
    return %arg0, %c0_i32, %c0_i32_0, %c0_i32_1 : i32, i32, i32, i32
  }
  func.func @transform_1(%arg0: i32) -> (i32, i32, i32) {
    %c0_i32 = arith.constant 0 : i32
    %c0_i32_0 = arith.constant 0 : i32
    %c0_i32_1 = arith.constant 0 : i32
    %c0_i32_2 = arith.constant 0 : i32
    return %c0_i32, %c0_i32_0, %c0_i32_1 : i32, i32, i32
  }
  func.func @transform_2(%arg0: i32) -> (i32, i32, i32) {
    %c0_i32 = arith.constant 0 : i32
    %c0_i32_0 = arith.constant 0 : i32
    %c0_i32_1 = arith.constant 0 : i32
    %c0_i32_2 = arith.constant 0 : i32
    return %c0_i32, %c0_i32_0, %c0_i32_1 : i32, i32, i32
  }
  func.func @transform_3(%arg0: i32) -> (i32, i32, i32) {
    %c0_i32 = arith.constant 0 : i32
    %c0_i32_0 = arith.constant 0 : i32
    %c0_i32_1 = arith.constant 0 : i32
    %c0_i32_2 = arith.constant 0 : i32
    return %c0_i32, %c0_i32_0, %c0_i32_1 : i32, i32, i32
  }
  func.func @transform_4(%arg0: i32) -> (i32, i32, i32) {
    %c0_i32 = arith.constant 0 : i32
    %c0_i32_0 = arith.constant 0 : i32
    %c0_i32_1 = arith.constant 0 : i32
    %c0_i32_2 = arith.constant 0 : i32
    return %c0_i32, %c0_i32_0, %c0_i32_1 : i32, i32, i32
  }
  func.func @transform_5(%arg0: i32) -> (i32, i32, i32) {
    %c0_i32 = arith.constant 0 : i32
    %c0_i32_0 = arith.constant 0 : i32
    %c0_i32_1 = arith.constant 0 : i32
    %c0_i32_2 = arith.constant 0 : i32
    return %c0_i32, %c0_i32_0, %c0_i32_1 : i32, i32, i32
  }
  func.func @transform_6(%arg0: i32) -> (i32, i32, i32) {
    %c0_i32 = arith.constant 0 : i32
    %c0_i32_0 = arith.constant 0 : i32
    %c0_i32_1 = arith.constant 0 : i32
    %c0_i32_2 = arith.constant 0 : i32
    return %c0_i32, %c0_i32_0, %c0_i32_1 : i32, i32, i32
  }
  func.func @transform_7(%arg0: i32) -> (i32, i32, i32) {
    %c0_i32 = arith.constant 0 : i32
    %c0_i32_0 = arith.constant 0 : i32
    %c0_i32_1 = arith.constant 0 : i32
    %c0_i32_2 = arith.constant 0 : i32
    return %c0_i32, %c0_i32_0, %c0_i32_1 : i32, i32, i32
  }
  func.func @transform_8(%arg0: i32) -> (i32, i32, i32) {
    %c0_i32 = arith.constant 0 : i32
    %c0_i32_0 = arith.constant 0 : i32
    %c0_i32_1 = arith.constant 0 : i32
    %c0_i32_2 = arith.constant 0 : i32
    return %c0_i32, %c0_i32_0, %c0_i32_1 : i32, i32, i32
  }
  func.func @transform_9(%arg0: i32) -> (i32, i32, i32) {
    %c0_i32 = arith.constant 0 : i32
    %c0_i32_0 = arith.constant 0 : i32
    %c0_i32_1 = arith.constant 0 : i32
    %c0_i32_2 = arith.constant 0 : i32
    return %c0_i32, %c0_i32_0, %c0_i32_1 : i32, i32, i32
  }
  func.func @transform_10(%arg0: i32) -> (i32, i32, i32) {
    %c0_i32 = arith.constant 0 : i32
    %c0_i32_0 = arith.constant 0 : i32
    %c0_i32_1 = arith.constant 0 : i32
    %c0_i32_2 = arith.constant 0 : i32
    return %c0_i32, %c0_i32_0, %c0_i32_1 : i32, i32, i32
  }
  func.func @transform_11(%arg0: i32) -> (i32, i32, i32) {
    %c0_i32 = arith.constant 0 : i32
    %c0_i32_0 = arith.constant 0 : i32
    %c0_i32_1 = arith.constant 0 : i32
    %c0_i32_2 = arith.constant 0 : i32
    return %c0_i32, %c0_i32_0, %c0_i32_1 : i32, i32, i32
  }
  func.func @transform_12(%arg0: i32) -> (i32, i32, i32) {
    %c0_i32 = arith.constant 0 : i32
    %c0_i32_0 = arith.constant 0 : i32
    %c0_i32_1 = arith.constant 0 : i32
    %c0_i32_2 = arith.constant 0 : i32
    return %c0_i32, %c0_i32_0, %c0_i32_1 : i32, i32, i32
  }
  func.func @transform_13(%arg0: i32) -> (i32, i32, i32, i32) {
    %c0_i32 = arith.constant 0 : i32
    %c0_i32_0 = arith.constant 0 : i32
    %c0_i32_1 = arith.constant 0 : i32
    %c0_i32_2 = arith.constant 0 : i32
    %c0_i32_3 = arith.constant 0 : i32
    return %c0_i32, %c0_i32_0, %c0_i32_1, %c0_i32_2 : i32, i32, i32, i32
  }
  func.func @transform_14(%arg0: i32) -> (i32, i32, i32) {
    %c0_i32 = arith.constant 0 : i32
    %c0_i32_0 = arith.constant 0 : i32
    %c0_i32_1 = arith.constant 0 : i32
    %c0_i32_2 = arith.constant 0 : i32
    return %c0_i32, %c0_i32_0, %c0_i32_1 : i32, i32, i32
  }
  func.func @transform_15(%arg0: i32) -> (i32, i32, i32, i32) {
    %c0_i32 = arith.constant 0 : i32
    %c0_i32_0 = arith.constant 0 : i32
    %c0_i32_1 = arith.constant 0 : i32
    %c0_i32_2 = arith.constant 0 : i32
    return %arg0, %c0_i32, %c0_i32_0, %c0_i32_1 : i32, i32, i32, i32
  }
}

</mosaic_0001>

<bundles_post_ra>
// kernel: _lambda_.1
= control target key start
LH: loop header
LB: loop body
LE: loop exit
PB: predicated region body
PF: predicated region fallthrough
CT: control target
= control target key end

     0   :  { %s21605_s0 = inlined_call_operand.hbm [shape: f32[2,16,16,64], index: 0, kind: input, shape index: {}]   ;;  %s21606_s1 = inlined_call_operand.hbm [shape: bf16[2,64,128], index: 1, kind: input, shape index: {}]   ;;  %s21607_s2 = inlined_call_operand.vmem [shape: f32[2,1,128], index: 2, kind: input, shape index: {}]   ;;  %s21608_s3 = inlined_call_operand.vmem [shape: f32[2,9,128], index: 3, kind: input, shape index: {}]   ;;  %s21609_s4 = inlined_call_operand.vmem [shape: f32[2,1,128], index: 4, kind: input, shape index: {}]   ;;  %s21610_s5 = inlined_call_operand.vmem [shape: f32[2,128,32], index: 5, kind: input, shape index: {}]   ;;  %s21611_s6 = inlined_call_operand.hbm [shape: f32[2,1,32], index: 6, kind: input, shape index: {}]   ;;  %s21612_s7 = inlined_call_operand.hbm [shape: f32[2,32,128], index: 7, kind: input, shape index: {}]   ;;  %s21613_s8 = inlined_call_operand.hbm [shape: f32[2,1,128], index: 8, kind: input, shape index: {}]   ;;  %s21614_s9 = inlined_call_operand.vmem [shape: bf16[2,128,64], index: 9, kind: input, shape index: {}]   ;;  %s21615_s10 = inlined_call_operand.vmem [shape: f32[2,1,64], index: 10, kind: input, shape index: {}]   ;;  %s21616_s11 = inlined_call_operand.hbm [shape: f32[2,64,4], index: 11, kind: input, shape index: {}]   ;;  %s21617_s12 = inlined_call_operand.hbm [shape: f32[2,4,64], index: 12, kind: input, shape index: {}]   ;;  %s21618_s13 = inlined_call_operand.vmem [shape: bf16[2,9,64,64], index: 13, kind: input, shape index: {}]   ;;  %s21619_s14 = inlined_call_operand.hbm [shape: f32[2,1,64], index: 14, kind: input, shape index: {}]   ;;  %s21620_s15 = inlined_call_operand.hbm [shape: f32[2,16,16,64], index: 15, kind: output, shape index: {}]  }
   0x1   :  { %21882 = sst [smem:[#allocation105_spill]] %s21605_s0 }
   0x2   :  { %21883 = sst [smem:[#allocation106_spill]] %s21606_s1 }
   0x3   :  { %21884 = sst [smem:[#allocation107_spill]] %s21607_s2 }
   0x4   :  { %21885 = sst [smem:[#allocation108_spill]] %s21608_s3 }
   0x5   :  { %21886 = sst [smem:[#allocation109_spill]] %s21609_s4 }
   0x6   :  { %21887 = sst [smem:[#allocation110_spill]] %s21610_s5 }
   0x7   :  { %21888 = sst [smem:[#allocation111_spill]] %s21614_s9 }
   0x8   :  { %21889 = sst [smem:[#allocation112_spill]] %s21615_s10 }
   0x9   :  { %21890 = sst [smem:[#allocation113_spill]] %s21618_s13 }
   0xa   :  { %21891 = sst [smem:[#allocation114_spill]] %s21620_s15 }
   0xb   :  { %20 = vsyncpa [#allocation8], 0 }
   0xc   :  { %22 = vsyncpa [#allocation8 + $0x1], 0 }
   0xd   :  { %23 = vsyncpa [#allocation11], 0 }
   0xe   :  { %24 = vsyncpa [#allocation14], 0 }
   0xf   :  { %25 = vsyncpa [#allocation17], 0 }
  0x10   :  { %26 = vsyncpa [#allocation20], 0 }
  0x11   :  { %27 = vsyncpa [#allocation9], 0 }
  0x12   :  { %29 = vsyncpa [#allocation9 + $0x1], 0  ;;  %s15081_s18 = smov 0   ;;  %s15083_s19 = smov 0  }
  0x13   :  { %s15085_s20 = smov 0   ;;  %s15087_s21 = smov 0  }
  0x14 LB: > { %s14981_s22 = smov [#allocation10]   ;;  %s15102_s24 = sadd.s32 4294967295, %s14979_s21   ;;  %s14979_s21 = sphi %s15087_s21, %s22559_s21   ;;  %s14975_s20 = sphi %s15085_s20, %s22558_s20   ;;  %s14971_s19 = sphi %s15083_s19, %s22557_s19   ;;  %s14967_s18 = sphi %s15081_s18, %s22556_s18  }
  0x15   : > { %s398_s23 = sshll.u32 %s14981_s22, 4  ;;  %p11587_p0 = scmp.ge.s32.totalorder %s14979_s21, 1  ;;  %s15107_s23 = int_to_ptr.vmem [resolvable:$true] %s398_s23 }
  0x16   : > { %p21629_p1 = scmp.eq.s32.totalorder %s15102_s24, 0  ;;  %p386_p2 = scmp.lt.s32.totalorder %s14979_s21, 3 }
  0x17   : > { %s14982_s26 = smov [#allocation13]   ;;  %s14983_s29 = smov [#allocation16]  }
  0x18   : > { %p15109_p3 = pnand %p11587_p0, %p386_p2  ;;  %s436_s27 = sshll.u32 %s14982_s26, 4  ;;  %s15122_s27 = int_to_ptr.vmem [resolvable:$true] %s436_s27 }
  0x19   : > { %s15124_s30 = sshll.u32 %s14983_s29, 4  ;;  %s21894_s1 = sld [smem:[#allocation106_spill]]  ;;  %s469_s30 = int_to_ptr.vmem [resolvable:$true] %s15124_s30 }
  0x1a   : > { %s21892_s25 = scalar_select %p15109_p3, 1, 0 }
  0x1b   : > { %p14457_p5 = pneg %p15109_p3 }
  0x1d   : > { %p15118_p6 = pnand %p14457_p5, %p21629_p1 }
  0x1f   : > { %s14671_s22 = scalar_lea.hbm %s21894_s1, 1024  ;;  %p15134_p8 = pneg %p15118_p6 }
  0x20   : > { %p14672_p7 = scmp.ne.s32.totalorder %s21894_s1, %s14671_s22  ;;  %p14678_p11 = scmp.lt.u32.totalorder %s14671_s22, %s21894_s1 }
  0x22   : > { %p14674_p9 = pnand %p15134_p8, %p14672_p7 }
  0x24   : > { %p14675_p10 = pneg %p14674_p9 }
  0x26   : > { %p14680_p12 = pnand %p14678_p11, %p14675_p10 }
  0x28   : > { %14683 = shalt.err (!%p14680_p12)
}
  0x29   : > { %s14684_s13 = scalar_lea.vmem %s15107_s23, 1024  ;;  %p14692_p5 = scmp.lt.s32.totalorder %s15107_s23, %s15107_s23 }
  0x2a   : > { %p14685_p13 = scmp.ne.s32.totalorder %s15107_s23, %s14684_s13  ;;  %p14693_p4 = scmp.lt.s32.totalorder %s14684_s13, %s14684_s13 }
  0x2c   : > { %p14687_p0 = pnand %p14685_p13, %p15134_p8  ;;  %p14694_p7 = por %p14693_p4, %p14692_p5 }
  0x2e   : > { %p14688_p2 = pneg %p14687_p0 }
  0x30   : > { %p14695_p9 = pnand %p14694_p7, %p14688_p2 }
  0x32   : > { %14698 = shalt.err (!%p14695_p9)
}
  0x33   : > { %s21628_s15 = smov 64   ;;  %s21631_s10 = smov 4  }
  0x34   : > { %14460 = dma.hbm_to_vmem [thread:$0]  (!%p15118_p6), %s21894_s1, 1024, %s15107_s23, [#allocation11], %s21628_s15, %s21628_s15, %s21631_s10  }
  0x35   : > { %s14699_s13 = scalar_lea.hbm %s21612_s7, 1024 }
  0x36   : > { %p14700_p4 = scmp.ne.s32.totalorder %s21612_s7, %s14699_s13  ;;  %p14706_p12 = scmp.lt.u32.totalorder %s14699_s13, %s21612_s7 }
  0x38   : > { %p14702_p10 = pnand %p14700_p4, %p15134_p8 }
  0x3a   : > { %p14703_p11 = pneg %p14702_p10 }
  0x3c   : > { %p14708_p13 = pnand %p14706_p12, %p14703_p11 }
  0x3e   : > { %14711 = shalt.err (!%p14708_p13)
}
  0x3f   : > { %s14712_s23 = scalar_lea.vmem %s15122_s27, 1024  ;;  %p14720_p7 = scmp.lt.s32.totalorder %s15122_s27, %s15122_s27 }
  0x40   : > { %p14713_p0 = scmp.ne.s32.totalorder %s15122_s27, %s14712_s23  ;;  %p14721_p9 = scmp.lt.s32.totalorder %s14712_s23, %s14712_s23 }
  0x42   : > { %p14715_p2 = pnand %p14713_p0, %p15134_p8  ;;  %p14722_p4 = por %p14721_p9, %p14720_p7 }
  0x44   : > { %p14716_p5 = pneg %p14715_p2 }
  0x46   : > { %p14723_p10 = pnand %p14722_p4, %p14716_p5 }
  0x48   : > { %14726 = shalt.err (!%p14723_p10)
}
  0x49   : > { %s21632_s5 = smov 128   ;;  %s21633_s2 = smov 8  }
  0x4a   : > { %14466 = dma.hbm_to_vmem [thread:$0]  (!%p15118_p6), %s21612_s7, 1024, %s15122_s27, [#allocation14], %s21632_s5, %s21632_s5, %s21633_s2  }
  0x4b   : > { %s14727_s22 = scalar_lea.hbm %s21616_s11, 2048 }
  0x4c   : > { %p14728_p11 = scmp.ne.s32.totalorder %s21616_s11, %s14727_s22  ;;  %p14734_p0 = scmp.lt.u32.totalorder %s14727_s22, %s21616_s11 }
  0x4e   : > { %p14730_p12 = pnand %p14728_p11, %p15134_p8 }
  0x50   : > { %p14731_p13 = pneg %p14730_p12 }
  0x52   : > { %p14736_p2 = pnand %p14734_p0, %p14731_p13 }
  0x54   : > { %14739 = shalt.err (!%p14736_p2)
}
  0x55   : > { %s14740_s4 = scalar_lea.vmem %s469_s30, 2048  ;;  %p14748_p4 = scmp.lt.s32.totalorder %s469_s30, %s469_s30 }
  0x56   : > { %p14741_p5 = scmp.ne.s32.totalorder %s469_s30, %s14740_s4  ;;  %p14749_p10 = scmp.lt.s32.totalorder %s14740_s4, %s14740_s4 }
  0x58   : > { %p14743_p7 = pnand %p14741_p5, %p15134_p8  ;;  %p14750_p1 = por %p14749_p10, %p14748_p4 }
  0x5a   : > { %p14744_p9 = pneg %p14743_p7 }
  0x5c   : > { %p14751_p3 = pnand %p14750_p1, %p14744_p9 }
  0x5e   : > { %14754 = shalt.err (!%p14751_p3)
}
  0x5f   : > { %14472 = dma.hbm_to_vmem [thread:$0]  (!%p15118_p6), %s21616_s11, 2048, %s469_s30, [#allocation17], %s21632_s5, %s21632_s5, %s21633_s2  }
  0x60   : > { %s14988_s9 = smov [#allocation12]   ;;  %s14755_s29 = scalar_lea.hbm %s21611_s6, 32 }
  0x61   : > { %s423_s16 = sshll.u32 %s14988_s9, 4  ;;  %p14756_p1 = scmp.ne.s32.totalorder %s21611_s6, %s14755_s29  ;;  %s424_s16 = int_to_ptr.vmem [resolvable:$true] %s423_s16 }
  0x62   : > { %p14762_p12 = scmp.lt.u32.totalorder %s14755_s29, %s21611_s6 }
  0x63   : > { %p14758_p3 = pnand %p14756_p1, %p15134_p8 }
  0x65   : > { %p14759_p11 = pneg %p14758_p3 }
  0x67   : > { %p14764_p13 = pnand %p14762_p12, %p14759_p11 }
  0x69   : > { %14767 = shalt.err (!%p14764_p13)
}
  0x6a   : > { %s14768_s30 = scalar_lea.vmem %s424_s16, 32  ;;  %p14776_p7 = scmp.lt.s32.totalorder %s424_s16, %s424_s16 }
  0x6b   : > { %p14769_p0 = scmp.ne.s32.totalorder %s424_s16, %s14768_s30  ;;  %p14777_p9 = scmp.lt.s32.totalorder %s14768_s30, %s14768_s30 }
  0x6d   : > { %p14771_p2 = pnand %p14769_p0, %p15134_p8  ;;  %p14778_p4 = por %p14777_p9, %p14776_p7 }
  0x6f   : > { %p14772_p5 = pneg %p14771_p2 }
  0x71   : > { %p14779_p10 = pnand %p14778_p4, %p14772_p5 }
  0x73   : > { %14782 = shalt.err (!%p14779_p10)
}
  0x74   : > { %s21634_s27 = smov 16   ;;  %s21635_s15 = smov 1  }
  0x75   : > { %14463 = dma.hbm_to_vmem [thread:$0]  (!%p15118_p6), %s21611_s6, 32, %s424_s16, [#allocation11], %s21634_s27, %s21634_s27, %s21635_s15  }
  0x76   : > { %s14991_s17 = smov [#allocation15]   ;;  %s14992_s29 = smov [#allocation18]  }
  0x77   : > { %s449_s22 = sshll.u32 %s14991_s17, 4  ;;  %s481_s13 = sshll.u32 %s14992_s29, 4  ;;  %s450_s22 = int_to_ptr.vmem [resolvable:$true] %s449_s22  ;;  %s15227_s13 = int_to_ptr.vmem [resolvable:$true] %s481_s13 }
  0x78   : > { %s14783_s30 = scalar_lea.hbm %s21613_s8, 32 }
  0x79   : > { %p14784_p1 = scmp.ne.s32.totalorder %s21613_s8, %s14783_s30  ;;  %p14790_p12 = scmp.lt.u32.totalorder %s14783_s30, %s21613_s8 }
  0x7b   : > { %p14786_p3 = pnand %p14784_p1, %p15134_p8 }
  0x7d   : > { %p14787_p11 = pneg %p14786_p3 }
  0x7f   : > { %p14792_p13 = pnand %p14790_p12, %p14787_p11 }
  0x81   : > { %14795 = shalt.err (!%p14792_p13)
}
  0x82   : > { %s14796_s9 = scalar_lea.vmem %s450_s22, 32  ;;  %p14804_p7 = scmp.lt.s32.totalorder %s450_s22, %s450_s22 }
  0x83   : > { %p14797_p0 = scmp.ne.s32.totalorder %s450_s22, %s14796_s9  ;;  %p14805_p9 = scmp.lt.s32.totalorder %s14796_s9, %s14796_s9 }
  0x85   : > { %p14799_p2 = pnand %p14797_p0, %p15134_p8  ;;  %p14806_p4 = por %p14805_p9, %p14804_p7 }
  0x87   : > { %p14800_p5 = pneg %p14799_p2 }
  0x89   : > { %p14807_p10 = pnand %p14806_p4, %p14800_p5 }
  0x8b   : > { %14810 = shalt.err (!%p14807_p10)
}
  0x8c   : > { %14469 = dma.hbm_to_vmem [thread:$0]  (!%p15118_p6), %s21613_s8, 32, %s450_s22, [#allocation14], %s21634_s27, %s21634_s27, %s21635_s15  }
  0x8d   : > { %s14811_s23 = scalar_lea.hbm %s21617_s12, 128 }
  0x8e   : > { %p14812_p1 = scmp.ne.s32.totalorder %s21617_s12, %s14811_s23  ;;  %p14818_p12 = scmp.lt.u32.totalorder %s14811_s23, %s21617_s12 }
  0x90   : > { %p14814_p3 = pnand %p14812_p1, %p15134_p8 }
  0x92   : > { %p14815_p11 = pneg %p14814_p3 }
  0x94   : > { %p14820_p13 = pnand %p14818_p12, %p14815_p11 }
  0x96   : > { %14823 = shalt.err (!%p14820_p13)
}
  0x97   : > { %s14824_s22 = scalar_lea.vmem %s15227_s13, 128  ;;  %p14832_p7 = scmp.lt.s32.totalorder %s15227_s13, %s15227_s13 }
  0x98   : > { %p14825_p0 = scmp.ne.s32.totalorder %s15227_s13, %s14824_s22  ;;  %p14833_p9 = scmp.lt.s32.totalorder %s14824_s22, %s14824_s22 }
  0x9a   : > { %p14827_p2 = pnand %p14825_p0, %p15134_p8  ;;  %p14834_p4 = por %p14833_p9, %p14832_p7 }
  0x9c   : > { %p14828_p5 = pneg %p14827_p2 }
  0x9e   : > { %p14835_p10 = pnand %p14834_p4, %p14828_p5 }
  0xa0   : > { %14838 = shalt.err (!%p14835_p10)
}
  0xa1   : > { %s21896_s9 = smov 4   ;;  %s21897_s5 = smov 64  }
  0xa2   : > { %14475 = dma.hbm_to_vmem [thread:$0]  (!%p15118_p6), %s21617_s12, 128, %s15227_s13, [#allocation17], %s21897_s5, %s21897_s5, %s21896_s9  }
  0xa3   : > { %s14993_s29 = smov [#allocation19]   ;;  %s14839_s10 = scalar_lea.hbm %s21619_s14, 32 }
  0xa4   : > { %s497_s23 = sshll.u32 %s14993_s29, 4  ;;  %p14840_p1 = scmp.ne.s32.totalorder %s21619_s14, %s14839_s10  ;;  %s498_s23 = int_to_ptr.vmem [resolvable:$true] %s497_s23 }
  0xa5   : > { %p14846_p12 = scmp.lt.u32.totalorder %s14839_s10, %s21619_s14 }
  0xa6   : > { %p14842_p3 = pnand %p14840_p1, %p15134_p8 }
  0xa8   : > { %p14843_p11 = pneg %p14842_p3 }
  0xaa   : > { %p14848_p13 = pnand %p14846_p12, %p14843_p11 }
  0xac   : > { %14851 = shalt.err (!%p14848_p13)
}
  0xad   : > { %s14852_s13 = scalar_lea.vmem %s498_s23, 32  ;;  %p14860_p7 = scmp.lt.s32.totalorder %s498_s23, %s498_s23 }
  0xae   : > { %p14853_p0 = scmp.ne.s32.totalorder %s498_s23, %s14852_s13  ;;  %p14861_p9 = scmp.lt.s32.totalorder %s14852_s13, %s14852_s13 }
  0xb0   : > { %p14855_p2 = pnand %p14853_p0, %p15134_p8  ;;  %p14862_p4 = por %p14861_p9, %p14860_p7 }
  0xb2   : > { %p14856_p5 = pneg %p14855_p2 }
  0xb4   : > { %p14863_p10 = pnand %p14862_p4, %p14856_p5 }
  0xb6   : > { %14866 = shalt.err (!%p14863_p10)
}
  0xb7   : > { %s21898_s9 = smov 1   ;;  %s21899_s5 = smov 16  }
  0xb8   : > { %14478 = dma.hbm_to_vmem [thread:$0]  (!%p15118_p6), %s21619_s14, 32, %s498_s23, [#allocation20], %s21899_s5, %s21899_s5, %s21898_s9  }
  0xb9   : > { %s11586_s28 = sadd.s32 4294967294, %s14979_s21   ;;  %s15299_s26 = sadd.s32 1, %s14979_s21  }
  0xba   : > { %s42_s2 = sadd.s32 1, %s14975_s20  ;;  %s39_s17 = ssub.s32 %s14979_s21, %s15299_s26 }
  0xbb   : > { %p49_p8 = scmp.ne.s32.totalorder %s14975_s20, %s14971_s19  ;;  %p40_p1 = scmp.eq.s32.totalorder %s39_s17, 0 }
  0xbc   : > { %p50_p3 = scmp.eq.s32.totalorder %s14979_s21, 0  ;;  %p55_p11 = scmp.ne.s32.totalorder %s14971_s19, %s14967_s18 }
  0xbd   : > { %p373_p12 = scmp.eq.s32.totalorder %s15102_s24, 1  ;;  %p21900_p0 = scmp.eq.s32.totalorder %s15102_s24, 0 }
  0xbe   : > { %s15311_s29 = scalar_select %p40_p1, %s14975_s20, %s42_s2  }
  0xbf   : > { %p51_p13 = por %p50_p3, %p49_p8  ;;  %p15315_p2 = por %p21900_p0, %p55_p11 }
  0xc0   : > { %p15319_p6 = por %p373_p12, %p49_p8  ;;  %p379_p5 = scmp.eq.s32.totalorder %s11586_s28, 1 }
  0xc1   : > { %p14494_p7 = scmp.lt.s32.totalorder %s14979_s21, 2  ;;  %s511_s30 = sand.u32 1, %s14975_s20  }
  0xc2   : > { %s21902_s23 = scalar_select %p15319_p6, 1, 0 }
  0xc3   : > { %p15325_p9 = por %p379_p5, %p55_p11  ;;  %s11596_s16 = sshll.u32 %s511_s30, 8 }
  0xc4   : > { %s12261_s22 = sshll.u32 %s14979_s21, 12  ;;  %s21904_s0 = sld [smem:[#allocation105_spill]] }
  0xc5   : > { %s21903_s10 = scalar_select %p15325_p9, 1, 0 }
  0xc6   : > { %s515_s27 = scalar_lea.vmem [#allocation7], %s11596_s16  ;;  %p15335_p4 = pnand %p14494_p7, %p51_p13 }
  0xc7   : > { %s522_s15 = sshll.u32 %s515_s27, 4  ;;  %s15341_s2 = scalar_lea.sflag [#allocation8], %s511_s30  ;;  %s15339_s15 = int_to_ptr.vmem [resolvable:$true] %s522_s15 }
  0xc8   : > { %p14869_p8 = pneg %p15335_p4 }
  0xca   : > { %s15333_s5 = scalar_lea.hbm %s21904_s0, %s12261_s22  ;;  %s14872_s13 = scalar_lea.hbm %s21904_s0, 8192 }
  0xcb   : > { %s14867_s17 = scalar_lea.hbm %s15333_s5, 4096  ;;  %p14873_p11 = scmp.lt.u32.totalorder %s15333_s5, %s21904_s0 }
  0xcc   : > { %p14868_p10 = scmp.ne.s32.totalorder %s15333_s5, %s14867_s17  ;;  %p14874_p12 = scmp.lt.u32.totalorder %s14872_s13, %s14867_s17 }
  0xcd   : > { %p14876_p0 = scmp.lt.u32.totalorder %s14867_s17, %s15333_s5 }
  0xce   : > { %p14870_p1 = pnand %p14869_p8, %p14868_p10  ;;  %p14875_p13 = por %p14874_p12, %p14873_p11 }
  0xd0   : > { %p14871_p3 = pneg %p14870_p1  ;;  %p14877_p5 = por %p14876_p0, %p14875_p13 }
  0xd2   : > { %p14878_p7 = pnand %p14877_p5, %p14871_p3 }
  0xd4   : > { %14881 = shalt.err (!%p14878_p7)
}
  0xd5   : > { %s14882_s30 = scalar_lea.vmem %s15339_s15, 4096  ;;  %s14994_s16 = smov [#allocation7]  }
  0xd6   : > { %p14883_p10 = scmp.ne.s32.totalorder %s15339_s15, %s14882_s30  ;;  %s14887_s22 = sshll.u32 %s14994_s16, 4  ;;  %s14888_s22 = int_to_ptr.vmem [resolvable:$false] %s14887_s22 }
  0xd7   : > { %s14889_s9 = scalar_lea.vmem %s14888_s22, 8192  ;;  %p14890_p6 = scmp.lt.s32.totalorder %s15339_s15, %s14888_s22 }
  0xd8   : > { %p14885_p1 = pnand %p14883_p10, %p14869_p8  ;;  %p14891_p11 = scmp.lt.s32.totalorder %s14889_s9, %s14882_s30 }
  0xda   : > { %p14886_p9 = pneg %p14885_p1  ;;  %p14892_p12 = por %p14891_p11, %p14890_p6 }
  0xdc   : > { %p14893_p13 = pnand %p14892_p12, %p14886_p9 }
  0xde   : > { %14896 = shalt.err (!%p14893_p13)
}
  0xdf   : > { %s21906_s17 = smov 8   ;;  %s21907_s13 = smov 128  }
  0xe0   : > { %14482 = dma.hbm_to_vmem [thread:$0]  (!%p15335_p4), %s15333_s5, 4096, %s15339_s15, %s15341_s2, %s21907_s13, %s21907_s13, %s21906_s17  }
  0xe1   : > { %p21908_p8 = scmp.ne.s32.totalorder %s21892_s25, 0 }
  0xe3   : > { %534 = sbr.rel (%p21908_p8) target bundleno = 5313 (0x14c1), region = 80 }
  0xea   : > { %s15375_s27 = sand.u32 1, %s14971_s19  }
  0xeb   : > { %s21740_s30 = sshll.u32 %s15375_s27, 8  ;;  %s537_s16 = scalar_lea.sflag [#allocation8], %s15375_s27 }
  0xec   : > { %s15381_s28 = scalar_lea.vmem [#allocation7], %s21740_s30 }
  0xed   : > { %14942 = dma.done.wait (%p15315_p2), %s537_s16, 4096  }
  0xee   : > { %14944 = vsyncadd (%p15315_p2), %s537_s16, 4294963200  ;;  %p21909_p6 = scmp.eq.s32.totalorder %s15102_s24, 0 }
  0xf0   : > { %14946 = dma.done.wait (%p21909_p6), [#allocation11], 1056   ;;  %p21910_p9 = pmov %p21909_p6 }
  0xf1   : > { %p21911_p4 = pmov %p21909_p6 }
  0xf2   : > { %14948 = vsyncadd (%p21910_p9), [#allocation11], 4294966240 }
  0xf3   : > { %14950 = dma.done.wait (%p21911_p4), [#allocation14], 1056   ;;  %p21912_p3 = pmov %p21911_p4 }
  0xf5   : > { %14952 = vsyncadd (%p21912_p3), [#allocation14], 4294966240  ;;  %p21913_p0 = pmov %p21912_p3 }
  0xf7   : > { %14954 = dma.done.wait (%p21913_p0), [#allocation17], 2176   ;;  %p21914_p5 = pmov %p21913_p0 }
  0xf8   : > { %p21915_p2 = pmov %p21913_p0 }
  0xf9   : > { %14956 = vsyncadd (%p21914_p5), [#allocation17], 4294965120 }
  0xfa   : > { %14958 = dma.done.wait (%p21915_p2), [#allocation20], 32   ;;  %p21916_p7 = pmov %p21913_p0 }
  0xfb   : > { %v14553_v0 = vld [vmem:[#allocation10] sm:$0xff]   ;;  %v14554_v1 = vld [vmem:[#allocation10 + $0x8] sm:$0xff]   ;;  %vm1333_vm0 = vcmask 523264   ;;  %v14555_v2 = vld [vmem:[#allocation10 + $0x10] sm:$0xff]   ;;  %s21917_s3 = sld [smem:[#allocation108_spill]]  ;;  %s21937_s2 = sld [smem:[#allocation107_spill]] }
  0xfc   : > { %14960 = vsyncadd (%p21916_p7), [#allocation20], 4294967264  ;;  %12777 = vmatprep.subr.bf16.mxu0 %v14553_v0  ;;  %v1301_v3 = vld [vmem:[%s15381_s28] sm:$0xff]  ;;  %v1302_v4 = vld [vmem:[%s15381_s28 + $0x8] sm:$0xff]  ;;  %s21976_s16 = sld [smem:[#allocation109_spill]]  ;;  %s22146_s13 = sld [smem:[#allocation110_spill]] }
  0xfd   : > { %12778 = vmatpush3.bf16.msra.mxu0 %v14553_v0  ;;  %v1303_v5 = vld [vmem:[%s15381_s28 + $0x10] sm:$0xff]  ;;  %1334 = vst.msk [vmem:[#allocation2] sm:$0xff] %vm1333_vm0, %v1301_v3  ;;  %1335 = vst.msk [vmem:[#allocation2 + $0x8] sm:$0xff] %vm1333_vm0, %v1302_v4  ;;  %v1304_v6 = vld [vmem:[%s15381_s28 + $0x18] sm:$0xff]  ;;  %s22172_s25 = sld [smem:[#allocation112_spill]]  ;;  %s22173_s5 = sld [smem:[#allocation113_spill]] }
  0xfe   : > { %12779 = vmatprep.subr.bf16.mxu0 %v14554_v1  ;;  %1336 = vst.msk [vmem:[#allocation2 + $0x10] sm:$0xff] %vm1333_vm0, %v1303_v5  ;;  %v1305_v7 = vld [vmem:[%s15381_s28 + $0x20] sm:$0xff]  ;;  %v1306_v8 = vld [vmem:[%s15381_s28 + $0x28] sm:$0xff]  ;;  %v14556_v9 = vld [vmem:[#allocation10 + $0x18] sm:$0xff]   ;;  %s22550_s30 = sshll.u32 %s15375_s27, 8  ;;  %s12262_s0 = sshll.u32 %s15102_s24, 12 }
  0xff   : > { %1337 = vst.msk [vmem:[#allocation2 + $0x18] sm:$0xff] %vm1333_vm0, %v1304_v6  ;;  %1338 = vst.msk [vmem:[#allocation2 + $0x20] sm:$0xff] %vm1333_vm0, %v1305_v7  ;;  %v1307_v10 = vld [vmem:[%s15381_s28 + $0x30] sm:$0xff]  ;;  %v1308_v11 = vld [vmem:[%s15381_s28 + $0x38] sm:$0xff]  ;;  %s21460_s4 = scalar_lea.vmem [#allocation21], %s22550_s30  ;;  %s22551_s22 = sld [smem:[#allocation114_spill]] }
 0x100   : > { %1339 = vst.msk [vmem:[#allocation2 + $0x28] sm:$0xff] %vm1333_vm0, %v1306_v8  ;;  %v1309_v12 = vld [vmem:[%s15381_s28 + $0x40] sm:$0xff]  ;;  %1340 = vst.msk [vmem:[#allocation2 + $0x30] sm:$0xff] %vm1333_vm0, %v1307_v10  ;;  %v1310_v13 = vld [vmem:[%s15381_s28 + $0x48] sm:$0xff]  ;;  %s11446_s1 = sshll.u32 %s21460_s4, 4  ;;  %p22552_p1 = scmp.ne.s32.totalorder %s21902_s23, 0  ;;  %s21555_s1 = int_to_ptr.vmem [resolvable:$true] %s11446_s1 }
 0x101   : > { %12780 = vmatpush3.bf16.msra.mxu0 %v14554_v1  ;;  %1341 = vst.msk [vmem:[#allocation2 + $0x38] sm:$0xff] %vm1333_vm0, %v1308_v11  ;;  %1342 = vst.msk [vmem:[#allocation2 + $0x40] sm:$0xff] %vm1333_vm0, %v1309_v12  ;;  %v1311_v14 = vld [vmem:[%s15381_s28 + $0x50] sm:$0xff]  ;;  %v1312_v15 = vld [vmem:[%s15381_s28 + $0x58] sm:$0xff]  ;;  %s14897_s30 = scalar_lea.vmem %s21555_s1, 4096 }
 0x102   : > { %12781 = vmatprep.subr.bf16.mxu0 %v14555_v2  ;;  %1343 = vst.msk [vmem:[#allocation2 + $0x48] sm:$0xff] %vm1333_vm0, %v1310_v13  ;;  %1344 = vst.msk [vmem:[#allocation2 + $0x50] sm:$0xff] %vm1333_vm0, %v1311_v14  ;;  %v1313_v16 = vld [vmem:[%s15381_s28 + $0x60] sm:$0xff]  ;;  %v1314_v17 = vld [vmem:[%s15381_s28 + $0x68] sm:$0xff]  ;;  %p14898_p10 = scmp.ne.s32.totalorder %s21555_s1, %s14897_s30 }
 0x103   : > { %1345 = vst.msk [vmem:[#allocation2 + $0x58] sm:$0xff] %vm1333_vm0, %v1312_v15  ;;  %v1315_v18 = vld [vmem:[%s15381_s28 + $0x70] sm:$0xff]  ;;  %1346 = vst.msk [vmem:[#allocation2 + $0x60] sm:$0xff] %vm1333_vm0, %v1313_v16  ;;  %v1316_v19 = vld [vmem:[%s15381_s28 + $0x78] sm:$0xff] }
 0x104   : > { %1347 = vst.msk [vmem:[#allocation2 + $0x68] sm:$0xff] %vm1333_vm0, %v1314_v17  ;;  %1348 = vst.msk [vmem:[#allocation2 + $0x70] sm:$0xff] %vm1333_vm0, %v1315_v18  ;;  %v1317_v20 = vld [vmem:[%s15381_s28 + $0x80] sm:$0xff]  ;;  %v1318_v21 = vld [vmem:[%s15381_s28 + $0x88] sm:$0xff]  ;;  %p14899_p11 = pnand %p14898_p10, %p22552_p1 }
 0x105   : > { %1349 = vst.msk [vmem:[#allocation2 + $0x78] sm:$0xff] %vm1333_vm0, %v1316_v19  ;;  %1350 = vst.msk [vmem:[#allocation2 + $0x80] sm:$0xff] %vm1333_vm0, %v1317_v20  ;;  %v1319_v22 = vld [vmem:[%s15381_s28 + $0x90] sm:$0xff]  ;;  %v1320_v23 = vld [vmem:[%s15381_s28 + $0x98] sm:$0xff]  ;;  %12782 = vmatpush3.bf16.msra.mxu0 %v14555_v2  ;;  %v21644_v20 = vmov 0.0   ;;  %s21553_s9 = scalar_lea.hbm %s22551_s22, %s12262_s0  ;;  %s14998_s0 = smov [#allocation21]  }
 0x106   : > { %1351 = vst.msk [vmem:[#allocation2 + $0x88] sm:$0xff] %vm1333_vm0, %v1318_v21  ;;  %v1321_v24 = vld [vmem:[%s15381_s28 + $0xa0] sm:$0xff]  ;;  %1352 = vst.msk [vmem:[#allocation2 + $0x90] sm:$0xff] %vm1333_vm0, %v1319_v22  ;;  %v1322_v25 = vld [vmem:[%s15381_s28 + $0xa8] sm:$0xff]  ;;  %12783 = vmatprep.subr.bf16.mxu0 %v14556_v9  ;;  %v616_v21 = vlaneseq  ;;  %p14900_p12 = pneg %p14899_p11  ;;  %s14901_s15 = sshll.u32 %s14998_s0, 4  ;;  %s14902_s15 = int_to_ptr.vmem [resolvable:$false] %s14901_s15 }
 0x107   : > { %1353 = vst.msk [vmem:[#allocation2 + $0x98] sm:$0xff] %vm1333_vm0, %v1320_v23  ;;  %1354 = vst.msk [vmem:[#allocation2 + $0xa0] sm:$0xff] %vm1333_vm0, %v1321_v24  ;;  %v1323_v26 = vld [vmem:[%s15381_s28 + $0xb0] sm:$0xff]  ;;  %v1324_v27 = vld [vmem:[%s15381_s28 + $0xb8] sm:$0xff]  ;;  %s14903_s24 = scalar_lea.vmem %s14902_s15, 8192  ;;  %p14904_p13 = scmp.lt.s32.totalorder %s21555_s1, %s14902_s15 }
 0x108   : > { %v1374_v28 = vld [vmem:[#allocation2] sm:$0xff]  ;;  %v1375_v29 = vld [vmem:[#allocation2 + $0x8] sm:$0xff]  ;;  %v1376_v30 = vld [vmem:[#allocation2 + $0x10] sm:$0xff]  ;;  %1355 = vst.msk [vmem:[#allocation2 + $0xa8] sm:$0xff] %vm1333_vm0, %v1322_v25  ;;  %v15492_v22 = vshrl.u32 %v616_v21, 7  ;;  %p14905_p8 = scmp.lt.s32.totalorder %s14903_s24, %s14897_s30 }
 0x109   : > { %1356 = vst.msk [vmem:[#allocation2 + $0xb0] sm:$0xff] %vm1333_vm0, %v1323_v26  ;;  %1357 = vst.msk [vmem:[#allocation2 + $0xb8] sm:$0xff] %vm1333_vm0, %v1324_v27  ;;  %v1406_v31 = vpack.c.bf16 %v1375_v29, %v1374_v28  ;;  %v1377_v32 = vld [vmem:[#allocation2 + $0x18] sm:$0xff]  ;;  %v1378_v33 = vld [vmem:[#allocation2 + $0x20] sm:$0xff]  ;;  %12784 = vmatpush3.bf16.msra.mxu0 %v14556_v9 }
 0x10a   : > { %v1379_v34 = vld [vmem:[#allocation2 + $0x28] sm:$0xff]  ;;  %v1407_v35 = vpack.c.bf16 %v1377_v32, %v1376_v30  ;;  %v1380_v37 = vld [vmem:[#allocation2 + $0x30] sm:$0xff]  ;;  %v1381_v38 = vld [vmem:[#allocation2 + $0x38] sm:$0xff]  ;;  %1370 = vst.msk [vmem:[#allocation5] sm:$0xff] %vm1333_vm0, %v21644_v20  ;;  %v618_v23 = vadd.s32 8, %v15492_v22  ;;  %v619_v24 = vadd.s32 16, %v15492_v22  ;;  %p14906_p6 = por %p14905_p8, %p14904_p13 }
 0x10b   : > { %12785 = vmatprep.mubr.msk.bf16.mxu0 %vm1333_vm0, %v1406_v31  ;;  %v1408_v36 = vpack.c.bf16 %v1379_v34, %v1378_v33  ;;  %v1382_v39 = vld [vmem:[#allocation2 + $0x40] sm:$0xff]  ;;  %v1383_v40 = vld [vmem:[#allocation2 + $0x48] sm:$0xff]  ;;  %v1327_v43 = vld [vmem:[%s15381_s28 + $0xd0] sm:$0xff]  ;;  %v1409_v47 = vpack.c.bf16 %v1381_v38, %v1380_v37  ;;  %1371 = vst.msk [vmem:[#allocation5 + $0x8] sm:$0xff] %vm1333_vm0, %v21644_v20  ;;  %v21643_v25 = vsub.s32 1, %v15492_v22  ;;  %v620_v29 = vadd.s32 24, %v15492_v22 }
 0x10c   : > { %12786 = vmatmul.mubr.msk.bf16.vlgmr.msra.gmra.mrb[0].mxu0 %vm1333_vm0, %v1407_v35  ;;  %v1325_v41 = vld [vmem:[%s15381_s28 + $0xc0] sm:$0xff]  ;;  %v1326_v42 = vld [vmem:[%s15381_s28 + $0xc8] sm:$0xff]  ;;  %v1328_v44 = vld [vmem:[%s15381_s28 + $0xd8] sm:$0xff]  ;;  %1360 = vst.msk [vmem:[#allocation2 + $0xd0] sm:$0xff] %vm1333_vm0, %v1327_v43  ;;  %v1410_v50 = vpack.c.bf16 %v1383_v40, %v1382_v39  ;;  %v648_v27 = vand.u32 15, %v618_v23  ;;  %v655_v28 = vand.u32 15, %v619_v24  ;;  %p14907_p9 = pnand %p14906_p6, %p14900_p12 }
 0x10d   : > { %12789 = vmatprep.mubr.msk.bf16.mxu0 %vm1333_vm0, %v1408_v36  ;;  %1358 = vst.msk [vmem:[#allocation2 + $0xc0] sm:$0xff] %vm1333_vm0, %v1325_v41  ;;  %1359 = vst.msk [vmem:[#allocation2 + $0xc8] sm:$0xff] %vm1333_vm0, %v1326_v42  ;;  %v1329_v45 = vld [vmem:[%s15381_s28 + $0xe0] sm:$0xff]  ;;  %v1330_v46 = vld [vmem:[%s15381_s28 + $0xe8] sm:$0xff]  ;;  %v621_v30 = vadd.s32 32, %v15492_v22  ;;  %v21642_v31 = vsub.s32 4, %v15492_v22 }
 0x10e   : > { %1361 = vst.msk [vmem:[#allocation2 + $0xd8] sm:$0xff] %vm1333_vm0, %v1328_v44  ;;  %1362 = vst.msk [vmem:[#allocation2 + $0xe0] sm:$0xff] %vm1333_vm0, %v1329_v45  ;;  %v1331_v48 = vld [vmem:[%s15381_s28 + $0xf0] sm:$0xff]  ;;  %v1332_v49 = vld [vmem:[%s15381_s28 + $0xf8] sm:$0xff]  ;;  %v21641_v32 = vsub.s32 7, %v15492_v22  ;;  %v15509_v34 = vsub.s32 0, %v15492_v22 }
 0x10f   : > { %1363 = vst.msk [vmem:[#allocation2 + $0xe8] sm:$0xff] %vm1333_vm0, %v1330_v46  ;;  %1364 = vst.msk [vmem:[#allocation2 + $0xf0] sm:$0xff] %vm1333_vm0, %v1331_v48  ;;  %v1384_v51 = vld [vmem:[#allocation2 + $0x50] sm:$0xff]  ;;  %v1385_v52 = vld [vmem:[#allocation2 + $0x58] sm:$0xff]  ;;  %v21640_v35 = vsub.s32 3, %v15492_v22  ;;  %vm878_vm1 = vcmp.ne.s32.totalorder %v648_v27, 15 }
 0x110   : > { %1365 = vst.msk [vmem:[#allocation2 + $0xf8] sm:$0xff] %vm1333_vm0, %v1332_v49  ;;  %v1386_v53 = vld [vmem:[#allocation2 + $0x60] sm:$0xff]  ;;  %v1387_v54 = vld [vmem:[#allocation2 + $0x68] sm:$0xff]  ;;  %v1411_v55 = vpack.c.bf16 %v1385_v52, %v1384_v51  ;;  %v1388_v57 = vld [vmem:[#allocation2 + $0x70] sm:$0xff]  ;;  %vm939_vm2 = vcmp.ne.s32.totalorder %v655_v28, 0  ;;  %v21639_v36 = vsub.s32 2, %v15492_v22 }
 0x111   : > { %v1412_v56 = vpack.c.bf16 %v1387_v54, %v1386_v53  ;;  %v1389_v58 = vld [vmem:[#allocation2 + $0x78] sm:$0xff]  ;;  %v1390_v59 = vld [vmem:[#allocation2 + $0x80] sm:$0xff]  ;;  %v1391_v60 = vld [vmem:[#allocation2 + $0x88] sm:$0xff]  ;;  %1372 = vst.msk [vmem:[#allocation5 + $0x110] sm:$0xff] %vm1333_vm0, %v21644_v20  ;;  %v21638_v37 = vsub.s32 5, %v15492_v22  ;;  %v662_v38 = vand.u32 15, %v620_v29 }
 0x112   : > { %v1413_v61 = vpack.c.bf16 %v1389_v58, %v1388_v57  ;;  %v1414_v62 = vpack.c.bf16 %v1391_v60, %v1390_v59  ;;  %v1392_v63 = vld [vmem:[#allocation2 + $0x90] sm:$0xff]  ;;  %v1393_v0 = vld [vmem:[#allocation2 + $0x98] sm:$0xff]  ;;  %v1394_v1 = vld [vmem:[#allocation2 + $0xa0] sm:$0xff]  ;;  %1373 = vst.msk [vmem:[#allocation5 + $0x118] sm:$0xff] %vm1333_vm0, %v21644_v20  ;;  %v669_v39 = vand.u32 15, %v621_v30  ;;  %v622_v40 = vadd.s32 40, %v15492_v22 }
 0x113   : > { %v1395_v2 = vld [vmem:[#allocation2 + $0xa8] sm:$0xff]  ;;  %v1415_v3 = vpack.c.bf16 %v1393_v0, %v1392_v63  ;;  %v1396_v5 = vld [vmem:[#allocation2 + $0xb0] sm:$0xff]  ;;  %v1397_v6 = vld [vmem:[#allocation2 + $0xb8] sm:$0xff]  ;;  %1798 = vst [vmem:[#allocation6] sm:$0x1] %v21644_v20  ;;  %v623_v41 = vadd.s32 48, %v15492_v22 }
 0x114   : > { %12790 = vmatmul.mubr.msk.bf16.gmra.mrb[4].mxu0 %vm1333_vm0, %v1409_v47  ;;  %v1416_v4 = vpack.c.bf16 %v1395_v2, %v1394_v1  ;;  %v1398_v7 = vld [vmem:[#allocation2 + $0xc0] sm:$0xff]  ;;  %v1399_v8 = vld [vmem:[#allocation2 + $0xc8] sm:$0xff]  ;;  %v1417_v9 = vpack.c.bf16 %v1397_v6, %v1396_v5  ;;  %v1400_v11 = vld [vmem:[#allocation2 + $0xd0] sm:$0xff]  ;;  %21918 = vst [vmem:[#allocation28_spill] sm:$0xff] %v15509_v34  ;;  %v15525_v44 = vrot.slane %v21644_v20, 7  ;;  %v624_v45 = vadd.s32 56, %v15492_v22 }
 0x115   : > { %12793 = vmatprep.mubr.msk.bf16.mxu0 %vm1333_vm0, %v1410_v50  ;;  %v1418_v10 = vpack.c.bf16 %v1399_v8, %v1398_v7  ;;  %v1401_v12 = vld [vmem:[#allocation2 + $0xd8] sm:$0xff]  ;;  %v1402_v13 = vld [vmem:[#allocation2 + $0xe0] sm:$0xff]  ;;  %v15529_v46 = vsel %vm878_vm1, 1.0, %v21644_v20  ;;  %v15532_v47 = vsel %vm939_vm2, 1.0, %v21644_v20  ;;  %v15535_v48 = vrot.slane %v21644_v20, 1  ;;  %s22149_s28 = sld [smem:[#allocation111_spill]] }
 0x116   : > { %v1403_v14 = vld [vmem:[#allocation2 + $0xe8] sm:$0xff]  ;;  %v1419_v15 = vpack.c.bf16 %v1401_v12, %v1400_v11  ;;  %v1404_v17 = vld [vmem:[#allocation2 + $0xf0] sm:$0xff]  ;;  %v1799_v26 = vld [vmem:[%s21917_s3] sm:$0xff]  ;;  %21919 = vst [vmem:[#allocation29_spill] sm:$0xff] %v15525_v44  ;;  %v21637_v49 = vsub.s32 6, %v15492_v22  ;;  %vm880_vm3 = vcmp.ne.s32.totalorder %v662_v38, 15 }
 0x117   : > { %v1420_v16 = vpack.c.bf16 %v1403_v14, %v1402_v13  ;;  %v1405_v18 = vld [vmem:[#allocation2 + $0xf8] sm:$0xff]  ;;  %v15506_v33 = vrot.slane %v1799_v26, %v21643_v25  ;;  %v15518_v42 = vrot.slane %v1799_v26, %v21642_v31  ;;  %v15522_v43 = vrot.slane %v1799_v26, %v21641_v32  ;;  %21920 = vst [vmem:[#allocation30_spill] sm:$0xff] %v15529_v46  ;;  %v15611_v30 = vld [vmem:[%s21937_s2] ss:$0 sm:$0xff]  ;;  %v15723_v32 = vld [vmem:[%s21917_s3 + $0x8] ss:$0 sm:$0xff] }
 0x118   : > { %v1421_v19 = vpack.c.bf16 %v1405_v18, %v1404_v17  ;;  %21921 = vst [vmem:[#allocation31_spill] sm:$0xff] %v15532_v47  ;;  %21922 = vst [vmem:[#allocation32_spill] sm:$0xff] %v15535_v48  ;;  %v15539_v50 = vrot.slane %v1799_v26, %v15509_v34  ;;  %v15543_v51 = vrot.slane %v1799_v26, %v21640_v35  ;;  %vm941_vm4 = vcmp.ne.s32.totalorder %v669_v39, 0 }
 0x119   : > { %v15547_v52 = vrot.slane %v1799_v26, %v21639_v36  ;;  %v15551_v53 = vrot.slane %v1799_v26, %v21638_v37  ;;  %v676_v54 = vand.u32 15, %v622_v40  ;;  %v690_v57 = vand.u32 15, %v624_v45  ;;  %21938 = vst [vmem:[#allocation39_spill] sm:$0xff] %v15611_v30 }
 0x11a   : > { %v626_v58 = vadd.s32 72, %v15492_v22  ;;  %v627_v59 = vadd.s32 80, %v15492_v22  ;;  %v15558_v60 = vrot.slane %v1799_v26, %v21637_v49  ;;  %v636_v63 = vadd.s32 152, %v15492_v22 }
 0x11b   : > { %v15564_v0 = vsel %vm880_vm3, 1.0, %v21644_v20  ;;  %v15567_v1 = vsel %vm941_vm4, 1.0, %v21644_v20  ;;  %v15571_v2 = vmul.f32 %v15539_v50, %v15525_v44  ;;  %vm882_vm5 = vcmp.ne.s32.totalorder %v676_v54, 15 }
 0x11c   : > { %12794 = vmatmul.mubr.msk.bf16.gmra.mrb[8].mxu0 %vm1333_vm0, %v1411_v55  ;;  %v683_v55 = vand.u32 15, %v623_v41  ;;  %21923 = vst [vmem:[#allocation33_spill] sm:$0xff] %v15564_v0  ;;  %21924 = vst [vmem:[#allocation34_spill] sm:$0xff] %v15567_v1  ;;  %v631_v5 = vadd.s32 112, %v15492_v22  ;;  %vm884_vm7 = vcmp.ne.s32.totalorder %v690_v57, 15  ;;  %v704_v7 = vand.u32 15, %v626_v58 }
 0x11d   : > { %12797 = vmatprep.mubr.msk.bf16.mxu0 %vm1333_vm0, %v1412_v56  ;;  %v625_v56 = vadd.s32 64, %v15492_v22  ;;  %v711_v8 = vand.u32 15, %v627_v59  ;;  %v774_v11 = vand.u32 15, %v636_v63  ;;  %v632_v12 = vadd.s32 120, %v15492_v22 }
 0x11e   : > { %vm943_vm6 = vcmp.ne.s32.totalorder %v683_v55, 0  ;;  %v641_v13 = vand.u32 15, %v15492_v22  ;;  %v15583_v17 = vsel %vm882_vm5, 1.0, %v21644_v20  ;;  %v635_v21 = vadd.s32 144, %v15492_v22 }
 0x11f   : > { %v697_v6 = vand.u32 15, %v625_v56  ;;  %21926 = vst [vmem:[#allocation36_spill] sm:$0xff] %v15583_v17  ;;  %v15586_v18 = vsel %vm943_vm6, 1.0, %v21644_v20  ;;  %v15590_v23 = vsel %vm884_vm7, 1.0, %v21644_v20  ;;  %vm886_vm9 = vcmp.ne.s32.totalorder %v704_v7, 15 }
 0x120   : > { %21927 = vst [vmem:[#allocation37_spill] sm:$0xff] %v15586_v18  ;;  %21928 = vst [vmem:[#allocation38_spill] sm:$0xff] %v15590_v23  ;;  %vm15592_vm10 = vcmp.ne.s32.totalorder %v711_v8, 0  ;;  %vm15604_vm13 = vcmp.ne.s32.totalorder %v774_v11, 15  ;;  %v746_v29 = vand.u32 15, %v632_v12  ;;  %vm15613_vm14 = vcmp.ne.s32.totalorder %v641_v13, 0 }
 0x121   : > { %vm945_vm8 = vcmp.ne.s32.totalorder %v697_v6, 0  ;;  %vm1842_vm1 = vcmp.lt.s32.totalorder %v15492_v22, 1  ;;  %vm2119_vm2 = vcmp.lt.s32.totalorder %v15492_v22, 7  ;;  %v15627_v54 = vsel %vm886_vm9, 1.0, %v21644_v20 }
 0x122   : > { %v15624_v45 = vsel %vm945_vm8, 1.0, %v21644_v20  ;;  %21944 = vst [vmem:[#allocation41_spill] sm:$0xff] %v15627_v54  ;;  %v767_v55 = vand.u32 15, %v635_v21  ;;  %v15632_v57 = vsel %vm15592_vm10, 1.0, %v21644_v20  ;;  %vm892_vm4 = vcmp.ne.s32.totalorder %v746_v29, 15 }
 0x123   : > { %21943 = vst [vmem:[#allocation40_spill] sm:$0xff] %v15624_v45  ;;  %21945 = vst [vmem:[#allocation42_spill] sm:$0xff] %v15632_v57 }
 0x124   : > { %12798 = vmatmul.mubr.msk.bf16.gmra.mrb[12].mxu0 %vm1333_vm0, %v1413_v61  ;;  %v628_v61 = vadd.s32 88, %v15492_v22  ;;  %vm955_vm8 = vcmp.ne.s32.totalorder %v767_v55, 0 }
 0x125   : > { %12801 = vmatprep.mubr.msk.bf16.mxu0 %vm1333_vm0, %v1414_v62  ;;  %v629_v62 = vadd.s32 96, %v15492_v22  ;;  %v15685_v28 = vsel %vm955_vm8, 1.0, %v21644_v20 }
 0x126   : > { %21957 = vst [vmem:[#allocation52_spill] sm:$0xff] %v15685_v28 }
 0x12c   : > { %12802 = vmatmul.mubr.msk.bf16.gmra.mrb[16].mxu0 %vm1333_vm0, %v1415_v3  ;;  %v630_v3 = vadd.s32 104, %v15492_v22 }
 0x12d   : > { %12805 = vmatprep.mubr.msk.bf16.mxu0 %vm1333_vm0, %v1416_v4  ;;  %v15575_v4 = vmul.f32 0.0, %v15506_v33 }
 0x12e   : > { %v732_v14 = vand.u32 15, %v630_v3  ;;  %v15653_v3 = vsel %vm15613_vm14, 1.0, %v21644_v20 }
 0x12f   : > { %21925 = vst [vmem:[#allocation35_spill] sm:$0xff] %v15575_v4  ;;  %21949 = vst [vmem:[#allocation46_spill] sm:$0xff] %v15653_v3 }
 0x130   : > { %vm15617_vm15 = vcmp.ne.s32.totalorder %v732_v14, 15 }
 0x134   : > { %12806 = vmatmul.mubr.msk.bf16.gmra.mrb[20].mxu0 %vm1333_vm0, %v1417_v9  ;;  %v718_v9 = vand.u32 15, %v628_v61  ;;  %v15647_v61 = vsel %vm15604_vm13, 1.0, %v21644_v20 }
 0x135   : > { %12809 = vmatprep.mubr.msk.bf16.mxu0 %vm1333_vm0, %v1418_v10  ;;  %v725_v10 = vand.u32 15, %v629_v62  ;;  %21948 = vst [vmem:[#allocation45_spill] sm:$0xff] %v15647_v61 }
 0x136   : > { %vm15596_vm11 = vcmp.ne.s32.totalorder %v718_v9, 15 }
 0x137   : > { %vm15600_vm12 = vcmp.ne.s32.totalorder %v725_v10, 0  ;;  %v15637_v58 = vsel %vm15596_vm11, 1.0, %v21644_v20 }
 0x138   : > { %21946 = vst [vmem:[#allocation43_spill] sm:$0xff] %v15637_v58  ;;  %v15642_v59 = vsel %vm15600_vm12, 1.0, %v21644_v20 }
 0x139   : > { %21947 = vst [vmem:[#allocation44_spill] sm:$0xff] %v15642_v59 }
 0x13c   : > { %12810 = vmatmul.mubr.msk.bf16.gmra.mrb[24].mxu0 %vm1333_vm0, %v1419_v15  ;;  %v633_v15 = vadd.s32 128, %v15492_v22 }
 0x13d   : > { %12813 = vmatprep.mubr.msk.bf16.mxu0 %vm1333_vm0, %v1420_v16  ;;  %v634_v16 = vadd.s32 136, %v15492_v22 }
 0x13e   : > { %v753_v40 = vand.u32 15, %v633_v15  ;;  %v15671_v15 = vsel %vm892_vm4, 1.0, %v21644_v20 }
 0x13f   : > { %v760_v41 = vand.u32 15, %v634_v16  ;;  %21954 = vst [vmem:[#allocation49_spill] sm:$0xff] %v15671_v15 }
 0x140   : > { %vm953_vm5 = vcmp.ne.s32.totalorder %v753_v40, 0 }
 0x141   : > { %vm15664_vm6 = vcmp.ne.s32.totalorder %v760_v41, 15  ;;  %v15674_v21 = vsel %vm953_vm5, 1.0, %v21644_v20 }
 0x142   : > { %21955 = vst [vmem:[#allocation50_spill] sm:$0xff] %v15674_v21  ;;  %v15682_v27 = vsel %vm15664_vm6, 1.0, %v21644_v20 }
 0x143   : > { %21956 = vst [vmem:[#allocation51_spill] sm:$0xff] %v15682_v27 }
 0x144   : > { %12814 = vmatmul.mubr.msk.bf16.gmra.mrb[28].mxu0 %vm1333_vm0, %v1421_v19  ;;  %v739_v19 = vand.u32 15, %v631_v5  ;;  %v15658_v5 = vsel %vm15617_vm15, 1.0, %v21644_v20 }
 0x145   : > { %21950 = vst [vmem:[#allocation47_spill] sm:$0xff] %v15658_v5 }
 0x146   : > { %vm951_vm3 = vcmp.ne.s32.totalorder %v739_v19, 0 }
 0x147   : > { %v15662_v8 = vsel %vm951_vm3, 1.0, %v21644_v20 }
 0x148   : > { %21951 = vst [vmem:[#allocation48_spill] sm:$0xff] %v15662_v8 }
 0x1df   : > { %v12787_v56 = vpop.f32.mrb[0].mxu0 }
 0x1e0   : > { %v1552_v62 = vadd.f32 %v12787_v56, %v15611_v30  ;;  %v1543_v63 = vpop.f32.mrb[1].mxu0 }
 0x1e1   : > { %v1544_v6 = vadd.f32 %v15611_v30, %v1543_v63  ;;  %v12788_v7 = vpop.f32.mrb[2].mxu0 }
 0x1e2   : > { %vm1672_vm7 = vcmp.gt.f32.partialorder %v1552_v62, 0.0  ;;  %v1704_v10 = vmul.f32 0.2, %v1552_v62  ;;  %v1555_v11 = vadd.f32 %v12788_v7, %v15611_v30  ;;  %v1546_v12 = vpop.f32.mrb[3].mxu0 }
 0x1e3   : > { %vm1670_vm9 = vcmp.gt.f32.partialorder %v1544_v6, 0.0  ;;  %v1702_v13 = vmul.f32 0.2, %v1544_v6  ;;  %v1547_v14 = vadd.f32 %v15611_v30, %v1546_v12 }
 0x1e4   : > { %v1736_v16 = vsel %vm1672_vm7, %v1552_v62, %v1704_v10  ;;  %vm1673_vm10 = vcmp.gt.f32.partialorder %v1555_v11, 0.0  ;;  %v1705_v19 = vmul.f32 0.2, %v1555_v11 }
 0x1e5   : > { %v1826_v24 = vrot.slane %v1736_v16, 7  ;;  %v15677_v26 = vmul.f32 %v15506_v33, %v1736_v16  ;;  %v15688_v29 = vmul.f32 %v15518_v42, %v1736_v16  ;;  %v15691_v38 = vmul.f32 %v15522_v43, %v1736_v16 }
 0x1e6   : > { %v1734_v39 = vsel %vm1670_vm9, %v1544_v6, %v1702_v13  ;;  %v15693_v40 = vsel %vm1673_vm10, %v1555_v11, %v1705_v19  ;;  %v2103_v41 = vrot.slane %v1736_v16, 1  ;;  %vm1671_vm11 = vcmp.gt.f32.partialorder %v1547_v14, 0.0 }
 0x1e7   : > { %21958 = vst [vmem:[#allocation53_spill] sm:$0xff] %v15691_v38  ;;  %v1824_v55 = vrot.slane %v1734_v39, 7  ;;  %v2101_v56 = vrot.slane %v1734_v39, 1  ;;  %v12791_v62 = vpop.f32.mrb[4].mxu0  ;;  %v15696_v63 = vmul.f32 %v15506_v33, %v1734_v39  ;;  %v15699_v7 = vmul.f32 %v15518_v42, %v1734_v39 }
 0x1e8   : > { %v21646_v9 = vrot.slane %v15693_v40, 7  ;;  %v15704_v10 = vmul.f32 %v15506_v33, %v15693_v40  ;;  %v1559_v6 = vpop.f32.mrb[5].mxu0  ;;  %v21649_v13 = vrot.slane %v15693_v40, 1  ;;  %v1703_v16 = vmul.f32 0.2, %v1547_v14 }
 0x1e9   : > { %21959 = vst [vmem:[#allocation54_spill] sm:$0xff] %v15699_v7  ;;  %v1860_v11 = vsel %vm1842_vm1, %v15525_v44, %v1824_v55  ;;  %v2137_v12 = vsel %vm2119_vm2, %v15535_v48, %v2101_v56  ;;  %v12792_v19 = vpop.f32.mrb[6].mxu0  ;;  %v1568_v36 = vadd.f32 %v12791_v62, %v15611_v30  ;;  %v15727_v31 = vmul.f32 %v15518_v42, %v15693_v40 }
 0x1ea   : > { %v1865_v39 = vmul.f32 %v15532_v47, %v1860_v11  ;;  %v2141_v49 = vmul.f32 %v15529_v46, %v2137_v12  ;;  %v1857_v37 = vsel %vm1842_vm1, %v1826_v24, %v21646_v9  ;;  %v1562_v35 = vpop.f32.mrb[7].mxu0  ;;  %v15731_v11 = vmul.f32 %v15522_v43, %v15693_v40 }
 0x1eb   : > { %v2134_v12 = vsel %vm2119_vm2, %v2103_v41, %v21649_v13  ;;  %v1735_v62 = vsel %vm1671_vm11, %v1547_v14, %v1703_v16  ;;  %v15743_v9 = vmul.f32 %v15539_v50, %v1857_v37  ;;  %v1926_v34 = vmul.f32 %v15543_v51, %v1857_v37 }
 0x1ec   : > { %v1889_v25 = vmul.f32 %v15539_v50, %v1865_v39  ;;  %v15740_v20 = vmul.f32 %v15543_v51, %v1865_v39  ;;  %v15747_v38 = vmul.f32 %v15547_v52, %v2141_v49  ;;  %v15750_v7 = vmul.f32 %v15547_v52, %v2134_v12 }
 0x1ed   : > { %v15753_v13 = vmul.f32 %v15551_v53, %v2134_v12  ;;  %v1825_v14 = vrot.slane %v1735_v62, 7  ;;  %v15756_v16 = vmul.f32 %v15723_v32, %v2134_v12  ;;  %v1960_v39 = vmul.f32 %v15558_v60, %v1857_v37 }
 0x1ee   : > { %21960 = vst [vmem:[#allocation55_spill] sm:$0xff] %v15740_v20  ;;  %v2102_v20 = vrot.slane %v1735_v62, 1  ;;  %vm1676_vm12 = vcmp.gt.f32.partialorder %v1568_v36, 0.0  ;;  %v1708_v47 = vmul.f32 0.2, %v1568_v36  ;;  %v1560_v27 = vadd.f32 %v15611_v30, %v1559_v6 }
 0x1ef   : > { %21961 = vst [vmem:[#allocation56_spill] sm:$0xff] %v15756_v16  ;;  %v1858_v46 = vsel %vm1842_vm1, %v1825_v14, %v1826_v24  ;;  %v1859_v49 = vsel %vm1842_vm1, %v1824_v55, %v1825_v14  ;;  %v12795_v28 = vpop.f32.mrb[8].mxu0  ;;  %v15770_v5 = vmul.f32 %v15506_v33, %v1735_v62  ;;  %v2032_v24 = vmul.f32 %v15518_v42, %v1735_v62 }
 0x1f0   : > { %v1867_v15 = vmul.f32 %v15567_v1, %v1858_v46  ;;  %v1890_v21 = vmul.f32 %v15539_v50, %v1859_v49  ;;  %v1924_v12 = vmul.f32 %v15543_v51, %v1859_v49  ;;  %v2135_v37 = vsel %vm2119_vm2, %v2102_v20, %v2103_v41  ;;  %v1575_v16 = vpop.f32.mrb[9].mxu0 }
 0x1f1   : > { %v2136_v55 = vsel %vm2119_vm2, %v2101_v56, %v2102_v20  ;;  %v2143_v6 = vmul.f32 %v15564_v0, %v2135_v37  ;;  %v12796_v14 = vpop.f32.mrb[10].mxu0  ;;  %v15781_v41 = vsel %vm1676_vm12, %v1568_v36, %v1708_v47  ;;  %vm1674_vm13 = vcmp.gt.f32.partialorder %v1560_v27, 0.0 }
 0x1f2   : > { %v1925_v46 = vmul.f32 %v15543_v51, %v1867_v15  ;;  %v1940_v1 = vadd.f32 %v1924_v12, %v15571_v2  ;;  %v15778_v49 = vadd.f32 %v1926_v34, %v1890_v21  ;;  %v1578_v8 = vpop.f32.mrb[11].mxu0  ;;  %v1891_v61 = vmul.f32 %v15539_v50, %v1867_v15 }
 0x1f3   : > { %v15785_v62 = vmul.f32 %v15558_v60, %v1867_v15  ;;  %v15788_v20 = vmul.f32 %v15547_v52, %v2136_v55  ;;  %v15791_v0 = vmul.f32 %v15547_v52, %v2143_v6  ;;  %v15794_v34 = vmul.f32 %v15551_v53, %v2136_v55 }
 0x1f4   : > { %v1941_v56 = vadd.f32 %v1925_v46, %v1889_v25  ;;  %v1976_v37 = vadd.f32 %v1960_v39, %v1940_v1  ;;  %v2201_v36 = vmul.f32 %v15551_v53, %v2143_v6  ;;  %v15800_v2 = vmul.f32 %v15506_v33, %v15781_v41 }
 0x1f5   : > { %21962 = vst [vmem:[#allocation57_spill] sm:$0xff] %v15785_v62  ;;  %21963 = vst [vmem:[#allocation58_spill] sm:$0xff] %v15794_v34  ;;  %v15804_v15 = vmul.f32 %v15518_v42, %v15781_v41  ;;  %v15809_v1 = vmul.f32 %v15522_v43, %v15781_v41  ;;  %v1706_v21 = vmul.f32 0.2, %v1560_v27  ;;  %v1571_v39 = vadd.f32 %v12792_v19, %v15611_v30 }
 0x1f6   : > { %21964 = vst [vmem:[#allocation59_spill] sm:$0xff] %v15800_v2  ;;  %v2012_v25 = vadd.f32 %v15575_v4, %v1976_v37  ;;  %v1563_v55 = vadd.f32 %v15611_v30, %v1562_v35  ;;  %v15815_v6 = vadd.f32 %v12795_v28, %v15611_v30  ;;  %v15818_v46 = vadd.f32 %v15611_v30, %v1575_v16 }
 0x1f7   : > { %v15820_v47 = vpop.f32.mrb[12].mxu0  ;;  %v15823_v34 = vsel %vm1674_vm13, %v1560_v27, %v1706_v21  ;;  %vm1677_vm14 = vcmp.gt.f32.partialorder %v1571_v39, 0.0  ;;  %v1709_v4 = vmul.f32 0.2, %v1571_v39  ;;  %v15833_v28 = vadd.f32 %v12796_v14, %v15611_v30 }
 0x1f8   : > { %21965 = vst [vmem:[#allocation60_spill] sm:$0xff] %v15820_v47  ;;  %v2048_v37 = vadd.f32 %v2032_v24, %v2012_v25  ;;  %v15825_v62 = vpop.f32.mrb[13].mxu0  ;;  %v1828_v19 = vrot.slane %v15823_v34, 7  ;;  %v15830_v35 = vmul.f32 %v15506_v33, %v15823_v34  ;;  %v15836_v16 = vadd.f32 %v15611_v30, %v1578_v8 }
 0x1f9   : > { %21966 = vst [vmem:[#allocation61_spill] sm:$0xff] %v15825_v62  ;;  %v15838_v24 = vpop.f32.mrb[14].mxu0  ;;  %v15843_v25 = vmul.f32 %v15518_v42, %v15823_v34  ;;  %v21673_v21 = vrot.slane %v15823_v34, 1  ;;  %v15846_v12 = vsel %vm1677_vm14, %v1571_v39, %v1709_v4  ;;  %v21969_v14 = vrot.slane %v15693_v40, 7 }
 0x1fa   : > { %21967 = vst [vmem:[#allocation62_spill] sm:$0xff] %v15838_v24  ;;  %v2084_v27 = vadd.f32 %v15731_v11, %v2048_v37  ;;  %v15848_v48 = vpop.f32.mrb[15].mxu0  ;;  %v2069_v24 = vmul.f32 %v15522_v43, %v15823_v34  ;;  %v21676_v11 = vrot.slane %v15846_v12, 7  ;;  %vm1675_vm15 = vcmp.gt.f32.partialorder %v1563_v55, 0.0 }
 0x1fb   : > { %21968 = vst [vmem:[#allocation63_spill] sm:$0xff] %v15848_v48  ;;  %v1856_v8 = vsel %vm1842_vm1, %v21969_v14, %v1828_v19  ;;  %v21970_v4 = vrot.slane %v15693_v40, 1  ;;  %v15867_v14 = vmul.f32 %v15506_v33, %v15846_v12  ;;  %v21972_v44 = vrot.slane %v15781_v41, 7 }
 0x1fc   : > { %v2181_v37 = vadd.f32 %v15747_v38, %v2084_v27  ;;  %v1869_v3 = vmul.f32 %v15586_v18, %v1856_v8  ;;  %v1707_v8 = vmul.f32 0.2, %v1563_v55  ;;  %v21978_v58 = vrot.slane %v15781_v41, 1 }
 0x1fd   : > { %v2133_v39 = vsel %vm2119_vm2, %v21970_v4, %v21673_v21  ;;  %21971 = vst [vmem:[#allocation64_spill] sm:$0xff] %v15867_v14  ;;  %v1853_v38 = vsel %vm1842_vm1, %v21972_v44, %v21676_v11  ;;  %v15881_v21 = vmul.f32 %v15518_v42, %v15846_v12  ;;  %v15892_v44 = vmul.f32 %v15522_v43, %v15846_v12 }
 0x1fe   : > { %v2145_v48 = vmul.f32 %v15583_v17, %v2133_v39  ;;  %v2217_v40 = vadd.f32 %v2201_v36, %v2181_v37  ;;  %v1927_v18 = vmul.f32 %v15543_v51, %v1869_v3  ;;  %v1961_v4 = vmul.f32 %v15558_v60, %v1869_v3  ;;  %v15899_v37 = vld [vmem:[%s21976_s16] ss:$0 sm:$0xff] }
 0x1ff   : > { %21973 = vst [vmem:[#allocation65_spill] sm:$0xff] %v15881_v21  ;;  %v15884_v39 = vmul.f32 %v15539_v50, %v1869_v3  ;;  %v15888_v62 = vmul.f32 %v15539_v50, %v1853_v38  ;;  %v15894_v36 = vpop.f32.mrb[16].mxu0  ;;  %v21977_v3 = vrot.slane %v15846_v12, 1  ;;  %v1739_v14 = vsel %vm1675_vm15, %v1563_v55, %v1707_v8 }
 0x200   : > { %v2237_v17 = vmul.f32 %v15723_v32, %v2145_v48  ;;  %21975 = vst [vmem:[#allocation67_spill] sm:$0xff] %v15894_v36  ;;  %v1943_v11 = vadd.f32 %v1927_v18, %v1891_v61  ;;  %v1977_v27 = vadd.f32 %v1961_v4, %v1941_v56  ;;  %v15908_v2 = vpop.f32.mrb[17].mxu0  ;;  %v1930_v36 = vmul.f32 %v15543_v51, %v1853_v38 }
 0x201   : > { %21974 = vst [vmem:[#allocation66_spill] sm:$0xff] %v15888_v62  ;;  %v2130_v21 = vsel %vm2119_vm2, %v21978_v58, %v21977_v3  ;;  %21979 = vst [vmem:[#allocation68_spill] sm:$0xff] %v15908_v2  ;;  %v1964_v30 = vmul.f32 %v15558_v60, %v1853_v38  ;;  %v15915_v18 = vpop.f32.mrb[18].mxu0  ;;  %v1829_v55 = vrot.slane %v1739_v14, 7  ;;  %v15928_v38 = vmul.f32 %v15506_v33, %v1739_v14 }
 0x202   : > { %v2253_v47 = vadd.f32 %v2237_v17, %v2217_v40  ;;  %v15913_v62 = vmul.f32 %v15547_v52, %v2130_v21  ;;  %21981 = vst [vmem:[#allocation70_spill] sm:$0xff] %v15915_v18  ;;  %v2013_v61 = vadd.f32 %v15696_v63, %v1977_v27  ;;  %v15919_v56 = vmul.f32 %v15551_v53, %v2130_v21  ;;  %v15924_v8 = vpop.f32.mrb[19].mxu0 }
 0x203   : > { %v15922_v58 = vmul.f32 %v15723_v32, %v2130_v21  ;;  %21983 = vst [vmem:[#allocation72_spill] sm:$0xff] %v15924_v8  ;;  %21984 = vst [vmem:[#allocation73_spill] sm:$0xff] %v15928_v38  ;;  %v2036_v40 = vmul.f32 %v15518_v42, %v1739_v14  ;;  %v2106_v4 = vrot.slane %v1739_v14, 1  ;;  %v21985_v63 = vrot.slane %v15781_v41, 7 }
 0x204   : > { %21980 = vst [vmem:[#allocation69_spill] sm:$0xff] %v15913_v62  ;;  %21982 = vst [vmem:[#allocation71_spill] sm:$0xff] %v15919_v56  ;;  %v2275_v17 = vadd.f32 %v15899_v37, %v2253_v47  ;;  %v2049_v3 = vadd.f32 %v15688_v29, %v2013_v61  ;;  %v1855_v21 = vsel %vm1842_vm1, %v1828_v19, %v1829_v55  ;;  %v21986_v61 = vrot.slane %v15781_v41, 1 }
 0x205   : > { %v1854_v27 = vsel %vm1842_vm1, %v1829_v55, %v21985_v63  ;;  %v2070_v8 = vmul.f32 %v15522_v43, %v1739_v14  ;;  %v1894_v2 = vmul.f32 %v15539_v50, %v1855_v21  ;;  %v1928_v38 = vmul.f32 %v15543_v51, %v1855_v21 }
 0x206   : > { %vm2291_vm3 = vcmp.gt.f32.partialorder %v2275_v17, 0.0  ;;  %v2307_v47 = vmul.f32 0.2, %v2275_v17  ;;  %v1871_v18 = vmul.f32 %v15624_v45, %v1854_v27  ;;  %v2085_v62 = vadd.f32 %v2069_v24, %v2049_v3 }
 0x207   : > { %v1962_v29 = vmul.f32 %v15558_v60, %v1855_v21  ;;  %v2131_v63 = vsel %vm2119_vm2, %v2106_v4, %v21986_v61  ;;  %v15949_v19 = vadd.f32 %v1930_v36, %v1894_v2  ;;  %v2169_v14 = vmul.f32 %v15547_v52, %v2145_v48  ;;  %v15953_v27 = vpop.f32.mrb[20].mxu0 }
 0x208   : > { %v15947_v56 = vsel %vm2291_vm3, %v2275_v17, %v2307_v47  ;;  %v2203_v55 = vmul.f32 %v15551_v53, %v2145_v48  ;;  %v2182_v24 = vadd.f32 %v15788_v20, %v2085_v62  ;;  %v1944_v3 = vadd.f32 %v1928_v38, %v15743_v9  ;;  %v15959_v45 = vpop.f32.mrb[21].mxu0 }
 0x209   : > { %21987 = vst [vmem:[#allocation74_spill] sm:$0xff] %v15947_v56  ;;  %v1963_v21 = vmul.f32 %v15558_v60, %v1871_v18  ;;  %v1978_v41 = vadd.f32 %v1962_v29, %v15778_v49  ;;  %v21988_v17 = vrot.slane %v15823_v34, 1  ;;  %v15966_v36 = vmul.f32 %v15590_v23, %v2131_v63  ;;  %v15970_v62 = vpop.f32.mrb[22].mxu0 }
 0x20a   : > { %vm1680_vm4 = vcmp.gt.f32.partialorder %v15815_v6, 0.0  ;;  %v1712_v48 = vmul.f32 0.2, %v15815_v6  ;;  %v2218_v9 = vadd.f32 %v15753_v13, %v2182_v24  ;;  %v1980_v49 = vadd.f32 %v1964_v30, %v1944_v3  ;;  %v15974_v47 = vpop.f32.mrb[23].mxu0 }
 0x20b   : > { %v2132_v2 = vsel %vm2119_vm2, %v21988_v17, %v2106_v4  ;;  %v1979_v20 = vadd.f32 %v1963_v21, %v1943_v11  ;;  %v2014_v38 = vadd.f32 %v15770_v5, %v1978_v41  ;;  %21989 = vst [vmem:[#allocation75_spill] sm:$0xff] %v15974_v47  ;;  %v1895_v34 = vmul.f32 %v15539_v50, %v1871_v18 }
 0x20c   : > { %v1929_v4 = vmul.f32 %v15543_v51, %v1871_v18  ;;  %v2204_v29 = vmul.f32 %v15551_v53, %v2132_v2  ;;  %v2238_v61 = vmul.f32 %v15723_v32, %v2132_v2  ;;  %v2016_v17 = vadd.f32 %v15704_v10, %v1980_v49 }
 0x20d   : > { %v2015_v63 = vadd.f32 %v15677_v26, %v1979_v20  ;;  %v2050_v13 = vadd.f32 %v15727_v31, %v2014_v38  ;;  %v15984_v30 = vsel %vm1680_vm4, %v15815_v6, %v1712_v48  ;;  %v2205_v5 = vmul.f32 %v15551_v53, %v15966_v36 }
 0x20e   : > { %v2239_v11 = vmul.f32 %v15723_v32, %v15966_v36  ;;  %v2254_v18 = vadd.f32 %v2238_v61, %v2218_v9  ;;  %v1834_v24 = vrot.slane %v15984_v30, 7  ;;  %v2052_v21 = vadd.f32 %v2036_v40, %v2016_v17 }
 0x20f   : > { %v2051_v3 = vadd.f32 %v15843_v25, %v2015_v63  ;;  %v2086_v26 = vadd.f32 %v2070_v8, %v2050_v13  ;;  %v15994_v10 = vmul.f32 %v15506_v33, %v15984_v30  ;;  %v15999_v6 = vmul.f32 %v15518_v42, %v15984_v30  ;;  %v16003_v48 = vpop.f32.mrb[24].mxu0 }
 0x210   : > { %v2276_v31 = vadd.f32 %v15899_v37, %v2254_v18  ;;  %vm1678_vm5 = vcmp.gt.f32.partialorder %v15818_v46, 0.0  ;;  %v1710_v41 = vmul.f32 0.2, %v15818_v46  ;;  %21990 = vst [vmem:[#allocation76_spill] sm:$0xff] %v16003_v48  ;;  %v2088_v8 = vadd.f32 %v15892_v44, %v2052_v21  ;;  %v16009_v20 = vpop.f32.mrb[25].mxu0  ;;  %v22005_v48 = vld [vmem:[#allocation60_spill] sm:$0xff] }
 0x211   : > { %v2087_v25 = vadd.f32 %v15809_v1, %v2051_v3  ;;  %v2183_v40 = vadd.f32 %v15791_v0, %v2086_v26  ;;  %v1945_v9 = vadd.f32 %v1929_v4, %v15884_v39  ;;  %21991 = vst [vmem:[#allocation77_spill] sm:$0xff] %v16009_v20  ;;  %v16013_v38 = vmul.f32 %v15522_v43, %v15984_v30 }
 0x212   : > { %vm2292_vm6 = vcmp.gt.f32.partialorder %v2276_v31, 0.0  ;;  %v2308_v49 = vmul.f32 0.2, %v2276_v31  ;;  %v16016_v61 = vsel %vm1678_vm5, %v15818_v46, %v1710_v41  ;;  %v2185_v1 = vadd.f32 %v2169_v14, %v2088_v8  ;;  %v16032_v14 = vpop.f32.mrb[26].mxu0 }
 0x213   : > { %v2184_v63 = vadd.f32 %v15750_v7, %v2087_v25  ;;  %v2219_v17 = vadd.f32 %v2203_v55, %v2183_v40  ;;  %v1832_v44 = vrot.slane %v16016_v61, 7  ;;  %v21685_v39 = vrot.slane %v15984_v30, 1  ;;  %21994 = vst [vmem:[#allocation79_spill] sm:$0xff] %v16032_v14 }
 0x214   : > { %v16020_v0 = vsel %vm2292_vm6, %v2276_v31, %v2308_v49  ;;  %v16025_v4 = vmul.f32 %v15506_v33, %v16016_v61  ;;  %v2170_v13 = vmul.f32 %v15547_v52, %v2132_v2  ;;  %v2221_v3 = vadd.f32 %v2205_v5, %v2185_v1 }
 0x215   : > { %21992 = vst [vmem:[#allocation78_spill] sm:$0xff] %v16020_v0  ;;  %v2220_v18 = vadd.f32 %v2204_v29, %v2184_v63  ;;  %v2255_v46 = vadd.f32 %v2239_v11, %v2219_v17  ;;  %v21993_v21 = vrot.slane %v15846_v12, 7  ;;  %v16037_v26 = vmul.f32 %v15518_v42, %v16016_v61 }
 0x216   : > { %v21684_v31 = vrot.slane %v16016_v61, 1  ;;  %v1713_v2 = vmul.f32 0.2, %v15833_v28  ;;  %vm1681_vm7 = vcmp.gt.f32.partialorder %v15833_v28, 0.0  ;;  %v1711_v11 = vmul.f32 0.2, %v15836_v16 }
 0x217   : > { %v1852_v7 = vsel %vm1842_vm1, %v21993_v21, %v1832_v44  ;;  %v2256_v29 = vadd.f32 %v15922_v58, %v2220_v18  ;;  %v2277_v5 = vadd.f32 %v15899_v37, %v2255_v46  ;;  %v21995_v8 = vrot.slane %v15846_v12, 1  ;;  %v16063_v12 = vpop.f32.mrb[27].mxu0 }
 0x218   : > { %v1873_v55 = vmul.f32 %v15632_v57, %v1852_v7  ;;  %vm1679_vm8 = vcmp.gt.f32.partialorder %v15836_v16, 0.0  ;;  %v2073_v18 = vmul.f32 %v15522_v43, %v16016_v61  ;;  %v16061_v46 = vsel %vm1681_vm7, %v15833_v28, %v1713_v2  ;;  %21996 = vst [vmem:[#allocation80_spill] sm:$0xff] %v16063_v12 }
 0x219   : > { %v2129_v40 = vsel %vm2119_vm2, %v21995_v8, %v21684_v31  ;;  %v2278_v58 = vadd.f32 %v15899_v37, %v2256_v29  ;;  %vm2293_vm9 = vcmp.gt.f32.partialorder %v2277_v5, 0.0  ;;  %v2309_v49 = vmul.f32 0.2, %v2277_v5 }
 0x21a   : > { %v1931_v41 = vmul.f32 %v15543_v51, %v1873_v55  ;;  %v1965_v25 = vmul.f32 %v15558_v60, %v1873_v55  ;;  %v16056_v63 = vmul.f32 %v15627_v54, %v2129_v40  ;;  %v1743_v29 = vsel %vm1679_vm8, %v15836_v16, %v1711_v11  ;;  %v21999_v54 = vld [vmem:[#allocation71_spill] sm:$0xff] }
 0x21b   : > { %vm2294_vm10 = vcmp.gt.f32.partialorder %v2278_v58, 0.0  ;;  %v2310_v21 = vmul.f32 0.2, %v2278_v58  ;;  %v16068_v8 = vsel %vm2293_vm9, %v2277_v5, %v2309_v49  ;;  %v16075_v28 = vmul.f32 %v15506_v33, %v16061_v46 }
 0x21c   : > { %v1947_v1 = vadd.f32 %v1931_v41, %v1895_v34  ;;  %v1981_v17 = vadd.f32 %v1965_v25, %v1945_v9  ;;  %v2241_v7 = vmul.f32 %v15723_v32, %v16056_v63  ;;  %21997 = vst [vmem:[#allocation81_spill] sm:$0xff] %v16068_v8  ;;  %v1897_v34 = vmul.f32 %v15539_v50, %v1873_v55  ;;  %v22028_v8 = vld [vmem:[#allocation47_spill] sm:$0xff] }
 0x21d   : > { %v21682_v41 = vrot.slane %v16061_v46, 7  ;;  %v16079_v2 = vmul.f32 %v15518_v42, %v16061_v46  ;;  %v21683_v40 = vrot.slane %v16061_v46, 1  ;;  %v16082_v16 = vsel %vm2294_vm10, %v2278_v58, %v2310_v21 }
 0x21e   : > { %v2017_v9 = vadd.f32 %v15830_v35, %v1981_v17  ;;  %v2257_v25 = vadd.f32 %v2241_v7, %v2221_v3  ;;  %21998 = vst [vmem:[#allocation82_spill] sm:$0xff] %v16082_v16  ;;  %v1833_v3 = vrot.slane %v1743_v29, 7  ;;  %v2076_v49 = vmul.f32 %v15522_v43, %v16061_v46 }
 0x21f   : > { %v1849_v35 = vsel %vm1842_vm1, %v1834_v24, %v21682_v41  ;;  %v16096_v58 = vmul.f32 %v15506_v33, %v1743_v29  ;;  %v22007_v23 = vrot.slane %v16016_v61, 1 }
 0x220   : > { %v2053_v5 = vadd.f32 %v15804_v15, %v2017_v9  ;;  %v2279_v55 = vadd.f32 %v15899_v37, %v2257_v25  ;;  %v1934_v11 = vmul.f32 %v15543_v51, %v1849_v35  ;;  %v2126_v15 = vsel %vm2119_vm2, %v21685_v39, %v21683_v40 }
 0x221   : > { %v1850_v21 = vsel %vm1842_vm1, %v1833_v3, %v1834_v24  ;;  %v1851_v7 = vsel %vm1842_vm1, %v1832_v44, %v1833_v3  ;;  %v16111_v25 = vmul.f32 %v15539_v50, %v1849_v35  ;;  %v16115_v41 = vmul.f32 %v15547_v52, %v2126_v15 }
 0x222   : > { %v2089_v17 = vadd.f32 %v2073_v18, %v2053_v5  ;;  %vm2295_vm11 = vcmp.gt.f32.partialorder %v2279_v55, 0.0  ;;  %v2311_v9 = vmul.f32 0.2, %v2279_v55  ;;  %v1968_v18 = vmul.f32 %v15558_v60, %v1849_v35 }
 0x223   : > { %v1875_v40 = vmul.f32 %v15642_v59, %v1850_v21  ;;  %v1898_v31 = vmul.f32 %v15539_v50, %v1851_v7  ;;  %v16120_v24 = vmul.f32 %v15551_v53, %v2126_v15  ;;  %v16123_v44 = vmul.f32 %v15723_v32, %v2126_v15  ;;  %v22001_v21 = vld [vmem:[#allocation66_spill] sm:$0xff] }
 0x224   : > { %v2186_v5 = vadd.f32 %v2170_v13, %v2089_v17  ;;  %v1932_v3 = vmul.f32 %v15543_v51, %v1851_v7  ;;  %v1966_v39 = vmul.f32 %v15558_v60, %v1851_v7  ;;  %v16128_v13 = vsel %vm2295_vm11, %v2279_v55, %v2311_v9  ;;  %v16143_v9 = vpop.f32.mrb[28].mxu0 }
 0x225   : > { %22000 = vst [vmem:[#allocation71_spill] sm:$0xff] %v16128_v13  ;;  %v1933_v17 = vmul.f32 %v15543_v51, %v1875_v40  ;;  %v16131_v57 = vadd.f32 %v1934_v11, %v1898_v31  ;;  %v1967_v12 = vmul.f32 %v15558_v60, %v1875_v40  ;;  %v2040_v15 = vmul.f32 %v15518_v42, %v1743_v29 }
 0x226   : > { %v2222_v35 = vadd.f32 %v21999_v54, %v2186_v5  ;;  %v1948_v59 = vadd.f32 %v1932_v3, %v22001_v21  ;;  %v1982_v14 = vadd.f32 %v1966_v39, %v15949_v19  ;;  %v16138_v20 = vmul.f32 %v15539_v50, %v1875_v40  ;;  %22002 = vst [vmem:[#allocation66_spill] sm:$0xff] %v16143_v9  ;;  %v22003_v5 = vld [vmem:[#allocation73_spill] sm:$0xff]  ;;  %v22004_v21 = vld [vmem:[#allocation39_spill] sm:$0xff] }
 0x227   : > { %v2074_v7 = vmul.f32 %v15522_v43, %v1743_v29  ;;  %v2110_v54 = vrot.slane %v1743_v29, 1  ;;  %v2171_v55 = vmul.f32 %v15547_v52, %v15966_v36  ;;  %v1983_v31 = vadd.f32 %v1967_v12, %v1947_v1  ;;  %v22012_v9 = vld [vmem:[#allocation43_spill] sm:$0xff] }
 0x228   : > { %v1984_v11 = vadd.f32 %v1968_v18, %v1948_v59  ;;  %v2018_v3 = vadd.f32 %v22003_v5, %v1982_v14  ;;  %v1600_v19 = vadd.f32 %v22005_v48, %v22004_v21  ;;  %v22006_v39 = vrot.slane %v15984_v30, 1  ;;  %v16160_v59 = vpop.f32.mrb[29].mxu0  ;;  %v22009_v14 = vld [vmem:[#allocation59_spill] sm:$0xff]  ;;  %v22010_v48 = vld [vmem:[#allocation64_spill] sm:$0xff]  ;;  %v22011_v30 = vld [vmem:[#allocation65_spill] sm:$0xff] }
 0x229   : > { %v2128_v29 = vsel %vm2119_vm2, %v22007_v23, %v2110_v54  ;;  %v2173_v36 = vmul.f32 %v15547_v52, %v16056_v63  ;;  %v16158_v1 = vadd.f32 %v1933_v17, %v1897_v34  ;;  %22008 = vst [vmem:[#allocation73_spill] sm:$0xff] %v16160_v59  ;;  %v2019_v12 = vadd.f32 %v22009_v14, %v1983_v31  ;;  %v22013_v23 = vld [vmem:[#allocation61_spill] sm:$0xff] }
 0x22a   : > { %v2127_v40 = vsel %vm2119_vm2, %v2110_v54, %v22006_v39  ;;  %v2020_v18 = vadd.f32 %v22010_v48, %v1984_v11  ;;  %v2054_v5 = vadd.f32 %v22011_v30, %v2018_v3  ;;  %v2242_v61 = vmul.f32 %v15723_v32, %v2128_v29 }
 0x22b   : > { %v2151_v39 = vmul.f32 %v22012_v9, %v2127_v40  ;;  %vm1684_vm12 = vcmp.gt.f32.partialorder %v1600_v19, 0.0  ;;  %v1716_v13 = vmul.f32 0.2, %v1600_v19  ;;  %v1592_v54 = vadd.f32 %v22004_v21, %v22013_v23 }
 0x22c   : > { %v2055_v34 = vadd.f32 %v16037_v26, %v2019_v12  ;;  %v2056_v17 = vadd.f32 %v2040_v15, %v2020_v18  ;;  %v2090_v16 = vadd.f32 %v2074_v7, %v2054_v5  ;;  %v2207_v31 = vmul.f32 %v15551_v53, %v16056_v63  ;;  %v22014_v63 = vld [vmem:[#allocation69_spill] sm:$0xff] }
 0x22d   : > { %v2208_v11 = vmul.f32 %v15551_v53, %v2128_v29  ;;  %v2209_v3 = vmul.f32 %v15551_v53, %v2151_v39  ;;  %v2258_v14 = vadd.f32 %v2242_v61, %v2222_v35  ;;  %v1748_v40 = vsel %vm1684_vm12, %v1600_v19, %v1716_v13  ;;  %v22015_v35 = vld [vmem:[#allocation29_spill] sm:$0xff]  ;;  %v22016_v13 = vld [vmem:[#allocation46_spill] sm:$0xff] }
 0x22e   : > { %v2091_v48 = vadd.f32 %v16013_v38, %v2055_v34  ;;  %v2092_v30 = vadd.f32 %v2076_v49, %v2056_v17  ;;  %v2187_v59 = vadd.f32 %v2171_v55, %v2090_v16  ;;  %v16175_v9 = vrot.slane %v1748_v40, 7  ;;  %v22017_v34 = vld [vmem:[#allocation32_spill] sm:$0xff] }
 0x22f   : > { %v2243_v23 = vmul.f32 %v15723_v32, %v2151_v39  ;;  %v2280_v26 = vadd.f32 %v15899_v37, %v2258_v14  ;;  %v16179_v15 = vrot.slane %v1748_v40, 1  ;;  %vm1682_vm13 = vcmp.gt.f32.partialorder %v1592_v54, 0.0 }
 0x230   : > { %v2188_v7 = vadd.f32 %v22014_v63, %v2091_v48  ;;  %v2189_v12 = vadd.f32 %v2173_v36, %v2092_v30  ;;  %v2223_v18 = vadd.f32 %v2207_v31, %v2187_v59  ;;  %v2437_v38 = vsel %vm1842_vm1, %v22015_v35, %v16175_v9  ;;  %v22019_v31 = vld [vmem:[#allocation45_spill] sm:$0xff]  ;;  %v16208_v63 = vpop.f32.mrb[30].mxu0 }
 0x231   : > { %vm2296_vm14 = vcmp.gt.f32.partialorder %v2280_v26, 0.0  ;;  %v2312_v16 = vmul.f32 0.2, %v2280_v26  ;;  %v16187_v49 = vmul.f32 %v15518_v42, %v1748_v40  ;;  %v2438_v55 = vmul.f32 %v22016_v13, %v2437_v38  ;;  %22021 = vst [vmem:[#allocation59_spill] sm:$0xff] %v16208_v63 }
 0x232   : > { %v2224_v19 = vadd.f32 %v2208_v11, %v2188_v7  ;;  %v2225_v5 = vadd.f32 %v2209_v3, %v2189_v12  ;;  %v2259_v61 = vadd.f32 %v2243_v23, %v2223_v18  ;;  %v2689_v36 = vsel %vm2119_vm2, %v22017_v34, %v16179_v15 }
 0x233   : > { %v16195_v59 = vmul.f32 %v15522_v43, %v1748_v40  ;;  %v16198_v17 = vmul.f32 %v15506_v33, %v1748_v40  ;;  %v2709_v14 = vmul.f32 %v22019_v31, %v2689_v36  ;;  %v1714_v48 = vmul.f32 0.2, %v1592_v54 }
 0x234   : > { %v2260_v30 = vadd.f32 %v16123_v44, %v2224_v19  ;;  %v2281_v11 = vadd.f32 %v15899_v37, %v2259_v61  ;;  %v16203_v3 = vsel %vm2296_vm14, %v2280_v26, %v2312_v16  ;;  %v16206_v23 = vmul.f32 %v2438_v55, %v15539_v50  ;;  %v22023_v44 = vld [vmem:[#allocation62_spill] sm:$0xff]  ;;  %v22024_v16 = vld [vmem:[#allocation63_spill] sm:$0xff] }
 0x235   : > { %22018 = vst [vmem:[#allocation39_spill] sm:$0xff] %v16198_v17  ;;  %22020 = vst [vmem:[#allocation60_spill] sm:$0xff] %v16203_v3  ;;  %v16211_v7 = vmul.f32 %v15723_v32, %v2709_v14  ;;  %v16214_v40 = vsel %vm1682_vm13, %v1592_v54, %v1714_v48  ;;  %v16217_v12 = vmul.f32 %v15547_v52, %v2128_v29  ;;  %v22025_v14 = vrot.slane %v16061_v46, 7 }
 0x236   : > { %v1603_v18 = vadd.f32 %v22023_v44, %v22004_v21  ;;  %v2282_v26 = vadd.f32 %v15899_v37, %v2260_v30  ;;  %v1836_v38 = vrot.slane %v16214_v40, 7  ;;  %v1595_v55 = vadd.f32 %v22004_v21, %v22024_v16 }
 0x237   : > { %22022 = vst [vmem:[#allocation64_spill] sm:$0xff] %v16211_v7  ;;  %v16226_v19 = vmul.f32 %v15547_v52, %v2151_v39  ;;  %vm2297_vm15 = vcmp.gt.f32.partialorder %v2281_v11, 0.0  ;;  %v2313_v61 = vmul.f32 0.2, %v2281_v11  ;;  %v16230_v54 = vmul.f32 %v15506_v33, %v16214_v40  ;;  %v22026_v39 = vld [vmem:[#allocation48_spill] sm:$0xff] }
 0x238   : > { %v21699_v29 = vrot.slane %v16214_v40, 1  ;;  %vm2298_vm3 = vcmp.gt.f32.partialorder %v2282_v26, 0.0  ;;  %v2314_v36 = vmul.f32 0.2, %v2282_v26  ;;  %v1848_v48 = vsel %vm1842_vm1, %v22025_v14, %v1836_v38 }
 0x239   : > { %v16239_v30 = vmul.f32 %v15518_v42, %v16214_v40  ;;  %v1877_v44 = vmul.f32 %v22026_v39, %v1848_v48  ;;  %v22027_v16 = vrot.slane %v16061_v46, 1  ;;  %vm1685_vm4 = vcmp.gt.f32.partialorder %v1603_v18, 0.0 }
 0x23a   : > { %v1717_v63 = vmul.f32 0.2, %v1603_v18  ;;  %v2077_v3 = vmul.f32 %v15522_v43, %v16214_v40  ;;  %vm1683_vm5 = vcmp.gt.f32.partialorder %v1595_v55, 0.0  ;;  %v1715_v0 = vmul.f32 0.2, %v1595_v55 }
 0x23b   : > { %v2125_v7 = vsel %vm2119_vm2, %v22027_v16, %v21699_v29  ;;  %v16254_v47 = vsel %vm2297_vm15, %v2281_v11, %v2313_v61  ;;  %v1935_v48 = vmul.f32 %v15543_v51, %v1877_v44  ;;  %v1969_v46 = vmul.f32 %v15558_v60, %v1877_v44  ;;  %v16260_v16 = vpop.f32.mrb[31].mxu0 }
 0x23c   : > { %v16251_v14 = vmul.f32 %v22028_v8, %v2125_v7  ;;  %22029 = vst [vmem:[#allocation65_spill] sm:$0xff] %v16254_v47  ;;  %v16258_v39 = vsel %vm1685_vm4, %v1603_v18, %v1717_v63  ;;  %22030 = vst [vmem:[#allocation61_spill] sm:$0xff] %v16260_v16  ;;  %v16263_v29 = vsel %vm2298_vm3, %v2282_v26, %v2314_v36  ;;  %v22034_v47 = vld [vmem:[#allocation50_spill] sm:$0xff] }
 0x23d   : > { %22031 = vst [vmem:[#allocation69_spill] sm:$0xff] %v16263_v29  ;;  %v1901_v56 = vmul.f32 %v15539_v50, %v1877_v44  ;;  %v21703_v8 = vrot.slane %v16258_v39, 7  ;;  %v1985_v11 = vadd.f32 %v1969_v46, %v16158_v1  ;;  %v16272_v61 = vmul.f32 %v15518_v42, %v16258_v39 }
 0x23e   : > { %v2245_v7 = vmul.f32 %v15723_v32, %v16251_v14  ;;  %v21702_v63 = vrot.slane %v16258_v39, 1  ;;  %v1747_v18 = vsel %vm1683_vm5, %v1595_v55, %v1715_v0  ;;  %v1951_v44 = vadd.f32 %v1935_v48, %v16138_v20 }
 0x23f   : > { %22032 = vst [vmem:[#allocation62_spill] sm:$0xff] %v16272_v61  ;;  %v1845_v26 = vsel %vm1842_vm1, %v16175_v9, %v21703_v8  ;;  %v1837_v36 = vrot.slane %v1747_v18, 7  ;;  %v2021_v29 = vadd.f32 %v16025_v4, %v1985_v11  ;;  %v2080_v1 = vmul.f32 %v15522_v43, %v16258_v39 }
 0x240   : > { %v2261_v16 = vadd.f32 %v2245_v7, %v2225_v5  ;;  %v2122_v0 = vsel %vm2119_vm2, %v16179_v15, %v21702_v63  ;;  %v16291_v5 = vmul.f32 %v15506_v33, %v16258_v39  ;;  %v1938_v46 = vmul.f32 %v15543_v51, %v1845_v26 }
 0x241   : > { %v1972_v20 = vmul.f32 %v15558_v60, %v1845_v26  ;;  %v16297_v4 = vmul.f32 %v15551_v53, %v2122_v0  ;;  %v2057_v48 = vadd.f32 %v15999_v6, %v2021_v29  ;;  %v16301_v7 = vmul.f32 %v15723_v32, %v2122_v0 }
 0x242   : > { %22033 = vst [vmem:[#allocation63_spill] sm:$0xff] %v16291_v5  ;;  %v2283_v55 = vadd.f32 %v15899_v37, %v2261_v16  ;;  %v1846_v11 = vsel %vm1842_vm1, %v1837_v36, %v16175_v9  ;;  %v1847_v63 = vsel %vm1842_vm1, %v1836_v38, %v1837_v36  ;;  %v16309_v8 = vmul.f32 %v15539_v50, %v1845_v26 }
 0x243   : > { %v1879_v17 = vmul.f32 %v22034_v47, %v1846_v11  ;;  %v1902_v5 = vmul.f32 %v15539_v50, %v1847_v63  ;;  %v2093_v61 = vadd.f32 %v2077_v3, %v2057_v48  ;;  %v1936_v6 = vmul.f32 %v15543_v51, %v1847_v63 }
 0x244   : > { %v2315_v16 = vmul.f32 0.2, %v2283_v55  ;;  %vm2299_vm6 = vcmp.gt.f32.partialorder %v2283_v55, 0.0  ;;  %v1970_v29 = vmul.f32 %v15558_v60, %v1847_v63  ;;  %v16316_v31 = vmul.f32 %v15547_v52, %v2122_v0 }
 0x245   : > { %v1937_v9 = vmul.f32 %v15543_v51, %v1879_v17  ;;  %v16319_v38 = vadd.f32 %v1938_v46, %v1902_v5  ;;  %v1971_v26 = vmul.f32 %v15558_v60, %v1879_v17  ;;  %v2190_v36 = vadd.f32 %v16217_v12, %v2093_v61 }
 0x246   : > { %22035 = vst [vmem:[#allocation83_spill] sm:$0xff] %v16316_v31  ;;  %v1952_v11 = vadd.f32 %v1936_v6, %v16111_v25  ;;  %v1986_v3 = vadd.f32 %v1970_v29, %v16131_v57  ;;  %v16326_v48 = vmul.f32 %v15506_v33, %v1747_v18  ;;  %v16328_v47 = vsel %vm2299_vm6, %v2283_v55, %v2315_v16  ;;  %v22040_v6 = vld [vmem:[#allocation68_spill] sm:$0xff] }
 0x247   : > { %22036 = vst [vmem:[#allocation84_spill] sm:$0xff] %v16328_v47  ;;  %v16330_v63 = vadd.f32 %v1937_v9, %v1901_v56  ;;  %v1987_v0 = vadd.f32 %v1971_v26, %v1951_v44  ;;  %v2114_v31 = vrot.slane %v1747_v18, 1  ;;  %v2226_v5 = vadd.f32 %v16120_v24, %v2190_v36 }
 0x248   : > { %v1988_v46 = vadd.f32 %v1972_v20, %v1952_v11  ;;  %v2022_v17 = vadd.f32 %v16096_v58, %v1986_v3  ;;  %v2044_v12 = vmul.f32 %v15518_v42, %v1747_v18  ;;  %v2078_v57 = vmul.f32 %v15522_v43, %v1747_v18  ;;  %v22038_v58 = vld [vmem:[#allocation49_spill] sm:$0xff] }
 0x249   : > { %v2023_v25 = vadd.f32 %v15994_v10, %v1987_v0  ;;  %v2123_v61 = vsel %vm2119_vm2, %v2114_v31, %v16179_v15  ;;  %v22037_v56 = vrot.slane %v16214_v40, 1  ;;  %v2177_v10 = vmul.f32 %v15547_v52, %v16251_v14  ;;  %v22039_v15 = vld [vmem:[#allocation67_spill] sm:$0xff] }
 0x24a   : > { %v2024_v24 = vadd.f32 %v16075_v28, %v1988_v46  ;;  %v2058_v55 = vadd.f32 %v16079_v2, %v2022_v17  ;;  %v16347_v20 = vmul.f32 %v22038_v58, %v2123_v61  ;;  %v1616_v40 = vadd.f32 %v22039_v15, %v22004_v21 }
 0x24b   : > { %v2124_v44 = vsel %vm2119_vm2, %v22037_v56, %v2114_v31  ;;  %v2059_v18 = vadd.f32 %v16239_v30, %v2023_v25  ;;  %v1608_v31 = vadd.f32 %v22004_v21, %v22040_v6  ;;  %v2211_v2 = vmul.f32 %v15551_v53, %v16251_v14 }
 0x24c   : > { %v2246_v16 = vmul.f32 %v15723_v32, %v2124_v44  ;;  %v2060_v29 = vadd.f32 %v2044_v12, %v2024_v24  ;;  %v2094_v28 = vadd.f32 %v2078_v57, %v2058_v55  ;;  %v2212_v9 = vmul.f32 %v15551_v53, %v2124_v44 }
 0x24d   : > { %v2095_v26 = vadd.f32 %v16195_v59, %v2059_v18  ;;  %vm1688_vm7 = vcmp.gt.f32.partialorder %v1616_v40, 0.0  ;;  %v1720_v30 = vmul.f32 0.2, %v1616_v40  ;;  %v2213_v0 = vmul.f32 %v15551_v53, %v16347_v20 }
 0x24e   : > { %v2262_v36 = vadd.f32 %v2246_v16, %v2226_v5  ;;  %v2096_v11 = vadd.f32 %v2080_v1, %v2060_v29  ;;  %v2191_v3 = vadd.f32 %v16226_v19, %v2094_v28  ;;  %v2247_v46 = vmul.f32 %v15723_v32, %v16347_v20  ;;  %v22041_v16 = vld [vmem:[#allocation70_spill] sm:$0xff] }
 0x24f   : > { %v2192_v17 = vadd.f32 %v16115_v41, %v2095_v26  ;;  %v16368_v12 = vsel %vm1688_vm7, %v1616_v40, %v1720_v30  ;;  %v1718_v25 = vmul.f32 0.2, %v1608_v31  ;;  %vm1686_vm8 = vcmp.gt.f32.partialorder %v1608_v31, 0.0 }
 0x250   : > { %v2284_v14 = vadd.f32 %v15899_v37, %v2262_v36  ;;  %v2193_v59 = vadd.f32 %v2177_v10, %v2096_v11  ;;  %v2227_v5 = vadd.f32 %v2211_v2, %v2191_v3  ;;  %v16371_v1 = vmul.f32 %v15547_v52, %v2124_v44  ;;  %v22045_v3 = vld [vmem:[#allocation52_spill] sm:$0xff] }
 0x251   : > { %v2228_v19 = vadd.f32 %v2212_v9, %v2192_v17  ;;  %v21708_v61 = vrot.slane %v16368_v12, 7  ;;  %v16376_v56 = vmul.f32 %v15506_v33, %v16368_v12  ;;  %v16380_v55 = vmul.f32 %v15518_v42, %v16368_v12 }
 0x252   : > { %v2316_v57 = vmul.f32 0.2, %v2284_v14  ;;  %v2229_v41 = vadd.f32 %v2213_v0, %v2193_v59  ;;  %v2263_v24 = vadd.f32 %v2247_v46, %v2227_v5  ;;  %vm2300_vm9 = vcmp.gt.f32.partialorder %v2284_v14, 0.0  ;;  %v22046_v46 = vld [vmem:[#allocation51_spill] sm:$0xff]  ;;  %v22048_v5 = vld [vmem:[#allocation30_spill] sm:$0xff] }
 0x253   : > { %v2264_v10 = vadd.f32 %v16301_v7, %v2228_v19  ;;  %v16385_v44 = vmul.f32 %v15522_v43, %v16368_v12  ;;  %v16387_v18 = vsel %vm1686_vm8, %v1608_v31, %v1718_v25  ;;  %v1619_v15 = vadd.f32 %v22041_v16, %v22004_v21 }
 0x254   : > { %v2285_v40 = vadd.f32 %v15899_v37, %v2263_v24  ;;  %v21710_v6 = vrot.slane %v16368_v12, 1  ;;  %v21706_v29 = vrot.slane %v16387_v18, 7  ;;  %v21705_v28 = vrot.slane %v16387_v18, 1 }
 0x255   : > { %v2286_v2 = vadd.f32 %v15899_v37, %v2264_v10  ;;  %v16396_v7 = vsel %vm2300_vm9, %v2284_v14, %v2316_v57  ;;  %v2081_v9 = vmul.f32 %v15522_v43, %v16387_v18  ;;  %vm1689_vm10 = vcmp.gt.f32.partialorder %v1619_v15, 0.0  ;;  %v22047_v14 = vld [vmem:[#allocation31_spill] sm:$0xff] }
 0x256   : > { %22042 = vst [vmem:[#allocation67_spill] sm:$0xff] %v16396_v7  ;;  %vm2301_vm11 = vcmp.gt.f32.partialorder %v2285_v40, 0.0  ;;  %v2317_v31 = vmul.f32 0.2, %v2285_v40  ;;  %v22043_v21 = vrot.slane %v16258_v39, 7  ;;  %v22044_v36 = vrot.slane %v16258_v39, 1 }
 0x257   : > { %vm2302_vm12 = vcmp.gt.f32.partialorder %v2286_v2, 0.0  ;;  %v2318_v11 = vmul.f32 0.2, %v2286_v2  ;;  %v16417_v59 = vmul.f32 %v15506_v33, %v16387_v18  ;;  %v1721_v57 = vmul.f32 0.2, %v1619_v15 }
 0x258   : > { %v1844_v26 = vsel %vm1842_vm1, %v22043_v21, %v21706_v29  ;;  %v2121_v30 = vsel %vm2119_vm2, %v22044_v36, %v21705_v28  ;;  %v16420_v24 = vsel %vm2301_vm11, %v2285_v40, %v2317_v31  ;;  %v16426_v16 = vmul.f32 %v15518_v42, %v16387_v18 }
 0x259   : > { %v1881_v0 = vmul.f32 %v22045_v3, %v1844_v26  ;;  %v2157_v17 = vmul.f32 %v22046_v46, %v2121_v30  ;;  %v2440_v25 = vmul.f32 %v22047_v14, %v1844_v26  ;;  %v2691_v19 = vmul.f32 %v22048_v5, %v2121_v30  ;;  %22049 = vst [vmem:[#allocation68_spill] sm:$0xff] %v16420_v24 }
 0x25a   : > { %v16428_v21 = vsel %vm2302_vm12, %v2286_v2, %v2318_v11  ;;  %v16435_v30 = vsel %vm1689_vm10, %v1619_v15, %v1721_v57  ;;  %v22055_v46 = vrot.slane %v16387_v18, 1 }
 0x25b   : > { %v1973_v39 = vmul.f32 %v15558_v60, %v1881_v0  ;;  %v2249_v10 = vmul.f32 %v15723_v32, %v2157_v17  ;;  %22050 = vst [vmem:[#allocation70_spill] sm:$0xff] %v16428_v21  ;;  %v16431_v26 = vmul.f32 %v15551_v53, %v2157_v17  ;;  %v2490_v36 = vmul.f32 %v2440_v25, %v15543_v51  ;;  %v16464_v17 = vld [vmem:[%s21937_s2] ss:$0 sm:$0xff] }
 0x25c   : > { %v16439_v0 = vmul.f32 %v2440_v25, %v15539_v50  ;;  %v21707_v28 = vrot.slane %v16435_v30, 7  ;;  %v16446_v2 = vmul.f32 %v2691_v19, %v15547_v52  ;;  %v16450_v11 = vmul.f32 %v15506_v33, %v16435_v30  ;;  %v22051_v25 = vld [vmem:[#allocation72_spill] sm:$0xff] }
 0x25d   : > { %v1989_v40 = vadd.f32 %v1973_v39, %v16330_v63  ;;  %v2265_v31 = vadd.f32 %v2249_v10, %v2229_v41  ;;  %v16443_v29 = vadd.f32 %v2490_v36, %v16206_v23  ;;  %v21709_v15 = vrot.slane %v16435_v30, 1 }
 0x25e   : > { %v2432_v23 = vsel %vm1842_vm1, %v21708_v61, %v21707_v28  ;;  %v1611_v19 = vadd.f32 %v16464_v17, %v22051_v25  ;;  %v16477_v39 = vmul.f32 %v15522_v43, %v16435_v30 }
 0x25f   : > { %v2025_v63 = vadd.f32 %v16230_v54, %v1989_v40  ;;  %v2287_v41 = vadd.f32 %v15899_v37, %v2265_v31  ;;  %v16469_v57 = vmul.f32 %v2432_v23, %v15539_v50  ;;  %v16473_v54 = vmul.f32 %v15518_v42, %v16435_v30 }
 0x260   : > { %v2684_v10 = vsel %vm2119_vm2, %v21710_v6, %v21709_v15  ;;  %v2493_v31 = vmul.f32 %v2432_v23, %v15543_v51  ;;  %v2523_v25 = vmul.f32 %v2432_v23, %v15558_v60  ;;  %vm1687_vm14 = vcmp.gt.f32.partialorder %v1611_v19, 0.0 }
 0x261   : > { %v2061_v36 = vadd.f32 %v16187_v49, %v2025_v63  ;;  %vm2303_vm13 = vcmp.gt.f32.partialorder %v2287_v41, 0.0  ;;  %v2319_v40 = vmul.f32 0.2, %v2287_v41  ;;  %v16489_v28 = vmul.f32 %v2684_v10, %v15547_v52 }
 0x262   : > { %v1719_v61 = vmul.f32 0.2, %v1611_v19  ;;  %v16494_v58 = vmul.f32 %v2684_v10, %v15551_v53  ;;  %v16497_v15 = vmul.f32 %v15723_v32, %v2684_v10  ;;  %v16501_v63 = vmul.f32 %v15547_v52, %v22017_v34 }
 0x263   : > { %22052 = vst [vmem:[#allocation72_spill] sm:$0xff] %v16489_v28  ;;  %v2097_v5 = vadd.f32 %v2081_v9, %v2061_v36  ;;  %v16491_v14 = vsel %vm2303_vm13, %v2287_v41, %v2319_v40  ;;  %v2179_v23 = vmul.f32 %v15547_v52, %v16347_v20  ;;  %v1632_v6 = vadd.f32 %v16464_v17, %v15953_v27 }
 0x264   : > { %22053 = vst [vmem:[#allocation85_spill] sm:$0xff] %v16491_v14  ;;  %v1751_v49 = vsel %vm1687_vm14, %v1611_v19, %v1719_v61  ;;  %v16510_v40 = vadd.f32 %v16464_v17, %v15959_v45  ;;  %v16519_v20 = vadd.f32 %v16464_v17, %v15970_v62 }
 0x265   : > { %v2194_v9 = vadd.f32 %v16371_v1, %v2097_v5  ;;  %v1841_v41 = vrot.slane %v1751_v49, 7  ;;  %v2118_v36 = vrot.slane %v1751_v49, 1  ;;  %v2082_v61 = vmul.f32 %v15522_v43, %v1751_v49 }
 0x266   : > { %v16514_v19 = vmul.f32 %v15506_v33, %v1751_v49  ;;  %v2587_v10 = vmul.f32 %v15518_v42, %v1751_v49  ;;  %v22054_v1 = vrot.slane %v16387_v18, 7  ;;  %vm1692_vm15 = vcmp.gt.f32.partialorder %v1632_v6, 0.0 }
 0x267   : > { %v2230_v27 = vadd.f32 %v16297_v4, %v2194_v9  ;;  %v1862_v45 = vsel %vm1842_vm1, %v1841_v41, %v22015_v35  ;;  %v16533_v49 = vsel %vm2119_vm2, %v22055_v46, %v2118_v36  ;;  %v2139_v4 = vsel %vm2119_vm2, %v2118_v36, %v22017_v34  ;;  %v22058_v34 = vld [vmem:[#allocation34_spill] sm:$0xff] }
 0x268   : > { %v1843_v5 = vsel %vm1842_vm1, %v22054_v1, %v1841_v41  ;;  %v1863_v62 = vmul.f32 %v22016_v13, %v1862_v45  ;;  %v2250_v9 = vmul.f32 %v15723_v32, %v16533_v49  ;;  %v22056_v1 = vld [vmem:[#allocation45_spill] sm:$0xff]  ;;  %v22057_v35 = vrot.slane %v16368_v12, 7 }
 0x269   : > { %v1974_v3 = vmul.f32 %v15558_v60, %v1843_v5  ;;  %v2159_v14 = vmul.f32 %v22056_v1, %v2139_v4  ;;  %v2461_v46 = vmul.f32 %v15539_v50, %v1843_v5  ;;  %v2491_v45 = vmul.f32 %v15543_v51, %v1843_v5 }
 0x26a   : > { %v2433_v18 = vsel %vm1842_vm1, %v1841_v41, %v22057_v35  ;;  %v1887_v13 = vmul.f32 %v15539_v50, %v1863_v62  ;;  %v2266_v21 = vadd.f32 %v2250_v9, %v2230_v27  ;;  %v22059_v4 = vrot.slane %v16368_v12, 1  ;;  %v22060_v41 = vld [vmem:[#allocation55_spill] sm:$0xff]  ;;  %v22061_v27 = vld [vmem:[#allocation33_spill] sm:$0xff] }
 0x26b   : > { %v1990_v28 = vadd.f32 %v1974_v3, %v16319_v38  ;;  %v2442_v24 = vmul.f32 %v22058_v34, %v2433_v18  ;;  %v2507_v32 = vadd.f32 %v2491_v45, %v16309_v8  ;;  %v16553_v7 = vadd.f32 %v2493_v31, %v2461_v46  ;;  %v16565_v3 = vld [vmem:[%s21917_s3 + $0x8] ss:$0 sm:$0xff]  ;;  %v22062_v9 = vld [vmem:[#allocation57_spill] sm:$0xff]  ;;  %v22063_v18 = vld [vmem:[#allocation62_spill] sm:$0xff] }
 0x26c   : > { %v2685_v35 = vsel %vm2119_vm2, %v2118_v36, %v22059_v4  ;;  %v1939_v1 = vadd.f32 %v22060_v41, %v1887_v13  ;;  %v2288_v62 = vadd.f32 %v15899_v37, %v2266_v21  ;;  %v1724_v38 = vmul.f32 0.2, %v1632_v6  ;;  %v22065_v41 = vld [vmem:[#allocation35_spill] sm:$0xff] }
 0x26d   : > { %v2026_v5 = vadd.f32 %v16326_v48, %v1990_v28  ;;  %v2251_v8 = vmul.f32 %v16565_v3, %v2159_v14  ;;  %v2522_v12 = vmul.f32 %v2442_v24, %v15558_v60  ;;  %v2539_v31 = vadd.f32 %v2523_v25, %v2507_v32  ;;  %v22064_v14 = vld [vmem:[#allocation63_spill] sm:$0xff] }
 0x26e   : > { %v16570_v36 = vmul.f32 %v22061_v27, %v2685_v35  ;;  %v1975_v13 = vadd.f32 %v22062_v9, %v1939_v1  ;;  %vm2304_vm3 = vcmp.gt.f32.partialorder %v2288_v62, 0.0  ;;  %v2320_v28 = vmul.f32 0.2, %v2288_v62  ;;  %v22067_v9 = vld [vmem:[#allocation39_spill] sm:$0xff] }
 0x26f   : > { %v2062_v48 = vadd.f32 %v22063_v18, %v2026_v5  ;;  %v16575_v21 = vmul.f32 %v2442_v24, %v15539_v50  ;;  %v2492_v46 = vmul.f32 %v2442_v24, %v15543_v51  ;;  %v2538_v45 = vadd.f32 %v2522_v12, %v16443_v29  ;;  %v22068_v29 = vld [vmem:[#allocation54_spill] sm:$0xff] }
 0x270   : > { %v2571_v4 = vadd.f32 %v22064_v14, %v2539_v31  ;;  %v2011_v25 = vadd.f32 %v22065_v41, %v1975_v13  ;;  %v2742_v35 = vmul.f32 %v15551_v53, %v16533_v49  ;;  %v16584_v1 = vsel %vm1692_vm15, %v1632_v6, %v1724_v38 }
 0x271   : > { %v2098_v32 = vadd.f32 %v2082_v61, %v2062_v48  ;;  %v16586_v5 = vsel %vm2304_vm3, %v2288_v62, %v2320_v28  ;;  %v2570_v18 = vadd.f32 %v22067_v9, %v2538_v45  ;;  %v2743_v24 = vmul.f32 %v16570_v36, %v15551_v53 }
 0x272   : > { %22066 = vst [vmem:[#allocation55_spill] sm:$0xff] %v16586_v5  ;;  %v2603_v27 = vadd.f32 %v2587_v10, %v2571_v4  ;;  %v2047_v12 = vadd.f32 %v22068_v29, %v2011_v25  ;;  %v21721_v13 = vrot.slane %v16584_v1, 7  ;;  %v16595_v61 = vmul.f32 %v15506_v33, %v16584_v1  ;;  %v22070_v10 = vld [vmem:[#allocation53_spill] sm:$0xff]  ;;  %v22071_v25 = vld [vmem:[#allocation83_spill] sm:$0xff] }
 0x273   : > { %v2195_v31 = vadd.f32 %v2179_v23, %v2098_v32  ;;  %v2602_v6 = vadd.f32 %v16426_v16, %v2570_v18  ;;  %v16601_v38 = vmul.f32 %v15518_v42, %v16584_v1  ;;  %vm1690_vm4 = vcmp.gt.f32.partialorder %v16510_v40, 0.0  ;;  %v22072_v32 = vld [vmem:[#allocation58_spill] sm:$0xff] }
 0x274   : > { %22069 = vst [vmem:[#allocation57_spill] sm:$0xff] %v16595_v61  ;;  %v2635_v62 = vadd.f32 %v16477_v39, %v2603_v27  ;;  %v2083_v48 = vadd.f32 %v22070_v10, %v2047_v12  ;;  %v1722_v28 = vmul.f32 0.2, %v16510_v40  ;;  %v2508_v45 = vadd.f32 %v2492_v46, %v16439_v0  ;;  %v22097_v61 = vld [vmem:[#allocation38_spill] sm:$0xff] }
 0x275   : > { %v2231_v23 = vadd.f32 %v16431_v26, %v2195_v31  ;;  %v2634_v14 = vadd.f32 %v16385_v44, %v2602_v6  ;;  %v16612_v39 = vmul.f32 %v15522_v43, %v16584_v1  ;;  %vm1693_vm5 = vcmp.gt.f32.partialorder %v16519_v20, 0.0  ;;  %v22074_v6 = vld [vmem:[#allocation56_spill] sm:$0xff] }
 0x276   : > { %v2727_v16 = vadd.f32 %v16446_v2, %v2635_v62  ;;  %v2180_v27 = vadd.f32 %v16501_v63, %v2083_v48  ;;  %v16617_v41 = vsel %vm1690_vm4, %v16510_v40, %v1722_v28  ;;  %v1725_v26 = vmul.f32 0.2, %v16519_v20  ;;  %v22075_v48 = vld [vmem:[#allocation37_spill] sm:$0xff] }
 0x277   : > { %v2267_v4 = vadd.f32 %v2251_v8, %v2231_v23  ;;  %v2726_v0 = vadd.f32 %v22071_v25, %v2634_v14  ;;  %v21723_v44 = vrot.slane %v16584_v1, 1  ;;  %v21720_v2 = vrot.slane %v16617_v41, 7  ;;  %v22077_v25 = vld [vmem:[#allocation36_spill] sm:$0xff] }
 0x278   : > { %v2759_v46 = vadd.f32 %v2743_v24, %v2727_v16  ;;  %v2216_v9 = vadd.f32 %v22072_v32, %v2180_v27  ;;  %v16627_v63 = vmul.f32 %v15506_v33, %v16617_v41  ;;  %v2712_v40 = vmul.f32 %v15547_v52, %v16533_v49 }
 0x279   : > { %v2289_v18 = vadd.f32 %v15899_v37, %v2267_v4  ;;  %v2758_v8 = vadd.f32 %v2742_v35, %v2726_v0  ;;  %v22073_v24 = vrot.slane %v16435_v30, 7  ;;  %v21719_v12 = vrot.slane %v16617_v41, 1 }
 0x27a   : > { %v16641_v31 = vsel %vm1693_vm5, %v16519_v20, %v1725_v26  ;;  %v2252_v62 = vadd.f32 %v22074_v6, %v2216_v9  ;;  %v16647_v35 = vmul.f32 %v15518_v42, %v16617_v41  ;;  %v22076_v28 = vrot.slane %v16435_v30, 1 }
 0x27b   : > { %v2431_v29 = vsel %vm1842_vm1, %v22073_v24, %v21720_v2  ;;  %v2321_v10 = vmul.f32 0.2, %v2289_v18  ;;  %vm2305_vm6 = vcmp.gt.f32.partialorder %v2289_v18, 0.0  ;;  %v2790_v23 = vadd.f32 %v16497_v15, %v2758_v8 }
 0x27c   : > { %v2444_v49 = vmul.f32 %v22075_v48, %v2431_v29  ;;  %v2683_v20 = vsel %vm2119_vm2, %v22076_v28, %v21719_v12  ;;  %v21718_v14 = vrot.slane %v16641_v31, 7  ;;  %v2274_v16 = vadd.f32 %v15899_v37, %v2252_v62  ;;  %v22084_v12 = vld [vmem:[#allocation78_spill] sm:$0xff] }
 0x27d   : > { %v2620_v4 = vmul.f32 %v15522_v43, %v16617_v41  ;;  %v16663_v26 = vmul.f32 %v15506_v33, %v16641_v31  ;;  %v2806_v15 = vadd.f32 %v15899_v37, %v2790_v23  ;;  %v2695_v0 = vmul.f32 %v22077_v25, %v2683_v20 }
 0x27e   : > { %v2494_v27 = vmul.f32 %v2444_v49, %v15543_v51  ;;  %v2524_v30 = vmul.f32 %v2444_v49, %v15558_v60  ;;  %v2428_v32 = vsel %vm1842_vm1, %v21721_v13, %v21718_v14  ;;  %vm2290_vm7 = vcmp.gt.f32.partialorder %v2274_v16, 0.0 }
 0x27f   : > { %v2306_v9 = vmul.f32 0.2, %v2274_v16  ;;  %v16674_v8 = vsel %vm2305_vm6, %v2289_v18, %v2321_v10  ;;  %vm2822_vm8 = vcmp.gt.f32.partialorder %v2806_v15, 0.0  ;;  %v2838_v37 = vmul.f32 0.2, %v2806_v15  ;;  %v22080_v18 = vld [vmem:[#allocation74_spill] sm:$0xff] }
 0x280   : > { %22078 = vst [vmem:[#allocation62_spill] sm:$0xff] %v16674_v8  ;;  %v16677_v24 = vadd.f32 %v2494_v27, %v16575_v21  ;;  %v2540_v29 = vadd.f32 %v2524_v30, %v2508_v45  ;;  %v2775_v6 = vmul.f32 %v16565_v3, %v2695_v0  ;;  %v16683_v23 = vmul.f32 %v2444_v49, %v15539_v50 }
 0x281   : > { %v16680_v62 = vsel %vm2290_vm7, %v2274_v16, %v2306_v9  ;;  %v16686_v28 = vmul.f32 %v2428_v32, %v15539_v50  ;;  %v2497_v20 = vmul.f32 %v2428_v32, %v15543_v51  ;;  %v2527_v45 = vmul.f32 %v2428_v32, %v15558_v60  ;;  %v22083_v9 = vld [vmem:[#allocation75_spill] sm:$0xff] }
 0x282   : > { %22079 = vst [vmem:[#allocation63_spill] sm:$0xff] %v16680_v62  ;;  %v2339_v10 = vadd.f32 %v22080_v18, %v16680_v62  ;;  %v2572_v21 = vadd.f32 %v16417_v59, %v2540_v29  ;;  %v2791_v27 = vadd.f32 %v2775_v6, %v2759_v46  ;;  %v16693_v30 = vsel %vm2822_vm8, %v2806_v15, %v2838_v37  ;;  %v16707_v59 = vld [vmem:[%s21976_s16] ss:$0 sm:$0xff]  ;;  %v22085_v29 = vld [vmem:[#allocation81_spill] sm:$0xff] }
 0x283   : > { %22081 = vst [vmem:[#allocation35_spill] sm:$0xff] %v16693_v30  ;;  %v16697_v16 = vmul.f32 %v15518_v42, %v16641_v31  ;;  %v21722_v49 = vrot.slane %v16641_v31, 1  ;;  %v1627_v14 = vadd.f32 %v16464_v17, %v22083_v9  ;;  %v16712_v15 = vmul.f32 %v15522_v43, %v16641_v31 }
 0x284   : > { %v2340_v2 = vadd.f32 %v2339_v10, %v22084_v12  ;;  %v2604_v13 = vadd.f32 %v16380_v55, %v2572_v21  ;;  %v2807_v46 = vadd.f32 %v16707_v59, %v2791_v27  ;;  %v16722_v37 = vmul.f32 %v16570_v36, %v15547_v52 }
 0x285   : > { %22082 = vst [vmem:[#allocation39_spill] sm:$0xff] %v16697_v16  ;;  %v2680_v32 = vsel %vm2119_vm2, %v21723_v44, %v21722_v49  ;;  %vm1691_vm9 = vcmp.gt.f32.partialorder %v1627_v14, 0.0  ;;  %v1723_v55 = vmul.f32 0.2, %v1627_v14  ;;  %v2715_v25 = vmul.f32 %v2695_v0, %v15547_v52  ;;  %v22087_v49 = vld [vmem:[#allocation82_spill] sm:$0xff] }
 0x286   : > { %v2341_v6 = vadd.f32 %v2340_v2, %v22085_v29  ;;  %v2636_v10 = vadd.f32 %v2620_v4, %v2604_v13  ;;  %vm2823_vm10 = vcmp.gt.f32.partialorder %v2807_v46, 0.0  ;;  %v2839_v21 = vmul.f32 0.2, %v2807_v46 }
 0x287   : > { %v16726_v27 = vmul.f32 %v2680_v32, %v15547_v52  ;;  %v1755_v9 = vsel %vm1691_vm9, %v1627_v14, %v1723_v55  ;;  %v16730_v48 = vmul.f32 %v2695_v0, %v15551_v53  ;;  %v16734_v36 = vmul.f32 %v2680_v32, %v15551_v53  ;;  %v22089_v55 = vld [vmem:[#allocation71_spill] sm:$0xff] }
 0x288   : > { %v2342_v44 = vadd.f32 %v2341_v6, %v22087_v49  ;;  %v2728_v34 = vadd.f32 %v2712_v40, %v2636_v10  ;;  %v2405_v12 = vrot.slane %v1755_v9, 7  ;;  %v16736_v2 = vsel %vm2823_vm10, %v2807_v46, %v2839_v21 }
 0x289   : > { %22086 = vst [vmem:[#allocation54_spill] sm:$0xff] %v16726_v27  ;;  %22088 = vst [vmem:[#allocation53_spill] sm:$0xff] %v16736_v2  ;;  %v16739_v13 = vmul.f32 %v16565_v3, %v2680_v32  ;;  %v16742_v4 = vmul.f32 %v15506_v33, %v1755_v9  ;;  %v2657_v14 = vrot.slane %v1755_v9, 1  ;;  %v22090_v6 = vrot.slane %v16584_v1, 7  ;;  %v22092_v32 = vld [vmem:[#allocation40_spill] sm:$0xff] }
 0x28a   : > { %v2343_v29 = vadd.f32 %v2342_v44, %v22089_v55  ;;  %v2760_v0 = vadd.f32 %v16494_v58, %v2728_v34  ;;  %v22091_v10 = vrot.slane %v16617_v41, 7  ;;  %v22093_v55 = vld [vmem:[#allocation60_spill] sm:$0xff]  ;;  %v2591_v58 = vmul.f32 %v15518_v42, %v1755_v9 }
 0x28b   : > { %v2429_v40 = vsel %vm1842_vm1, %v2405_v12, %v22090_v6  ;;  %v22094_v62 = vrot.slane %v16584_v1, 1  ;;  %v22095_v27 = vrot.slane %v16617_v41, 1 }
 0x28c   : > { %v2430_v46 = vsel %vm1842_vm1, %v22091_v10, %v2405_v12  ;;  %v2446_v21 = vmul.f32 %v22092_v32, %v2429_v40  ;;  %v2344_v34 = vadd.f32 %v2343_v29, %v22093_v55  ;;  %v2871_v29 = vadd.f32 %v16736_v2, %v16693_v30  ;;  %v22096_v32 = vld [vmem:[#allocation65_spill] sm:$0xff] }
 0x28d   : > { %v2465_v49 = vmul.f32 %v2430_v46, %v15539_v50  ;;  %v2495_v18 = vmul.f32 %v2430_v46, %v15543_v51  ;;  %v2525_v44 = vmul.f32 %v2430_v46, %v15558_v60  ;;  %v2681_v6 = vsel %vm2119_vm2, %v2657_v14, %v22094_v62 }
 0x28e   : > { %v2682_v12 = vsel %vm2119_vm2, %v22095_v27, %v2657_v14  ;;  %v2621_v46 = vmul.f32 %v15522_v43, %v1755_v9  ;;  %v2345_v55 = vadd.f32 %v2344_v34, %v22096_v32  ;;  %v2496_v1 = vmul.f32 %v2446_v21, %v15543_v51 }
 0x28f   : > { %v2511_v40 = vadd.f32 %v2495_v18, %v16469_v57  ;;  %v16769_v10 = vadd.f32 %v2497_v20, %v2465_v49  ;;  %v2526_v62 = vmul.f32 %v2446_v21, %v15558_v60  ;;  %v2541_v41 = vadd.f32 %v2525_v44, %v16553_v7  ;;  %v22098_v20 = vld [vmem:[#allocation76_spill] sm:$0xff]  ;;  %v22099_v49 = vld [vmem:[#allocation69_spill] sm:$0xff] }
 0x290   : > { %v2697_v27 = vmul.f32 %v22097_v61, %v2681_v6  ;;  %v2776_v57 = vmul.f32 %v16565_v3, %v2682_v12  ;;  %v1648_v18 = vadd.f32 %v16464_v17, %v22098_v20  ;;  %v2346_v9 = vadd.f32 %v2345_v55, %v22099_v49 }
 0x291   : > { %v2543_v16 = vadd.f32 %v2527_v45, %v2511_v40  ;;  %v16784_v14 = vmul.f32 %v2446_v21, %v15539_v50  ;;  %v2542_v34 = vadd.f32 %v2526_v62, %v16677_v24  ;;  %v2573_v2 = vadd.f32 %v16514_v19, %v2541_v41 }
 0x292   : > { %v2746_v7 = vmul.f32 %v2682_v12, %v15551_v53  ;;  %v2792_v45 = vadd.f32 %v2776_v57, %v2760_v0  ;;  %vm1696_vm11 = vcmp.gt.f32.partialorder %v1648_v18, 0.0  ;;  %v2347_v44 = vadd.f32 %v2346_v9, %v16328_v47 }
 0x293   : > { %v2575_v30 = vadd.f32 %v16450_v11, %v2543_v16  ;;  %v2574_v6 = vadd.f32 %v16376_v56, %v2542_v34  ;;  %v2605_v40 = vadd.f32 %v16473_v54, %v2573_v2  ;;  %v1728_v55 = vmul.f32 0.2, %v1648_v18  ;;  %v22100_v11 = vld [vmem:[#allocation67_spill] sm:$0xff]  ;;  %v22101_v2 = vld [vmem:[#allocation77_spill] sm:$0xff] }
 0x294   : > { %v2747_v21 = vmul.f32 %v2697_v27, %v15551_v53  ;;  %v2808_v24 = vadd.f32 %v16707_v59, %v2792_v45  ;;  %v16796_v19 = vadd.f32 %v2496_v1, %v16683_v23  ;;  %v2348_v16 = vadd.f32 %v2347_v44, %v22100_v11  ;;  %v22105_v44 = vld [vmem:[#allocation72_spill] sm:$0xff] }
 0x295   : > { %v2607_v20 = vadd.f32 %v2591_v58, %v2575_v30  ;;  %v2606_v0 = vadd.f32 %v16647_v35, %v2574_v6  ;;  %v2637_v62 = vadd.f32 %v2621_v46, %v2605_v40  ;;  %v16800_v41 = vsel %vm1696_vm11, %v1648_v18, %v1728_v55  ;;  %v22102_v58 = vld [vmem:[#allocation68_spill] sm:$0xff]  ;;  %v22104_v18 = vld [vmem:[#allocation70_spill] sm:$0xff] }
 0x296   : > { %vm2824_vm12 = vcmp.gt.f32.partialorder %v2808_v24, 0.0  ;;  %v2840_v54 = vmul.f32 0.2, %v2808_v24  ;;  %v1640_v30 = vadd.f32 %v16464_v17, %v22101_v2  ;;  %v2349_v57 = vadd.f32 %v2348_v16, %v22102_v58 }
 0x297   : > { %v2639_v56 = vadd.f32 %v16712_v15, %v2607_v20  ;;  %v2638_v9 = vadd.f32 %v16612_v39, %v2606_v0  ;;  %v2729_v23 = vadd.f32 %v16722_v37, %v2637_v62  ;;  %v2777_v1 = vmul.f32 %v16565_v3, %v2697_v27  ;;  %v22106_v20 = vld [vmem:[#allocation85_spill] sm:$0xff] }
 0x298   : > { %v16809_v35 = vsel %vm2824_vm12, %v2808_v24, %v2840_v54  ;;  %v16814_v15 = vmul.f32 %v15506_v33, %v16800_v41  ;;  %v2350_v45 = vadd.f32 %v2349_v57, %v22104_v18  ;;  %v16821_v39 = vmul.f32 %v15518_v42, %v16800_v41 }
 0x299   : > { %v2731_v34 = vadd.f32 %v2715_v25, %v2639_v56  ;;  %22103 = vst [vmem:[#allocation83_spill] sm:$0xff] %v16809_v35  ;;  %v2730_v6 = vadd.f32 %v22105_v44, %v2638_v9  ;;  %v2761_v40 = vadd.f32 %v16730_v48, %v2729_v23  ;;  %v16825_v25 = vmul.f32 %v15522_v43, %v16800_v41  ;;  %v22113_v56 = vld [vmem:[#allocation41_spill] sm:$0xff] }
 0x29a   : > { %vm1694_vm13 = vcmp.gt.f32.partialorder %v1640_v30, 0.0  ;;  %v1726_v55 = vmul.f32 0.2, %v1640_v30  ;;  %v2351_v24 = vadd.f32 %v2350_v45, %v22106_v20  ;;  %v2872_v62 = vadd.f32 %v2871_v29, %v16809_v35 }
 0x29b   : > { %v2763_v37 = vadd.f32 %v2747_v21, %v2731_v34  ;;  %v2762_v16 = vadd.f32 %v2746_v7, %v2730_v6  ;;  %v2793_v0 = vadd.f32 %v2777_v1, %v2761_v40  ;;  %v16833_v54 = vmul.f32 %v2682_v12, %v15547_v52  ;;  %v22107_v21 = vld [vmem:[#allocation79_spill] sm:$0xff]  ;;  %v22108_v1 = vld [vmem:[#allocation80_spill] sm:$0xff] }
 0x29c   : > { %v16830_v48 = vsel %vm1694_vm13, %v1640_v30, %v1726_v55  ;;  %v1651_v2 = vadd.f32 %v16464_v17, %v22107_v21  ;;  %v2352_v57 = vadd.f32 %v2351_v24, %v16586_v5  ;;  %v1643_v12 = vadd.f32 %v16464_v17, %v22108_v1 }
 0x29d   : > { %v2794_v9 = vadd.f32 %v16739_v13, %v2762_v16  ;;  %v2809_v23 = vadd.f32 %v16707_v59, %v2793_v0  ;;  %v21727_v7 = vrot.slane %v16830_v48, 7  ;;  %v16843_v29 = vmul.f32 %v15506_v33, %v16830_v48 }
 0x29e   : > { %v21728_v30 = vrot.slane %v16830_v48, 1  ;;  %v16849_v34 = vmul.f32 %v2697_v27, %v15547_v52  ;;  %v2353_v45 = vadd.f32 %v2352_v57, %v16674_v8  ;;  %v22109_v6 = vrot.slane %v16641_v31, 7 }
 0x29f   : > { %v2810_v13 = vadd.f32 %v16707_v59, %v2794_v9  ;;  %vm2825_vm14 = vcmp.gt.f32.partialorder %v2809_v23, 0.0  ;;  %v2841_v44 = vmul.f32 0.2, %v2809_v23  ;;  %v22110_v55 = vrot.slane %v16641_v31, 1  ;;  %v22112_v9 = vld [vmem:[#allocation42_spill] sm:$0xff] }
 0x2a0   : > { %v2427_v40 = vsel %vm1842_vm1, %v22109_v6, %v21727_v7  ;;  %vm1697_vm15 = vcmp.gt.f32.partialorder %v1651_v2, 0.0  ;;  %v1729_v24 = vmul.f32 0.2, %v1651_v2  ;;  %v2354_v16 = vrot.slane %v2353_v45, 4 }
 0x2a1   : > { %v2679_v27 = vsel %vm2119_vm2, %v22110_v55, %v21728_v30  ;;  %vm2826_vm3 = vcmp.gt.f32.partialorder %v2810_v13, 0.0  ;;  %v2842_v0 = vmul.f32 0.2, %v2810_v13  ;;  %v16865_v21 = vsel %vm2825_vm14, %v2809_v23, %v2841_v44 }
 0x2a2   : > { %22111 = vst [vmem:[#allocation58_spill] sm:$0xff] %v16865_v21  ;;  %v2873_v57 = vadd.f32 %v2872_v62, %v16865_v21  ;;  %v2448_v1 = vmul.f32 %v22112_v9, %v2427_v40  ;;  %v2699_v6 = vmul.f32 %v22113_v56, %v2679_v27  ;;  %v16870_v7 = vsel %vm1697_vm15, %v1651_v2, %v1729_v24 }
 0x2a3   : > { %v2355_v46 = vadd.f32 %v2354_v16, %v2353_v45  ;;  %v16874_v31 = vmul.f32 %v15518_v42, %v16830_v48  ;;  %v2624_v55 = vmul.f32 %v15522_v43, %v16830_v48  ;;  %v21731_v30 = vrot.slane %v16870_v7, 7 }
 0x2a4   : > { %v16879_v23 = vsel %vm2826_vm3, %v2810_v13, %v2842_v0  ;;  %v2498_v62 = vmul.f32 %v2448_v1, %v15543_v51  ;;  %v2528_v44 = vmul.f32 %v2448_v1, %v15558_v60  ;;  %v16885_v2 = vmul.f32 %v15506_v33, %v16870_v7 }
 0x2a5   : > { %v2356_v45 = vrot.slane %v2355_v46, 2  ;;  %v2874_v40 = vadd.f32 %v2873_v57, %v16879_v23  ;;  %v2779_v27 = vmul.f32 %v16565_v3, %v2699_v6  ;;  %v22114_v24 = vrot.slane %v16800_v41, 7 }
 0x2a6   : > { %v16896_v16 = vmul.f32 %v2448_v1, %v15539_v50  ;;  %v2514_v0 = vadd.f32 %v2498_v62, %v16784_v14  ;;  %v2544_v56 = vadd.f32 %v2528_v44, %v16796_v19  ;;  %v16902_v61 = vmul.f32 %v15518_v42, %v16870_v7 }
 0x2a7   : > { %v2424_v13 = vsel %vm1842_vm1, %v22114_v24, %v21731_v30  ;;  %v16904_v57 = vadd.f32 %v2356_v45, %v2355_v46  ;;  %v2795_v9 = vadd.f32 %v2779_v27, %v2763_v37  ;;  %v21734_v1 = vrot.slane %v16870_v7, 1  ;;  %v22116_v30 = vld [vmem:[#allocation66_spill] sm:$0xff] }
 0x2a8   : > { %v16907_v21 = vmul.f32 %v2424_v13, %v15539_v50  ;;  %v2501_v35 = vmul.f32 %v2424_v13, %v15543_v51  ;;  %v2576_v24 = vadd.f32 %v16627_v63, %v2544_v56  ;;  %vm1695_vm4 = vcmp.gt.f32.partialorder %v1643_v12, 0.0 }
 0x2a9   : > { %v1727_v14 = vmul.f32 0.2, %v1643_v12  ;;  %v2811_v19 = vadd.f32 %v16707_v59, %v2795_v9  ;;  %v2531_v62 = vmul.f32 %v2424_v13, %v15558_v60  ;;  %v2627_v46 = vmul.f32 %v15522_v43, %v16870_v7 }
 0x2aa   : > { %v16917_v37 = vmul.f32 %v2699_v6, %v15547_v52  ;;  %v2608_v44 = vadd.f32 %v16601_v38, %v2576_v24  ;;  %v22115_v63 = vrot.slane %v16800_v41, 1  ;;  %v16927_v9 = vmul.f32 %v2699_v6, %v15551_v53 }
 0x2ab   : > { %v1759_v45 = vsel %vm1695_vm4, %v1643_v12, %v1727_v14  ;;  %vm2827_vm5 = vcmp.gt.f32.partialorder %v2811_v19, 0.0  ;;  %v2843_v27 = vmul.f32 0.2, %v2811_v19  ;;  %v1664_v8 = vadd.f32 %v16464_v17, %v22116_v30 }
 0x2ac   : > { %v2676_v56 = vsel %vm2119_vm2, %v22115_v63, %v21734_v1  ;;  %v2640_v38 = vadd.f32 %v2624_v55, %v2608_v44  ;;  %v2409_v63 = vrot.slane %v1759_v45, 7  ;;  %v16943_v6 = vmul.f32 %v15506_v33, %v1759_v45 }
 0x2ad   : > { %v16930_v13 = vmul.f32 %v2676_v56, %v15547_v52  ;;  %v16935_v24 = vmul.f32 %v2676_v56, %v15551_v53  ;;  %v16938_v5 = vmul.f32 %v16565_v3, %v2676_v56  ;;  %v16940_v12 = vsel %vm2827_vm5, %v2811_v19, %v2843_v27  ;;  %v22120_v27 = vld [vmem:[#allocation44_spill] sm:$0xff] }
 0x2ae   : > { %22117 = vst [vmem:[#allocation56_spill] sm:$0xff] %v16940_v12  ;;  %v2595_v14 = vmul.f32 %v15518_v42, %v1759_v45  ;;  %v2625_v1 = vmul.f32 %v15522_v43, %v1759_v45  ;;  %v2732_v20 = vadd.f32 %v16833_v54, %v2640_v38  ;;  %v22118_v30 = vrot.slane %v16800_v41, 7 }
 0x2af   : > { %v22119_v44 = vrot.slane %v16830_v48, 7  ;;  %v2661_v56 = vrot.slane %v1759_v45, 1  ;;  %v22121_v38 = vrot.slane %v16800_v41, 1  ;;  %v22122_v49 = vrot.slane %v16830_v48, 1 }
 0x2b0   : > { %v2425_v55 = vsel %vm1842_vm1, %v2409_v63, %v22118_v30  ;;  %v2764_v54 = vadd.f32 %v16734_v36, %v2732_v20  ;;  %vm1700_vm6 = vcmp.gt.f32.partialorder %v1664_v8, 0.0 }
 0x2b1   : > { %v2426_v19 = vsel %vm1842_vm1, %v22119_v44, %v2409_v63  ;;  %v2450_v18 = vmul.f32 %v22120_v27, %v2425_v55  ;;  %v2677_v30 = vsel %vm2119_vm2, %v2661_v56, %v22121_v38  ;;  %v2678_v45 = vsel %vm2119_vm2, %v22122_v49, %v2661_v56  ;;  %v22123_v38 = vld [vmem:[#allocation43_spill] sm:$0xff] }
 0x2b2   : > { %v2469_v58 = vmul.f32 %v2426_v19, %v15539_v50  ;;  %v2499_v11 = vmul.f32 %v2426_v19, %v15543_v51  ;;  %v2529_v47 = vmul.f32 %v2426_v19, %v15558_v60  ;;  %v2875_v63 = vadd.f32 %v2874_v40, %v16940_v12 }
 0x2b3   : > { %v16971_v55 = vmul.f32 %v2450_v18, %v15539_v50  ;;  %v2500_v44 = vmul.f32 %v2450_v18, %v15543_v51  ;;  %v2530_v41 = vmul.f32 %v2450_v18, %v15558_v60  ;;  %v16980_v48 = vmul.f32 %v22123_v38, %v2677_v30 }
 0x2b4   : > { %v2515_v19 = vadd.f32 %v2499_v11, %v16686_v28  ;;  %v16975_v36 = vadd.f32 %v2501_v35, %v2469_v58  ;;  %v2545_v20 = vadd.f32 %v2529_v47, %v16769_v10  ;;  %v2750_v49 = vmul.f32 %v2678_v45, %v15551_v53  ;;  %v22124_v35 = vld [vmem:[#allocation73_spill] sm:$0xff] }
 0x2b5   : > { %v2780_v40 = vmul.f32 %v16565_v3, %v2678_v45  ;;  %v1732_v27 = vmul.f32 0.2, %v1664_v8  ;;  %v2546_v32 = vadd.f32 %v2530_v41, %v2514_v0  ;;  %v2751_v28 = vmul.f32 %v16980_v48, %v15551_v53 }
 0x2b6   : > { %v2547_v56 = vadd.f32 %v2531_v62, %v2515_v19  ;;  %v2577_v12 = vadd.f32 %v16742_v4, %v2545_v20  ;;  %v2781_v11 = vmul.f32 %v16565_v3, %v16980_v48  ;;  %v1656_v18 = vadd.f32 %v16464_v17, %v22124_v35  ;;  %v22125_v62 = vld [vmem:[#allocation57_spill] sm:$0xff]  ;;  %v22126_v19 = vld [vmem:[#allocation39_spill] sm:$0xff] }
 0x2b7   : > { %v2796_v10 = vadd.f32 %v2780_v40, %v2764_v54  ;;  %v16990_v58 = vsel %vm1700_vm6, %v1664_v8, %v1732_v27  ;;  %v2578_v30 = vadd.f32 %v22125_v62, %v2546_v32  ;;  %v2516_v40 = vadd.f32 %v2500_v44, %v16896_v16  ;;  %v22127_v16 = vld [vmem:[#allocation54_spill] sm:$0xff] }
 0x2b8   : > { %v2579_v47 = vadd.f32 %v16663_v26, %v2547_v56  ;;  %v2609_v0 = vadd.f32 %v22126_v19, %v2577_v12  ;;  %v16999_v41 = vmul.f32 %v15518_v42, %v16990_v58  ;;  %v17004_v26 = vmul.f32 %v15522_v43, %v16990_v58 }
 0x2b9   : > { %v2812_v38 = vadd.f32 %v16707_v59, %v2796_v10  ;;  %v2610_v27 = vadd.f32 %v16874_v31, %v2578_v30  ;;  %vm1698_vm7 = vcmp.gt.f32.partialorder %v1656_v18, 0.0  ;;  %v1730_v12 = vmul.f32 0.2, %v1656_v18 }
 0x2ba   : > { %v2611_v20 = vadd.f32 %v2595_v14, %v2579_v47  ;;  %v2641_v32 = vadd.f32 %v2625_v1, %v2609_v0  ;;  %v17014_v35 = vmul.f32 %v2678_v45, %v15547_v52 }
 0x2bb   : > { %vm2828_vm8 = vcmp.gt.f32.partialorder %v2812_v38, 0.0  ;;  %v2844_v56 = vmul.f32 0.2, %v2812_v38  ;;  %v2642_v14 = vadd.f32 %v16825_v25, %v2610_v27  ;;  %v17011_v10 = vsel %vm1698_vm7, %v1656_v18, %v1730_v12  ;;  %v22130_v27 = vld [vmem:[#allocation59_spill] sm:$0xff] }
 0x2bc   : > { %v2643_v54 = vadd.f32 %v2627_v46, %v2611_v20  ;;  %v2733_v47 = vadd.f32 %v16849_v34, %v2641_v32  ;;  %v21738_v1 = vrot.slane %v17011_v10, 7  ;;  %v17022_v46 = vmul.f32 %v15506_v33, %v17011_v10 }
 0x2bd   : > { %v17017_v31 = vsel %vm2828_vm8, %v2812_v38, %v2844_v56  ;;  %v2734_v44 = vadd.f32 %v22127_v16, %v2642_v14  ;;  %v17029_v45 = vmul.f32 %v15518_v42, %v17011_v10  ;;  %v2628_v30 = vmul.f32 %v15522_v43, %v17011_v10  ;;  %v22133_v14 = vld [vmem:[#allocation29_spill] sm:$0xff] }
 0x2be   : > { %v2735_v62 = vadd.f32 %v16917_v37, %v2643_v54  ;;  %v2765_v25 = vadd.f32 %v16927_v9, %v2733_v47  ;;  %v2876_v34 = vadd.f32 %v2875_v63, %v17017_v31  ;;  %v22128_v37 = vrot.slane %v16870_v7, 7  ;;  %v22129_v63 = vld [vmem:[#allocation48_spill] sm:$0xff]  ;;  %v22132_v54 = vld [vmem:[#allocation61_spill] sm:$0xff] }
 0x2bf   : > { %v21737_v19 = vrot.slane %v17011_v10, 1  ;;  %v2766_v9 = vadd.f32 %v2750_v49, %v2734_v44  ;;  %v1667_v32 = vadd.f32 %v16464_v17, %v22130_v27  ;;  %v1659_v56 = vadd.f32 %v16464_v17, %v22132_v54 }
 0x2c0   : > { %v2767_v18 = vadd.f32 %v2751_v28, %v2735_v62  ;;  %v2423_v38 = vsel %vm1842_vm1, %v22128_v37, %v21738_v1  ;;  %v2797_v0 = vadd.f32 %v2781_v11, %v2765_v25  ;;  %v22131_v28 = vrot.slane %v16870_v7, 1  ;;  %v22134_v25 = vld [vmem:[#allocation47_spill] sm:$0xff] }
 0x2c1   : > { %v2452_v20 = vmul.f32 %v22129_v63, %v2423_v38  ;;  %v17053_v47 = vmul.f32 %v15558_v60, %v22133_v14  ;;  %v17056_v49 = vmul.f32 0.0, %v15522_v43  ;;  %v2798_v11 = vadd.f32 %v16938_v5, %v2766_v9 }
 0x2c2   : > { %v2675_v12 = vsel %vm2119_vm2, %v22131_v28, %v21737_v19  ;;  %v2813_v62 = vadd.f32 %v16707_v59, %v2797_v0  ;;  %vm1701_vm9 = vcmp.gt.f32.partialorder %v1667_v32, 0.0  ;;  %v1733_v37 = vmul.f32 0.2, %v1667_v32 }
 0x2c3   : > { %v17061_v16 = vmul.f32 %v2452_v20, %v15539_v50  ;;  %v2502_v7 = vmul.f32 %v2452_v20, %v15543_v51  ;;  %v2532_v44 = vmul.f32 %v2452_v20, %v15558_v60  ;;  %v17066_v17 = vmul.f32 %v22134_v25, %v2675_v12 }
 0x2c4   : > { %v2814_v38 = vadd.f32 %v16707_v59, %v2798_v11  ;;  %vm2829_vm10 = vcmp.gt.f32.partialorder %v2813_v62, 0.0  ;;  %v2845_v27 = vmul.f32 0.2, %v2813_v62  ;;  %vm1699_vm11 = vcmp.gt.f32.partialorder %v1659_v56, 0.0 }
 0x2c5   : > { %v2548_v5 = vadd.f32 %v2532_v44, %v2516_v40  ;;  %v2783_v9 = vmul.f32 %v16565_v3, %v17066_v17  ;;  %v1765_v0 = vsel %vm1701_vm9, %v1667_v32, %v1733_v37  ;;  %v1731_v28 = vmul.f32 0.2, %v1659_v56  ;;  %v22136_v37 = vld [vmem:[#allocation52_spill] sm:$0xff] }
 0x2c6   : > { %vm2830_vm12 = vcmp.gt.f32.partialorder %v2814_v38, 0.0  ;;  %v2846_v54 = vmul.f32 0.2, %v2814_v38  ;;  %v17071_v19 = vsel %vm2829_vm10, %v2813_v62, %v2845_v27  ;;  %v2415_v20 = vrot.slane %v1765_v0, 7 }
 0x2c7   : > { %v2877_v12 = vadd.f32 %v2876_v34, %v17071_v19  ;;  %v2580_v1 = vadd.f32 %v16843_v29, %v2548_v5  ;;  %v2799_v8 = vadd.f32 %v2783_v9, %v2767_v18  ;;  %v17076_v11 = vmul.f32 %v15518_v42, %v1765_v0 }
 0x2c8   : > { %v17078_v4 = vsel %vm2830_vm12, %v2814_v38, %v2846_v54  ;;  %v2419_v40 = vsel %vm1842_vm1, %v2415_v20, %v22133_v14  ;;  %v22135_v32 = vrot.slane %v16990_v58, 7  ;;  %v17088_v44 = vmul.f32 %v15522_v43, %v1765_v0 }
 0x2c9   : > { %v17091_v29 = vadd.f32 %v2877_v12, %v17078_v4  ;;  %v2612_v34 = vadd.f32 %v16821_v39, %v2580_v1  ;;  %v2815_v18 = vadd.f32 %v16707_v59, %v2799_v8  ;;  %v2456_v38 = vmul.f32 %v22136_v37, %v2419_v40  ;;  %v22137_v12 = vld [vmem:[#allocation32_spill] sm:$0xff] }
 0x2ca   : > { %v2420_v62 = vsel %vm1842_vm1, %v22135_v32, %v2415_v20  ;;  %v2667_v9 = vrot.slane %v1765_v0, 1  ;;  %v1763_v54 = vsel %vm1699_vm11, %v1659_v56, %v1731_v28  ;;  %v22138_v8 = vrot.slane %v16990_v58, 1 }
 0x2cb   : > { %v2505_v27 = vmul.f32 %v2420_v62, %v15543_v51  ;;  %v2535_v5 = vmul.f32 %v2420_v62, %v15558_v60  ;;  %v2644_v20 = vadd.f32 %v2628_v30, %v2612_v34  ;;  %vm2831_vm13 = vcmp.gt.f32.partialorder %v2815_v18, 0.0  ;;  %v22139_v30 = vld [vmem:[#allocation51_spill] sm:$0xff] }
 0x2cc   : > { %v2847_v32 = vmul.f32 0.2, %v2815_v18  ;;  %v2536_v14 = vmul.f32 %v2456_v38, %v15558_v60  ;;  %v2671_v39 = vsel %vm2119_vm2, %v2667_v9, %v22137_v12  ;;  %v2672_v1 = vsel %vm2119_vm2, %v22138_v8, %v2667_v9 }
 0x2cd   : > { %v2413_v40 = vrot.slane %v1763_v54, 7  ;;  %v2518_v62 = vadd.f32 %v2502_v7, %v16971_v55  ;;  %v2736_v0 = vadd.f32 %v17014_v35, %v2644_v20  ;;  %v2707_v28 = vmul.f32 %v22139_v30, %v2671_v39 }
 0x2ce   : > { %v17109_v56 = vsel %vm2831_vm13, %v2815_v18, %v2847_v32  ;;  %v17113_v34 = vmul.f32 %v2672_v1, %v15551_v53  ;;  %v17116_v38 = vmul.f32 %v16565_v3, %v2672_v1  ;;  %v22140_v25 = vrot.slane %v16990_v58, 7  ;;  %v22142_v32 = vld [vmem:[#allocation50_spill] sm:$0xff] }
 0x2cf   : > { %v22141_v8 = vrot.slane %v17011_v10, 7  ;;  %v2569_v35 = vmul.f32 %v15506_v33, %v1763_v54  ;;  %v2768_v7 = vadd.f32 %v16935_v24, %v2736_v0  ;;  %v17129_v18 = vmul.f32 %v2707_v28, %v15551_v53 }
 0x2d0   : > { %v2421_v9 = vsel %vm1842_vm1, %v2413_v40, %v22140_v25  ;;  %v17132_v20 = vmul.f32 %v16565_v3, %v2707_v28  ;;  %v2629_v0 = vmul.f32 %v15522_v43, %v1763_v54  ;;  %vm14997_vm7 = vmmov 0  }
 0x2d1   : > { %v2422_v55 = vsel %vm1842_vm1, %v22141_v8, %v2413_v40  ;;  %v2454_v39 = vmul.f32 %v22142_v32, %v2421_v9  ;;  %v2599_v40 = vmul.f32 %v15518_v42, %v1763_v54  ;;  %v2665_v8 = vrot.slane %v1763_v54, 1  ;;  %v22145_v54 = vld [vmem:[#allocation49_spill] sm:$0xff] }
 0x2d2   : > { %v2473_v1 = vmul.f32 %v2422_v55, %v15539_v50  ;;  %v2503_v25 = vmul.f32 %v2422_v55, %v15543_v51  ;;  %v2533_v30 = vmul.f32 %v2422_v55, %v15558_v60  ;;  %v2721_v50 = vmul.f32 %v16980_v48, %v15547_v52 }
 0x2d3   : > { %v2504_v33 = vmul.f32 %v2454_v39, %v15543_v51  ;;  %v2534_v24 = vmul.f32 %v2454_v39, %v15558_v60  ;;  %v22143_v42 = vrot.slane %v16990_v58, 1  ;;  %v22144_v60 = vrot.slane %v17011_v10, 1 }
 0x2d4   : > { %v2519_v28 = vadd.f32 %v2503_v25, %v16907_v21  ;;  %v2521_v37 = vadd.f32 %v2505_v27, %v2473_v1  ;;  %v2549_v9 = vadd.f32 %v2533_v30, %v16975_v36  ;;  %v2723_v58 = vmul.f32 %v17066_v17, %v15547_v52 }
 0x2d5   : > { %v2520_v32 = vadd.f32 %v2504_v33, %v17061_v16  ;;  %v2550_v55 = vadd.f32 %v2534_v24, %v2518_v62  ;;  %v2673_v51 = vsel %vm2119_vm2, %v2665_v8, %v22143_v42  ;;  %v2674_v43 = vsel %vm2119_vm2, %v22144_v60, %v2665_v8 }
 0x2d6   : > { %v2551_v21 = vadd.f32 %v2535_v5, %v2519_v28  ;;  %v2553_v27 = vadd.f32 %v17053_v47, %v2521_v37  ;;  %v2581_v36 = vadd.f32 %v16943_v6, %v2549_v9  ;;  %v2705_v48 = vmul.f32 %v22145_v54, %v2673_v51 }
 0x2d7   : > { %v2552_v30 = vadd.f32 %v2536_v14, %v2520_v32  ;;  %v2582_v16 = vadd.f32 %v16814_v15, %v2550_v55  ;;  %v2724_v62 = vmul.f32 %v2674_v43, %v15547_v52  ;;  %v2753_v14 = vmul.f32 %v17066_v17, %v15551_v53 }
 0x2d8   : > { %v2583_v10 = vadd.f32 %v16885_v2, %v2551_v21  ;;  %v2585_v39 = vadd.f32 %v2569_v35, %v2553_v27  ;;  %v2613_v1 = vadd.f32 %v16902_v61, %v2581_v36  ;;  %v2725_v5 = vmul.f32 %v2705_v48, %v15547_v52  ;;  %v2916_v36 = vld [vmem:[%s22146_s13 + $0x20] sm:$0xff] }
 0x2d9   : > { %v2584_v47 = vadd.f32 %v17022_v46, %v2552_v30  ;;  %v2614_v6 = vadd.f32 %v17029_v45, %v2582_v16  ;;  %v2754_v15 = vmul.f32 %v2674_v43, %v15551_v53  ;;  %v2755_v2 = vmul.f32 %v2705_v48, %v15551_v53  ;;  %v2912_v53 = vld [vmem:[%s22146_s13] sm:$0xff]  ;;  %v22147_v16 = vld [vmem:[#allocation64_spill] sm:$0xff] }
 0x2da   : > { %v2615_v37 = vadd.f32 %v2599_v40, %v2583_v10  ;;  %v2617_v32 = vadd.f32 %v17076_v11, %v2585_v39  ;;  %v2645_v25 = vadd.f32 %v2629_v0, %v2613_v1  ;;  %v2784_v52 = vmul.f32 %v16565_v3, %v2674_v43  ;;  %v2915_v0 = vld [vmem:[%s22146_s13 + $0x18] sm:$0xff] }
 0x2db   : > { %v2616_v35 = vadd.f32 %v16999_v41, %v2584_v47  ;;  %v2646_v61 = vadd.f32 %v17004_v26, %v2614_v6  ;;  %v2785_v46 = vmul.f32 %v16565_v3, %v2705_v48  ;;  %v2788_v40 = vmul.f32 %v16565_v3, %v22137_v12  ;;  %v2913_v41 = vld [vmem:[%s22146_s13 + $0x8] sm:$0xff]  ;;  %v2914_v3 = vld [vmem:[%s22146_s13 + $0x10] sm:$0xff] }
 0x2dc   : > { %v2647_v45 = vadd.f32 %v17088_v44, %v2615_v37  ;;  %v2649_v17 = vadd.f32 %v17056_v49, %v2617_v32  ;;  %v2737_v33 = vadd.f32 %v2721_v50, %v2645_v25  ;;  %v2800_v24 = vadd.f32 %v2784_v52, %v2768_v7  ;;  %v2917_v48 = vld [vmem:[%s22146_s13 + $0x28] sm:$0xff]  ;;  %v2918_v37 = vld [vmem:[%s22146_s13 + $0x30] sm:$0xff]  ;;  %v2919_v32 = vld [vmem:[%s22146_s13 + $0x38] sm:$0xff] }
 0x2dd   : > { %v2648_v26 = vadd.f32 %v17056_v49, %v2616_v35  ;;  %v2738_v11 = vadd.f32 %v16930_v13, %v2646_v61  ;;  %v2879_v44 = vadd.f32 %v17091_v29, %v17109_v56  ;;  %v21741_v13 = vmov 0.0|0.0  }
 0x2de   : > { %v2739_v8 = vadd.f32 %v2723_v58, %v2647_v45  ;;  %v2741_v28 = vadd.f32 %v2725_v5, %v2649_v17  ;;  %v2769_v9 = vadd.f32 %v2753_v14, %v2737_v33  ;;  %v2816_v49 = vadd.f32 %v16707_v59, %v2800_v24  ;;  %13813 = vmatprep.subr.bf16.mxu1 %v21741_v13  ;;  %v2920_v17 = vld [vmem:[%s22146_s13 + $0x40] sm:$0xff]  ;;  %v2921_v33 = vld [vmem:[%s22146_s13 + $0x48] sm:$0xff] }
 0x2df   : > { %v2740_v50 = vadd.f32 %v2724_v62, %v2648_v26  ;;  %v2770_v55 = vadd.f32 %v2754_v15, %v2738_v11  ;;  %v13814_v7 = vpack.c.bf16 %v2913_v41, %v2912_v53  ;;  %v13817_v60 = vpack.c.bf16 %v2915_v0, %v2914_v3  ;;  %v2922_v0 = vld [vmem:[%s22146_s13 + $0x50] sm:$0xff] }
 0x2e0   : > { %v2771_v29 = vadd.f32 %v2755_v2, %v2739_v8  ;;  %v2773_v42 = vadd.f32 %v17129_v18, %v2741_v28  ;;  %v2801_v51 = vadd.f32 %v2785_v46, %v2769_v9  ;;  %vm2832_vm14 = vcmp.gt.f32.partialorder %v2816_v49, 0.0  ;;  %v2923_v8 = vld [vmem:[%s22146_s13 + $0x58] sm:$0xff] }
 0x2e1   : > { %v2772_v43 = vadd.f32 %v17113_v34, %v2740_v50  ;;  %v2802_v21 = vadd.f32 %v17116_v38, %v2770_v55  ;;  %v2848_v27 = vmul.f32 0.2, %v2816_v49  ;;  %13815 = vmatpush3.bf16.msra.mxu1 %v13814_v7  ;;  %v2358_v30 = vrot.slane %v16904_v57, 1 }
 0x2e2   : > { %v2803_v18 = vadd.f32 %v17132_v20, %v2771_v29  ;;  %v2805_v58 = vadd.f32 %v22147_v16, %v2773_v42  ;;  %v2817_v34 = vadd.f32 %v16707_v59, %v2801_v51  ;;  %13816 = vmatprep.subr.bf16.mxu1 %v21741_v13  ;;  %v13820_v5 = vpack.c.bf16 %v2917_v48, %v2916_v36  ;;  %v2924_v51 = vld [vmem:[%s22146_s13 + $0x60] sm:$0xff]  ;;  %v2926_v36 = vld [vmem:[%s22146_s13 + $0x70] sm:$0xff]  ;;  %v2927_v48 = vld [vmem:[%s22146_s13 + $0x78] sm:$0xff] }
 0x2e3   : > { %v2804_v38 = vadd.f32 %v2788_v40, %v2772_v43  ;;  %v2818_v62 = vadd.f32 %v16707_v59, %v2802_v21  ;;  %v17213_v10 = vsel %vm2832_vm14, %v2816_v49, %v2848_v27  ;;  %v2359_v15 = vadd.f32 %v2358_v30, %v16904_v57 }
 0x2e4   : > { %v2819_v39 = vadd.f32 %v16707_v59, %v2803_v18  ;;  %vm2833_vm15 = vcmp.gt.f32.partialorder %v2817_v34, 0.0  ;;  %v2849_v1 = vmul.f32 0.2, %v2817_v34  ;;  %v2821_v20 = vadd.f32 %v16707_v59, %v2805_v58 }
 0x2e5   : > { %v2820_v47 = vadd.f32 %v16707_v59, %v2804_v38  ;;  %v2850_v6 = vmul.f32 0.2, %v2818_v62  ;;  %v2880_v14 = vadd.f32 %v2879_v44, %v17213_v10  ;;  %13818 = vmatpush3.bf16.msra.mxu1 %v13817_v60  ;;  %vm2834_vm3 = vcmp.gt.f32.partialorder %v2818_v62, 0.0  ;;  %v2338_v59 = vld [vmem:[#allocation6] sm:$0x1]  ;;  %v2925_v60 = vld [vmem:[%s22146_s13 + $0x68] sm:$0xff] }
 0x2e6   : > { %13819 = vmatprep.subr.bf16.mxu1 %v21741_v13  ;;  %v2851_v25 = vmul.f32 0.2, %v2819_v39  ;;  %v17227_v2 = vsel %vm2833_vm15, %v2817_v34, %v2849_v1  ;;  %vm2835_vm4 = vcmp.gt.f32.partialorder %v2819_v39, 0.0  ;;  %v2853_v57 = vmul.f32 0.2, %v2821_v20 }
 0x2e7   : > { %v2852_v35 = vmul.f32 0.2, %v2820_v47  ;;  %v2881_v61 = vadd.f32 %v2880_v14, %v17227_v2  ;;  %vm2836_vm5 = vcmp.gt.f32.partialorder %v2820_v47, 0.0  ;;  %v17230_v52 = vsel %vm2834_vm3, %v2818_v62, %v2850_v6  ;;  %v3002_v62 = vld [vmem:[#allocation13] sm:$0xff]  ;;  %v3005_v6 = vld [vmem:[#allocation13 + $0x18] sm:$0xff] }
 0x2e8   : > { %v13823_v46 = vpack.c.bf16 %v2919_v32, %v2918_v37  ;;  %vm2837_vm6 = vcmp.gt.f32.partialorder %v2821_v20, 0.0  ;;  %v2360_v40 = vadd.f32 %v2359_v15, %v2338_v59  ;;  %v17240_v53 = vsel %vm2835_vm4, %v2819_v39, %v2851_v25  ;;  %v3003_v39 = vld [vmem:[#allocation13 + $0x8] sm:$0xff]  ;;  %v14557_v15 = vld [vmem:[%s22149_s28] sm:$0xff]   ;;  %v14560_v25 = vld [vmem:[%s22149_s28 + $0x18] sm:$0xff]  }
 0x2e9   : > { %13821 = vmatpush3.bf16.msra.mxu1 %v13820_v5  ;;  %v2882_v45 = vadd.f32 %v2881_v61, %v17230_v52  ;;  %v22148_v41 = vmov 0.0   ;;  %v17244_v26 = vsel %vm2836_vm5, %v2820_v47, %v2852_v35  ;;  %v17247_v24 = vsel %vm2837_vm6, %v2821_v20, %v2853_v57  ;;  %v3004_v20 = vld [vmem:[#allocation13 + $0x10] sm:$0xff]  ;;  %v14558_v37 = vld [vmem:[%s22149_s28 + $0x8] sm:$0xff]   ;;  %12863 = vmatprep.subr.bf16.mxu0 %v14557_v15  ;;  %v2928_v59 = vld [vmem:[#allocation12] sm:$0x1] }
 0x2ea   : > { %13822 = vmatprep.subr.bf16.mxu1 %v21741_v13  ;;  %12849 = vmatprep.mubr.msk.f32.mxu1 %vm14997_vm7, %v22148_v41  ;;  %2361 = vst [vmem:[#allocation6] sm:$0x1] %v2360_v40  ;;  %v13826_v44 = vpack.c.bf16 %v2921_v33, %v2920_v17  ;;  %v2897_v28 = vpack.c.bf16 %v17071_v19, %v17017_v31  ;;  %v14559_v32 = vld [vmem:[%s22149_s28 + $0x10] sm:$0xff]   ;;  %vm3007_vm9 = vcmask 261120   ;;  %v14561_v17 = vld [vmem:[%s22149_s28 + $0x20] sm:$0xff]   ;;  %v14562_v33 = vld [vmem:[%s22149_s28 + $0x28] sm:$0xff]  }
 0x2eb   : > { %v2883_v11 = vadd.f32 %v2882_v45, %v17240_v53  ;;  %v2898_v9 = vpack.c.bf16 %v17109_v56, %v17078_v4  ;;  %v2899_v50 = vpack.c.bf16 %v17227_v2, %v17213_v10  ;;  %v2900_v55 = vpack.c.bf16 %v17240_v53, %v17230_v52  ;;  %12864 = vmatpush3.bf16.msra.mxu0 %v14557_v15  ;;  %v14563_v40 = vld [vmem:[%s22149_s28 + $0x30] sm:$0xff]   ;;  %v22162_v10 = vld [vmem:[#allocation67_spill] sm:$0xff]  ;;  %v22164_v52 = vld [vmem:[#allocation70_spill] sm:$0xff] }
 0x2ec   : > { %v2901_v49 = vpack.c.bf16 %v17247_v24, %v17244_v26  ;;  %v13829_v29 = vpack.c.bf16 %v2923_v8, %v2922_v0  ;;  %v13832_v21 = vpack.c.bf16 %v2925_v60, %v2924_v51  ;;  %v13835_v18 = vpack.c.bf16 %v2927_v48, %v2926_v36  ;;  %12865 = vmatprep.subr.bf16.mxu0 %v14558_v37  ;;  %v22151_v36 = vld [vmem:[#allocation63_spill] sm:$0xff]  ;;  %v22152_v48 = vld [vmem:[#allocation74_spill] sm:$0xff]  ;;  %v22158_v31 = vld [vmem:[#allocation60_spill] sm:$0xff] }
 0x2ed   : > { %13824 = vmatpush3.bf16.msra.mxu1 %v13823_v46  ;;  %v2884_v3 = vadd.f32 %v2883_v11, %v17244_v26  ;;  %v13838_v5 = vpack.c.bf16 %v3003_v39, %v3002_v62  ;;  %v13841_v14 = vpack.c.bf16 %v3005_v6, %v3004_v20  ;;  %v14564_v11 = vld [vmem:[%s22149_s28 + $0x38] sm:$0xff]   ;;  %v22156_v39 = vld [vmem:[#allocation71_spill] sm:$0xff]  ;;  %v22163_v2 = vld [vmem:[#allocation68_spill] sm:$0xff] }
 0x2ee   : > { %13825 = vmatprep.subr.bf16.mxu1 %v21741_v13  ;;  %v22155_v62 = vld [vmem:[#allocation82_spill] sm:$0xff]  ;;  %v22159_v19 = vld [vmem:[#allocation65_spill] sm:$0xff] }
 0x2ef   : > { %v2885_v7 = vadd.f32 %v2884_v3, %v17247_v24  ;;  %12866 = vmatpush3.bf16.msra.mxu0 %v14558_v37  ;;  %v22165_v53 = vld [vmem:[#allocation85_spill] sm:$0xff]  ;;  %v22166_v24 = vld [vmem:[#allocation55_spill] sm:$0xff] }
 0x2f0   : > { %12867 = vmatprep.subr.bf16.mxu0 %v14559_v32 }
 0x2f1   : > { %13827 = vmatpush3.bf16.msra.mxu1 %v13826_v44  ;;  %v2886_v42 = vrot.slane %v2885_v7, 4  ;;  %v2870_v58 = vld [vmem:[#allocation6] sm:$0x1]  ;;  %v3006_v44 = vld [vmem:[#allocation15] sm:$0x1] }
 0x2f2   : > { %13828 = vmatprep.subr.bf16.mxu1 %v21741_v13 }
 0x2f3   : > { %v2887_v43 = vadd.f32 %v2886_v42, %v2885_v7  ;;  %12868 = vmatpush3.bf16.msra.mxu0 %v14559_v32 }
 0x2f4   : > { %12869 = vmatprep.subr.bf16.mxu0 %v14560_v25 }
 0x2f5   : > { %13830 = vmatpush3.bf16.msra.mxu1 %v13829_v29  ;;  %v2888_v27 = vrot.slane %v2887_v43, 2 }
 0x2f6   : > { %13831 = vmatprep.subr.bf16.mxu1 %v21741_v13 }
 0x2f7   : > { %v2889_v30 = vadd.f32 %v2888_v27, %v2887_v43  ;;  %12870 = vmatpush3.bf16.msra.mxu0 %v14560_v25  ;;  %v22160_v25 = vld [vmem:[#allocation69_spill] sm:$0xff] }
 0x2f8   : > { %12871 = vmatprep.subr.bf16.mxu0 %v14561_v17 }
 0x2f9   : > { %13833 = vmatpush3.bf16.msra.mxu1 %v13832_v21  ;;  %v2890_v16 = vrot.slane %v2889_v30, 1  ;;  %v22150_v21 = vld [vmem:[#allocation28_spill] sm:$0xff] }
 0x2fa   : > { %13834 = vmatprep.subr.bf16.mxu1 %v21741_v13 }
 0x2fb   : > { %v2891_v34 = vadd.f32 %v2890_v16, %v2889_v30  ;;  %12872 = vmatpush3.bf16.msra.mxu0 %v14561_v17  ;;  %v2362_v30 = vpack.c.bf16 %v22152_v48, %v22151_v36  ;;  %v22154_v16 = vld [vmem:[#allocation81_spill] sm:$0xff] }
 0x2fc   : > { %12873 = vmatprep.subr.bf16.mxu0 %v14562_v33  ;;  %v3596_v36 = vld [vmem:[#allocation16 + $0x30] sm:$0xff]  ;;  %v3597_v48 = vld [vmem:[#allocation16 + $0x38] sm:$0xff] }
 0x2fd   : > { %13836 = vmatpush3.bf16.msra.mxu1 %v13835_v18  ;;  %v2892_v38 = vadd.f32 %v2891_v34, %v2870_v58  ;;  %v22153_v18 = vld [vmem:[#allocation78_spill] sm:$0xff] }
 0x2fe   : > { %13837 = vmatprep.subr.bf16.mxu1 %v21741_v13  ;;  %v2363_v58 = vpack.c.bf16 %v22154_v16, %v22153_v18  ;;  %v17361_v18 = vld [vmem:[%s22172_s25] ss:$0 sm:$0xff] }
 0x2ff   : > { %2893 = vst [vmem:[#allocation6] sm:$0x1] %v2892_v38  ;;  %12874 = vmatpush3.bf16.msra.mxu0 %v14562_v33 }
 0x300   : > { %12875 = vmatprep.subr.bf16.mxu0 %v14563_v40 }
 0x303   : > { %12876 = vmatpush3.bf16.msra.mxu0 %v14563_v40  ;;  %v22170_v40 = vld [vmem:[#allocation83_spill] sm:$0xff] }
 0x304   : > { %12877 = vmatprep.subr.bf16.mxu0 %v14564_v11 }
 0x306   : > { %v2910_v1 = vld [vmem:[#allocation6] sm:$0x1] }
 0x307   : > { %v2911_v47 = vmul.f32 0.00390625, %v2910_v1  ;;  %6825 = vst [vmem:[#allocation6] sm:$0x1] %v22148_v41  ;;  %12878 = vmatpush3.bf16.msra.mxu0 %v14564_v11  ;;  %v2364_v1 = vpack.c.bf16 %v22156_v39, %v22155_v62  ;;  %v22171_v11 = vld [vmem:[#allocation58_spill] sm:$0xff] }
 0x308   : > { %13843 = vmatprep.subr.bf16.mxu0 %v21741_v13 }
 0x309   : > { %12850 = vmatmul.mubr.f32.vlgmr.msra.gmra.mrb[0].mxu1 %v2911_v47 }
 0x30a   : > { %13839 = vmatpush3.bf16.msra.mxu1 %v13838_v5  ;;  %12860 = vmatprep.mubr.msk.f32.mxu1 %vm14997_vm7, %v22148_v41  ;;  %v22157_v5 = vld [vmem:[#allocation56_spill] sm:$0xff] }
 0x30b   : > { %13840 = vmatprep.subr.bf16.mxu1 %v21741_v13  ;;  %v2896_v47 = vpack.c.bf16 %v22157_v5, %v16879_v23 }
 0x30e   : > { %13842 = vmatpush3.bf16.msra.mxu1 %v13841_v14 }
 0x3dc   : > { %v2995_v35 = vpop.f32.mrb[0].mxu1 }
 0x3dd   : > { %v2996_v61 = vadd.f32 %v2995_v35, %v2928_v59  ;;  %v12851_v57 = vpop.f32.mrb[1].mxu1  ;;  %v22161_v59 = vld [vmem:[#allocation84_spill] sm:$0xff] }
 0x3de   : > { %v2366_v4 = vpack.c.bf16 %v22161_v59, %v22160_v25  ;;  %v22168_v57 = vld [vmem:[#allocation35_spill] sm:$0xff]  ;;  %v3458_v25 = vld [vmem:[#allocation2 + $0x18] sm:$0xff] }
 0x3df   : > { %vm2999_vm8 = vcmp.gt.f32.partialorder %v2996_v61, 0.0  ;;  %v3000_v46 = vmul.f32 0.2, %v2996_v61 }
 0x3e1   : > { %v3001_v45 = vsel %vm2999_vm8, %v2996_v61, %v3000_v46  ;;  %v22169_v46 = vld [vmem:[#allocation53_spill] sm:$0xff] }
 0x3e2   : > { %12861 = vmatmul.mubr.msk.f32.vlgmr.msra.gmra.mrb[2].mxu1 %vm3007_vm9, %v3001_v45  ;;  %v2894_v45 = vpack.c.bf16 %v22169_v46, %v22168_v57  ;;  %v3459_v46 = vld [vmem:[#allocation2 + $0x20] sm:$0xff] }
 0x4b5   : > { %v3077_v3 = vpop.f32.mrb[2].mxu1 }
 0x4b6   : > { %v3078_v0 = vadd.f32 %v3077_v3, %v3006_v44  ;;  %v12862_v8 = vpop.f32.mrb[3].mxu1  ;;  %v2895_v44 = vpack.c.bf16 %v22171_v11, %v22170_v40 }
 0x4b7   : > { %v3591_v8 = vld [vmem:[#allocation16 + $0x8] sm:$0xff] }
 0x4b8   : > { %v11669_v7 = vmul.f32 -1.442695, %v3078_v0  ;;  %v3590_v0 = vld [vmem:[#allocation16] sm:$0xff] }
 0x4ba   : > { %14649 = vpow2.f32 %v11669_v7  ;;  %v13844_v7 = vpack.c.bf16 %v3591_v8, %v3590_v0  ;;  %v3461_v0 = vld [vmem:[#allocation2 + $0x30] sm:$0xff] }
 0x4c4   : > { %v14650_v29 = vpop.eup %14649 }
 0x4c5   : > { %v3084_v42 = vadd.f32 1.0, %v14650_v29  ;;  %v3592_v29 = vld [vmem:[#allocation16 + $0x10] sm:$0xff] }
 0x4c7   : > { %14651 = vrcp.f32 %v3084_v42  ;;  %v3593_v42 = vld [vmem:[#allocation16 + $0x18] sm:$0xff] }
 0x4d1   : > { %v14652_v51 = vpop.eup %14651 }
 0x4d2   : > { %v3103_v60 = vpack.c.bf16 %v14652_v51, %v14652_v51  ;;  %v13847_v51 = vpack.c.bf16 %v3593_v42, %v3592_v29  ;;  %v3460_v29 = vld [vmem:[#allocation2 + $0x28] sm:$0xff] }
 0x4d4   : > { %v3105_v43 = vpack.i.b16 %v3103_v60, %v3103_v60  ;;  %v3594_v60 = vld [vmem:[#allocation16 + $0x20] sm:$0xff] }
 0x4d6   : > { %v3110_v27 = vrot.slane %v3105_v43, %v22150_v21  ;;  %v3595_v43 = vld [vmem:[#allocation16 + $0x28] sm:$0xff] }
 0x4d8   : > { %v3111_v34 = vmul.bf16 %v3110_v27, %v2362_v30  ;;  %v3112_v38 = vmul.bf16 %v3110_v27, %v2363_v58  ;;  %v3113_v20 = vmul.bf16 %v3110_v27, %v2364_v1  ;;  %v3121_v6 = vmul.bf16 %v3110_v27, %v2896_v47 }
 0x4d9   : > { %v3122_v14 = vmul.bf16 %v3110_v27, %v2897_v28  ;;  %v3123_v15 = vmul.bf16 %v3110_v27, %v2898_v9  ;;  %v3124_v37 = vmul.bf16 %v3110_v27, %v2899_v50  ;;  %v3125_v23 = vmul.bf16 %v3110_v27, %v2900_v55 }
 0x4da   : > { %12879 = vmatprep.mubr.bf16.mxu0 %v3111_v34  ;;  %v3126_v32 = vmul.bf16 %v3110_v27, %v2901_v49  ;;  %v2365_v28 = vpack.c.bf16 %v22159_v19, %v22158_v31  ;;  %v3115_v9 = vmul.bf16 %v3110_v27, %v2366_v4  ;;  %v2367_v50 = vpack.c.bf16 %v22163_v2, %v22162_v10  ;;  %v22167_v49 = vld [vmem:[#allocation62_spill] sm:$0xff]  ;;  %v3456_v31 = vld [vmem:[#allocation2 + $0x8] sm:$0xff] }
 0x4db   : > { %12880 = vmatmul.mubr.bf16.vlgmr.msra.gmra.mrb[32].mxu0 %v3112_v38  ;;  %v2368_v55 = vpack.c.bf16 %v22165_v53, %v22164_v52  ;;  %v2369_v61 = vpack.c.bf16 %v22167_v49, %v22166_v24  ;;  %v3119_v33 = vmul.bf16 %v3110_v27, %v2894_v45  ;;  %v3120_v3 = vmul.bf16 %v3110_v27, %v2895_v44 }
 0x4dc   : > { %12883 = vmatprep.mubr.bf16.mxu0 %v3113_v20  ;;  %v3114_v56 = vmul.bf16 %v3110_v27, %v2365_v28  ;;  %v3116_v35 = vmul.bf16 %v3110_v27, %v2367_v50  ;;  %13845 = vmatpush3.bf16.msra.mxu0 %v13844_v7  ;;  %v13853_v30 = vpack.c.bf16 %v3597_v48, %v3596_v36  ;;  %v3455_v20 = vld [vmem:[#allocation2] sm:$0xff] }
 0x4dd   : > { %v3117_v26 = vmul.bf16 %v3110_v27, %v2368_v55  ;;  %v3118_v17 = vmul.bf16 %v3110_v27, %v2369_v61  ;;  %13846 = vmatprep.subr.bf16.mxu0 %v21741_v13  ;;  %v13850_v27 = vpack.c.bf16 %v3595_v43, %v3594_v60  ;;  %v3462_v60 = vld [vmem:[#allocation2 + $0x38] sm:$0xff] }
 0x4e0   : > { %13848 = vmatpush3.bf16.msra.mxu0 %v13847_v51 }
 0x4e1   : > { %13849 = vmatprep.subr.bf16.mxu0 %v21741_v13 }
 0x4e3   : > { %12884 = vmatmul.mubr.bf16.gmra.mrb[36].mxu0 %v3114_v56 }
 0x4e4   : > { %12887 = vmatprep.mubr.bf16.mxu0 %v3115_v9  ;;  %13851 = vmatpush3.bf16.msra.mxu0 %v13850_v27 }
 0x4e5   : > { %13852 = vmatprep.subr.bf16.mxu0 %v21741_v13 }
 0x4e8   : > { %13854 = vmatpush3.bf16.msra.mxu0 %v13853_v30 }
 0x4e9   : > { %12930 = vmatprep.subr.mxu0 %v22148_v41 }
 0x4eb   : > { %12888 = vmatmul.mubr.bf16.gmra.mrb[40].mxu0 %v3116_v35 }
 0x4ec   : > { %12891 = vmatprep.mubr.bf16.mxu0 %v3117_v26 }
 0x4f3   : > { %12892 = vmatmul.mubr.bf16.gmra.mrb[44].mxu0 %v3118_v17 }
 0x4f4   : > { %12895 = vmatprep.mubr.bf16.mxu0 %v3119_v33 }
 0x4fb   : > { %12896 = vmatmul.mubr.bf16.gmra.mrb[48].mxu0 %v3120_v3 }
 0x4fc   : > { %12899 = vmatprep.mubr.bf16.mxu0 %v3121_v6 }
 0x503   : > { %12900 = vmatmul.mubr.bf16.gmra.mrb[52].mxu0 %v3122_v14 }
 0x504   : > { %12903 = vmatprep.mubr.bf16.mxu0 %v3123_v15 }
 0x50b   : > { %12904 = vmatmul.mubr.bf16.gmra.mrb[56].mxu0 %v3124_v37  ;;  %v3457_v37 = vld [vmem:[#allocation2 + $0x10] sm:$0xff] }
 0x50c   : > { %12907 = vmatprep.mubr.bf16.mxu0 %v3125_v23 }
 0x513   : > { %12908 = vmatmul.mubr.bf16.gmra.mrb[60].mxu0 %v3126_v32 }
 0x514   : > { %12927 = vmatprep.mubr.msk.f32.mxu0 %vm14997_vm7, %v22148_v41 }
 0x5ae   : > { %v12881_v16 = vpop.f32.mrb[32].mxu0 }
 0x5af   : > { %v3241_v58 = vadd.f32 %v12881_v16, %v17361_v18  ;;  %v3232_v34 = vpop.f32.mrb[33].mxu0 }
 0x5b0   : > { %v3233_v38 = vadd.f32 %v17361_v18, %v3232_v34  ;;  %v12882_v62 = vpop.f32.mrb[34].mxu0 }
 0x5b1   : > { %vm3361_vm10 = vcmp.gt.f32.partialorder %v3241_v58, 0.0  ;;  %v3393_v39 = vmul.f32 0.2, %v3241_v58  ;;  %v3244_v1 = vadd.f32 %v12882_v62, %v17361_v18  ;;  %v3235_v5 = vpop.f32.mrb[35].mxu0 }
 0x5b2   : > { %vm3359_vm11 = vcmp.gt.f32.partialorder %v3233_v38, 0.0  ;;  %v3391_v47 = vmul.f32 0.2, %v3233_v38  ;;  %v3236_v6 = vadd.f32 %v17361_v18, %v3235_v5 }
 0x5b3   : > { %vm3362_vm12 = vcmp.gt.f32.partialorder %v3244_v1, 0.0  ;;  %v3394_v14 = vmul.f32 0.2, %v3244_v1  ;;  %v3425_v15 = vsel %vm3361_vm10, %v3241_v58, %v3393_v39 }
 0x5b4   : > { %v3423_v23 = vsel %vm3359_vm11, %v3233_v38, %v3391_v47  ;;  %vm3360_vm13 = vcmp.gt.f32.partialorder %v3236_v6, 0.0  ;;  %v3392_v32 = vmul.f32 0.2, %v3236_v6  ;;  %v17369_v56 = vadd.f32 %v3457_v37, %v3425_v15 }
 0x5b5   : > { %v17367_v19 = vadd.f32 %v3455_v20, %v3423_v23  ;;  %v3426_v28 = vsel %vm3362_vm12, %v3244_v1, %v3394_v14  ;;  %v3463_v14 = vld [vmem:[#allocation2 + $0x40] sm:$0xff] }
 0x5b6   : > { %v3424_v59 = vsel %vm3360_vm13, %v3236_v6, %v3392_v32  ;;  %v12885_v4 = vpop.f32.mrb[36].mxu0  ;;  %v17376_v52 = vadd.f32 %v3458_v25, %v3426_v28  ;;  %v3522_v17 = vsel %vm1333_vm0, %v17369_v56, 0.0  ;;  %v3465_v32 = vld [vmem:[#allocation2 + $0x50] sm:$0xff] }
 0x5b7   : > { %v17371_v9 = vadd.f32 %v3456_v31, %v3424_v59  ;;  %v3257_v10 = vadd.f32 %v12885_v4, %v17361_v18  ;;  %v3248_v2 = vpop.f32.mrb[37].mxu0  ;;  %v3519_v50 = vsel %vm1333_vm0, %v17367_v19, 0.0  ;;  %v3464_v4 = vld [vmem:[#allocation2 + $0x48] sm:$0xff] }
 0x5b8   : > { %v3249_v53 = vadd.f32 %v17361_v18, %v3248_v2  ;;  %v12886_v55 = vpop.f32.mrb[38].mxu0  ;;  %v3524_v44 = vsel %vm1333_vm0, %v17376_v52, 0.0 }
 0x5b9   : > { %v3520_v35 = vsel %vm1333_vm0, %v17371_v9, 0.0  ;;  %vm3365_vm14 = vcmp.gt.f32.partialorder %v3257_v10, 0.0  ;;  %v3397_v26 = vmul.f32 0.2, %v3257_v10  ;;  %v3260_v24 = vadd.f32 %v12886_v55, %v17361_v18  ;;  %v3251_v49 = vpop.f32.mrb[39].mxu0 }
 0x5ba   : > { %v3521_v61 = vadd.f32 %v3520_v35, %v3519_v50  ;;  %vm3363_vm15 = vcmp.gt.f32.partialorder %v3249_v53, 0.0  ;;  %v3395_v57 = vmul.f32 0.2, %v3249_v53  ;;  %v3252_v45 = vadd.f32 %v17361_v18, %v3251_v49 }
 0x5bb   : > { %vm3366_vm3 = vcmp.gt.f32.partialorder %v3260_v24, 0.0  ;;  %v3398_v33 = vmul.f32 0.2, %v3260_v24  ;;  %v3429_v3 = vsel %vm3365_vm14, %v3257_v10, %v3397_v26 }
 0x5bc   : > { %v3523_v40 = vadd.f32 %v3522_v17, %v3521_v61  ;;  %v3427_v11 = vsel %vm3363_vm15, %v3249_v53, %v3395_v57  ;;  %vm3364_vm4 = vcmp.gt.f32.partialorder %v3252_v45, 0.0  ;;  %v3396_v7 = vmul.f32 0.2, %v3252_v45  ;;  %v3466_v53 = vld [vmem:[#allocation2 + $0x58] sm:$0xff] }
 0x5bd   : > { %v17388_v8 = vadd.f32 %v3459_v46, %v3427_v11  ;;  %v3430_v51 = vsel %vm3366_vm3, %v3260_v24, %v3398_v33  ;;  %v17393_v16 = vadd.f32 %v3461_v0, %v3429_v3 }
 0x5be   : > { %v3525_v42 = vadd.f32 %v3524_v44, %v3523_v40  ;;  %v12889_v43 = vpop.f32.mrb[40].mxu0  ;;  %v3428_v36 = vsel %vm3364_vm4, %v3252_v45, %v3396_v7  ;;  %v17398_v39 = vadd.f32 %v3462_v60, %v3430_v51 }
 0x5bf   : > { %v3526_v27 = vsel %vm1333_vm0, %v17388_v8, 0.0  ;;  %v3273_v48 = vadd.f32 %v12889_v43, %v17361_v18  ;;  %v3264_v30 = vpop.f32.mrb[41].mxu0  ;;  %v17395_v34 = vadd.f32 %v3460_v29, %v3428_v36  ;;  %v3530_v28 = vsel %vm1333_vm0, %v17393_v16, 0.0  ;;  %v3467_v29 = vld [vmem:[#allocation2 + $0x60] sm:$0xff] }
 0x5c0   : > { %v3527_v58 = vadd.f32 %v3526_v27, %v3525_v42  ;;  %v3265_v38 = vadd.f32 %v17361_v18, %v3264_v30  ;;  %v12890_v62 = vpop.f32.mrb[42].mxu0  ;;  %v3532_v55 = vsel %vm1333_vm0, %v17398_v39, 0.0 }
 0x5c1   : > { %vm3369_vm5 = vcmp.gt.f32.partialorder %v3273_v48, 0.0  ;;  %v3401_v1 = vmul.f32 0.2, %v3273_v48  ;;  %v3276_v5 = vadd.f32 %v12890_v62, %v17361_v18  ;;  %v3267_v47 = vpop.f32.mrb[43].mxu0  ;;  %v3528_v20 = vsel %vm1333_vm0, %v17395_v34, 0.0 }
 0x5c2   : > { %vm3367_vm6 = vcmp.gt.f32.partialorder %v3265_v38, 0.0  ;;  %v3399_v6 = vmul.f32 0.2, %v3265_v38  ;;  %v3268_v15 = vadd.f32 %v17361_v18, %v3267_v47  ;;  %v3529_v37 = vadd.f32 %v3528_v20, %v3527_v58  ;;  %v3469_v58 = vld [vmem:[#allocation2 + $0x70] sm:$0xff]  ;;  %v3470_v20 = vld [vmem:[#allocation2 + $0x78] sm:$0xff] }
 0x5c3   : > { %v3433_v23 = vsel %vm3369_vm5, %v3273_v48, %v3401_v1  ;;  %vm3370_vm8 = vcmp.gt.f32.partialorder %v3276_v5, 0.0  ;;  %v3402_v31 = vmul.f32 0.2, %v3276_v5  ;;  %v3468_v1 = vld [vmem:[#allocation2 + $0x68] sm:$0xff] }
 0x5c4   : > { %v3431_v25 = vsel %vm3367_vm6, %v3265_v38, %v3399_v6  ;;  %vm3368_vm10 = vcmp.gt.f32.partialorder %v3268_v15, 0.0  ;;  %v3400_v59 = vmul.f32 0.2, %v3268_v15  ;;  %v3531_v10 = vadd.f32 %v3530_v28, %v3529_v37 }
 0x5c5   : > { %v17406_v2 = vadd.f32 %v3463_v14, %v3431_v25  ;;  %v3434_v50 = vsel %vm3370_vm8, %v3276_v5, %v3402_v31  ;;  %v17410_v35 = vadd.f32 %v3465_v32, %v3433_v23 }
 0x5c6   : > { %v3432_v26 = vsel %vm3368_vm10, %v3268_v15, %v3400_v59  ;;  %v12893_v24 = vpop.f32.mrb[44].mxu0  ;;  %v3533_v49 = vadd.f32 %v3532_v55, %v3531_v10  ;;  %v17417_v17 = vadd.f32 %v3466_v53, %v3434_v50 }
 0x5c7   : > { %v3534_v61 = vsel %vm1333_vm0, %v17406_v2, 0.0  ;;  %v17414_v57 = vadd.f32 %v3464_v4, %v3432_v26  ;;  %v3289_v46 = vadd.f32 %v12893_v24, %v17361_v18  ;;  %v3280_v45 = vpop.f32.mrb[45].mxu0  ;;  %v3538_v60 = vsel %vm1333_vm0, %v17410_v35, 0.0 }
 0x5c8   : > { %v3281_v33 = vadd.f32 %v17361_v18, %v3280_v45  ;;  %v12894_v40 = vpop.f32.mrb[46].mxu0  ;;  %v3535_v11 = vadd.f32 %v3534_v61, %v3533_v49  ;;  %v3540_v5 = vsel %vm1333_vm0, %v17417_v17, 0.0  ;;  %v3471_v61 = vld [vmem:[#allocation2 + $0x80] sm:$0xff] }
 0x5c9   : > { %v3536_v44 = vsel %vm1333_vm0, %v17414_v57, 0.0  ;;  %vm3373_vm11 = vcmp.gt.f32.partialorder %v3289_v46, 0.0  ;;  %v3405_v3 = vmul.f32 0.2, %v3289_v46  ;;  %v3283_v0 = vpop.f32.mrb[47].mxu0  ;;  %v3292_v42 = vadd.f32 %v12894_v40, %v17361_v18 }
 0x5ca   : > { %vm3371_vm12 = vcmp.gt.f32.partialorder %v3281_v33, 0.0  ;;  %v3403_v7 = vmul.f32 0.2, %v3281_v33  ;;  %v3284_v51 = vadd.f32 %v17361_v18, %v3283_v0  ;;  %v3537_v43 = vadd.f32 %v3536_v44, %v3535_v11 }
 0x5cb   : > { %v3437_v27 = vsel %vm3373_vm11, %v3289_v46, %v3405_v3  ;;  %vm3374_vm13 = vcmp.gt.f32.partialorder %v3292_v42, 0.0  ;;  %v3406_v48 = vmul.f32 0.2, %v3292_v42 }
 0x5cc   : > { %v3435_v36 = vsel %vm3371_vm12, %v3281_v33, %v3403_v7  ;;  %v3539_v30 = vadd.f32 %v3538_v60, %v3537_v43  ;;  %vm3372_vm14 = vcmp.gt.f32.partialorder %v3284_v51, 0.0  ;;  %v3404_v62 = vmul.f32 0.2, %v3284_v51  ;;  %v3473_v33 = vld [vmem:[#allocation2 + $0x90] sm:$0xff] }
 0x5cd   : > { %v17426_v38 = vadd.f32 %v3467_v29, %v3435_v36  ;;  %v3438_v47 = vsel %vm3374_vm13, %v3292_v42, %v3406_v48  ;;  %v17432_v32 = vadd.f32 %v3469_v58, %v3437_v27  ;;  %v3472_v42 = vld [vmem:[#allocation2 + $0x88] sm:$0xff]  ;;  %v3474_v58 = vld [vmem:[#allocation2 + $0x98] sm:$0xff] }
 0x5ce   : > { %v12897_v6 = vpop.f32.mrb[48].mxu0  ;;  %v3541_v14 = vadd.f32 %v3540_v5, %v3539_v30  ;;  %v3436_v37 = vsel %vm3372_vm14, %v3284_v51, %v3404_v62  ;;  %v17438_v10 = vadd.f32 %v3470_v20, %v3438_v47 }
 0x5cf   : > { %v3542_v15 = vsel %vm1333_vm0, %v17426_v38, 0.0  ;;  %v3296_v23 = vpop.f32.mrb[49].mxu0  ;;  %v17434_v31 = vadd.f32 %v3468_v1, %v3436_v37  ;;  %v3305_v28 = vadd.f32 %v12897_v6, %v17361_v18  ;;  %v3546_v46 = vsel %vm1333_vm0, %v17432_v32, 0.0  ;;  %v3475_v37 = vld [vmem:[#allocation2 + $0xa0] sm:$0xff] }
 0x5d0   : > { %v3297_v25 = vadd.f32 %v17361_v18, %v3296_v23  ;;  %v12898_v59 = vpop.f32.mrb[50].mxu0  ;;  %v3543_v4 = vadd.f32 %v3542_v15, %v3541_v14  ;;  %v3548_v0 = vsel %vm1333_vm0, %v17438_v10, 0.0 }
 0x5d1   : > { %v3308_v50 = vadd.f32 %v12898_v59, %v17361_v18  ;;  %v3299_v53 = vpop.f32.mrb[51].mxu0  ;;  %v3544_v55 = vsel %vm1333_vm0, %v17434_v31, 0.0  ;;  %vm3377_vm15 = vcmp.gt.f32.partialorder %v3305_v28, 0.0  ;;  %v3409_v26 = vmul.f32 0.2, %v3305_v28 }
 0x5d2   : > { %vm3375_vm3 = vcmp.gt.f32.partialorder %v3297_v25, 0.0  ;;  %v3545_v24 = vadd.f32 %v3544_v55, %v3543_v4  ;;  %v3407_v49 = vmul.f32 0.2, %v3297_v25  ;;  %v3300_v11 = vadd.f32 %v17361_v18, %v3299_v53 }
 0x5d3   : > { %v3441_v45 = vsel %vm3377_vm15, %v3305_v28, %v3409_v26  ;;  %v3410_v40 = vmul.f32 0.2, %v3308_v50  ;;  %vm3378_vm4 = vcmp.gt.f32.partialorder %v3308_v50, 0.0 }
 0x5d4   : > { %v3547_v44 = vadd.f32 %v3546_v46, %v3545_v24  ;;  %v3439_v3 = vsel %vm3375_vm3, %v3297_v25, %v3407_v49  ;;  %vm3376_vm5 = vcmp.gt.f32.partialorder %v3300_v11, 0.0  ;;  %v3408_v29 = vmul.f32 0.2, %v3300_v11  ;;  %v3476_v49 = vld [vmem:[#allocation2 + $0xa8] sm:$0xff] }
 0x5d5   : > { %v17448_v7 = vadd.f32 %v3471_v61, %v3439_v3  ;;  %v17450_v60 = vadd.f32 %v3473_v33, %v3441_v45  ;;  %v3442_v30 = vsel %vm3378_vm4, %v3308_v50, %v3410_v40  ;;  %v3477_v45 = vld [vmem:[#allocation2 + $0xb0] sm:$0xff] }
 0x5d6   : > { %v12901_v51 = vpop.f32.mrb[52].mxu0  ;;  %v3549_v43 = vadd.f32 %v3548_v0, %v3547_v44  ;;  %v3440_v62 = vsel %vm3376_vm5, %v3300_v11, %v3408_v29  ;;  %v17460_v25 = vadd.f32 %v3474_v58, %v3442_v30 }
 0x5d7   : > { %v3321_v27 = vadd.f32 %v12901_v51, %v17361_v18  ;;  %v3312_v36 = vpop.f32.mrb[53].mxu0  ;;  %v3550_v48 = vsel %vm1333_vm0, %v17448_v7, 0.0  ;;  %v17456_v20 = vadd.f32 %v3472_v42, %v3440_v62  ;;  %v3554_v4 = vsel %vm1333_vm0, %v17450_v60, 0.0  ;;  %v3478_v51 = vld [vmem:[#allocation2 + $0xb8] sm:$0xff] }
 0x5d8   : > { %v3313_v1 = vadd.f32 %v17361_v18, %v3312_v36  ;;  %v12902_v5 = vpop.f32.mrb[54].mxu0  ;;  %v3551_v47 = vadd.f32 %v3550_v48, %v3549_v43  ;;  %v3556_v40 = vsel %vm1333_vm0, %v17460_v25, 0.0 }
 0x5d9   : > { %v3413_v6 = vmul.f32 0.2, %v3321_v27  ;;  %v3315_v14 = vpop.f32.mrb[55].mxu0  ;;  %v3324_v23 = vadd.f32 %v12902_v5, %v17361_v18  ;;  %v3552_v59 = vsel %vm1333_vm0, %v17456_v20, 0.0  ;;  %vm3381_vm8 = vcmp.gt.f32.partialorder %v3321_v27, 0.0 }
 0x5da   : > { %vm3379_vm6 = vcmp.gt.f32.partialorder %v3313_v1, 0.0  ;;  %v3411_v15 = vmul.f32 0.2, %v3313_v1  ;;  %v3316_v28 = vadd.f32 %v17361_v18, %v3315_v14  ;;  %v3553_v50 = vadd.f32 %v3552_v59, %v3551_v47  ;;  %v3479_v14 = vld [vmem:[#allocation2 + $0xc0] sm:$0xff] }
 0x5db   : > { %vm3382_vm10 = vcmp.gt.f32.partialorder %v3324_v23, 0.0  ;;  %v3414_v26 = vmul.f32 0.2, %v3324_v23  ;;  %v3445_v46 = vsel %vm3381_vm8, %v3321_v27, %v3413_v6  ;;  %vm3679_vm8 = vcmask 1043456  }
 0x5dc   : > { %v3443_v53 = vsel %vm3379_vm6, %v3313_v1, %v3411_v15  ;;  %vm3380_vm11 = vcmp.gt.f32.partialorder %v3316_v28, 0.0  ;;  %v3412_v24 = vmul.f32 0.2, %v3316_v28  ;;  %v3555_v61 = vadd.f32 %v3554_v4, %v3553_v50 }
 0x5dd   : > { %v17466_v55 = vadd.f32 %v3475_v37, %v3443_v53  ;;  %v3446_v42 = vsel %vm3382_vm10, %v3324_v23, %v3414_v26  ;;  %v17477_v48 = vadd.f32 %v3477_v45, %v3445_v46  ;;  %v3481_v53 = vld [vmem:[#allocation2 + $0xd0] sm:$0xff]  ;;  %v3480_v46 = vld [vmem:[#allocation2 + $0xc8] sm:$0xff] }
 0x5de   : > { %v12905_v33 = vpop.f32.mrb[56].mxu0  ;;  %v3444_v44 = vsel %vm3380_vm11, %v3316_v28, %v3412_v24  ;;  %v3557_v29 = vadd.f32 %v3556_v40, %v3555_v61  ;;  %v17482_v47 = vadd.f32 %v3478_v51, %v3446_v42  ;;  %v3482_v42 = vld [vmem:[#allocation2 + $0xd8] sm:$0xff]  ;;  %vm3675_vm11 = vcmask 31744  }
 0x5df   : > { %v3558_v11 = vsel %vm1333_vm0, %v17466_v55, 0.0  ;;  %v3337_v3 = vadd.f32 %v12905_v33, %v17361_v18  ;;  %v3328_v0 = vpop.f32.mrb[57].mxu0  ;;  %v17474_v43 = vadd.f32 %v3476_v49, %v3444_v44  ;;  %v3562_v23 = vsel %vm1333_vm0, %v17477_v48, 0.0 }
 0x5e0   : > { %v3329_v27 = vadd.f32 %v17361_v18, %v3328_v0  ;;  %v12906_v36 = vpop.f32.mrb[58].mxu0  ;;  %v3559_v62 = vadd.f32 %v3558_v11, %v3557_v29  ;;  %v3564_v49 = vsel %vm1333_vm0, %v17482_v47, 0.0 }
 0x5e1   : > { %v3340_v30 = vadd.f32 %v12906_v36, %v17361_v18  ;;  %v3331_v58 = vpop.f32.mrb[59].mxu0  ;;  %v3560_v1 = vsel %vm1333_vm0, %v17474_v43, 0.0  ;;  %v3417_v5 = vmul.f32 0.2, %v3337_v3  ;;  %vm3385_vm13 = vcmp.gt.f32.partialorder %v3337_v3, 0.0 }
 0x5e2   : > { %vm3383_vm12 = vcmp.gt.f32.partialorder %v3329_v27, 0.0  ;;  %v3415_v6 = vmul.f32 0.2, %v3329_v27  ;;  %v3561_v15 = vadd.f32 %v3560_v1, %v3559_v62  ;;  %v3332_v37 = vadd.f32 %v17361_v18, %v3331_v58 }
 0x5e3   : > { %v3418_v59 = vmul.f32 0.2, %v3340_v30  ;;  %v3449_v50 = vsel %vm3385_vm13, %v3337_v3, %v3417_v5  ;;  %vm3386_vm14 = vcmp.gt.f32.partialorder %v3340_v30, 0.0  ;;  %v3483_v5 = vld [vmem:[#allocation2 + $0xe0] sm:$0xff] }
 0x5e4   : > { %v3447_v28 = vsel %vm3383_vm12, %v3329_v27, %v3415_v6  ;;  %v3563_v4 = vadd.f32 %v3562_v23, %v3561_v15  ;;  %vm3384_vm15 = vcmp.gt.f32.partialorder %v3332_v37, 0.0  ;;  %v3416_v61 = vmul.f32 0.2, %v3332_v37 }
 0x5e5   : > { %v17487_v26 = vadd.f32 %v3479_v14, %v3447_v28  ;;  %v17495_v0 = vadd.f32 %v3481_v53, %v3449_v50  ;;  %v3450_v29 = vsel %vm3386_vm14, %v3340_v30, %v3418_v59  ;;  %v3484_v53 = vld [vmem:[#allocation2 + $0xe8] sm:$0xff] }
 0x5e6   : > { %v12909_v24 = vpop.f32.mrb[60].mxu0  ;;  %v3565_v40 = vadd.f32 %v3564_v49, %v3563_v4  ;;  %v3448_v51 = vsel %vm3384_vm15, %v3332_v37, %v3416_v61  ;;  %v17501_v15 = vadd.f32 %v3482_v42, %v3450_v29  ;;  %v3485_v49 = vld [vmem:[#allocation2 + $0xf0] sm:$0xff] }
 0x5e7   : > { %v3353_v45 = vadd.f32 %v12909_v24, %v17361_v18  ;;  %v3344_v33 = vpop.f32.mrb[61].mxu0  ;;  %v3566_v11 = vsel %vm1333_vm0, %v17487_v26, 0.0  ;;  %v17498_v62 = vadd.f32 %v3480_v46, %v3448_v51  ;;  %v3570_v4 = vsel %vm1333_vm0, %v17495_v0, 0.0 }
 0x5e8   : > { %v3345_v44 = vadd.f32 %v17361_v18, %v3344_v33  ;;  %v12910_v3 = vpop.f32.mrb[62].mxu0  ;;  %v3567_v58 = vadd.f32 %v3566_v11, %v3565_v40  ;;  %v3572_v61 = vsel %vm1333_vm0, %v17501_v15, 0.0 }
 0x5e9   : > { %v3356_v27 = vadd.f32 %v12910_v3, %v17361_v18  ;;  %v3347_v36 = vpop.f32.mrb[63].mxu0  ;;  %v3421_v6 = vmul.f32 0.2, %v3353_v45  ;;  %v3568_v23 = vsel %vm1333_vm0, %v17498_v62, 0.0  ;;  %vm3389_vm4 = vcmp.gt.f32.partialorder %v3353_v45, 0.0 }
 0x5ea   : > { %vm3387_vm3 = vcmp.gt.f32.partialorder %v3345_v44, 0.0  ;;  %v3419_v1 = vmul.f32 0.2, %v3345_v44  ;;  %v3348_v14 = vadd.f32 %v17361_v18, %v3347_v36  ;;  %v3569_v37 = vadd.f32 %v3568_v23, %v3567_v58 }
 0x5eb   : > { %v3422_v59 = vmul.f32 0.2, %v3356_v27  ;;  %vm3390_vm6 = vcmp.gt.f32.partialorder %v3356_v27, 0.0  ;;  %v3453_v18 = vsel %vm3389_vm4, %v3353_v45, %v3421_v6 }
 0x5ec   : > { %v3451_v30 = vsel %vm3387_vm3, %v3345_v44, %v3419_v1  ;;  %vm3388_vm5 = vcmp.gt.f32.partialorder %v3348_v14, 0.0  ;;  %v3420_v50 = vmul.f32 0.2, %v3348_v14  ;;  %v3571_v24 = vadd.f32 %v3570_v4, %v3569_v37  ;;  %v3486_v44 = vld [vmem:[#allocation2 + $0xf8] sm:$0xff] }
 0x5ed   : > { %v17505_v28 = vadd.f32 %v3483_v5, %v3451_v30  ;;  %v3454_v11 = vsel %vm3390_vm6, %v3356_v27, %v3422_v59  ;;  %v17515_v29 = vadd.f32 %v3485_v49, %v3453_v18 }
 0x5ee   : > { %v3452_v33 = vsel %vm3388_vm5, %v3348_v14, %v3420_v50  ;;  %v3573_v40 = vadd.f32 %v3572_v61, %v3571_v24  ;;  %v17519_v45 = vadd.f32 %v3486_v44, %v3454_v11  ;;  %v3674_v50 = vld [vmem:[#allocation18] sm:$0xf] }
 0x5ef   : > { %v3574_v46 = vsel %vm1333_vm0, %v17505_v28, 0.0  ;;  %v17513_v3 = vadd.f32 %v3484_v53, %v3452_v33  ;;  %v3578_v58 = vsel %vm1333_vm0, %v17515_v29, 0.0  ;;  %v14565_v61 = vld [vmem:[%s22173_s5 + $0x60] sm:$0xff]   ;;  %v14567_v33 = vld [vmem:[%s22173_s5 + $0x70] sm:$0xff]  }
 0x5f0   : > { %v3575_v42 = vadd.f32 %v3574_v46, %v3573_v40  ;;  %v3580_v5 = vsel %vm1333_vm0, %v17519_v45, 0.0  ;;  %v14566_v46 = vld [vmem:[%s22173_s5 + $0x68] sm:$0xff]   ;;  %v14568_v40 = vld [vmem:[%s22173_s5 + $0x78] sm:$0xff]   ;;  %v17545_v11 = vld [vmem:[%s22173_s5] sm:$0xff]  }
 0x5f1   : > { %v3576_v51 = vsel %vm1333_vm0, %v17513_v3, 0.0 }
 0x5f2   : > { %v3577_v36 = vadd.f32 %v3576_v51, %v3575_v42 }
 0x5f4   : > { %v3579_v1 = vadd.f32 %v3578_v58, %v3577_v36 }
 0x5f6   : > { %v3581_v27 = vadd.f32 %v3580_v5, %v3579_v1 }
 0x5f8   : > { %v3582_v6 = vrot.slane %v3581_v27, 4 }
 0x5fa   : > { %v3583_v14 = vadd.f32 %v3582_v6, %v3581_v27 }
 0x5fc   : > { %v3584_v23 = vrot.slane %v3583_v14, 2 }
 0x5fe   : > { %v3585_v30 = vadd.f32 %v3584_v23, %v3583_v14 }
 0x600   : > { %v3586_v37 = vrot.slane %v3585_v30, 1 }
 0x602   : > { %v3587_v59 = vadd.f32 %v3586_v37, %v3585_v30 }
 0x604   : > { %v3589_v4 = vmul.f32 0.00390625, %v3587_v59 }
 0x606   : > { %12928 = vmatmul.mubr.msk.f32.vlgmr.msra.gmra.mrb[64].mxu0 %vm1333_vm0, %v3589_v4 }
 0x607   : > { %12932 = vmatprep.mubr.msk.f32.mxu0 %vm14997_vm7, %v22148_v41  ;;  %12931 = vmatpush3.msk.msra.mxu0 %vm3679_vm8, %v3674_v50 }
 0x608   : > { %12935 = vmatprep.subr.bf16.mxu0 %v14565_v61 }
 0x6d9   : > { %v3667_v53 = vpop.f32.mrb[64].mxu0 }
 0x6da   : > { %vm3671_vm10 = vcmp.gt.f32.partialorder %v3667_v53, 0.0  ;;  %v3672_v24 = vmul.f32 0.2, %v3667_v53  ;;  %v12929_v18 = vpop.f32.mrb[65].mxu0 }
 0x6dc   : > { %v3673_v49 = vsel %vm3671_vm10, %v3667_v53, %v3672_v24 }
 0x6dd   : > { %12933 = vmatmul.mubr.msk.f32.vlgmr.msra.gmra.mrb[66].mxu0 %vm3675_vm11, %v3673_v49 }
 0x6de   : > { %12936 = vmatpush3.bf16.msra.mxu0 %v14565_v61 }
 0x6df   : > { %12937 = vmatprep.subr.bf16.mxu0 %v14566_v46 }
 0x6e2   : > { %12938 = vmatpush3.bf16.msra.mxu0 %v14566_v46 }
 0x6e3   : > { %12939 = vmatprep.subr.bf16.mxu0 %v14567_v33 }
 0x6e6   : > { %12940 = vmatpush3.bf16.msra.mxu0 %v14567_v33 }
 0x6e7   : > { %12941 = vmatprep.subr.bf16.mxu0 %v14568_v40 }
 0x6ea   : > { %12942 = vmatpush3.bf16.msra.mxu0 %v14568_v40 }
 0x6eb   : > { %12975 = vmatprep.subr.bf16.mxu0 %v17545_v11 }
 0x7b0   : > { %v3749_v44 = vpop.f32.mrb[66].mxu0 }
 0x7b1   : > { %v11682_v42 = vmul.f32 -1.442695, %v3749_v44  ;;  %v12934_v51 = vpop.f32.mrb[67].mxu0 }
 0x7b3   : > { %14653 = vpow2.f32 %v11682_v42 }
 0x7bd   : > { %v14654_v36 = vpop.eup %14653 }
 0x7be   : > { %v3756_v58 = vadd.f32 1.0, %v14654_v36  ;;  %v22174_v36 = vld [vmem:[#allocation31_spill] sm:$0xff] }
 0x7c0   : > { %14655 = vrcp.f32 %v3756_v58 }
 0x7ca   : > { %v14656_v1 = vpop.eup %14655 }
 0x7cb   : > { %v3762_v5 = vrot.slane %v14656_v1, %v22150_v21  ;;  %v22175_v1 = vld [vmem:[#allocation34_spill] sm:$0xff] }
 0x7cd   : > { %v3763_v27 = vmul.f32 %v3762_v5, %v17367_v19  ;;  %v3764_v6 = vmul.f32 %v3762_v5, %v17371_v9  ;;  %v3765_v14 = vmul.f32 %v3762_v5, %v17369_v56  ;;  %v3766_v23 = vmul.f32 %v3762_v5, %v17376_v52 }
 0x7ce   : > { %v3767_v30 = vmul.f32 %v3762_v5, %v17388_v8  ;;  %v3768_v37 = vmul.f32 %v3762_v5, %v17395_v34  ;;  %v3769_v59 = vmul.f32 %v3762_v5, %v17393_v16  ;;  %v3770_v4 = vmul.f32 %v3762_v5, %v17398_v39 }
 0x7cf   : > { %v3771_v50 = vmul.f32 %v3762_v5, %v17406_v2  ;;  %v3772_v53 = vmul.f32 %v3762_v5, %v17414_v57  ;;  %v3773_v19 = vmul.f32 %v3762_v5, %v17410_v35  ;;  %v3774_v9 = vmul.f32 %v3762_v5, %v17417_v17  ;;  %3795 = vst.msk [vmem:[#allocation5 + $0x10] sm:$0xff] %vm1333_vm0, %v3763_v27 }
 0x7d0   : > { %3796 = vst.msk [vmem:[#allocation5 + $0x18] sm:$0xff] %vm1333_vm0, %v3764_v6  ;;  %3797 = vst.msk [vmem:[#allocation5 + $0x20] sm:$0xff] %vm1333_vm0, %v3765_v14  ;;  %v3775_v56 = vmul.f32 %v3762_v5, %v17426_v38  ;;  %v3776_v52 = vmul.f32 %v3762_v5, %v17434_v31  ;;  %v3777_v8 = vmul.f32 %v3762_v5, %v17432_v32  ;;  %v17589_v31 = vld [vmem:[#allocation5 + $0x8] sm:$0xff]  ;;  %v22176_v14 = vld [vmem:[#allocation37_spill] sm:$0xff] }
 0x7d1   : > { %3798 = vst.msk [vmem:[#allocation5 + $0x28] sm:$0xff] %vm1333_vm0, %v3766_v23  ;;  %v3778_v16 = vmul.f32 %v3762_v5, %v17438_v10  ;;  %3799 = vst.msk [vmem:[#allocation5 + $0x30] sm:$0xff] %vm1333_vm0, %v3767_v30  ;;  %v3779_v34 = vmul.f32 %v3762_v5, %v17448_v7  ;;  %v3780_v39 = vmul.f32 %v3762_v5, %v17456_v20 }
 0x7d2   : > { %3800 = vst.msk [vmem:[#allocation5 + $0x38] sm:$0xff] %vm1333_vm0, %v3768_v37  ;;  %3801 = vst.msk [vmem:[#allocation5 + $0x40] sm:$0xff] %vm1333_vm0, %v3769_v59  ;;  %v3781_v2 = vmul.f32 %v3762_v5, %v17450_v60  ;;  %v3782_v35 = vmul.f32 %v3762_v5, %v17460_v25  ;;  %v3783_v57 = vmul.f32 %v3762_v5, %v17466_v55 }
 0x7d3   : > { %3802 = vst.msk [vmem:[#allocation5 + $0x48] sm:$0xff] %vm1333_vm0, %v3770_v4  ;;  %3803 = vst.msk [vmem:[#allocation5 + $0x50] sm:$0xff] %vm1333_vm0, %v3771_v50  ;;  %v3784_v17 = vmul.f32 %v3762_v5, %v17474_v43  ;;  %v3785_v38 = vmul.f32 %v3762_v5, %v17477_v48  ;;  %v3786_v32 = vmul.f32 %v3762_v5, %v17482_v47  ;;  %v21743_v47 = vrot.slane %v17589_v31, 7 }
 0x7d4   : > { %3804 = vst.msk [vmem:[#allocation5 + $0x58] sm:$0xff] %vm1333_vm0, %v3772_v53  ;;  %3805 = vst.msk [vmem:[#allocation5 + $0x60] sm:$0xff] %vm1333_vm0, %v3773_v19  ;;  %v3787_v10 = vmul.f32 %v3762_v5, %v17487_v26  ;;  %v3788_v7 = vmul.f32 %v3762_v5, %v17498_v62  ;;  %v3789_v60 = vmul.f32 %v3762_v5, %v17495_v0  ;;  %v14570_v19 = vld [vmem:[%s22173_s5 + $0x8] sm:$0xff]  }
 0x7d5   : > { %3806 = vst.msk [vmem:[#allocation5 + $0x68] sm:$0xff] %vm1333_vm0, %v3774_v9  ;;  %3807 = vst.msk [vmem:[#allocation5 + $0x70] sm:$0xff] %vm1333_vm0, %v3775_v56  ;;  %v3790_v20 = vmul.f32 %v3762_v5, %v17501_v15  ;;  %v3791_v25 = vmul.f32 %v3762_v5, %v17505_v28  ;;  %v3792_v55 = vmul.f32 %v3762_v5, %v17513_v3 }
 0x7d6   : > { %3808 = vst.msk [vmem:[#allocation5 + $0x78] sm:$0xff] %vm1333_vm0, %v3776_v52  ;;  %3809 = vst.msk [vmem:[#allocation5 + $0x80] sm:$0xff] %vm1333_vm0, %v3777_v8  ;;  %v3793_v43 = vmul.f32 %v3762_v5, %v17515_v29  ;;  %v3794_v48 = vmul.f32 %v3762_v5, %v17519_v45  ;;  %v17616_v26 = vld [vmem:[#allocation5 + $0x10] sm:$0xff] }
 0x7d7   : > { %3810 = vst.msk [vmem:[#allocation5 + $0x88] sm:$0xff] %vm1333_vm0, %v3778_v16  ;;  %3811 = vst.msk [vmem:[#allocation5 + $0x90] sm:$0xff] %vm1333_vm0, %v3779_v34  ;;  %v17618_v0 = vld [vmem:[#allocation5 + $0x18] sm:$0xff]  ;;  %v17620_v62 = vld [vmem:[#allocation5 + $0x20] sm:$0xff]  ;;  %v3866_v15 = vrot.slane %v17616_v26, 7 }
 0x7d8   : > { %3812 = vst.msk [vmem:[#allocation5 + $0x98] sm:$0xff] %vm1333_vm0, %v3780_v39  ;;  %3813 = vst.msk [vmem:[#allocation5 + $0xa0] sm:$0xff] %vm1333_vm0, %v3781_v2  ;;  %v3867_v28 = vrot.slane %v17618_v0, 7  ;;  %v17624_v3 = vld [vmem:[#allocation5 + $0x28] sm:$0xff]  ;;  %v3868_v29 = vrot.slane %v17620_v62, 7  ;;  %v17627_v45 = vld [vmem:[#allocation5 + $0x30] sm:$0xff] }
 0x7d9   : > { %3814 = vst.msk [vmem:[#allocation5 + $0xa8] sm:$0xff] %vm1333_vm0, %v3782_v35  ;;  %3815 = vst.msk [vmem:[#allocation5 + $0xb0] sm:$0xff] %vm1333_vm0, %v3783_v57  ;;  %v3869_v24 = vrot.slane %v17624_v3, 7  ;;  %v17630_v18 = vld [vmem:[#allocation5 + $0x38] sm:$0xff]  ;;  %v3870_v49 = vrot.slane %v17627_v45, 7  ;;  %v17633_v61 = vld [vmem:[#allocation5 + $0x40] sm:$0xff]  ;;  %v3933_v33 = vsel %vm1842_vm1, %v21743_v47, %v3866_v15 }
 0x7da   : > { %3816 = vst.msk [vmem:[#allocation5 + $0xb8] sm:$0xff] %vm1333_vm0, %v3784_v17  ;;  %3817 = vst.msk [vmem:[#allocation5 + $0xc0] sm:$0xff] %vm1333_vm0, %v3785_v38  ;;  %v17635_v46 = vld [vmem:[#allocation5 + $0x48] sm:$0xff]  ;;  %v3931_v40 = vsel %vm1842_vm1, %v3867_v28, %v3868_v29  ;;  %v3871_v44 = vrot.slane %v17630_v18, 7  ;;  %v17644_v42 = vld [vmem:[#allocation5 + $0x50] sm:$0xff]  ;;  %v3932_v51 = vsel %vm1842_vm1, %v3866_v15, %v3867_v28  ;;  %v3938_v58 = vmul.f32 %v22174_v36, %v3933_v33 }
 0x7db   : > { %3818 = vst.msk [vmem:[#allocation5 + $0xc8] sm:$0xff] %vm1333_vm0, %v3786_v32  ;;  %3819 = vst.msk [vmem:[#allocation5 + $0xd0] sm:$0xff] %vm1333_vm0, %v3787_v10  ;;  %v3940_v5 = vmul.f32 %v22175_v1, %v3931_v40  ;;  %v3929_v27 = vsel %vm1842_vm1, %v3869_v24, %v3870_v49  ;;  %v3930_v6 = vsel %vm1842_vm1, %v3868_v29, %v3869_v24  ;;  %v3872_v30 = vrot.slane %v17633_v61, 7  ;;  %v17673_v52 = vld [vmem:[#allocation5 + $0x58] sm:$0xff]  ;;  %v17679_v16 = vld [vmem:[#allocation5 + $0x60] sm:$0xff] }
 0x7dc   : > { %3820 = vst.msk [vmem:[#allocation5 + $0xd8] sm:$0xff] %vm1333_vm0, %v3788_v7  ;;  %3821 = vst.msk [vmem:[#allocation5 + $0xe0] sm:$0xff] %vm1333_vm0, %v3789_v60  ;;  %v3942_v23 = vmul.f32 %v22176_v14, %v3929_v27  ;;  %v3873_v37 = vrot.slane %v17635_v46, 7  ;;  %v17657_v59 = vpack.c.bf16 %v3932_v51, %v3938_v58  ;;  %v3874_v50 = vrot.slane %v17644_v42, 7  ;;  %v17684_v34 = vld [vmem:[#allocation5 + $0x68] sm:$0xff]  ;;  %v17686_v39 = vld [vmem:[#allocation5 + $0x70] sm:$0xff] }
 0x7dd   : > { %3822 = vst.msk [vmem:[#allocation5 + $0xe8] sm:$0xff] %vm1333_vm0, %v3790_v20  ;;  %3823 = vst.msk [vmem:[#allocation5 + $0xf0] sm:$0xff] %vm1333_vm0, %v3791_v25  ;;  %v17659_v4 = vpack.c.bf16 %v3930_v6, %v3940_v5  ;;  %v3928_v53 = vsel %vm1842_vm1, %v3870_v49, %v3871_v44  ;;  %v3927_v56 = vsel %vm1842_vm1, %v3871_v44, %v3872_v30  ;;  %v22177_v2 = vld [vmem:[#allocation40_spill] sm:$0xff]  ;;  %v3875_v57 = vrot.slane %v17673_v52, 7  ;;  %v22178_v38 = vld [vmem:[#allocation42_spill] sm:$0xff] }
 0x7de   : > { %3824 = vst.msk [vmem:[#allocation5 + $0xf8] sm:$0xff] %vm1333_vm0, %v3792_v55  ;;  %3825 = vst.msk [vmem:[#allocation5 + $0x100] sm:$0xff] %vm1333_vm0, %v3793_v43  ;;  %12943 = vmatprep.mubr.msk.bf16.mxu0 %vm1333_vm0, %v17657_v59  ;;  %v17669_v9 = vpack.c.bf16 %v3928_v53, %v3942_v23  ;;  %v3925_v8 = vsel %vm1842_vm1, %v3873_v37, %v3874_v50  ;;  %v3944_v35 = vmul.f32 %v22177_v2, %v3927_v56  ;;  %v14571_v17 = vld [vmem:[%s22173_s5 + $0x10] sm:$0xff]   ;;  %v14572_v43 = vld [vmem:[%s22173_s5 + $0x18] sm:$0xff]  }
 0x7df   : > { %3826 = vst.msk [vmem:[#allocation5 + $0x108] sm:$0xff] %vm1333_vm0, %v3794_v48  ;;  %12944 = vmatmul.mubr.msk.bf16.vlgmr.msra.gmra.mrb[68].mxu0 %vm1333_vm0, %v17659_v4  ;;  %v3946_v32 = vmul.f32 %v22178_v38, %v3925_v8  ;;  %v1011_v10 = vadd.s32 272, %v15492_v22  ;;  %v3877_v7 = vrot.slane %v17684_v34, 7  ;;  %v3878_v60 = vrot.slane %v17686_v39, 7  ;;  %v17711_v28 = vld [vmem:[#allocation5 + $0x78] sm:$0xff]  ;;  %v17717_v49 = vld [vmem:[#allocation5 + $0x80] sm:$0xff] }
 0x7e0   : > { %12976 = vmatpush3.bf16.msra.mxu0 %v17545_v11  ;;  %12947 = vmatprep.mubr.msk.bf16.mxu0 %vm1333_vm0, %v17669_v9  ;;  %v3876_v11 = vrot.slane %v17679_v16, 7  ;;  %v3926_v20 = vsel %vm1842_vm1, %v3872_v30, %v3873_v37  ;;  %v3924_v55 = vsel %vm1842_vm1, %v3874_v50, %v3875_v57  ;;  %v17719_v33 = vld [vmem:[#allocation5 + $0x110] sm:$0xff]  ;;  %v17723_v40 = vld [vmem:[#allocation5 + $0x88] sm:$0xff]  ;;  %v17727_v51 = vld [vmem:[#allocation5 + $0x118] sm:$0xff]  ;;  %v3879_v27 = vrot.slane %v17711_v28, 7 }
 0x7e1   : > { %12977 = vmatprep.subr.bf16.mxu0 %v14570_v19  ;;  %v17700_v25 = vpack.c.bf16 %v3926_v20, %v3944_v35  ;;  %v17707_v48 = vpack.c.bf16 %v3924_v55, %v3946_v32  ;;  %v1115_v29 = vand.u32 15, %v1011_v10  ;;  %v3921_v24 = vsel %vm1842_vm1, %v3877_v7, %v3878_v60  ;;  %22179 = vst [vmem:[#allocation75_spill] sm:$0xff] %v17719_v33  ;;  %v17725_v44 = vld [vmem:[#allocation5 + $0x90] sm:$0xff]  ;;  %v17734_v6 = vld [vmem:[%s22173_s5 + $0xc0] sm:$0xff]  }
 0x7e2   : > { %v3923_v15 = vsel %vm1842_vm1, %v3875_v57, %v3876_v11  ;;  %v22180_v58 = vld [vmem:[#allocation44_spill] sm:$0xff]  ;;  %v3950_v23 = vmul.f32 %v22129_v63, %v3921_v24  ;;  %v3880_v30 = vrot.slane %v17717_v49, 7  ;;  %v997_v37 = vadd.s32 160, %v15492_v22 }
 0x7e3   : > { %v3948_v5 = vmul.f32 %v22180_v58, %v3923_v15  ;;  %vm1267_vm12 = vcmp.ne.s32.totalorder %v1115_v29, 0  ;;  %v3881_v53 = vrot.slane %v17723_v40, 7  ;;  %v21744_v56 = vrot.slane %v17727_v51, 7  ;;  %v17767_v15 = vld [vmem:[#allocation5 + $0xa0] sm:$0xff]  ;;  %v22183_v47 = vld [vmem:[#allocation52_spill] sm:$0xff]  ;;  %v17849_v12 = vld [vmem:[#allocation5 + $0xd8] sm:$0xff] }
 0x7e4   : > { %12978 = vmatpush3.bf16.msra.mxu0 %v14570_v19  ;;  %v3882_v19 = vrot.slane %v17725_v44, 7  ;;  %v3898_v8 = vrot.slane %v17719_v33, 7  ;;  %v3922_v35 = vsel %vm1842_vm1, %v3876_v11, %v3877_v7  ;;  %v999_v57 = vadd.s32 176, %v15492_v22  ;;  %v17761_v7 = vld [vmem:[#allocation5 + $0x98] sm:$0xff]  ;;  %22189 = vst [vmem:[#allocation73_spill] sm:$0xff] %v17849_v12 }
 0x7e5   : > { %12979 = vmatprep.subr.bf16.mxu0 %v14571_v17  ;;  %v3920_v32 = vsel %vm1842_vm1, %v3878_v60, %v3879_v27  ;;  %v17755_v20 = vsel %vm1267_vm12, 1.0, %v22148_v41  ;;  %v3919_v11 = vsel %vm1842_vm1, %v3879_v27, %v3880_v30  ;;  %v3883_v13 = vrot.slane %v17761_v7, 7 }
 0x7e6   : > { %v17739_v50 = vld [vmem:[#allocation5 + $0x108] sm:$0xff]  ;;  %22181 = vst [vmem:[#allocation76_spill] sm:$0xff] %v17755_v20  ;;  %v17757_v55 = vpack.c.bf16 %v3920_v32, %v3950_v23  ;;  %v3917_v60 = vsel %vm1842_vm1, %v3881_v53, %v3882_v19  ;;  %v17773_v29 = vsel %vm1842_vm1, %v3898_v8, %v21744_v56  ;;  %v1031_v27 = vand.u32 15, %v999_v57  ;;  %v17783_v23 = vld [vmem:[#allocation5 + $0xb0] sm:$0xff] }
 0x7e7   : > { %12948 = vmatmul.mubr.msk.bf16.gmra.mrb[72].mxu0 %vm1333_vm0, %v17700_v25  ;;  %v21746_v10 = vrot.slane %v17739_v50, 7  ;;  %v3954_v56 = vmul.f32 %v22183_v47, %v3917_v60  ;;  %v3884_v63 = vrot.slane %v17767_v15, 7  ;;  %v3886_v57 = vrot.slane %v17783_v23, 7 }
 0x7e8   : > { %12951 = vmatprep.mubr.msk.bf16.mxu0 %vm1333_vm0, %v17707_v48  ;;  %12980 = vmatpush3.bf16.msra.mxu0 %v14571_v17  ;;  %v17748_v17 = vpack.c.bf16 %v3922_v35, %v3948_v5  ;;  %v17781_v5 = vld [vmem:[#allocation5 + $0xa8] sm:$0xff]  ;;  %v22182_v35 = vld [vmem:[#allocation50_spill] sm:$0xff]  ;;  %v1001_v58 = vadd.s32 192, %v15492_v22  ;;  %vm1255_vm14 = vcmp.ne.s32.totalorder %v1031_v27, 0  ;;  %v3916_v60 = vsel %vm1842_vm1, %v3882_v19, %v3883_v13 }
 0x7e9   : > { %12981 = vmatprep.subr.bf16.mxu0 %v14572_v43  ;;  %v3901_v24 = vsel %vm1842_vm1, %v21746_v10, %v3898_v8  ;;  %v3952_v32 = vmul.f32 %v22182_v35, %v3919_v11  ;;  %v3885_v10 = vrot.slane %v17781_v5, 7  ;;  %v1003_v11 = vadd.s32 208, %v15492_v22  ;;  %v17811_v35 = vld [vmem:[#allocation5 + $0xb8] sm:$0xff]  ;;  %v17824_v27 = vld [vmem:[#allocation5 + $0xc8] sm:$0xff] }
 0x7ea   : > { %v17804_v47 = vpack.c.bf16 %v3916_v60, %v3954_v56  ;;  %v3915_v8 = vsel %vm1842_vm1, %v3883_v13, %v3884_v63  ;;  %v1045_v19 = vand.u32 15, %v1001_v58  ;;  %v17820_v56 = vld [vmem:[#allocation5 + $0xc0] sm:$0xff]  ;;  %22186 = vst [vmem:[#allocation79_spill] sm:$0xff] %v17824_v27  ;;  %v3887_v60 = vrot.slane %v17811_v35, 7 }
 0x7eb   : > { %v1059_v13 = vand.u32 15, %v1003_v11  ;;  %v3888_v2 = vrot.slane %v17820_v56, 7  ;;  %v3889_v58 = vrot.slane %v17824_v27, 7  ;;  %v1005_v1 = vadd.s32 224, %v15492_v22 }
 0x7ec   : > { %12982 = vmatpush3.bf16.msra.mxu0 %v14572_v43  ;;  %v1017_v43 = vand.u32 15, %v997_v37  ;;  %v17786_v37 = vmul.f32 %v17755_v20, %v3901_v24  ;;  %v3918_v24 = vsel %vm1842_vm1, %v3880_v30, %v3881_v53  ;;  %v17816_v30 = vsel %vm1255_vm14, 1.0, %v22148_v41 }
 0x7ed   : > { %13015 = vmatprep.subr.bf16.mxu0 %v17734_v6  ;;  %v17800_v20 = vpack.c.bf16 %v3918_v24, %v3952_v32  ;;  %22185 = vst [vmem:[#allocation72_spill] sm:$0xff] %v17816_v30  ;;  %v3913_v53 = vsel %vm1842_vm1, %v3885_v10, %v3886_v57  ;;  %v17826_v32 = vld [vmem:[#allocation5 + $0xd0] sm:$0xff]  ;;  %vm1257_vm15 = vcmp.ne.s32.totalorder %v1045_v19, 0  ;;  %v3914_v11 = vsel %vm1842_vm1, %v3884_v63, %v3885_v10 }
 0x7ee   : > { %vm1253_vm13 = vcmp.ne.s32.totalorder %v1017_v43, 0  ;;  %22187 = vst [vmem:[#allocation80_spill] sm:$0xff] %v17826_v32  ;;  %v3958_v38 = vmul.f32 %v17816_v30, %v3913_v53  ;;  %v3890_v14 = vrot.slane %v17826_v32, 7  ;;  %vm1259_vm3 = vcmp.ne.s32.totalorder %v1059_v13, 0  ;;  %v17862_v13 = vld [vmem:[#allocation5 + $0xe8] sm:$0xff] }
 0x7ef   : > { %12952 = vmatmul.mubr.msk.bf16.gmra.mrb[76].mxu0 %vm1333_vm0, %v17748_v17  ;;  %v17807_v43 = vsel %vm1253_vm13, 1.0, %v22148_v41  ;;  %v1007_v36 = vadd.s32 240, %v15492_v22  ;;  %v3912_v53 = vsel %vm1842_vm1, %v3886_v57, %v3887_v60  ;;  %v17845_v19 = vsel %vm1257_vm15, 1.0, %v22148_v41  ;;  %22192 = vst [vmem:[#allocation54_spill] sm:$0xff] %v17862_v13 }
 0x7f0   : > { %12955 = vmatprep.mubr.msk.bf16.mxu0 %vm1333_vm0, %v17757_v55  ;;  %22184 = vst [vmem:[#allocation77_spill] sm:$0xff] %v17807_v43  ;;  %v3956_v24 = vmul.f32 %v17807_v43, %v3915_v8  ;;  %v17842_v30 = vpack.c.bf16 %v3912_v53, %v3958_v38  ;;  %22188 = vst [vmem:[#allocation66_spill] sm:$0xff] %v17845_v19  ;;  %v3911_v43 = vsel %vm1842_vm1, %v3887_v60, %v3888_v2  ;;  %v17858_v38 = vld [vmem:[#allocation5 + $0xe0] sm:$0xff]  ;;  %v17864_v60 = vld [vmem:[#allocation5 + $0xf0] sm:$0xff] }
 0x7f1   : > { %v17854_v63 = vsel %vm1259_vm3, 1.0, %v22148_v41  ;;  %v3909_v10 = vsel %vm1842_vm1, %v3889_v58, %v3890_v14  ;;  %v1073_v57 = vand.u32 15, %v1005_v1  ;;  %22191 = vst [vmem:[#allocation39_spill] sm:$0xff] %v17858_v38  ;;  %22193 = vst [vmem:[#allocation59_spill] sm:$0xff] %v17864_v60  ;;  %v3891_v53 = vrot.slane %v17849_v12, 7 }
 0x7f2   : > { %v17838_v8 = vpack.c.bf16 %v3914_v11, %v3956_v24  ;;  %22190 = vst [vmem:[#allocation57_spill] sm:$0xff] %v17854_v63  ;;  %v1087_v24 = vand.u32 15, %v1007_v36  ;;  %v3960_v11 = vmul.f32 %v17845_v19, %v3911_v43  ;;  %v3962_v21 = vmul.f32 %v17854_v63, %v3909_v10  ;;  %v17886_v63 = vld [vmem:[#allocation5 + $0xf8] sm:$0xff] }
 0x7f3   : > { %v3892_v54 = vrot.slane %v17858_v38, 7  ;;  %vm1261_vm4 = vcmp.ne.s32.totalorder %v1073_v57, 0  ;;  %v3893_v1 = vrot.slane %v17862_v13, 7  ;;  %v3894_v33 = vrot.slane %v17864_v60, 7 }
 0x7f4   : > { %v1009_v32 = vadd.s32 256, %v15492_v22  ;;  %v3910_v36 = vsel %vm1842_vm1, %v3888_v2, %v3889_v58  ;;  %vm1263_vm5 = vcmp.ne.s32.totalorder %v1087_v24, 0  ;;  %v3908_v43 = vsel %vm1842_vm1, %v3890_v14, %v3891_v53  ;;  %v17899_v24 = vld [vmem:[#allocation5] sm:$0xff] }
 0x7f5   : > { %v17875_v27 = vpack.c.bf16 %v3910_v36, %v3960_v11  ;;  %v17879_v19 = vpack.c.bf16 %v3908_v43, %v3962_v21  ;;  %v17882_v10 = vsel %vm1261_vm4, 1.0, %v22148_v41  ;;  %v3907_v57 = vsel %vm1842_vm1, %v3891_v53, %v3892_v54  ;;  %v17895_v21 = vld [vmem:[#allocation5 + $0x100] sm:$0xff] }
 0x7f6   : > { %22194 = vst [vmem:[#allocation61_spill] sm:$0xff] %v17882_v10  ;;  %v17891_v2 = vsel %vm1263_vm5, 1.0, %v22148_v41  ;;  %v3905_v58 = vsel %vm1842_vm1, %v3893_v1, %v3894_v33  ;;  %v1101_v14 = vand.u32 15, %v1009_v32  ;;  %v3964_v11 = vmul.f32 %v17882_v10, %v3907_v57 }
 0x7f7   : > { %12956 = vmatmul.mubr.msk.bf16.gmra.mrb[80].mxu0 %vm1333_vm0, %v17800_v20  ;;  %22195 = vst [vmem:[#allocation64_spill] sm:$0xff] %v17891_v2  ;;  %v3895_v53 = vrot.slane %v17886_v63, 7  ;;  %v3864_v36 = vrot.slane %v17899_v24, 7  ;;  %v3966_v43 = vmul.f32 %v17891_v2, %v3905_v58  ;;  %v3896_v60 = vrot.slane %v17895_v21, 7 }
 0x7f8   : > { %12959 = vmatprep.mubr.msk.bf16.mxu0 %vm1333_vm0, %v17804_v47  ;;  %vm1265_vm6 = vcmp.ne.s32.totalorder %v1101_v14, 0  ;;  %v3906_v32 = vsel %vm1842_vm1, %v3892_v54, %v3893_v1  ;;  %v22196_v12 = vrot.slane %v17727_v51, 7  ;;  %v22198_v54 = vld [vmem:[#allocation46_spill] sm:$0xff] }
 0x7f9   : > { %v17908_v13 = vpack.c.bf16 %v3906_v32, %v3964_v11  ;;  %v3904_v38 = vsel %vm1842_vm1, %v3894_v33, %v3895_v53  ;;  %v17919_v58 = vsel %vm1265_vm6, 1.0, %v22148_v41  ;;  %v3903_v14 = vsel %vm1842_vm1, %v3895_v53, %v3896_v60 }
 0x7fa   : > { %v3935_v57 = vsel %vm1842_vm1, %v22196_v12, %v3864_v36  ;;  %v17916_v10 = vpack.c.bf16 %v3904_v38, %v3966_v43  ;;  %22197 = vst [vmem:[#allocation63_spill] sm:$0xff] %v17919_v58  ;;  %v3968_v1 = vmul.f32 %v17919_v58, %v3903_v14  ;;  %v22199_v12 = vrot.slane %v17589_v31, 7  ;;  %v14579_v14 = vld [vmem:[%s22173_s5 + $0x30] sm:$0xff]  }
 0x7fb   : > { %v3936_v33 = vmul.f32 %v22198_v54, %v3935_v57  ;;  %v22200_v11 = vrot.slane %v17739_v50, 7  ;;  %v14574_v57 = vld [vmem:[%s22173_s5 + $0xc8] sm:$0xff]  }
 0x7fc   : > { %v3934_v38 = vsel %vm1842_vm1, %v3864_v36, %v22199_v12  ;;  %v14576_v36 = vld [vmem:[%s22173_s5 + $0xd8] sm:$0xff]   ;;  %v4668_v12 = vpack.c.bf16 %v17811_v35, %v17783_v23 }
 0x7fd   : > { %v3902_v53 = vsel %vm1842_vm1, %v3896_v60, %v22200_v11  ;;  %v3972_v43 = vpack.c.bf16 %v3934_v38, %v3936_v33  ;;  %v14575_v60 = vld [vmem:[%s22173_s5 + $0xd0] sm:$0xff]   ;;  %v4666_v33 = vpack.c.bf16 %v17761_v7, %v17725_v44  ;;  %v22202_v38 = vld [vmem:[#allocation79_spill] sm:$0xff] }
 0x7fe   : > { %v3988_v32 = vpack.c.bf16 %v3902_v53, %v3968_v1  ;;  %v4667_v1 = vpack.c.bf16 %v17781_v5, %v17767_v15  ;;  %v4669_v11 = vpack.c.bf16 %v22202_v38, %v17820_v56  ;;  %v22203_v53 = vld [vmem:[#allocation80_spill] sm:$0xff] }
 0x7ff   : > { %12960 = vmatmul.mubr.msk.bf16.gmra.mrb[84].mxu0 %vm1333_vm0, %v17838_v8 }
 0x800   : > { %12963 = vmatprep.mubr.msk.bf16.mxu0 %vm1333_vm0, %v17842_v30 }
 0x807   : > { %12964 = vmatmul.mubr.msk.bf16.gmra.mrb[88].mxu0 %vm1333_vm0, %v17875_v27 }
 0x808   : > { %12967 = vmatprep.mubr.msk.bf16.mxu0 %vm1333_vm0, %v17879_v19 }
 0x80f   : > { %12968 = vmatmul.mubr.msk.bf16.gmra.mrb[92].mxu0 %vm1333_vm0, %v17908_v13 }
 0x810   : > { %12971 = vmatprep.mubr.msk.bf16.mxu0 %vm1333_vm0, %v17916_v10 }
 0x817   : > { %12972 = vmatmul.mubr.msk.bf16.gmra.mrb[96].mxu0 %vm1333_vm0, %v3988_v32 }
 0x818   : > { %12983 = vmatprep.mubr.msk.bf16.mxu0 %vm1333_vm0, %v3972_v43  ;;  %v22204_v43 = vld [vmem:[#allocation73_spill] sm:$0xff] }
 0x81f   : > { %12984 = vmatmul.mubr.msk.bf16.vlgmr.msra.gmra.mrb[68].mxu0 %vm1333_vm0, %v17657_v59  ;;  %v14577_v59 = vld [vmem:[%s22173_s5 + $0x20] sm:$0xff]  }
 0x820   : > { %13016 = vmatpush3.bf16.msra.mxu0 %v17734_v6  ;;  %12987 = vmatprep.mubr.msk.bf16.mxu0 %vm1333_vm0, %v17659_v4  ;;  %v14578_v6 = vld [vmem:[%s22173_s5 + $0x28] sm:$0xff]  }
 0x821   : > { %13017 = vmatprep.subr.bf16.mxu0 %v14574_v57 }
 0x824   : > { %13018 = vmatpush3.bf16.msra.mxu0 %v14574_v57  ;;  %v22205_v57 = vld [vmem:[#allocation39_spill] sm:$0xff] }
 0x825   : > { %13019 = vmatprep.subr.bf16.mxu0 %v14575_v60 }
 0x827   : > { %12988 = vmatmul.mubr.msk.bf16.gmra.mrb[72].mxu0 %vm1333_vm0, %v17669_v9 }
 0x828   : > { %12991 = vmatprep.mubr.msk.bf16.mxu0 %vm1333_vm0, %v17700_v25  ;;  %13020 = vmatpush3.bf16.msra.mxu0 %v14575_v60  ;;  %v22206_v60 = vld [vmem:[#allocation54_spill] sm:$0xff] }
 0x829   : > { %13021 = vmatprep.subr.bf16.mxu0 %v14576_v36 }
 0x82c   : > { %13022 = vmatpush3.bf16.msra.mxu0 %v14576_v36  ;;  %v4671_v36 = vpack.c.bf16 %v22206_v60, %v22205_v57 }
 0x82d   : > { %13055 = vmatprep.subr.bf16.mxu0 %v14577_v59 }
 0x82f   : > { %12992 = vmatmul.mubr.msk.bf16.gmra.mrb[76].mxu0 %vm1333_vm0, %v17707_v48 }
 0x830   : > { %12995 = vmatprep.mubr.msk.bf16.mxu0 %vm1333_vm0, %v17748_v17 }
 0x837   : > { %12996 = vmatmul.mubr.msk.bf16.gmra.mrb[80].mxu0 %vm1333_vm0, %v17757_v55 }
 0x838   : > { %12999 = vmatprep.mubr.msk.bf16.mxu0 %vm1333_vm0, %v17800_v20 }
 0x83f   : > { %13000 = vmatmul.mubr.msk.bf16.gmra.mrb[84].mxu0 %vm1333_vm0, %v17804_v47 }
 0x840   : > { %13003 = vmatprep.mubr.msk.bf16.mxu0 %vm1333_vm0, %v17838_v8 }
 0x847   : > { %13004 = vmatmul.mubr.msk.bf16.gmra.mrb[88].mxu0 %vm1333_vm0, %v17842_v30 }
 0x848   : > { %13007 = vmatprep.mubr.msk.bf16.mxu0 %vm1333_vm0, %v17875_v27 }
 0x84f   : > { %13008 = vmatmul.mubr.msk.bf16.gmra.mrb[92].mxu0 %vm1333_vm0, %v17879_v19 }
 0x850   : > { %13011 = vmatprep.mubr.msk.bf16.mxu0 %vm1333_vm0, %v17908_v13 }
 0x857   : > { %13012 = vmatmul.mubr.msk.bf16.gmra.mrb[96].mxu0 %vm1333_vm0, %v17916_v10 }
 0x858   : > { %13023 = vmatprep.mubr.msk.bf16.mxu0 %vm1333_vm0, %v17659_v4  ;;  %v14580_v4 = vld [vmem:[%s22173_s5 + $0x38] sm:$0xff]  }
 0x85f   : > { %13024 = vmatmul.mubr.msk.bf16.vlgmr.msra.gmra.mrb[68].mxu0 %vm1333_vm0, %v17669_v9  ;;  %v14581_v9 = vld [vmem:[%s22173_s5 + $0x80] sm:$0xff]  }
 0x860   : > { %13056 = vmatpush3.bf16.msra.mxu0 %v14577_v59  ;;  %13027 = vmatprep.mubr.msk.bf16.mxu0 %vm1333_vm0, %v17700_v25  ;;  %v22201_v25 = vpack.c.bf16 %v17773_v29, %v17786_v37  ;;  %v18047_v29 = vpack.c.bf16 %v17630_v18, %v17627_v45  ;;  %v14584_v37 = vld [vmem:[%s22173_s5 + $0x98] sm:$0xff]   ;;  %v22207_v59 = vld [vmem:[#allocation59_spill] sm:$0xff] }
 0x861   : > { %13057 = vmatprep.subr.bf16.mxu0 %v14578_v6 }
 0x864   : > { %13058 = vmatpush3.bf16.msra.mxu0 %v14578_v6  ;;  %v4672_v6 = vpack.c.bf16 %v17886_v63, %v22207_v59 }
 0x865   : > { %13059 = vmatprep.subr.bf16.mxu0 %v14579_v14 }
 0x867   : > { %13028 = vmatmul.mubr.msk.bf16.gmra.mrb[72].mxu0 %vm1333_vm0, %v17707_v48  ;;  %v4658_v48 = vpack.c.bf16 %v17618_v0, %v17616_v26 }
 0x868   : > { %13031 = vmatprep.mubr.msk.bf16.mxu0 %vm1333_vm0, %v17748_v17  ;;  %13060 = vmatpush3.bf16.msra.mxu0 %v14579_v14  ;;  %v14582_v17 = vld [vmem:[%s22173_s5 + $0x88] sm:$0xff]  }
 0x869   : > { %13061 = vmatprep.subr.bf16.mxu0 %v14580_v4  ;;  %v14586_v14 = vld [vmem:[%s22173_s5 + $0xe8] sm:$0xff]  }
 0x86c   : > { %13062 = vmatpush3.bf16.msra.mxu0 %v14580_v4  ;;  %v14587_v4 = vld [vmem:[%s22173_s5 + $0xf0] sm:$0xff]  }
 0x86d   : > { %13095 = vmatprep.subr.bf16.mxu0 %v14581_v9 }
 0x86f   : > { %13032 = vmatmul.mubr.msk.bf16.gmra.mrb[76].mxu0 %vm1333_vm0, %v17757_v55  ;;  %v14583_v55 = vld [vmem:[%s22173_s5 + $0x90] sm:$0xff]  }
 0x870   : > { %13035 = vmatprep.mubr.msk.bf16.mxu0 %vm1333_vm0, %v17800_v20  ;;  %v18037_v20 = vpack.c.bf16 %v17624_v3, %v17620_v62 }
 0x877   : > { %13036 = vmatmul.mubr.msk.bf16.gmra.mrb[80].mxu0 %vm1333_vm0, %v17804_v47  ;;  %v4657_v47 = vpack.c.bf16 %v17589_v31, %v17899_v24 }
 0x878   : > { %13039 = vmatprep.mubr.msk.bf16.mxu0 %vm1333_vm0, %v17838_v8  ;;  %v4662_v8 = vpack.c.bf16 %v17673_v52, %v17644_v42 }
 0x87f   : > { %13040 = vmatmul.mubr.msk.bf16.gmra.mrb[84].mxu0 %vm1333_vm0, %v17842_v30  ;;  %v18054_v30 = vpack.c.bf16 %v17635_v46, %v17633_v61 }
 0x880   : > { %13043 = vmatprep.mubr.msk.bf16.mxu0 %vm1333_vm0, %v17875_v27  ;;  %v14585_v27 = vld [vmem:[%s22173_s5 + $0xe0] sm:$0xff]  }
 0x887   : > { %13044 = vmatmul.mubr.msk.bf16.gmra.mrb[88].mxu0 %vm1333_vm0, %v17879_v19  ;;  %v4663_v19 = vpack.c.bf16 %v17684_v34, %v17679_v16 }
 0x888   : > { %13047 = vmatprep.mubr.msk.bf16.mxu0 %vm1333_vm0, %v17908_v13  ;;  %v18071_v13 = vpack.c.bf16 %v17711_v28, %v17686_v39 }
 0x88f   : > { %13048 = vmatmul.mubr.msk.bf16.gmra.mrb[92].mxu0 %vm1333_vm0, %v17916_v10  ;;  %v18075_v10 = vpack.c.bf16 %v17723_v40, %v17717_v49 }
 0x890   : > { %13051 = vmatprep.mubr.msk.bf16.mxu0 %vm1333_vm0, %v3988_v32  ;;  %v4670_v32 = vpack.c.bf16 %v22204_v43, %v22203_v53 }
 0x897   : > { %13052 = vmatmul.mubr.msk.bf16.gmra.mrb[96].mxu0 %vm1333_vm0, %v22201_v25  ;;  %v4673_v25 = vpack.c.bf16 %v17739_v50, %v17895_v21 }
 0x898   : > { %13063 = vmatprep.mubr.msk.bf16.mxu0 %vm1333_vm0, %v4657_v47  ;;  %v14589_v47 = vld [vmem:[%s22173_s5 + $0x40] sm:$0xff]  }
 0x89f   : > { %13064 = vmatmul.mubr.msk.bf16.vlgmr.msra.gmra.mrb[68].mxu0 %vm1333_vm0, %v4658_v48 }
 0x8a0   : > { %13096 = vmatpush3.bf16.msra.mxu0 %v14581_v9  ;;  %13067 = vmatprep.mubr.msk.bf16.mxu0 %vm1333_vm0, %v18037_v20  ;;  %v14588_v9 = vld [vmem:[%s22173_s5 + $0xf8] sm:$0xff]  }
 0x8a1   : > { %13097 = vmatprep.subr.bf16.mxu0 %v14582_v17 }
 0x8a4   : > { %13098 = vmatpush3.bf16.msra.mxu0 %v14582_v17  ;;  %v14591_v17 = vld [vmem:[%s22173_s5 + $0x50] sm:$0xff]  }
 0x8a5   : > { %13099 = vmatprep.subr.bf16.mxu0 %v14583_v55 }
 0x8a7   : > { %13068 = vmatmul.mubr.msk.bf16.gmra.mrb[72].mxu0 %vm1333_vm0, %v18047_v29 }
 0x8a8   : > { %13071 = vmatprep.mubr.msk.bf16.mxu0 %vm1333_vm0, %v18054_v30  ;;  %13100 = vmatpush3.bf16.msra.mxu0 %v14583_v55  ;;  %v14593_v55 = vld [vmem:[%s22173_s5 + $0xa0] sm:$0xff]  }
 0x8a9   : > { %13101 = vmatprep.subr.bf16.mxu0 %v14584_v37 }
 0x8ac   : > { %13102 = vmatpush3.bf16.msra.mxu0 %v14584_v37  ;;  %v5409_v37 = vrot.slane %v17616_v26, 1 }
 0x8ad   : > { %13135 = vmatprep.subr.bf16.mxu0 %v14585_v27 }
 0x8af   : > { %13072 = vmatmul.mubr.msk.bf16.gmra.mrb[76].mxu0 %vm1333_vm0, %v4662_v8 }
 0x8b0   : > { %13075 = vmatprep.mubr.msk.bf16.mxu0 %vm1333_vm0, %v4663_v19 }
 0x8b7   : > { %13076 = vmatmul.mubr.msk.bf16.gmra.mrb[80].mxu0 %vm1333_vm0, %v18071_v13 }
 0x8b8   : > { %13079 = vmatprep.mubr.msk.bf16.mxu0 %vm1333_vm0, %v18075_v10 }
 0x8bf   : > { %13080 = vmatmul.mubr.msk.bf16.gmra.mrb[84].mxu0 %vm1333_vm0, %v4666_v33 }
 0x8c0   : > { %13083 = vmatprep.mubr.msk.bf16.mxu0 %vm1333_vm0, %v4667_v1 }
 0x8c7   : > { %13084 = vmatmul.mubr.msk.bf16.gmra.mrb[88].mxu0 %vm1333_vm0, %v4668_v12 }
 0x8c8   : > { %13087 = vmatprep.mubr.msk.bf16.mxu0 %vm1333_vm0, %v4669_v11 }
 0x8cf   : > { %13088 = vmatmul.mubr.msk.bf16.gmra.mrb[92].mxu0 %vm1333_vm0, %v4670_v32 }
 0x8d0   : > { %13091 = vmatprep.mubr.msk.bf16.mxu0 %vm1333_vm0, %v4671_v36 }
 0x8d7   : > { %13092 = vmatmul.mubr.msk.bf16.gmra.mrb[96].mxu0 %vm1333_vm0, %v4672_v6 }
 0x8d8   : > { %13103 = vmatprep.mubr.msk.bf16.mxu0 %vm1333_vm0, %v4658_v48  ;;  %v14590_v48 = vld [vmem:[%s22173_s5 + $0x48] sm:$0xff]  }
 0x8df   : > { %13104 = vmatmul.mubr.msk.bf16.vlgmr.msra.gmra.mrb[68].mxu0 %vm1333_vm0, %v18037_v20 }
 0x8e0   : > { %13136 = vmatpush3.bf16.msra.mxu0 %v14585_v27  ;;  %13107 = vmatprep.mubr.msk.bf16.mxu0 %vm1333_vm0, %v18047_v29 }
 0x8e1   : > { %13137 = vmatprep.subr.bf16.mxu0 %v14586_v14 }
 0x8e4   : > { %13138 = vmatpush3.bf16.msra.mxu0 %v14586_v14 }
 0x8e5   : > { %13139 = vmatprep.subr.bf16.mxu0 %v14587_v4 }
 0x8e7   : > { %13108 = vmatmul.mubr.msk.bf16.gmra.mrb[72].mxu0 %vm1333_vm0, %v18054_v30 }
 0x8e8   : > { %13111 = vmatprep.mubr.msk.bf16.mxu0 %vm1333_vm0, %v4662_v8  ;;  %13140 = vmatpush3.bf16.msra.mxu0 %v14587_v4  ;;  %v5414_v4 = vrot.slane %v17630_v18, 1 }
 0x8e9   : > { %13141 = vmatprep.subr.bf16.mxu0 %v14588_v9 }
 0x8ec   : > { %13142 = vmatpush3.bf16.msra.mxu0 %v14588_v9  ;;  %v5417_v9 = vrot.slane %v17644_v42, 1 }
 0x8ed   : > { %13175 = vmatprep.subr.bf16.mxu0 %v14589_v47 }
 0x8ef   : > { %13112 = vmatmul.mubr.msk.bf16.gmra.mrb[76].mxu0 %vm1333_vm0, %v4663_v19 }
 0x8f0   : > { %13115 = vmatprep.mubr.msk.bf16.mxu0 %vm1333_vm0, %v18071_v13 }
 0x8f7   : > { %13116 = vmatmul.mubr.msk.bf16.gmra.mrb[80].mxu0 %vm1333_vm0, %v18075_v10 }
 0x8f8   : > { %13119 = vmatprep.mubr.msk.bf16.mxu0 %vm1333_vm0, %v4666_v33 }
 0x8ff   : > { %13120 = vmatmul.mubr.msk.bf16.gmra.mrb[84].mxu0 %vm1333_vm0, %v4667_v1 }
 0x900   : > { %13123 = vmatprep.mubr.msk.bf16.mxu0 %vm1333_vm0, %v4668_v12 }
 0x907   : > { %13124 = vmatmul.mubr.msk.bf16.gmra.mrb[88].mxu0 %vm1333_vm0, %v4669_v11 }
 0x908   : > { %13127 = vmatprep.mubr.msk.bf16.mxu0 %vm1333_vm0, %v4670_v32 }
 0x90f   : > { %13128 = vmatmul.mubr.msk.bf16.gmra.mrb[92].mxu0 %vm1333_vm0, %v4671_v36 }
 0x910   : > { %13131 = vmatprep.mubr.msk.bf16.mxu0 %vm1333_vm0, %v4672_v6 }
 0x917   : > { %13132 = vmatmul.mubr.msk.bf16.gmra.mrb[96].mxu0 %vm1333_vm0, %v4673_v25 }
 0x918   : > { %13143 = vmatprep.mubr.msk.bf16.mxu0 %vm1333_vm0, %v18037_v20  ;;  %v14592_v20 = vld [vmem:[%s22173_s5 + $0x58] sm:$0xff]  }
 0x91f   : > { %13144 = vmatmul.mubr.msk.bf16.vlgmr.msra.gmra.mrb[68].mxu0 %vm1333_vm0, %v18047_v29  ;;  %v5408_v29 = vrot.slane %v17589_v31, 1 }
 0x920   : > { %13176 = vmatpush3.bf16.msra.mxu0 %v14589_v47  ;;  %13147 = vmatprep.mubr.msk.bf16.mxu0 %vm1333_vm0, %v18054_v30  ;;  %v5407_v30 = vrot.slane %v17899_v24, 1  ;;  %v14603_v24 = vld [vmem:[#allocation10 + $0x30] sm:$0xff]  }
 0x921   : > { %13177 = vmatprep.subr.bf16.mxu0 %v14590_v48  ;;  %v5476_v27 = vsel %vm2119_vm2, %v5408_v29, %v5409_v37 }
 0x922   : > { %v5477_v26 = vsel %vm2119_vm2, %v5407_v30, %v5408_v29  ;;  %v14595_v29 = vld [vmem:[%s22173_s5 + $0xb0] sm:$0xff]  }
 0x924   : > { %13178 = vmatpush3.bf16.msra.mxu0 %v14590_v48 }
 0x925   : > { %13179 = vmatprep.subr.bf16.mxu0 %v14591_v17 }
 0x927   : > { %13148 = vmatmul.mubr.msk.bf16.gmra.mrb[72].mxu0 %vm1333_vm0, %v4662_v8  ;;  %v5410_v8 = vrot.slane %v17618_v0, 1 }
 0x928   : > { %13151 = vmatprep.mubr.msk.bf16.mxu0 %vm1333_vm0, %v4663_v19  ;;  %13180 = vmatpush3.bf16.msra.mxu0 %v14591_v17  ;;  %v22208_v19 = vld [vmem:[#allocation30_spill] sm:$0xff]  ;;  %v14594_v17 = vld [vmem:[%s22173_s5 + $0xa8] sm:$0xff]  }
 0x929   : > { %13181 = vmatprep.subr.bf16.mxu0 %v14592_v20  ;;  %v5475_v47 = vsel %vm2119_vm2, %v5409_v37, %v5410_v8  ;;  %v22213_v37 = vld [vmem:[#allocation41_spill] sm:$0xff] }
 0x92c   : > { %13182 = vmatpush3.bf16.msra.mxu0 %v14592_v20 }
 0x92d   : > { %13215 = vmatprep.subr.bf16.mxu0 %v14593_v55 }
 0x92f   : > { %13152 = vmatmul.mubr.msk.bf16.gmra.mrb[76].mxu0 %vm1333_vm0, %v18071_v13  ;;  %v5480_v13 = vmul.f32 %v22208_v19, %v5476_v27 }
 0x930   : > { %13155 = vmatprep.mubr.msk.bf16.mxu0 %vm1333_vm0, %v18075_v10  ;;  %v5411_v10 = vrot.slane %v17620_v62, 1 }
 0x932   : > { %v5474_v0 = vsel %vm2119_vm2, %v5410_v8, %v5411_v10  ;;  %v5418_v8 = vrot.slane %v17673_v52, 1  ;;  %v14596_v52 = vld [vmem:[%s22173_s5 + $0xb8] sm:$0xff]  }
 0x937   : > { %13156 = vmatmul.mubr.msk.bf16.gmra.mrb[80].mxu0 %vm1333_vm0, %v4666_v33  ;;  %v22209_v33 = vld [vmem:[#allocation75_spill] sm:$0xff] }
 0x938   : > { %13159 = vmatprep.mubr.msk.bf16.mxu0 %vm1333_vm0, %v4667_v1  ;;  %v4674_v31 = vpack.c.bf16 %v17727_v51, %v22209_v33  ;;  %v5412_v1 = vrot.slane %v17624_v3, 1  ;;  %v5415_v3 = vrot.slane %v17633_v61, 1 }
 0x93a   : > { %v5473_v48 = vsel %vm2119_vm2, %v5411_v10, %v5412_v1  ;;  %v5470_v18 = vsel %vm2119_vm2, %v5414_v4, %v5415_v3  ;;  %v5420_v10 = vrot.slane %v17684_v34, 1 }
 0x93f   : > { %13160 = vmatmul.mubr.msk.bf16.gmra.mrb[84].mxu0 %vm1333_vm0, %v4668_v12  ;;  %v5413_v12 = vrot.slane %v17627_v45, 1  ;;  %v5416_v45 = vrot.slane %v17635_v46, 1  ;;  %v22212_v46 = vld [vmem:[#allocation38_spill] sm:$0xff] }
 0x940   : > { %13163 = vmatprep.mubr.msk.bf16.mxu0 %vm1333_vm0, %v4669_v11  ;;  %v5515_v11 = vpack.c.bf16 %v5480_v13, %v5477_v26  ;;  %v5486_v42 = vmul.f32 %v22212_v46, %v5470_v18  ;;  %v5419_v13 = vrot.slane %v17679_v16, 1 }
 0x941   : > { %v5472_v62 = vsel %vm2119_vm2, %v5412_v1, %v5413_v12  ;;  %v5468_v61 = vsel %vm2119_vm2, %v5416_v45, %v5417_v9  ;;  %v5469_v1 = vsel %vm2119_vm2, %v5415_v3, %v5416_v45  ;;  %v5424_v3 = vrot.slane %v17723_v40, 1 }
 0x942   : > { %v5488_v27 = vmul.f32 %v22213_v37, %v5468_v61  ;;  %v5466_v16 = vsel %vm2119_vm2, %v5418_v8, %v5419_v13  ;;  %v5425_v45 = vrot.slane %v17725_v44, 1  ;;  %v5465_v18 = vsel %vm2119_vm2, %v5419_v13, %v5420_v10 }
 0x943   : > { %v5428_v13 = vrot.slane %v17781_v5, 1 }
 0x944   : > { %v5460_v40 = vsel %vm2119_vm2, %v5424_v3, %v5425_v45 }
 0x947   : > { %13164 = vmatmul.mubr.msk.bf16.gmra.mrb[88].mxu0 %vm1333_vm0, %v4670_v32  ;;  %v22210_v32 = vld [vmem:[#allocation33_spill] sm:$0xff] }
 0x948   : > { %13167 = vmatprep.mubr.msk.bf16.mxu0 %vm1333_vm0, %v4671_v36  ;;  %v5482_v36 = vmul.f32 %v22210_v32, %v5474_v0  ;;  %v18248_v0 = vld [vmem:[%s22173_s5 + $0x100] sm:$0xff]  }
 0x94f   : > { %13168 = vmatmul.mubr.msk.bf16.gmra.mrb[92].mxu0 %vm1333_vm0, %v4672_v6  ;;  %v22211_v6 = vld [vmem:[#allocation36_spill] sm:$0xff] }
 0x950   : > { %13171 = vmatprep.mubr.msk.bf16.mxu0 %vm1333_vm0, %v4673_v25  ;;  %v5484_v14 = vmul.f32 %v22211_v6, %v5472_v62  ;;  %v18199_v25 = vpack.c.bf16 %v5482_v36, %v5475_v47  ;;  %v22215_v62 = vld [vmem:[#allocation47_spill] sm:$0xff]  ;;  %v5467_v47 = vsel %vm2119_vm2, %v5417_v9, %v5418_v8  ;;  %v22216_v9 = vld [vmem:[#allocation49_spill] sm:$0xff]  ;;  %v5427_v8 = vrot.slane %v17767_v15, 1 }
 0x952   : > { %v18206_v20 = vpack.c.bf16 %v5484_v14, %v5473_v48  ;;  %v5422_v14 = vrot.slane %v17711_v28, 1  ;;  %v998_v48 = vadd.s32 168, %v15492_v22 }
 0x954   : > { %v1024_v44 = vand.u32 15, %v998_v48  ;;  %v5432_v48 = vrot.slane %v22202_v38, 1 }
 0x956   : > { %vm1206_vm10 = vcmp.ne.s32.totalorder %v1024_v44, 15  ;;  %v1006_v44 = vadd.s32 232, %v15492_v22 }
 0x957   : > { %13172 = vmatmul.mubr.msk.bf16.gmra.mrb[96].mxu0 %vm1333_vm0, %v4674_v31  ;;  %v5471_v31 = vsel %vm2119_vm2, %v5413_v12, %v5414_v4  ;;  %v5423_v4 = vrot.slane %v17717_v49, 1  ;;  %v18294_v5 = vsel %vm1206_vm10, 1.0, %v22148_v41 }
 0x958   : > { %13183 = vmatprep.mubr.msk.bf16.mxu0 %vm1333_vm0, %v5515_v11  ;;  %v18227_v26 = vpack.c.bf16 %v5486_v42, %v5471_v31  ;;  %v18234_v11 = vpack.c.bf16 %v5488_v27, %v5469_v1  ;;  %v22217_v42 = vld [vmem:[#allocation51_spill] sm:$0xff]  ;;  %v5426_v27 = vrot.slane %v17761_v7, 1  ;;  %v1000_v31 = vadd.s32 184, %v15492_v22  ;;  %22218 = vst [vmem:[#allocation74_spill] sm:$0xff] %v18294_v5 }
 0x959   : > { %v5462_v49 = vsel %vm2119_vm2, %v5422_v14, %v5423_v4 }
 0x95a   : > { %v5494_v61 = vmul.f32 %v22216_v9, %v5462_v49  ;;  %v5458_v15 = vsel %vm2119_vm2, %v5426_v27, %v5427_v8  ;;  %v1004_v49 = vadd.s32 216, %v15492_v22 }
 0x95f   : > { %13184 = vmatmul.mubr.msk.bf16.vlgmr.msra.gmra.mrb[68].mxu0 %vm1333_vm0, %v18199_v25 }
 0x960   : > { %13216 = vmatpush3.bf16.msra.mxu0 %v14593_v55  ;;  %13187 = vmatprep.mubr.msk.bf16.mxu0 %vm1333_vm0, %v18206_v20  ;;  %v5421_v55 = vrot.slane %v17686_v39, 1  ;;  %v22214_v39 = vld [vmem:[#allocation43_spill] sm:$0xff] }
 0x961   : > { %13217 = vmatprep.subr.bf16.mxu0 %v14594_v17  ;;  %v5490_v12 = vmul.f32 %v22214_v39, %v5466_v16 }
 0x962   : > { %v5464_v34 = vsel %vm2119_vm2, %v5420_v10, %v5421_v55  ;;  %v5429_v10 = vrot.slane %v17783_v23, 1  ;;  %v5463_v1 = vsel %vm2119_vm2, %v5421_v55, %v5422_v14  ;;  %v1038_v55 = vand.u32 15, %v1000_v31 }
 0x963   : > { %v5492_v36 = vmul.f32 %v22215_v62, %v5464_v34  ;;  %v18283_v16 = vpack.c.bf16 %v5494_v61, %v5463_v1  ;;  %v5461_v34 = vsel %vm2119_vm2, %v5423_v4, %v5424_v3  ;;  %v5430_v3 = vrot.slane %v17811_v35, 1 }
 0x964   : > { %13218 = vmatpush3.bf16.msra.mxu0 %v14594_v17  ;;  %v18258_v17 = vpack.c.bf16 %v5490_v12, %v5467_v47  ;;  %v5456_v23 = vsel %vm2119_vm2, %v5428_v13, %v5429_v10  ;;  %v5431_v47 = vrot.slane %v17820_v56, 1  ;;  %vm1208_vm12 = vcmp.ne.s32.totalorder %v1038_v55, 15 }
 0x965   : > { %13219 = vmatprep.subr.bf16.mxu0 %v14595_v29  ;;  %v18263_v28 = vpack.c.bf16 %v5492_v36, %v5465_v18  ;;  %v22219_v36 = vld [vmem:[#allocation45_spill] sm:$0xff]  ;;  %v5500_v4 = vmul.f32 %v18294_v5, %v5456_v23  ;;  %v5433_v18 = vrot.slane %v22203_v53, 1  ;;  %v5457_v35 = vsel %vm2119_vm2, %v5427_v8, %v5428_v13 }
 0x966   : > { %v5498_v14 = vmul.f32 %v22219_v36, %v5458_v15  ;;  %v18317_v56 = vsel %vm1208_vm12, 1.0, %v22148_v41  ;;  %v5454_v38 = vsel %vm2119_vm2, %v5430_v3, %v5431_v47  ;;  %v1080_v8 = vand.u32 15, %v1006_v44 }
 0x967   : > { %13188 = vmatmul.mubr.msk.bf16.gmra.mrb[72].mxu0 %vm1333_vm0, %v18227_v26  ;;  %22220 = vst [vmem:[#allocation78_spill] sm:$0xff] %v18317_v56  ;;  %v5502_v13 = vmul.f32 %v18317_v56, %v5454_v38  ;;  %v5434_v1 = vrot.slane %v22204_v43, 1  ;;  %v5437_v15 = vrot.slane %v22207_v59, 1  ;;  %v1008_v23 = vadd.s32 248, %v15492_v22 }
 0x968   : > { %13191 = vmatprep.mubr.msk.bf16.mxu0 %vm1333_vm0, %v18234_v11  ;;  %13220 = vmatpush3.bf16.msra.mxu0 %v14595_v29  ;;  %v5496_v29 = vmul.f32 %v22217_v42, %v5460_v40  ;;  %v5459_v40 = vsel %vm2119_vm2, %v5425_v45, %v5426_v27  ;;  %v5452_v45 = vsel %vm2119_vm2, %v5432_v48, %v5433_v18  ;;  %v1066_v27 = vand.u32 15, %v1004_v49 }
 0x969   : > { %13221 = vmatprep.subr.bf16.mxu0 %v14596_v52  ;;  %v18310_v61 = vpack.c.bf16 %v5498_v14, %v5459_v40  ;;  %v5455_v55 = vsel %vm2119_vm2, %v5429_v10, %v5430_v3  ;;  %vm1214_vm15 = vcmp.ne.s32.totalorder %v1080_v8, 15  ;;  %v5453_v14 = vsel %vm2119_vm2, %v5431_v47, %v5432_v48  ;;  %v14598_v8 = vld [vmem:[%s22173_s5 + $0x108] sm:$0xff]  }
 0x96a   : > { %v18287_v7 = vpack.c.bf16 %v5496_v29, %v5461_v34  ;;  %v18314_v29 = vpack.c.bf16 %v5500_v4, %v5457_v35  ;;  %vm1212_vm14 = vcmp.ne.s32.totalorder %v1066_v27, 15  ;;  %v5436_v34 = vrot.slane %v22206_v60, 1 }
 0x96b   : > { %v18346_v43 = vsel %vm1212_vm14, 1.0, %v22148_v41  ;;  %v18353_v60 = vsel %vm1214_vm15, 1.0, %v22148_v41  ;;  %v1094_v10 = vand.u32 15, %v1008_v23  ;;  %v5438_v48 = vrot.slane %v17886_v63, 1 }
 0x96c   : > { %13222 = vmatpush3.bf16.msra.mxu0 %v14596_v52  ;;  %v1002_v52 = vadd.s32 200, %v15492_v22  ;;  %22222 = vst [vmem:[#allocation82_spill] sm:$0xff] %v18346_v43  ;;  %22223 = vst [vmem:[#allocation71_spill] sm:$0xff] %v18353_v60  ;;  %v5448_v59 = vsel %vm2119_vm2, %v5436_v34, %v5437_v15  ;;  %v5439_v49 = vrot.slane %v17895_v21, 1  ;;  %v5451_v40 = vsel %vm2119_vm2, %v5433_v18, %v5434_v1 }
 0x96d   : > { %13255 = vmatprep.subr.bf16.mxu0 %v18248_v0  ;;  %v5508_v47 = vmul.f32 %v18353_v60, %v5448_v59  ;;  %vm1216_vm3 = vcmp.ne.s32.totalorder %v1094_v10, 15  ;;  %v5447_v21 = vsel %vm2119_vm2, %v5437_v15, %v5438_v48  ;;  %v6303_v10 = vld [vmem:[#allocation2] sm:$0xff] }
 0x96e   : > { %v1052_v12 = vand.u32 15, %v1002_v52  ;;  %v5435_v52 = vrot.slane %v22205_v57, 1  ;;  %v5446_v27 = vsel %vm2119_vm2, %v5438_v48, %v5439_v49  ;;  %v6306_v48 = vld [vmem:[#allocation2 + $0x18] sm:$0xff] }
 0x96f   : > { %13192 = vmatmul.mubr.msk.bf16.gmra.mrb[76].mxu0 %vm1333_vm0, %v18258_v17 }
 0x970   : > { %13195 = vmatprep.mubr.msk.bf16.mxu0 %vm1333_vm0, %v18263_v28  ;;  %vm1210_vm13 = vcmp.ne.s32.totalorder %v1052_v12, 15  ;;  %v18339_v12 = vpack.c.bf16 %v5502_v13, %v5455_v55  ;;  %v5450_v57 = vsel %vm2119_vm2, %v5434_v1, %v5435_v52  ;;  %v5449_v35 = vsel %vm2119_vm2, %v5435_v52, %v5436_v34  ;;  %v14599_v13 = vld [vmem:[%s22173_s5 + $0x110] sm:$0xff]  }
 0x971   : > { %v18324_v53 = vsel %vm1210_vm13, 1.0, %v22148_v41  ;;  %v5506_v3 = vmul.f32 %v18346_v43, %v5450_v57  ;;  %v5529_v38 = vpack.c.bf16 %v5508_v47, %v5449_v35  ;;  %v5440_v1 = vrot.slane %v17739_v50, 1  ;;  %v6304_v35 = vld [vmem:[#allocation2 + $0x8] sm:$0xff] }
 0x972   : > { %22221 = vst [vmem:[#allocation81_spill] sm:$0xff] %v18324_v53  ;;  %v5504_v31 = vmul.f32 %v18324_v53, %v5452_v45  ;;  %v18368_v45 = vsel %vm1216_vm3, 1.0, %v22148_v41  ;;  %v5441_v52 = vrot.slane %v22209_v33, 1  ;;  %v1012_v50 = vadd.s32 280, %v15492_v22 }
 0x973   : > { %v5528_v44 = vpack.c.bf16 %v5506_v3, %v5451_v40  ;;  %22224 = vst [vmem:[#allocation56_spill] sm:$0xff] %v18368_v45  ;;  %v5510_v63 = vmul.f32 %v18368_v45, %v5446_v27  ;;  %v5445_v55 = vsel %vm2119_vm2, %v5439_v49, %v5440_v1 }
 0x974   : > { %v18343_v4 = vpack.c.bf16 %v5504_v31, %v5453_v14  ;;  %v5444_v15 = vsel %vm2119_vm2, %v5440_v1, %v5441_v52  ;;  %v1122_v33 = vand.u32 15, %v1012_v50 }
 0x975   : > { %v5530_v18 = vpack.c.bf16 %v5510_v63, %v5447_v21 }
 0x976   : > { %vm1220_vm5 = vcmp.ne.s32.totalorder %v1122_v33, 15 }
 0x977   : > { %13196 = vmatmul.mubr.msk.bf16.gmra.mrb[80].mxu0 %vm1333_vm0, %v18283_v16 }
 0x978   : > { %13199 = vmatprep.mubr.msk.bf16.mxu0 %vm1333_vm0, %v18287_v7 }
 0x97f   : > { %13200 = vmatmul.mubr.msk.bf16.gmra.mrb[84].mxu0 %vm1333_vm0, %v18310_v61 }
 0x980   : > { %13203 = vmatprep.mubr.msk.bf16.mxu0 %vm1333_vm0, %v18314_v29 }
 0x987   : > { %13204 = vmatmul.mubr.msk.bf16.gmra.mrb[88].mxu0 %vm1333_vm0, %v18339_v12 }
 0x988   : > { %13207 = vmatprep.mubr.msk.bf16.mxu0 %vm1333_vm0, %v18343_v4 }
 0x98f   : > { %13208 = vmatmul.mubr.msk.bf16.gmra.mrb[92].mxu0 %vm1333_vm0, %v5528_v44 }
 0x990   : > { %13211 = vmatprep.mubr.msk.bf16.mxu0 %vm1333_vm0, %v5529_v38 }
 0x997   : > { %13212 = vmatmul.mubr.msk.bf16.gmra.mrb[96].mxu0 %vm1333_vm0, %v5530_v18 }
 0x998   : > { %13223 = vmatprep.mubr.msk.bf16.mxu0 %vm1333_vm0, %v18199_v25  ;;  %v14600_v25 = vld [vmem:[%s22173_s5 + $0x118] sm:$0xff]  }
 0x99f   : > { %13224 = vmatmul.mubr.msk.bf16.vlgmr.msra.gmra.mrb[68].mxu0 %vm1333_vm0, %v18206_v20 }
 0x9a0   : > { %13256 = vmatpush3.bf16.msra.mxu0 %v18248_v0  ;;  %13227 = vmatprep.mubr.msk.bf16.mxu0 %vm1333_vm0, %v18227_v26  ;;  %v1010_v0 = vadd.s32 264, %v15492_v22 }
 0x9a1   : > { %13257 = vmatprep.subr.bf16.mxu0 %v14598_v8 }
 0x9a2   : > { %v1108_v31 = vand.u32 15, %v1010_v0  ;;  %v6307_v0 = vld [vmem:[#allocation2 + $0x20] sm:$0xff] }
 0x9a4   : > { %13258 = vmatpush3.bf16.msra.mxu0 %v14598_v8  ;;  %vm1218_vm4 = vcmp.ne.s32.totalorder %v1108_v31, 15  ;;  %v6309_v8 = vld [vmem:[#allocation2 + $0x30] sm:$0xff] }
 0x9a5   : > { %13259 = vmatprep.subr.bf16.mxu0 %v14599_v13  ;;  %v18417_v34 = vsel %vm1218_vm4, 1.0, %v22148_v41 }
 0x9a6   : > { %22225 = vst [vmem:[#allocation60_spill] sm:$0xff] %v18417_v34  ;;  %v5512_v23 = vmul.f32 %v18417_v34, %v5444_v15 }
 0x9a7   : > { %13228 = vmatmul.mubr.msk.bf16.gmra.mrb[72].mxu0 %vm1333_vm0, %v18234_v11 }
 0x9a8   : > { %13231 = vmatprep.mubr.msk.bf16.mxu0 %vm1333_vm0, %v18258_v17  ;;  %13260 = vmatpush3.bf16.msra.mxu0 %v14599_v13  ;;  %v5531_v14 = vpack.c.bf16 %v5512_v23, %v5445_v55 }
 0x9a9   : > { %13261 = vmatprep.subr.bf16.mxu0 %v14600_v25 }
 0x9ac   : > { %13262 = vmatpush3.bf16.msra.mxu0 %v14600_v25 }
 0x9af   : > { %13232 = vmatmul.mubr.msk.bf16.gmra.mrb[76].mxu0 %vm1333_vm0, %v18263_v28 }
 0x9b0   : > { %13235 = vmatprep.mubr.msk.bf16.mxu0 %vm1333_vm0, %v18283_v16 }
 0x9b7   : > { %13236 = vmatmul.mubr.msk.bf16.gmra.mrb[80].mxu0 %vm1333_vm0, %v18287_v7 }
 0x9b8   : > { %13239 = vmatprep.mubr.msk.bf16.mxu0 %vm1333_vm0, %v18310_v61 }
 0x9bf   : > { %13240 = vmatmul.mubr.msk.bf16.gmra.mrb[84].mxu0 %vm1333_vm0, %v18314_v29 }
 0x9c0   : > { %13243 = vmatprep.mubr.msk.bf16.mxu0 %vm1333_vm0, %v18339_v12 }
 0x9c7   : > { %13244 = vmatmul.mubr.msk.bf16.gmra.mrb[88].mxu0 %vm1333_vm0, %v18343_v4 }
 0x9c8   : > { %13247 = vmatprep.mubr.msk.bf16.mxu0 %vm1333_vm0, %v5528_v44 }
 0x9cf   : > { %13248 = vmatmul.mubr.msk.bf16.gmra.mrb[92].mxu0 %vm1333_vm0, %v5529_v38 }
 0x9d0   : > { %13251 = vmatprep.mubr.msk.bf16.mxu0 %vm1333_vm0, %v5530_v18 }
 0x9d7   : > { %13252 = vmatmul.mubr.msk.bf16.gmra.mrb[96].mxu0 %vm1333_vm0, %v5531_v14 }
 0x9d8   : > { %13263 = vmatprep.mubr.msk.bf16.mxu0 %vm1333_vm0, %v18206_v20  ;;  %v5442_v20 = vrot.slane %v17727_v51, 1  ;;  %v14601_v51 = vld [vmem:[#allocation10 + $0x20] sm:$0xff]  }
 0x9d9   : > { %13295 = vmatprep.subr.bf16.mxu1 %v14601_v51 }
 0x9da   : > { %13296 = vmatpush3.bf16.msra.mxu1 %v14601_v51 }
 0x9df   : > { %13264 = vmatmul.mubr.msk.bf16.vlgmr.msra.gmra.mrb[68].mxu0 %vm1333_vm0, %v18227_v26  ;;  %v18454_v26 = vsel %vm1220_vm5, 1.0, %v22148_v41 }
 0x9e0   : > { %13267 = vmatprep.mubr.msk.bf16.mxu0 %vm1333_vm0, %v18234_v11  ;;  %22226 = vst [vmem:[#allocation65_spill] sm:$0xff] %v18454_v26  ;;  %v5478_v11 = vsel %vm2119_vm2, %v5442_v20, %v5407_v30  ;;  %v14604_v30 = vld [vmem:[#allocation10 + $0x38] sm:$0xff]  }
 0x9e7   : > { %13268 = vmatmul.mubr.msk.bf16.gmra.mrb[72].mxu0 %vm1333_vm0, %v18258_v17  ;;  %v5514_v17 = vmul.f32 %v18454_v26, %v5478_v11 }
 0x9e8   : > { %13271 = vmatprep.mubr.msk.bf16.mxu0 %vm1333_vm0, %v18263_v28  ;;  %v5443_v28 = vsel %vm2119_vm2, %v5441_v52, %v5442_v20  ;;  %v6310_v52 = vld [vmem:[#allocation2 + $0x38] sm:$0xff] }
 0x9ef   : > { %13272 = vmatmul.mubr.msk.bf16.gmra.mrb[76].mxu0 %vm1333_vm0, %v18283_v16  ;;  %v5532_v16 = vpack.c.bf16 %v5514_v17, %v5443_v28 }
 0x9f0   : > { %13275 = vmatprep.mubr.msk.bf16.mxu0 %vm1333_vm0, %v18287_v7  ;;  %v14602_v7 = vld [vmem:[#allocation10 + $0x28] sm:$0xff]  }
 0x9f1   : > { %13297 = vmatprep.subr.bf16.mxu1 %v14602_v7 }
 0x9f2   : > { %13298 = vmatpush3.bf16.msra.mxu1 %v14602_v7  ;;  %v6313_v7 = vld [vmem:[#allocation2 + $0x50] sm:$0xff] }
 0x9f3   : > { %13299 = vmatprep.subr.bf16.mxu1 %v14603_v24 }
 0x9f6   : > { %13300 = vmatpush3.bf16.msra.mxu1 %v14603_v24 }
 0x9f7   : > { %13276 = vmatmul.mubr.msk.bf16.gmra.mrb[80].mxu0 %vm1333_vm0, %v18310_v61  ;;  %13301 = vmatprep.subr.bf16.mxu1 %v14604_v30  ;;  %v22227_v61 = vmov 0.0|0.0  }
 0x9f8   : > { %13279 = vmatprep.mubr.msk.bf16.mxu0 %vm1333_vm0, %v18314_v29  ;;  %v18467_v29 = vld [vmem:[#allocation19] ss:$0 sm:$0xff] }
 0x9fa   : > { %13302 = vmatpush3.bf16.msra.mxu1 %v14604_v30 }
 0x9fb   : > { %13855 = vmatprep.subr.bf16.mxu1 %v22227_v61 }
 0x9ff   : > { %13280 = vmatmul.mubr.msk.bf16.gmra.mrb[84].mxu0 %vm1333_vm0, %v18339_v12 }
 0xa00   : > { %13283 = vmatprep.mubr.msk.bf16.mxu0 %vm1333_vm0, %v18343_v4  ;;  %v6305_v4 = vld [vmem:[#allocation2 + $0x10] sm:$0xff] }
 0xa07   : > { %13284 = vmatmul.mubr.msk.bf16.gmra.mrb[88].mxu0 %vm1333_vm0, %v5528_v44 }
 0xa08   : > { %13287 = vmatprep.mubr.msk.bf16.mxu0 %vm1333_vm0, %v5529_v38 }
 0xa0f   : > { %13288 = vmatmul.mubr.msk.bf16.gmra.mrb[92].mxu0 %vm1333_vm0, %v5530_v18 }
 0xa10   : > { %13291 = vmatprep.mubr.msk.bf16.mxu0 %vm1333_vm0, %v5531_v14  ;;  %v6308_v14 = vld [vmem:[#allocation2 + $0x28] sm:$0xff] }
 0xa17   : > { %13292 = vmatmul.mubr.msk.bf16.gmra.mrb[96].mxu0 %vm1333_vm0, %v5532_v16 }
 0xab2   : > { %v13265_v12 = vpop.f32.mrb[68].mxu0 }
 0xab3   : > { %v6273_v57 = vadd.f32 %v13265_v12, %v18467_v29  ;;  %v6106_v59 = vpop.f32.mrb[69].mxu0 }
 0xab4   : > { %v6271_v3 = vadd.f32 %v18467_v29, %v6106_v59  ;;  %v13266_v47 = vpop.f32.mrb[70].mxu0 }
 0xab5   : > { %v6337_v49 = vadd.f32 %v6305_v4, %v6273_v57  ;;  %v6274_v40 = vadd.f32 %v13266_v47, %v18467_v29  ;;  %v6109_v44 = vpop.f32.mrb[71].mxu0  ;;  %v6311_v57 = vld [vmem:[#allocation2 + $0x40] sm:$0xff]  ;;  %v6314_v47 = vld [vmem:[#allocation2 + $0x58] sm:$0xff] }
 0xab6   : > { %v6335_v38 = vadd.f32 %v6303_v10, %v6271_v3  ;;  %v6272_v27 = vadd.f32 %v18467_v29, %v6109_v44  ;;  %v6312_v44 = vld [vmem:[#allocation2 + $0x48] sm:$0xff] }
 0xab7   : > { %6369 = vst.msk [vmem:[#allocation2 + $0x10] sm:$0xff] %vm1333_vm0, %v6337_v49  ;;  %v6338_v63 = vadd.f32 %v6306_v48, %v6274_v40 }
 0xab8   : > { %6367 = vst.msk [vmem:[#allocation2] sm:$0xff] %vm1333_vm0, %v6335_v38  ;;  %v6336_v21 = vadd.f32 %v6304_v35, %v6272_v27 }
 0xab9   : > { %6370 = vst.msk [vmem:[#allocation2 + $0x18] sm:$0xff] %vm1333_vm0, %v6338_v63 }
 0xaba   : > { %6368 = vst.msk [vmem:[#allocation2 + $0x8] sm:$0xff] %vm1333_vm0, %v6336_v21  ;;  %v13269_v18 = vpop.f32.mrb[72].mxu0 }
 0xabb   : > { %v6277_v13 = vadd.f32 %v13269_v18, %v18467_v29  ;;  %v6122_v25 = vpop.f32.mrb[73].mxu0 }
 0xabc   : > { %v6275_v31 = vadd.f32 %v18467_v29, %v6122_v25  ;;  %v13270_v1 = vpop.f32.mrb[74].mxu0  ;;  %v6317_v25 = vld [vmem:[#allocation2 + $0x70] sm:$0xff] }
 0xabd   : > { %v6341_v15 = vadd.f32 %v6309_v8, %v6277_v13  ;;  %v6278_v23 = vadd.f32 %v13270_v1, %v18467_v29  ;;  %v6125_v55 = vpop.f32.mrb[75].mxu0 }
 0xabe   : > { %v6339_v50 = vadd.f32 %v6307_v0, %v6275_v31  ;;  %v6276_v33 = vadd.f32 %v18467_v29, %v6125_v55  ;;  %v6401_v30 = vld [vmem:[#allocation2 + $0x10] sm:$0xff] }
 0xabf   : > { %6373 = vst.msk [vmem:[#allocation2 + $0x30] sm:$0xff] %vm1333_vm0, %v6341_v15  ;;  %v6342_v20 = vadd.f32 %v6310_v52, %v6278_v23  ;;  %v6399_v28 = vld [vmem:[#allocation2] sm:$0xff] }
 0xac0   : > { %6371 = vst.msk [vmem:[#allocation2 + $0x20] sm:$0xff] %vm1333_vm0, %v6339_v50  ;;  %v6340_v11 = vadd.f32 %v6308_v14, %v6276_v33  ;;  %v6402_v17 = vld [vmem:[#allocation2 + $0x18] sm:$0xff]  ;;  %v6315_v15 = vld [vmem:[#allocation2 + $0x60] sm:$0xff] }
 0xac1   : > { %6374 = vst.msk [vmem:[#allocation2 + $0x38] sm:$0xff] %vm1333_vm0, %v6342_v20  ;;  %v6400_v16 = vld [vmem:[#allocation2 + $0x8] sm:$0xff]  ;;  %v6432_v59 = vpack.c.bf16 %v6402_v17, %v6401_v30  ;;  %v6318_v50 = vld [vmem:[#allocation2 + $0x78] sm:$0xff] }
 0xac2   : > { %6372 = vst.msk [vmem:[#allocation2 + $0x28] sm:$0xff] %vm1333_vm0, %v6340_v11  ;;  %v13273_v51 = vpop.f32.mrb[76].mxu0  ;;  %v6431_v24 = vpack.c.bf16 %v6400_v16, %v6399_v28  ;;  %v6316_v17 = vld [vmem:[#allocation2 + $0x68] sm:$0xff] }
 0xac3   : > { %v6281_v12 = vadd.f32 %v13273_v51, %v18467_v29  ;;  %v6138_v4 = vpop.f32.mrb[77].mxu0 }
 0xac4   : > { %v6279_v10 = vadd.f32 %v18467_v29, %v6138_v4  ;;  %v13274_v3 = vpop.f32.mrb[78].mxu0  ;;  %13303 = vmatprep.mubr.msk.bf16.mxu1 %vm1333_vm0, %v6431_v24 }
 0xac5   : > { %v6345_v48 = vadd.f32 %v6313_v7, %v6281_v12  ;;  %v6282_v49 = vadd.f32 %v13274_v3, %v18467_v29  ;;  %v6141_v40 = vpop.f32.mrb[79].mxu0  ;;  %13304 = vmatmul.mubr.msk.bf16.vlgmr.msra.gmra.mrb[4].mxu1 %vm1333_vm0, %v6432_v59 }
 0xac6   : > { %v6343_v35 = vadd.f32 %v6311_v57, %v6279_v10  ;;  %v6280_v38 = vadd.f32 %v18467_v29, %v6141_v40  ;;  %v6405_v31 = vld [vmem:[#allocation2 + $0x30] sm:$0xff] }
 0xac7   : > { %6377 = vst.msk [vmem:[#allocation2 + $0x50] sm:$0xff] %vm1333_vm0, %v6345_v48  ;;  %v6346_v27 = vadd.f32 %v6314_v47, %v6282_v49  ;;  %v6403_v18 = vld [vmem:[#allocation2 + $0x20] sm:$0xff]  ;;  %v6321_v57 = vld [vmem:[#allocation2 + $0x90] sm:$0xff] }
 0xac8   : > { %6375 = vst.msk [vmem:[#allocation2 + $0x40] sm:$0xff] %vm1333_vm0, %v6343_v35  ;;  %v6344_v63 = vadd.f32 %v6312_v44, %v6280_v38  ;;  %v6406_v21 = vld [vmem:[#allocation2 + $0x38] sm:$0xff]  ;;  %v6319_v48 = vld [vmem:[#allocation2 + $0x80] sm:$0xff] }
 0xac9   : > { %6378 = vst.msk [vmem:[#allocation2 + $0x58] sm:$0xff] %vm1333_vm0, %v6346_v27  ;;  %v6404_v8 = vld [vmem:[#allocation2 + $0x28] sm:$0xff]  ;;  %v6434_v23 = vpack.c.bf16 %v6406_v21, %v6405_v31  ;;  %v6322_v35 = vld [vmem:[#allocation2 + $0x98] sm:$0xff] }
 0xaca   : > { %6376 = vst.msk [vmem:[#allocation2 + $0x48] sm:$0xff] %vm1333_vm0, %v6344_v63  ;;  %v13277_v13 = vpop.f32.mrb[80].mxu0  ;;  %v6433_v0 = vpack.c.bf16 %v6404_v8, %v6403_v18  ;;  %v6320_v21 = vld [vmem:[#allocation2 + $0x88] sm:$0xff] }
 0xacb   : > { %v6285_v1 = vadd.f32 %v13277_v13, %v18467_v29  ;;  %v6154_v52 = vpop.f32.mrb[81].mxu0 }
 0xacc   : > { %v6283_v55 = vadd.f32 %v18467_v29, %v6154_v52  ;;  %v13278_v14 = vpop.f32.mrb[82].mxu0  ;;  %13307 = vmatprep.mubr.msk.bf16.mxu1 %vm1333_vm0, %v6433_v0 }
 0xacd   : > { %v6349_v33 = vadd.f32 %v6317_v25, %v6285_v1  ;;  %v6286_v20 = vadd.f32 %v13278_v14, %v18467_v29  ;;  %v6157_v11 = vpop.f32.mrb[83].mxu0  ;;  %13308 = vmatmul.mubr.msk.bf16.gmra.mrb[8].mxu1 %vm1333_vm0, %v6434_v23 }
 0xace   : > { %v6347_v28 = vadd.f32 %v6315_v15, %v6283_v55  ;;  %v6284_v16 = vadd.f32 %v18467_v29, %v6157_v11  ;;  %v6409_v10 = vld [vmem:[#allocation2 + $0x50] sm:$0xff] }
 0xacf   : > { %6381 = vst.msk [vmem:[#allocation2 + $0x70] sm:$0xff] %vm1333_vm0, %v6349_v33  ;;  %v6350_v51 = vadd.f32 %v6318_v50, %v6286_v20  ;;  %v6407_v30 = vld [vmem:[#allocation2 + $0x40] sm:$0xff]  ;;  %v6325_v15 = vld [vmem:[#allocation2 + $0xb0] sm:$0xff] }
 0xad0   : > { %6379 = vst.msk [vmem:[#allocation2 + $0x60] sm:$0xff] %vm1333_vm0, %v6347_v28  ;;  %v6348_v7 = vadd.f32 %v6316_v17, %v6284_v16  ;;  %v6410_v24 = vld [vmem:[#allocation2 + $0x58] sm:$0xff]  ;;  %v6323_v33 = vld [vmem:[#allocation2 + $0xa0] sm:$0xff] }
 0xad1   : > { %6382 = vst.msk [vmem:[#allocation2 + $0x78] sm:$0xff] %vm1333_vm0, %v6350_v51  ;;  %v6408_v12 = vld [vmem:[#allocation2 + $0x48] sm:$0xff]  ;;  %v6436_v49 = vpack.c.bf16 %v6410_v24, %v6409_v10  ;;  %v6326_v28 = vld [vmem:[#allocation2 + $0xb8] sm:$0xff] }
 0xad2   : > { %6380 = vst.msk [vmem:[#allocation2 + $0x68] sm:$0xff] %vm1333_vm0, %v6348_v7  ;;  %v13281_v4 = vpop.f32.mrb[84].mxu0  ;;  %v6435_v59 = vpack.c.bf16 %v6408_v12, %v6407_v30  ;;  %v6324_v24 = vld [vmem:[#allocation2 + $0xa8] sm:$0xff] }
 0xad3   : > { %v6289_v3 = vadd.f32 %v13281_v4, %v18467_v29  ;;  %v6170_v47 = vpop.f32.mrb[85].mxu0 }
 0xad4   : > { %v6287_v40 = vadd.f32 %v18467_v29, %v6170_v47  ;;  %v13282_v44 = vpop.f32.mrb[86].mxu0  ;;  %13311 = vmatprep.mubr.msk.bf16.mxu1 %vm1333_vm0, %v6435_v59 }
 0xad5   : > { %v6353_v38 = vadd.f32 %v6321_v57, %v6289_v3  ;;  %v6290_v27 = vadd.f32 %v13282_v44, %v18467_v29  ;;  %v6173_v63 = vpop.f32.mrb[87].mxu0  ;;  %13312 = vmatmul.mubr.msk.bf16.gmra.mrb[12].mxu1 %vm1333_vm0, %v6436_v49 }
 0xad6   : > { %v6351_v18 = vadd.f32 %v6319_v48, %v6287_v40  ;;  %v6288_v8 = vadd.f32 %v18467_v29, %v6173_v63  ;;  %v6413_v55 = vld [vmem:[#allocation2 + $0x70] sm:$0xff] }
 0xad7   : > { %6385 = vst.msk [vmem:[#allocation2 + $0x90] sm:$0xff] %vm1333_vm0, %v6353_v38  ;;  %v6354_v13 = vadd.f32 %v6322_v35, %v6290_v27  ;;  %v6411_v31 = vld [vmem:[#allocation2 + $0x60] sm:$0xff]  ;;  %v6329_v48 = vld [vmem:[#allocation2 + $0xd0] sm:$0xff] }
 0xad8   : > { %6383 = vst.msk [vmem:[#allocation2 + $0x80] sm:$0xff] %vm1333_vm0, %v6351_v18  ;;  %v6352_v25 = vadd.f32 %v6320_v21, %v6288_v8  ;;  %v6414_v0 = vld [vmem:[#allocation2 + $0x78] sm:$0xff]  ;;  %v6327_v38 = vld [vmem:[#allocation2 + $0xc0] sm:$0xff] }
 0xad9   : > { %6386 = vst.msk [vmem:[#allocation2 + $0x98] sm:$0xff] %vm1333_vm0, %v6354_v13  ;;  %v6412_v1 = vld [vmem:[#allocation2 + $0x68] sm:$0xff]  ;;  %v6438_v20 = vpack.c.bf16 %v6414_v0, %v6413_v55  ;;  %v6330_v18 = vld [vmem:[#allocation2 + $0xd8] sm:$0xff] }
 0xada   : > { %6384 = vst.msk [vmem:[#allocation2 + $0x88] sm:$0xff] %vm1333_vm0, %v6352_v25  ;;  %v13285_v52 = vpop.f32.mrb[88].mxu0  ;;  %v6437_v23 = vpack.c.bf16 %v6412_v1, %v6411_v31  ;;  %v6328_v0 = vld [vmem:[#allocation2 + $0xc8] sm:$0xff] }
 0xadb   : > { %v6293_v14 = vadd.f32 %v13285_v52, %v18467_v29  ;;  %v6186_v50 = vpop.f32.mrb[89].mxu0 }
 0xadc   : > { %v6291_v11 = vadd.f32 %v18467_v29, %v6186_v50  ;;  %v13286_v17 = vpop.f32.mrb[90].mxu0  ;;  %13315 = vmatprep.mubr.msk.bf16.mxu1 %vm1333_vm0, %v6437_v23 }
 0xadd   : > { %v6357_v16 = vadd.f32 %v6325_v15, %v6293_v14  ;;  %v6294_v51 = vadd.f32 %v13286_v17, %v18467_v29  ;;  %v6189_v7 = vpop.f32.mrb[91].mxu0  ;;  %13316 = vmatmul.mubr.msk.bf16.gmra.mrb[16].mxu1 %vm1333_vm0, %v6438_v20 }
 0xade   : > { %v6355_v30 = vadd.f32 %v6323_v33, %v6291_v11  ;;  %v6292_v12 = vadd.f32 %v18467_v29, %v6189_v7  ;;  %v6417_v40 = vld [vmem:[#allocation2 + $0x90] sm:$0xff] }
 0xadf   : > { %6389 = vst.msk [vmem:[#allocation2 + $0xb0] sm:$0xff] %vm1333_vm0, %v6357_v16  ;;  %v6358_v4 = vadd.f32 %v6326_v28, %v6294_v51  ;;  %v6415_v10 = vld [vmem:[#allocation2 + $0x80] sm:$0xff]  ;;  %v6333_v33 = vld [vmem:[#allocation2 + $0xf0] sm:$0xff] }
 0xae0   : > { %6387 = vst.msk [vmem:[#allocation2 + $0xa0] sm:$0xff] %vm1333_vm0, %v6355_v30  ;;  %v6356_v57 = vadd.f32 %v6324_v24, %v6292_v12  ;;  %v6418_v59 = vld [vmem:[#allocation2 + $0x98] sm:$0xff]  ;;  %v6331_v16 = vld [vmem:[#allocation2 + $0xe0] sm:$0xff] }
 0xae1   : > { %6390 = vst.msk [vmem:[#allocation2 + $0xb8] sm:$0xff] %vm1333_vm0, %v6358_v4  ;;  %v6416_v3 = vld [vmem:[#allocation2 + $0x88] sm:$0xff]  ;;  %v6440_v27 = vpack.c.bf16 %v6418_v59, %v6417_v40  ;;  %v6334_v30 = vld [vmem:[#allocation2 + $0xf8] sm:$0xff] }
 0xae2   : > { %6388 = vst.msk [vmem:[#allocation2 + $0xa8] sm:$0xff] %vm1333_vm0, %v6356_v57  ;;  %v13289_v47 = vpop.f32.mrb[92].mxu0  ;;  %v6439_v49 = vpack.c.bf16 %v6416_v3, %v6415_v10  ;;  %v6332_v59 = vld [vmem:[#allocation2 + $0xe8] sm:$0xff] }
 0xae3   : > { %v6297_v44 = vadd.f32 %v13289_v47, %v18467_v29  ;;  %v6202_v35 = vpop.f32.mrb[93].mxu0 }
 0xae4   : > { %v6295_v63 = vadd.f32 %v18467_v29, %v6202_v35  ;;  %v13290_v21 = vpop.f32.mrb[94].mxu0  ;;  %13319 = vmatprep.mubr.msk.bf16.mxu1 %vm1333_vm0, %v6439_v49 }
 0xae5   : > { %v6361_v8 = vadd.f32 %v6329_v48, %v6297_v44  ;;  %v6298_v13 = vadd.f32 %v13290_v21, %v18467_v29  ;;  %v6205_v25 = vpop.f32.mrb[95].mxu0  ;;  %13320 = vmatmul.mubr.msk.bf16.gmra.mrb[20].mxu1 %vm1333_vm0, %v6440_v27 }
 0xae6   : > { %v6359_v31 = vadd.f32 %v6327_v38, %v6295_v63  ;;  %v6296_v1 = vadd.f32 %v18467_v29, %v6205_v25  ;;  %v6421_v11 = vld [vmem:[#allocation2 + $0xb0] sm:$0xff]  ;;  %v18554_v25 = vld [vmem:[%s21937_s2 + $0x1] ss:$0 sm:$0xff] }
 0xae7   : > { %6393 = vst.msk [vmem:[#allocation2 + $0xd0] sm:$0xff] %vm1333_vm0, %v6361_v8  ;;  %v6362_v52 = vadd.f32 %v6330_v18, %v6298_v13  ;;  %v6419_v55 = vld [vmem:[#allocation2 + $0xa0] sm:$0xff] }
 0xae8   : > { %6391 = vst.msk [vmem:[#allocation2 + $0xc0] sm:$0xff] %vm1333_vm0, %v6359_v31  ;;  %v6360_v15 = vadd.f32 %v6328_v0, %v6296_v1  ;;  %v6422_v23 = vld [vmem:[#allocation2 + $0xb8] sm:$0xff]  ;;  %v11950_v0 = vld [vmem:[%s21917_s3 + $0x10] sm:$0xff] }
 0xae9   : > { %6394 = vst.msk [vmem:[#allocation2 + $0xd8] sm:$0xff] %vm1333_vm0, %v6362_v52  ;;  %v6420_v14 = vld [vmem:[#allocation2 + $0xa8] sm:$0xff]  ;;  %v6442_v51 = vpack.c.bf16 %v6422_v23, %v6421_v11 }
 0xaea   : > { %6392 = vst.msk [vmem:[#allocation2 + $0xc8] sm:$0xff] %vm1333_vm0, %v6360_v15  ;;  %v13293_v50 = vpop.f32.mrb[96].mxu0  ;;  %v6441_v20 = vpack.c.bf16 %v6420_v14, %v6419_v55  ;;  %v22228_v15 = vsub.s32 1, %v15492_v22  ;;  %v22229_v55 = vsub.s32 4, %v15492_v22 }
 0xaeb   : > { %v6301_v17 = vadd.f32 %v13293_v50, %v18467_v29  ;;  %v6218_v28 = vpop.f32.mrb[97].mxu0 }
 0xaec   : > { %v6299_v7 = vadd.f32 %v18467_v29, %v6218_v28  ;;  %v13294_v24 = vpop.f32.mrb[98].mxu0  ;;  %13323 = vmatprep.mubr.msk.bf16.mxu1 %vm1333_vm0, %v6441_v20  ;;  %v18562_v23 = vrot.slane %v11950_v0, %v22228_v15  ;;  %v18566_v14 = vrot.slane %v11950_v0, %v22229_v55  ;;  %v22231_v28 = vsub.s32 7, %v15492_v22 }
 0xaed   : > { %v6365_v12 = vadd.f32 %v6333_v33, %v6301_v17  ;;  %v6302_v4 = vadd.f32 %v13294_v24, %v18467_v29  ;;  %v6221_v57 = vpop.f32.mrb[99].mxu0  ;;  %13324 = vmatmul.mubr.msk.bf16.gmra.mrb[24].mxu1 %vm1333_vm0, %v6442_v51  ;;  %v22230_v33 = vld [vmem:[#allocation28_spill] sm:$0xff] }
 0xaee   : > { %v6363_v10 = vadd.f32 %v6331_v16, %v6299_v7  ;;  %v6300_v3 = vadd.f32 %v18467_v29, %v6221_v57  ;;  %v6425_v38 = vld [vmem:[#allocation2 + $0xd0] sm:$0xff]  ;;  %v18570_v20 = vrot.slane %v11950_v0, %v22230_v33  ;;  %v18574_v16 = vrot.slane %v11950_v0, %v22231_v28  ;;  %v22244_v33 = vld [vmem:[#allocation34_spill] sm:$0xff] }
 0xaef   : > { %6397 = vst.msk [vmem:[#allocation2 + $0xf0] sm:$0xff] %vm1333_vm0, %v6365_v12  ;;  %v6366_v47 = vadd.f32 %v6334_v30, %v6302_v4  ;;  %v6423_v40 = vld [vmem:[#allocation2 + $0xc0] sm:$0xff]  ;;  %v22232_v30 = vsub.s32 3, %v15492_v22  ;;  %v22233_v4 = vsub.s32 2, %v15492_v22 }
 0xaf0   : > { %6395 = vst.msk [vmem:[#allocation2 + $0xe0] sm:$0xff] %vm1333_vm0, %v6363_v10  ;;  %v6364_v48 = vadd.f32 %v6332_v59, %v6300_v3  ;;  %v6426_v49 = vld [vmem:[#allocation2 + $0xd8] sm:$0xff] }
 0xaf1   : > { %6398 = vst.msk [vmem:[#allocation2 + $0xf8] sm:$0xff] %vm1333_vm0, %v6366_v47  ;;  %v6424_v44 = vld [vmem:[#allocation2 + $0xc8] sm:$0xff]  ;;  %v6444_v27 = vpack.c.bf16 %v6426_v49, %v6425_v38  ;;  %v18579_v12 = vrot.slane %v11950_v0, %v22232_v30  ;;  %v18583_v57 = vrot.slane %v11950_v0, %v22233_v4  ;;  %v22234_v47 = vsub.s32 5, %v15492_v22  ;;  %v22235_v49 = vld [vmem:[#allocation29_spill] sm:$0xff] }
 0xaf2   : > { %6396 = vst.msk [vmem:[#allocation2 + $0xe8] sm:$0xff] %vm1333_vm0, %v6364_v48  ;;  %v6443_v35 = vpack.c.bf16 %v6424_v44, %v6423_v40  ;;  %v6916_v40 = vmul.f32 %v18570_v20, %v22235_v49  ;;  %v22236_v44 = vsub.s32 6, %v15492_v22  ;;  %v18597_v38 = vmul.f32 0.0, %v18562_v23 }
 0xaf3   : > { %v18588_v48 = vrot.slane %v11950_v0, %v22234_v47 }
 0xaf4   : > { %13327 = vmatprep.mubr.msk.bf16.mxu1 %vm1333_vm0, %v6443_v35  ;;  %v18594_v35 = vrot.slane %v11950_v0, %v22236_v44  ;;  %22237 = vst [vmem:[#allocation69_spill] sm:$0xff] %v18597_v38 }
 0xaf5   : > { %13328 = vmatmul.mubr.msk.bf16.gmra.mrb[28].mxu1 %vm1333_vm0, %v6444_v27 }
 0xaf6   : > { %v6429_v8 = vld [vmem:[#allocation2 + $0xf0] sm:$0xff] }
 0xaf7   : > { %v6427_v63 = vld [vmem:[#allocation2 + $0xe0] sm:$0xff] }
 0xaf8   : > { %v6430_v29 = vld [vmem:[#allocation2 + $0xf8] sm:$0xff] }
 0xaf9   : > { %v6428_v21 = vld [vmem:[#allocation2 + $0xe8] sm:$0xff]  ;;  %v6446_v13 = vpack.c.bf16 %v6430_v29, %v6429_v8 }
 0xafa   : > { %v6445_v18 = vpack.c.bf16 %v6428_v21, %v6427_v63 }
 0xafc   : > { %13331 = vmatprep.mubr.msk.bf16.mxu1 %vm1333_vm0, %v6445_v18 }
 0xafd   : > { %13332 = vmatmul.mubr.msk.bf16.gmra.mrb[32].mxu1 %vm1333_vm0, %v6446_v13 }
 0xafe   : > { %13367 = vmatprep.mubr.msk.f32.mxu1 %vm14997_vm7, %v22148_v41 }
 0xb98   : > { %v13305_v31 = vpop.f32.mrb[4].mxu1 }
 0xb99   : > { %v6579_v1 = vadd.f32 %v13305_v31, %v18554_v25  ;;  %v6570_v52 = vpop.f32.mrb[5].mxu1 }
 0xb9a   : > { %v6571_v50 = vadd.f32 %v18554_v25, %v6570_v52  ;;  %v13306_v11 = vpop.f32.mrb[6].mxu1 }
 0xb9b   : > { %vm6699_vm6 = vcmp.gt.f32.partialorder %v6579_v1, 0.0  ;;  %v6731_v17 = vmul.f32 0.2, %v6579_v1  ;;  %v6582_v51 = vadd.f32 %v13306_v11, %v18554_v25  ;;  %v6573_v7 = vpop.f32.mrb[7].mxu1  ;;  %v22239_v11 = vld [vmem:[#allocation32_spill] sm:$0xff] }
 0xb9c   : > { %vm6697_vm10 = vcmp.gt.f32.partialorder %v6571_v50, 0.0  ;;  %v6729_v24 = vmul.f32 0.2, %v6571_v50  ;;  %v6574_v3 = vadd.f32 %v18554_v25, %v6573_v7 }
 0xb9d   : > { %v6763_v59 = vsel %vm6699_vm6, %v6579_v1, %v6731_v17  ;;  %vm6700_vm12 = vcmp.gt.f32.partialorder %v6582_v51, 0.0  ;;  %v6732_v10 = vmul.f32 0.2, %v6582_v51 }
 0xb9e   : > { %v6855_v27 = vrot.slane %v6763_v59, 7  ;;  %v18600_v29 = vmul.f32 %v18562_v23, %v6763_v59  ;;  %v6761_v63 = vsel %vm6697_vm10, %v6571_v50, %v6729_v24  ;;  %v18605_v18 = vmul.f32 %v18566_v14, %v6763_v59  ;;  %v22240_v24 = vld [vmem:[#allocation31_spill] sm:$0xff] }
 0xb9f   : > { %v18602_v21 = vsel %vm6700_vm12, %v6582_v51, %v6732_v10  ;;  %v18608_v8 = vmul.f32 %v18574_v16, %v6763_v59  ;;  %v6853_v13 = vrot.slane %v6761_v63, 7  ;;  %v7129_v31 = vrot.slane %v6761_v63, 1 }
 0xba0   : > { %v13309_v0 = vpop.f32.mrb[8].mxu1  ;;  %v7131_v1 = vrot.slane %v6763_v59, 1  ;;  %v18611_v52 = vmul.f32 %v18562_v23, %v6761_v63  ;;  %v21771_v15 = vrot.slane %v18602_v21, 7  ;;  %vm6698_vm13 = vcmp.gt.f32.partialorder %v6574_v3, 0.0 }
 0xba1   : > { %22238 = vst [vmem:[#allocation84_spill] sm:$0xff] %v18608_v8  ;;  %v6586_v55 = vpop.f32.mrb[9].mxu1  ;;  %v6888_v50 = vsel %vm1842_vm1, %v22235_v49, %v6853_v13  ;;  %v7164_v17 = vsel %vm2119_vm2, %v22239_v11, %v7129_v31  ;;  %v6730_v51 = vmul.f32 0.2, %v6574_v3  ;;  %v6595_v10 = vadd.f32 %v13309_v0, %v18554_v25 }
 0xba2   : > { %v13310_v7 = vpop.f32.mrb[10].mxu1  ;;  %v6893_v30 = vmul.f32 %v22240_v24, %v6888_v50  ;;  %v7168_v4 = vmul.f32 %v22208_v19, %v7164_v17  ;;  %v6885_v59 = vsel %vm1842_vm1, %v6855_v27, %v21771_v15  ;;  %v18629_v44 = vmul.f32 %v18566_v14, %v6761_v63 }
 0xba3   : > { %v6589_v47 = vpop.f32.mrb[11].mxu1  ;;  %v18633_v28 = vmul.f32 %v18562_v23, %v18602_v21  ;;  %v22242_v26 = vrot.slane %v18602_v21, 1  ;;  %v6762_v17 = vsel %vm6698_vm13, %v6574_v3, %v6730_v51  ;;  %v18640_v58 = vmul.f32 %v18570_v20, %v6885_v59  ;;  %v18659_v51 = vld [vmem:[%s21917_s3 + $0x18] ss:$0 sm:$0xff] }
 0xba4   : > { %22241 = vst [vmem:[#allocation67_spill] sm:$0xff] %v18629_v44  ;;  %v6954_v15 = vmul.f32 %v18579_v12, %v6885_v59  ;;  %v18645_v0 = vmul.f32 %v18566_v14, %v18602_v21  ;;  %v7096_v63 = vmul.f32 %v18574_v16, %v18602_v21  ;;  %v6917_v34 = vmul.f32 %v18570_v20, %v6893_v30 }
 0xba5   : > { %v7161_v50 = vsel %vm2119_vm2, %v7131_v1, %v22242_v26  ;;  %v18651_v45 = vmul.f32 %v18579_v12, %v6893_v30  ;;  %v18654_v26 = vmul.f32 %v18583_v57, %v7168_v4  ;;  %v6854_v3 = vrot.slane %v6762_v17, 7 }
 0xba6   : > { %v18662_v60 = vmul.f32 %v18583_v57, %v7161_v50  ;;  %v18665_v2 = vmul.f32 %v18588_v48, %v7161_v50  ;;  %v7130_v43 = vrot.slane %v6762_v17, 1  ;;  %vm6703_vm14 = vcmp.gt.f32.partialorder %v6595_v10, 0.0 }
 0xba7   : > { %22243 = vst [vmem:[#allocation68_spill] sm:$0xff] %v18651_v45  ;;  %v6886_v30 = vsel %vm1842_vm1, %v6854_v3, %v6855_v27  ;;  %v6887_v4 = vsel %vm1842_vm1, %v6853_v13, %v6854_v3  ;;  %v6735_v53 = vmul.f32 0.2, %v6595_v10  ;;  %v6587_v56 = vadd.f32 %v18554_v25, %v6586_v55 }
 0xba8   : > { %v13313_v5 = vpop.f32.mrb[12].mxu1  ;;  %v6895_v41 = vmul.f32 %v22244_v33, %v6886_v30  ;;  %v6918_v61 = vmul.f32 %v18570_v20, %v6887_v4  ;;  %v6952_v8 = vmul.f32 %v18579_v12, %v6887_v4  ;;  %v7162_v44 = vsel %vm2119_vm2, %v7130_v43, %v7131_v1 }
 0xba9   : > { %v6602_v45 = vpop.f32.mrb[13].mxu1  ;;  %v18678_v19 = vmul.f32 %v18659_v51, %v7161_v50  ;;  %v6988_v27 = vmul.f32 %v18594_v35, %v6885_v59  ;;  %v7163_v13 = vsel %vm2119_vm2, %v7129_v31, %v7130_v43  ;;  %v7170_v55 = vmul.f32 %v22210_v32, %v7162_v44 }
 0xbaa   : > { %v13314_v3 = vpop.f32.mrb[14].mxu1  ;;  %v6953_v30 = vmul.f32 %v18579_v12, %v6895_v41  ;;  %v6968_v33 = vadd.f32 %v6952_v8, %v6916_v40  ;;  %v18685_v24 = vadd.f32 %v6954_v15, %v6918_v61  ;;  %v18688_v4 = vsel %vm6703_vm14, %v6595_v10, %v6735_v53 }
 0xbab   : > { %22245 = vst [vmem:[#allocation70_spill] sm:$0xff] %v18678_v19  ;;  %v6605_v1 = vpop.f32.mrb[15].mxu1  ;;  %v6919_v50 = vmul.f32 %v18570_v20, %v6895_v41  ;;  %v18692_v19 = vmul.f32 %v18562_v23, %v6762_v17  ;;  %v7060_v59 = vmul.f32 %v18566_v14, %v6762_v17  ;;  %vm6701_vm15 = vcmp.gt.f32.partialorder %v6587_v56, 0.0 }
 0xbac   : > { %v6969_v43 = vadd.f32 %v6953_v30, %v6917_v34  ;;  %v18696_v31 = vmul.f32 %v18594_v35, %v6895_v41  ;;  %v7004_v44 = vadd.f32 %v6988_v27, %v6968_v33  ;;  %v18699_v61 = vmul.f32 %v18583_v57, %v7163_v13 }
 0xbad   : > { %v18702_v53 = vmul.f32 %v18583_v57, %v7170_v55  ;;  %v18705_v40 = vmul.f32 %v18588_v48, %v7163_v13  ;;  %v7228_v8 = vmul.f32 %v18588_v48, %v7170_v55  ;;  %v18712_v41 = vmul.f32 %v18562_v23, %v18688_v4 }
 0xbae   : > { %22246 = vst [vmem:[#allocation85_spill] sm:$0xff] %v18696_v31  ;;  %v7040_v10 = vadd.f32 %v18597_v38, %v7004_v44  ;;  %v6733_v34 = vmul.f32 0.2, %v6587_v56  ;;  %v6598_v33 = vadd.f32 %v13310_v7, %v18554_v25  ;;  %v18717_v17 = vmul.f32 %v18566_v14, %v18688_v4 }
 0xbaf   : > { %22247 = vst [vmem:[#allocation55_spill] sm:$0xff] %v18705_v40  ;;  %22248 = vst [vmem:[#allocation62_spill] sm:$0xff] %v18712_v41  ;;  %v18721_v27 = vmul.f32 %v18574_v16, %v18688_v4  ;;  %v6590_v55 = vadd.f32 %v18554_v25, %v6589_v47  ;;  %v18734_v32 = vadd.f32 %v13313_v5, %v18554_v25  ;;  %v22253_v5 = vrot.slane %v18602_v21, 7 }
 0xbb0   : > { %v18725_v30 = vpop.f32.mrb[16].mxu1  ;;  %v7076_v44 = vadd.f32 %v7060_v59, %v7040_v10  ;;  %v18728_v15 = vsel %vm6701_vm15, %v6587_v56, %v6733_v34  ;;  %vm6704_vm3 = vcmp.gt.f32.partialorder %v6598_v33, 0.0  ;;  %v6736_v7 = vmul.f32 0.2, %v6598_v33 }
 0xbb1   : > { %22249 = vst [vmem:[#allocation35_spill] sm:$0xff] %v18725_v30  ;;  %v18730_v40 = vpop.f32.mrb[17].mxu1  ;;  %v6857_v38 = vrot.slane %v18728_v15, 7  ;;  %v18737_v31 = vadd.f32 %v18554_v25, %v6602_v45  ;;  %v18740_v47 = vadd.f32 %v13314_v3, %v18554_v25  ;;  %v21784_v56 = vrot.slane %v18728_v15, 1 }
 0xbb2   : > { %22250 = vst [vmem:[#allocation53_spill] sm:$0xff] %v18730_v40  ;;  %v18742_v13 = vpop.f32.mrb[18].mxu1  ;;  %v7112_v59 = vadd.f32 %v7096_v63, %v7076_v44  ;;  %v18745_v10 = vsel %vm6704_vm3, %v6598_v33, %v6736_v7  ;;  %v18748_v34 = vadd.f32 %v18554_v25, %v6605_v1  ;;  %v18758_v3 = vmul.f32 %v18562_v23, %v18728_v15  ;;  %v22254_v44 = vld [vmem:[#allocation37_spill] sm:$0xff] }
 0xbb3   : > { %22251 = vst [vmem:[#allocation83_spill] sm:$0xff] %v18742_v13  ;;  %v18750_v42 = vpop.f32.mrb[19].mxu1  ;;  %v6884_v45 = vsel %vm1842_vm1, %v22253_v5, %v6857_v38  ;;  %v18762_v63 = vmul.f32 %v18566_v14, %v18728_v15  ;;  %v21785_v33 = vrot.slane %v18745_v10, 7  ;;  %v22255_v9 = vrot.slane %v18602_v21, 1 }
 0xbb4   : > { %22252 = vst [vmem:[#allocation58_spill] sm:$0xff] %v18750_v42  ;;  %v7208_v1 = vadd.f32 %v18654_v26, %v7112_v59  ;;  %v6897_v7 = vmul.f32 %v22254_v44, %v6884_v45  ;;  %vm6702_vm4 = vcmp.gt.f32.partialorder %v6590_v55, 0.0  ;;  %v22256_v42 = vrot.slane %v18688_v4, 7 }
 0xbb5   : > { %v7160_v5 = vsel %vm2119_vm2, %v22255_v9, %v21784_v56  ;;  %v6734_v45 = vmul.f32 0.2, %v6590_v55  ;;  %v7097_v9 = vmul.f32 %v18574_v16, %v18728_v15  ;;  %v18791_v56 = vmul.f32 %v18562_v23, %v18745_v10 }
 0xbb6   : > { %v18774_v62 = vmul.f32 %v22211_v6, %v7160_v5  ;;  %v6881_v26 = vsel %vm1842_vm1, %v22256_v42, %v21785_v33  ;;  %v7244_v44 = vadd.f32 %v7228_v8, %v7208_v1  ;;  %v6955_v21 = vmul.f32 %v18579_v12, %v6897_v7  ;;  %v18806_v33 = vld [vmem:[%s21976_s16 + $0x1] ss:$0 sm:$0xff] }
 0xbb7   : > { %v6989_v13 = vmul.f32 %v18594_v35, %v6897_v7  ;;  %22257 = vst [vmem:[#allocation79_spill] sm:$0xff] %v18791_v56  ;;  %v18795_v42 = vmul.f32 %v18566_v14, %v18745_v10  ;;  %v18799_v8 = vmul.f32 %v18574_v16, %v18745_v10  ;;  %v22260_v36 = vrot.slane %v18745_v10, 1 }
 0xbb8   : > { %v7264_v5 = vmul.f32 %v18659_v51, %v18774_v62  ;;  %v18801_v1 = vpop.f32.mrb[20].mxu1  ;;  %v6971_v59 = vadd.f32 %v6955_v21, %v6919_v50  ;;  %v22261_v11 = vrot.slane %v18688_v4, 1  ;;  %v6766_v49 = vsel %vm6702_vm4, %v6590_v55, %v6734_v45 }
 0xbb9   : > { %22258 = vst [vmem:[#allocation80_spill] sm:$0xff] %v18795_v42  ;;  %22259 = vst [vmem:[#allocation73_spill] sm:$0xff] %v18801_v1  ;;  %v7005_v6 = vadd.f32 %v6989_v13, %v6969_v43  ;;  %v18815_v40 = vpop.f32.mrb[21].mxu1  ;;  %v18818_v1 = vmul.f32 %v18570_v20, %v6897_v7  ;;  %v18821_v42 = vmul.f32 %v18570_v20, %v6881_v26  ;;  %vm6707_vm6 = vcmp.gt.f32.partialorder %v18734_v32, 0.0 }
 0xbba   : > { %v7157_v54 = vsel %vm2119_vm2, %v22261_v11, %v22260_v36  ;;  %22262 = vst [vmem:[#allocation39_spill] sm:$0xff] %v18815_v40  ;;  %v7280_v39 = vadd.f32 %v7264_v5, %v7244_v44  ;;  %v6958_v50 = vmul.f32 %v18579_v12, %v6881_v26  ;;  %v18824_v43 = vpop.f32.mrb[22].mxu1  ;;  %v6992_v21 = vmul.f32 %v18594_v35, %v6881_v26 }
 0xbbb   : > { %22263 = vst [vmem:[#allocation54_spill] sm:$0xff] %v18824_v43  ;;  %v7041_v13 = vadd.f32 %v18611_v52, %v7005_v6  ;;  %v18829_v36 = vmul.f32 %v18583_v57, %v7157_v54  ;;  %v6858_v11 = vrot.slane %v6766_v49, 7  ;;  %v18831_v55 = vpop.f32.mrb[23].mxu1  ;;  %v18835_v44 = vmul.f32 %v18588_v48, %v7157_v54 }
 0xbbc   : > { %22265 = vst [vmem:[#allocation75_spill] sm:$0xff] %v18831_v55  ;;  %v7302_v7 = vadd.f32 %v18806_v33, %v7280_v39  ;;  %v18838_v45 = vmul.f32 %v18659_v51, %v7157_v54  ;;  %v7134_v5 = vrot.slane %v6766_v49, 1  ;;  %v22266_v6 = vrot.slane %v18688_v4, 7  ;;  %v22267_v39 = vld [vmem:[#allocation40_spill] sm:$0xff] }
 0xbbd   : > { %22264 = vst [vmem:[#allocation59_spill] sm:$0xff] %v18829_v36  ;;  %v7077_v43 = vadd.f32 %v18605_v18, %v7041_v13  ;;  %v6883_v26 = vsel %vm1842_vm1, %v6857_v38, %v6858_v11  ;;  %v18848_v55 = vmul.f32 %v18562_v23, %v6766_v49  ;;  %v7064_v54 = vmul.f32 %v18566_v14, %v6766_v49 }
 0xbbe   : > { %v6882_v52 = vsel %vm1842_vm1, %v6858_v11, %v22266_v6  ;;  %v6922_v36 = vmul.f32 %v18570_v20, %v6883_v26  ;;  %v7098_v56 = vmul.f32 %v18574_v16, %v6766_v49  ;;  %v6956_v13 = vmul.f32 %v18579_v12, %v6883_v26 }
 0xbbf   : > { %v6899_v40 = vmul.f32 %v22267_v39, %v6882_v52  ;;  %v7113_v18 = vadd.f32 %v7097_v9, %v7077_v43  ;;  %v6990_v41 = vmul.f32 %v18594_v35, %v6883_v26  ;;  %v22268_v6 = vrot.slane %v18688_v4, 1 }
 0xbc0   : > { %vm7318_vm5 = vcmp.gt.f32.partialorder %v7302_v7, 0.0  ;;  %v7334_v11 = vmul.f32 0.2, %v7302_v7  ;;  %v18860_v30 = vadd.f32 %v6958_v50, %v6922_v36  ;;  %v7196_v52 = vmul.f32 %v18583_v57, %v18774_v62  ;;  %v18864_v39 = vpop.f32.mrb[24].mxu1 }
 0xbc1   : > { %v7158_v38 = vsel %vm2119_vm2, %v7134_v5, %v22268_v6  ;;  %v7209_v49 = vadd.f32 %v18699_v61, %v7113_v18  ;;  %v6972_v9 = vadd.f32 %v6956_v13, %v18640_v58  ;;  %v6991_v43 = vmul.f32 %v18594_v35, %v6899_v40  ;;  %v18870_v26 = vpop.f32.mrb[25].mxu1 }
 0xbc2   : > { %v7006_v4 = vadd.f32 %v6990_v41, %v18685_v24  ;;  %22269 = vst [vmem:[#allocation86_spill] sm:$0xff] %v18870_v26  ;;  %v22270_v6 = vrot.slane %v18728_v15, 1  ;;  %v18877_v36 = vmul.f32 %v22212_v46, %v7158_v38  ;;  %v6739_v61 = vmul.f32 0.2, %v18734_v32  ;;  %v18881_v18 = vpop.f32.mrb[26].mxu1 }
 0xbc3   : > { %v7245_v58 = vadd.f32 %v18665_v2, %v7209_v49  ;;  %v7007_v13 = vadd.f32 %v6991_v43, %v6971_v59  ;;  %v7008_v24 = vadd.f32 %v6992_v21, %v6972_v9  ;;  %v18885_v26 = vpop.f32.mrb[27].mxu1  ;;  %v18888_v15 = vsel %vm7318_vm5, %v7302_v7, %v7334_v11 }
 0xbc4   : > { %v7159_v50 = vsel %vm2119_vm2, %v22270_v6, %v7134_v5  ;;  %v7042_v41 = vadd.f32 %v18692_v19, %v7006_v4  ;;  %22271 = vst [vmem:[#allocation87_spill] sm:$0xff] %v18885_v26  ;;  %22272 = vst [vmem:[#allocation88_spill] sm:$0xff] %v18888_v15  ;;  %v6957_v5 = vmul.f32 %v18579_v12, %v6899_v40  ;;  %vm6705_vm10 = vcmp.gt.f32.partialorder %v18737_v31, 0.0 }
 0xbc5   : > { %v7230_v38 = vmul.f32 %v18588_v48, %v18774_v62  ;;  %v7265_v6 = vmul.f32 %v18659_v51, %v7159_v50  ;;  %v7043_v46 = vadd.f32 %v18600_v29, %v7007_v13  ;;  %v7044_v2 = vadd.f32 %v18633_v28, %v7008_v24 }
 0xbc6   : > { %v7078_v59 = vadd.f32 %v18645_v0, %v7042_v41  ;;  %v18898_v19 = vsel %vm6707_vm6, %v18734_v32, %v6739_v61  ;;  %v6923_v21 = vmul.f32 %v18570_v20, %v6899_v40  ;;  %v7231_v7 = vmul.f32 %v18588_v48, %v7159_v50 }
 0xbc7   : > { %v7232_v11 = vmul.f32 %v18588_v48, %v18877_v36  ;;  %v7281_v49 = vadd.f32 %v7265_v6, %v7245_v58  ;;  %v7079_v62 = vadd.f32 %v18762_v63, %v7043_v46  ;;  %v7080_v9 = vadd.f32 %v7064_v54, %v7044_v2 }
 0xbc8   : > { %v7114_v43 = vadd.f32 %v7098_v56, %v7078_v59  ;;  %v7266_v29 = vmul.f32 %v18659_v51, %v18877_v36  ;;  %v6863_v32 = vrot.slane %v18898_v19, 7  ;;  %v6737_v0 = vmul.f32 0.2, %v18737_v31  ;;  %v18911_v40 = vpop.f32.mrb[28].mxu1 }
 0xbc9   : > { %v7303_v28 = vadd.f32 %v18806_v33, %v7281_v49  ;;  %22273 = vst [vmem:[#allocation89_spill] sm:$0xff] %v18911_v40  ;;  %v7115_v4 = vadd.f32 %v18721_v27, %v7079_v62  ;;  %v7116_v61 = vadd.f32 %v18799_v8, %v7080_v9  ;;  %v6973_v56 = vadd.f32 %v6957_v5, %v18818_v1  ;;  %v18917_v63 = vpop.f32.mrb[29].mxu1  ;;  %v22278_v62 = vld [vmem:[#allocation42_spill] sm:$0xff] }
 0xbca   : > { %v7210_v46 = vadd.f32 %v18702_v53, %v7114_v43  ;;  %22274 = vst [vmem:[#allocation90_spill] sm:$0xff] %v18917_v63  ;;  %v18921_v58 = vmul.f32 %v18562_v23, %v18898_v19  ;;  %v18924_v13 = vsel %vm6705_vm10, %v18737_v31, %v6737_v0  ;;  %v18930_v53 = vmul.f32 %v18566_v14, %v18898_v19 }
 0xbcb   : > { %vm7319_vm12 = vcmp.gt.f32.partialorder %v7303_v28, 0.0  ;;  %v7335_v54 = vmul.f32 0.2, %v7303_v28  ;;  %v7211_v24 = vadd.f32 %v18662_v60, %v7115_v4  ;;  %v7212_v27 = vadd.f32 %v7196_v52, %v7116_v61 }
 0xbcc   : > { %v7246_v41 = vadd.f32 %v7230_v38, %v7210_v46  ;;  %v6861_v8 = vrot.slane %v18924_v13, 7  ;;  %v18934_v1 = vmul.f32 %v18574_v16, %v18898_v19  ;;  %v21792_v5 = vrot.slane %v18898_v19, 1  ;;  %v18942_v38 = vpop.f32.mrb[30].mxu1 }
 0xbcd   : > { %v7197_v6 = vmul.f32 %v18583_v57, %v7159_v50  ;;  %v7247_v31 = vadd.f32 %v7231_v7, %v7211_v24  ;;  %v7248_v2 = vadd.f32 %v7232_v11, %v7212_v27  ;;  %v22275_v60 = vrot.slane %v18745_v10, 7  ;;  %22276 = vst [vmem:[#allocation91_spill] sm:$0xff] %v18942_v38 }
 0xbce   : > { %v7282_v59 = vadd.f32 %v7266_v29, %v7246_v41  ;;  %v18945_v49 = vsel %vm7319_vm12, %v7303_v28, %v7335_v54  ;;  %v21791_v43 = vrot.slane %v18924_v13, 1  ;;  %v6740_v0 = vmul.f32 0.2, %v18740_v47 }
 0xbcf   : > { %v6880_v52 = vsel %vm1842_vm1, %v22275_v60, %v6861_v8  ;;  %22277 = vst [vmem:[#allocation92_spill] sm:$0xff] %v18945_v49  ;;  %v7283_v50 = vadd.f32 %v18838_v45, %v7247_v31  ;;  %vm6708_vm13 = vcmp.gt.f32.partialorder %v18740_v47, 0.0  ;;  %v6738_v11 = vmul.f32 0.2, %v18748_v34 }
 0xbd0   : > { %v6901_v9 = vmul.f32 %v22278_v62, %v6880_v52  ;;  %v7304_v7 = vadd.f32 %v18806_v33, %v7282_v59  ;;  %v22279_v28 = vrot.slane %v18745_v10, 1  ;;  %vm6706_vm14 = vcmp.gt.f32.partialorder %v18748_v34, 0.0 }
 0xbd1   : > { %v7305_v45 = vadd.f32 %v18806_v33, %v7283_v50  ;;  %v18966_v54 = vmul.f32 %v18562_v23, %v18924_v13  ;;  %v18972_v10 = vsel %vm6708_vm13, %v18740_v47, %v6740_v0  ;;  %v18976_v59 = vmul.f32 %v18566_v14, %v18924_v13 }
 0xbd2   : > { %v6959_v29 = vmul.f32 %v18579_v12, %v6901_v9  ;;  %v6993_v4 = vmul.f32 %v18594_v35, %v6901_v9  ;;  %v7156_v61 = vsel %vm2119_vm2, %v22279_v28, %v21791_v43  ;;  %v7336_v46 = vmul.f32 0.2, %v7304_v7 }
 0xbd3   : > { %v18969_v24 = vmul.f32 %v22213_v37, %v7156_v61  ;;  %vm7320_vm15 = vcmp.gt.f32.partialorder %v7304_v7, 0.0  ;;  %v7337_v31 = vmul.f32 0.2, %v7305_v45  ;;  %v6770_v52 = vsel %vm6706_vm14, %v18748_v34, %v6738_v11  ;;  %v19000_v11 = vpop.f32.mrb[31].mxu1 }
 0xbd4   : > { %v6975_v27 = vadd.f32 %v6959_v29, %v6923_v21  ;;  %v7009_v41 = vadd.f32 %v6993_v4, %v6973_v56  ;;  %vm7321_vm3 = vcmp.gt.f32.partialorder %v7305_v45, 0.0  ;;  %v7101_v21 = vmul.f32 %v18574_v16, %v18924_v13  ;;  %22281 = vst [vmem:[#allocation94_spill] sm:$0xff] %v19000_v11 }
 0xbd5   : > { %v7268_v60 = vmul.f32 %v18659_v51, %v18969_v24  ;;  %v21790_v56 = vrot.slane %v18972_v10, 7  ;;  %v18985_v47 = vsel %vm7320_vm15, %v7304_v7, %v7336_v46  ;;  %v6925_v0 = vmul.f32 %v18570_v20, %v6901_v9 }
 0xbd6   : > { %v7045_v50 = vadd.f32 %v18758_v3, %v7009_v41  ;;  %22280 = vst [vmem:[#allocation93_spill] sm:$0xff] %v18985_v47  ;;  %v21789_v4 = vrot.slane %v18972_v10, 1  ;;  %v18998_v3 = vmul.f32 %v18562_v23, %v18972_v10  ;;  %v6862_v7 = vrot.slane %v6770_v52, 7 }
 0xbd7   : > { %v7284_v29 = vadd.f32 %v7268_v60, %v7248_v2  ;;  %v6877_v34 = vsel %vm1842_vm1, %v6863_v32, %v21790_v56  ;;  %v19002_v9 = vsel %vm7321_vm3, %v7305_v45, %v7337_v31  ;;  %v19008_v61 = vmul.f32 %v18566_v14, %v18972_v10  ;;  %v22283_v56 = vld [vmem:[#allocation44_spill] sm:$0xff] }
 0xbd8   : > { %v7081_v28 = vadd.f32 %v18717_v17, %v7045_v50  ;;  %22282 = vst [vmem:[#allocation95_spill] sm:$0xff] %v19002_v9  ;;  %v6962_v17 = vmul.f32 %v18579_v12, %v6877_v34  ;;  %v7153_v41 = vsel %vm2119_vm2, %v21792_v5, %v21789_v4  ;;  %v6878_v45 = vsel %vm1842_vm1, %v6862_v7, %v6863_v32 }
 0xbd9   : > { %v7306_v2 = vadd.f32 %v18806_v33, %v7284_v29  ;;  %v6879_v31 = vsel %vm1842_vm1, %v6861_v8, %v6862_v7  ;;  %v19023_v60 = vmul.f32 %v18570_v20, %v6877_v34  ;;  %v6996_v50 = vmul.f32 %v18594_v35, %v6877_v34 }
 0xbda   : > { %v7117_v46 = vadd.f32 %v7101_v21, %v7081_v28  ;;  %v7104_v21 = vmul.f32 %v18574_v16, %v18972_v10  ;;  %v19029_v29 = vmul.f32 %v18562_v23, %v6770_v52  ;;  %v19032_v43 = vmul.f32 %v22283_v56, %v6878_v45 }
 0xbdb   : > { %v7338_v4 = vmul.f32 0.2, %v7306_v2  ;;  %v6926_v32 = vmul.f32 %v18570_v20, %v6879_v31  ;;  %vm7322_vm4 = vcmp.gt.f32.partialorder %v7306_v2, 0.0  ;;  %v19036_v8 = vmul.f32 %v18583_v57, %v7153_v41 }
 0xbdc   : > { %v7213_v28 = vadd.f32 %v7197_v6, %v7117_v46  ;;  %v6960_v7 = vmul.f32 %v18579_v12, %v6879_v31  ;;  %v6994_v34 = vmul.f32 %v18594_v35, %v6879_v31  ;;  %v19042_v37 = vmul.f32 %v18588_v48, %v7153_v41 }
 0xbdd   : > { %v6961_v6 = vmul.f32 %v18579_v12, %v19032_v43  ;;  %v19046_v46 = vadd.f32 %v6962_v17, %v6926_v32  ;;  %v7271_v45 = vmul.f32 %v18659_v51, %v7153_v41  ;;  %v6995_v62 = vmul.f32 %v18594_v35, %v19032_v43  ;;  %v22285_v41 = vld [vmem:[#allocation35_spill] sm:$0xff] }
 0xbde   : > { %v7249_v5 = vadd.f32 %v18835_v44, %v7213_v28  ;;  %v6976_v56 = vadd.f32 %v6960_v7, %v18821_v42  ;;  %v7010_v11 = vadd.f32 %v6994_v34, %v18860_v30  ;;  %v19053_v31 = vsel %vm7322_vm4, %v7306_v2, %v7338_v4  ;;  %v22290_v2 = vld [vmem:[#allocation80_spill] sm:$0xff]  ;;  %v19077_v34 = vpop.f32.mrb[32].mxu1 }
 0xbdf   : > { %22284 = vst [vmem:[#allocation96_spill] sm:$0xff] %v19053_v31  ;;  %v7068_v44 = vmul.f32 %v18566_v14, %v6770_v52  ;;  %v7102_v28 = vmul.f32 %v18574_v16, %v6770_v52  ;;  %v7138_v38 = vrot.slane %v6770_v52, 1  ;;  %v7011_v63 = vadd.f32 %v6995_v62, %v6975_v27  ;;  %v22288_v27 = vld [vmem:[#allocation62_spill] sm:$0xff]  ;;  %22291 = vst [vmem:[#allocation35_spill] sm:$0xff] %v19077_v34  ;;  %v19090_v31 = vpop.f32.mrb[33].mxu1 }
 0xbe0   : > { %v7012_v40 = vadd.f32 %v6996_v50, %v6976_v56  ;;  %v7046_v17 = vadd.f32 %v18848_v55, %v7010_v11  ;;  %v6627_v32 = vadd.f32 %v22285_v41, %v18554_v25  ;;  %v22286_v42 = vrot.slane %v18898_v19, 1  ;;  %v22289_v56 = vld [vmem:[#allocation79_spill] sm:$0xff]  ;;  %22294 = vst [vmem:[#allocation62_spill] sm:$0xff] %v19090_v31 }
 0xbe1   : > { %v22287_v30 = vrot.slane %v18924_v13, 1  ;;  %v7198_v52 = vmul.f32 %v18583_v57, %v18877_v36  ;;  %v19070_v62 = vadd.f32 %v6961_v6, %v6925_v0  ;;  %v7047_v55 = vadd.f32 %v22288_v27, %v7011_v63  ;;  %v22292_v13 = vld [vmem:[#allocation43_spill] sm:$0xff]  ;;  %v22293_v27 = vld [vmem:[#allocation53_spill] sm:$0xff] }
 0xbe2   : > { %v7154_v7 = vsel %vm2119_vm2, %v7138_v38, %v22286_v42  ;;  %v7048_v11 = vadd.f32 %v22289_v56, %v7012_v40  ;;  %v7082_v50 = vadd.f32 %v22290_v2, %v7046_v17  ;;  %v7200_v19 = vmul.f32 %v18583_v57, %v18969_v24  ;;  %v22309_v31 = vld [vmem:[#allocation47_spill] sm:$0xff] }
 0xbe3   : > { %v7155_v4 = vsel %vm2119_vm2, %v22287_v30, %v7138_v38  ;;  %v7178_v41 = vmul.f32 %v22292_v13, %v7154_v7  ;;  %vm6711_vm5 = vcmp.gt.f32.partialorder %v6627_v32, 0.0  ;;  %v6743_v42 = vmul.f32 0.2, %v6627_v32 }
 0xbe4   : > { %v7269_v38 = vmul.f32 %v18659_v51, %v7155_v4  ;;  %v7083_v36 = vadd.f32 %v18976_v59, %v7047_v55  ;;  %v7084_v0 = vadd.f32 %v7068_v44, %v7048_v11  ;;  %v7118_v6 = vadd.f32 %v7102_v28, %v7082_v50  ;;  %v22297_v50 = vld [vmem:[#allocation46_spill] sm:$0xff] }
 0xbe5   : > { %v7234_v40 = vmul.f32 %v18588_v48, %v18969_v24  ;;  %v7235_v63 = vmul.f32 %v18588_v48, %v7155_v4  ;;  %v6775_v30 = vsel %vm6711_vm5, %v6627_v32, %v6743_v42  ;;  %v6619_v56 = vadd.f32 %v18554_v25, %v22293_v27 }
 0xbe6   : > { %v7285_v17 = vadd.f32 %v7269_v38, %v7249_v5  ;;  %v7119_v7 = vadd.f32 %v18934_v1, %v7083_v36  ;;  %v7120_v2 = vadd.f32 %v7104_v21, %v7084_v0  ;;  %v7214_v13 = vadd.f32 %v7198_v52, %v7118_v6  ;;  %v22295_v5 = vld [vmem:[#allocation59_spill] sm:$0xff]  ;;  %v22296_v1 = vld [vmem:[#allocation29_spill] sm:$0xff]  ;;  %v22298_v6 = vld [vmem:[#allocation32_spill] sm:$0xff] }
 0xbe7   : > { %v19088_v34 = vrot.slane %v6775_v30, 7  ;;  %v7236_v59 = vmul.f32 %v18588_v48, %v7178_v41  ;;  %v7270_v44 = vmul.f32 %v18659_v51, %v7178_v41  ;;  %v19095_v28 = vrot.slane %v6775_v30, 1 }
 0xbe8   : > { %v7307_v24 = vadd.f32 %v18806_v33, %v7285_v17  ;;  %v7215_v32 = vadd.f32 %v22295_v5, %v7119_v7  ;;  %v7216_v55 = vadd.f32 %v7200_v19, %v7120_v2  ;;  %v7250_v11 = vadd.f32 %v7234_v40, %v7214_v13  ;;  %v22299_v40 = vld [vmem:[#allocation45_spill] sm:$0xff] }
 0xbe9   : > { %v7464_v21 = vsel %vm1842_vm1, %v22296_v1, %v19088_v34  ;;  %vm6709_vm10 = vcmp.gt.f32.partialorder %v6619_v56, 0.0  ;;  %v7716_v17 = vsel %vm2119_vm2, %v22298_v6, %v19095_v28  ;;  %v6927_v19 = vmul.f32 %v18570_v20, %v19032_v43 }
 0xbea   : > { %vm7323_vm6 = vcmp.gt.f32.partialorder %v7307_v24, 0.0  ;;  %v7339_v52 = vmul.f32 0.2, %v7307_v24  ;;  %v7465_v38 = vmul.f32 %v22297_v50, %v7464_v21  ;;  %v7251_v42 = vadd.f32 %v7235_v63, %v7215_v32 }
 0xbeb   : > { %v7252_v36 = vadd.f32 %v7236_v59, %v7216_v55  ;;  %v7286_v0 = vadd.f32 %v7270_v44, %v7250_v11  ;;  %v19110_v13 = vmul.f32 %v18566_v14, %v6775_v30  ;;  %v7736_v27 = vmul.f32 %v22299_v40, %v7716_v17  ;;  %v19120_v44 = vpop.f32.mrb[34].mxu1 }
 0xbec   : > { %v6741_v7 = vmul.f32 0.2, %v6619_v56  ;;  %v7287_v2 = vadd.f32 %v7271_v45, %v7251_v42  ;;  %v19115_v63 = vmul.f32 %v18574_v16, %v6775_v30  ;;  %v19118_v59 = vmul.f32 %v18562_v23, %v6775_v30  ;;  %22301 = vst [vmem:[#allocation80_spill] sm:$0xff] %v19120_v44  ;;  %v22303_v45 = vld [vmem:[#allocation83_spill] sm:$0xff] }
 0xbed   : > { %v7308_v5 = vadd.f32 %v18806_v33, %v7286_v0  ;;  %v19123_v32 = vsel %vm7323_vm6, %v7307_v24, %v7339_v52  ;;  %v19126_v43 = vmul.f32 %v7465_v38, %v18570_v20  ;;  %v6630_v11 = vadd.f32 %v22303_v45, %v18554_v25  ;;  %v22304_v0 = vld [vmem:[#allocation58_spill] sm:$0xff] }
 0xbee   : > { %22300 = vst [vmem:[#allocation79_spill] sm:$0xff] %v19118_v59  ;;  %22302 = vst [vmem:[#allocation53_spill] sm:$0xff] %v19123_v32  ;;  %v19129_v55 = vsel %vm6709_vm10, %v6619_v56, %v6741_v7  ;;  %v7309_v21 = vadd.f32 %v18806_v33, %v7287_v2  ;;  %v7201_v30 = vmul.f32 %v18583_v57, %v7155_v4  ;;  %v22306_v2 = vrot.slane %v18972_v10, 7 }
 0xbef   : > { %v6865_v42 = vrot.slane %v19129_v55, 7  ;;  %v6622_v17 = vadd.f32 %v18554_v25, %v22304_v0  ;;  %vm7324_vm12 = vcmp.gt.f32.partialorder %v7308_v5, 0.0  ;;  %v19139_v24 = vmul.f32 %v18659_v51, %v7736_v27  ;;  %v22307_v0 = vld [vmem:[#allocation48_spill] sm:$0xff] }
 0xbf0   : > { %v21798_v52 = vrot.slane %v19129_v55, 1  ;;  %v19143_v56 = vmul.f32 %v18583_v57, %v7178_v41  ;;  %v7340_v38 = vmul.f32 0.2, %v7308_v5  ;;  %v7341_v7 = vmul.f32 0.2, %v7309_v21 }
 0xbf1   : > { %22305 = vst [vmem:[#allocation59_spill] sm:$0xff] %v19139_v24  ;;  %v6876_v45 = vsel %vm1842_vm1, %v22306_v2, %v6865_v42  ;;  %v19151_v4 = vmul.f32 %v18562_v23, %v19129_v55  ;;  %v22308_v27 = vrot.slane %v18972_v10, 1  ;;  %vm6712_vm13 = vcmp.gt.f32.partialorder %v6630_v11, 0.0 }
 0xbf2   : > { %v6905_v44 = vmul.f32 %v22307_v0, %v6876_v45  ;;  %v6744_v24 = vmul.f32 0.2, %v6630_v11  ;;  %vm7325_vm14 = vcmp.gt.f32.partialorder %v7309_v21, 0.0  ;;  %vm6710_vm15 = vcmp.gt.f32.partialorder %v6622_v17, 0.0 }
 0xbf3   : > { %v7152_v41 = vsel %vm2119_vm2, %v22308_v27, %v21798_v52  ;;  %v6742_v2 = vmul.f32 0.2, %v6622_v17  ;;  %v7071_v45 = vmul.f32 %v18566_v14, %v19129_v55  ;;  %v19170_v10 = vsel %vm7324_vm12, %v7308_v5, %v7340_v38 }
 0xbf4   : > { %v19161_v32 = vmul.f32 %v22309_v31, %v7152_v41  ;;  %v6963_v9 = vmul.f32 %v18579_v12, %v6905_v44  ;;  %v6997_v47 = vmul.f32 %v18594_v35, %v6905_v44  ;;  %v19167_v0 = vsel %vm6712_vm13, %v6630_v11, %v6744_v24  ;;  %22310 = vst [vmem:[#allocation83_spill] sm:$0xff] %v19170_v10  ;;  %v19181_v11 = vpop.f32.mrb[35].mxu1 }
 0xbf5   : > { %v7105_v27 = vmul.f32 %v18574_v16, %v19129_v55  ;;  %v21803_v52 = vrot.slane %v19167_v0, 7  ;;  %v19177_v31 = vsel %vm7325_vm14, %v7309_v21, %v7341_v7  ;;  %v21802_v26 = vrot.slane %v19167_v0, 1  ;;  %22312 = vst [vmem:[#allocation97_spill] sm:$0xff] %v19181_v11 }
 0xbf6   : > { %v7272_v41 = vmul.f32 %v18659_v51, %v19161_v32  ;;  %22311 = vst [vmem:[#allocation58_spill] sm:$0xff] %v19177_v31  ;;  %v7013_v49 = vadd.f32 %v6997_v47, %v19070_v62  ;;  %v6774_v15 = vsel %vm6710_vm15, %v6622_v17, %v6742_v2  ;;  %v6979_v10 = vadd.f32 %v6963_v9, %v6927_v19 }
 0xbf7   : > { %v6873_v5 = vsel %vm1842_vm1, %v19088_v34, %v21803_v52  ;;  %v6866_v38 = vrot.slane %v6774_v15, 7  ;;  %v6929_v59 = vmul.f32 %v18570_v20, %v6905_v44  ;;  %v19192_v47 = vmul.f32 %v18566_v14, %v19167_v0 }
 0xbf8   : > { %v7288_v24 = vadd.f32 %v7272_v41, %v7252_v36  ;;  %v7049_v21 = vadd.f32 %v18966_v54, %v7013_v49  ;;  %v7149_v62 = vsel %vm2119_vm2, %v19095_v28, %v21802_v26  ;;  %v6966_v36 = vmul.f32 %v18579_v12, %v6873_v5  ;;  %v22315_v26 = vld [vmem:[#allocation50_spill] sm:$0xff] }
 0xbf9   : > { %22313 = vst [vmem:[#allocation98_spill] sm:$0xff] %v19192_v47  ;;  %v7000_v17 = vmul.f32 %v18594_v35, %v6873_v5  ;;  %v7108_v9 = vmul.f32 %v18574_v16, %v19167_v0  ;;  %v19205_v49 = vmul.f32 %v18562_v23, %v19167_v0  ;;  %v6874_v44 = vsel %vm1842_vm1, %v6866_v38, %v19088_v34 }
 0xbfa   : > { %v7085_v54 = vadd.f32 %v18930_v53, %v7049_v21  ;;  %v7310_v19 = vadd.f32 %v18806_v33, %v7288_v24  ;;  %v6875_v7 = vsel %vm1842_vm1, %v6865_v42, %v6866_v38  ;;  %v19215_v2 = vmul.f32 %v18588_v48, %v7149_v62 }
 0xbfb   : > { %22314 = vst [vmem:[#allocation99_spill] sm:$0xff] %v19205_v49  ;;  %v19218_v41 = vmul.f32 %v18659_v51, %v7149_v62  ;;  %v6907_v52 = vmul.f32 %v22315_v26, %v6874_v44  ;;  %v6930_v11 = vmul.f32 %v18570_v20, %v6875_v7  ;;  %v19223_v24 = vmul.f32 %v18570_v20, %v6873_v5 }
 0xbfc   : > { %v7121_v53 = vadd.f32 %v7105_v27, %v7085_v54  ;;  %v6964_v21 = vmul.f32 %v18579_v12, %v6875_v7  ;;  %v6998_v34 = vmul.f32 %v18594_v35, %v6875_v7  ;;  %v19228_v42 = vmul.f32 %v18583_v57, %v7149_v62 }
 0xbfd   : > { %22316 = vst [vmem:[#allocation100_spill] sm:$0xff] %v19223_v24  ;;  %v6965_v38 = vmul.f32 %v18579_v12, %v6907_v52  ;;  %v19231_v31 = vadd.f32 %v6966_v36, %v6930_v11  ;;  %v6999_v49 = vmul.f32 %v18594_v35, %v6907_v52  ;;  %vm7326_vm3 = vcmp.gt.f32.partialorder %v7310_v19, 0.0 }
 0xbfe   : > { %22317 = vst [vmem:[#allocation101_spill] sm:$0xff] %v19228_v42  ;;  %v7217_v44 = vadd.f32 %v7201_v30, %v7121_v53  ;;  %v6980_v27 = vadd.f32 %v6964_v21, %v19023_v60  ;;  %v7014_v5 = vadd.f32 %v6998_v34, %v19046_v46  ;;  %v7342_v54 = vmul.f32 0.2, %v7310_v19  ;;  %v22321_v53 = vld [vmem:[#allocation39_spill] sm:$0xff] }
 0xbff   : > { %v19236_v26 = vadd.f32 %v6965_v38, %v6929_v59  ;;  %v7015_v47 = vadd.f32 %v6999_v49, %v6979_v10  ;;  %v7142_v7 = vrot.slane %v6774_v15, 1  ;;  %v19240_v24 = vmul.f32 %v18562_v23, %v6774_v15  ;;  %v22320_v49 = vld [vmem:[#allocation73_spill] sm:$0xff] }
 0xc00   : > { %v7253_v62 = vadd.f32 %v19042_v37, %v7217_v44  ;;  %v7016_v42 = vadd.f32 %v7000_v17, %v6980_v27  ;;  %v7050_v11 = vadd.f32 %v19029_v29, %v7014_v5  ;;  %v7072_v52 = vmul.f32 %v18566_v14, %v6774_v15  ;;  %v22319_v29 = vld [vmem:[#allocation49_spill] sm:$0xff] }
 0xc01   : > { %v7051_v30 = vadd.f32 %v18921_v58, %v7015_v47  ;;  %v7150_v60 = vsel %vm2119_vm2, %v7142_v7, %v19095_v28  ;;  %v22318_v46 = vrot.slane %v19129_v55, 1  ;;  %v7106_v36 = vmul.f32 %v18574_v16, %v6774_v15 }
 0xc02   : > { %v7052_v37 = vadd.f32 %v18998_v3, %v7016_v42  ;;  %v7086_v10 = vadd.f32 %v19008_v61, %v7050_v11  ;;  %v19256_v17 = vmul.f32 %v22319_v29, %v7150_v60  ;;  %v6643_v28 = vadd.f32 %v22320_v49, %v18554_v25 }
 0xc03   : > { %v7151_v59 = vsel %vm2119_vm2, %v22318_v46, %v7142_v7  ;;  %v7087_v58 = vadd.f32 %v7071_v45, %v7051_v30  ;;  %v6635_v55 = vadd.f32 %v18554_v25, %v22321_v53  ;;  %v7204_v3 = vmul.f32 %v18583_v57, %v19161_v32 }
 0xc04   : > { %v7273_v47 = vmul.f32 %v18659_v51, %v7151_v59  ;;  %v7088_v21 = vadd.f32 %v7072_v52, %v7052_v37  ;;  %v7122_v34 = vadd.f32 %v7106_v36, %v7086_v10  ;;  %v7238_v15 = vmul.f32 %v18588_v48, %v19161_v32 }
 0xc05   : > { %v7123_v61 = vadd.f32 %v19115_v63, %v7087_v58  ;;  %vm6715_vm4 = vcmp.gt.f32.partialorder %v6643_v28, 0.0  ;;  %v6747_v45 = vmul.f32 0.2, %v6643_v28  ;;  %v7239_v27 = vmul.f32 %v18588_v48, %v7151_v59 }
 0xc06   : > { %v7289_v42 = vadd.f32 %v7273_v47, %v7253_v62  ;;  %v7124_v38 = vadd.f32 %v7108_v9, %v7088_v21  ;;  %v7218_v44 = vadd.f32 %v19143_v56, %v7122_v34  ;;  %v7240_v5 = vmul.f32 %v18588_v48, %v19256_v17 }
 0xc07   : > { %v7219_v7 = vadd.f32 %v19036_v8, %v7123_v61  ;;  %v19274_v30 = vsel %vm6715_vm4, %v6643_v28, %v6747_v45  ;;  %v6745_v32 = vmul.f32 0.2, %v6635_v55  ;;  %v7274_v62 = vmul.f32 %v18659_v51, %v19256_v17 }
 0xc08   : > { %v7311_v11 = vadd.f32 %v18806_v33, %v7289_v42  ;;  %v7220_v52 = vadd.f32 %v7204_v3, %v7124_v38  ;;  %v7254_v63 = vadd.f32 %v7238_v15, %v7218_v44  ;;  %vm6713_vm5 = vcmp.gt.f32.partialorder %v6635_v55, 0.0  ;;  %v22327_v38 = vld [vmem:[#allocation52_spill] sm:$0xff] }
 0xc09   : > { %v19279_v56 = vsel %vm7326_vm3, %v7310_v19, %v7342_v54  ;;  %v7255_v9 = vadd.f32 %v7239_v27, %v7219_v7  ;;  %v19282_v46 = vmul.f32 %v18583_v57, %v7151_v59  ;;  %v21810_v10 = vrot.slane %v19274_v30, 7  ;;  %v22323_v19 = vld [vmem:[#allocation54_spill] sm:$0xff]  ;;  %v22328_v27 = vld [vmem:[#allocation51_spill] sm:$0xff] }
 0xc0a   : > { %22322 = vst [vmem:[#allocation73_spill] sm:$0xff] %v19279_v56  ;;  %v7343_v60 = vmul.f32 0.2, %v7311_v11  ;;  %v7256_v8 = vadd.f32 %v7240_v5, %v7220_v52  ;;  %v7290_v37 = vadd.f32 %v7274_v62, %v7254_v63  ;;  %vm7327_vm6 = vcmp.gt.f32.partialorder %v7311_v11, 0.0 }
 0xc0b   : > { %v7291_v36 = vadd.f32 %v19218_v41, %v7255_v9  ;;  %v19288_v58 = vmul.f32 %v18562_v23, %v19274_v30  ;;  %v19290_v47 = vsel %vm6713_vm5, %v6635_v55, %v6745_v32  ;;  %v6646_v54 = vadd.f32 %v22323_v19, %v18554_v25 }
 0xc0c   : > { %v7312_v49 = vadd.f32 %v18806_v33, %v7290_v37  ;;  %v19297_v59 = vmul.f32 %v18566_v14, %v19274_v30  ;;  %v21806_v28 = vrot.slane %v19290_v47, 7  ;;  %v21805_v53 = vrot.slane %v19290_v47, 1 }
 0xc0d   : > { %v7313_v41 = vadd.f32 %v18806_v33, %v7291_v36  ;;  %v19302_v21 = vsel %vm7327_vm6, %v7311_v11, %v7343_v60  ;;  %v19306_v55 = vmul.f32 %v18574_v16, %v19274_v30  ;;  %v21809_v25 = vrot.slane %v19274_v30, 1  ;;  %v22329_v11 = vld [vmem:[#allocation31_spill] sm:$0xff]  ;;  %v22331_v36 = vld [vmem:[#allocation30_spill] sm:$0xff] }
 0xc0e   : > { %22324 = vst [vmem:[#allocation39_spill] sm:$0xff] %v19302_v21  ;;  %v7344_v34 = vmul.f32 0.2, %v7312_v49  ;;  %v22325_v3 = vrot.slane %v19167_v0, 7  ;;  %v22326_v61 = vrot.slane %v19167_v0, 1  ;;  %vm6716_vm10 = vcmp.gt.f32.partialorder %v6646_v54, 0.0 }
 0xc0f   : > { %vm7328_vm12 = vcmp.gt.f32.partialorder %v7312_v49, 0.0  ;;  %v7345_v45 = vmul.f32 0.2, %v7313_v41  ;;  %vm7329_vm13 = vcmp.gt.f32.partialorder %v7313_v41, 0.0  ;;  %v7109_v7 = vmul.f32 %v18574_v16, %v19290_v47 }
 0xc10   : > { %v6872_v15 = vsel %vm1842_vm1, %v22325_v3, %v21806_v28  ;;  %v7148_v42 = vsel %vm2119_vm2, %v22326_v61, %v21805_v53  ;;  %v6748_v52 = vmul.f32 0.2, %v6646_v54  ;;  %v19330_v62 = vmul.f32 %v18562_v23, %v19290_v47 }
 0xc11   : > { %v6909_v44 = vmul.f32 %v22327_v38, %v6872_v15  ;;  %v7184_v5 = vmul.f32 %v22328_v27, %v7148_v42  ;;  %v7467_v32 = vmul.f32 %v22329_v11, %v6872_v15  ;;  %v19334_v9 = vmul.f32 %v18566_v14, %v19290_v47 }
 0xc12   : > { %v19336_v60 = vsel %vm7328_vm12, %v7312_v49, %v7344_v34  ;;  %v7718_v19 = vmul.f32 %v22331_v36, %v7148_v42  ;;  %v19341_v3 = vsel %vm6716_vm10, %v6646_v54, %v6748_v52  ;;  %v19343_v15 = vsel %vm7329_vm13, %v7313_v41, %v7345_v45 }
 0xc13   : > { %v7001_v63 = vmul.f32 %v18594_v35, %v6909_v44  ;;  %v7276_v0 = vmul.f32 %v18659_v51, %v7184_v5  ;;  %22330 = vst [vmem:[#allocation54_spill] sm:$0xff] %v19336_v60  ;;  %v7517_v37 = vmul.f32 %v7467_v32, %v18579_v12  ;;  %22332 = vst [vmem:[#allocation102_spill] sm:$0xff] %v19343_v15  ;;  %v21807_v53 = vrot.slane %v19341_v3, 7  ;;  %v22342_v15 = vld [vmem:[#allocation100_spill] sm:$0xff] }
 0xc14   : > { %v19348_v28 = vmul.f32 %v18588_v48, %v7184_v5  ;;  %v19351_v49 = vmul.f32 %v7467_v32, %v18570_v20  ;;  %v21808_v42 = vrot.slane %v19341_v3, 1  ;;  %v19373_v5 = vmul.f32 %v7718_v19, %v18583_v57 }
 0xc15   : > { %v7017_v61 = vadd.f32 %v7001_v63, %v19236_v26  ;;  %v7292_v44 = vadd.f32 %v7276_v0, %v7256_v8  ;;  %v19354_v34 = vadd.f32 %v7517_v37, %v19126_v43  ;;  %v7459_v26 = vsel %vm1842_vm1, %v21810_v10, %v21807_v53  ;;  %v19368_v8 = vld [vmem:[%s21937_s2 + $0x1] ss:$0 sm:$0xff]  ;;  %v22333_v43 = vld [vmem:[#allocation75_spill] sm:$0xff] }
 0xc16   : > { %v6638_v45 = vadd.f32 %v19368_v8, %v22333_v43  ;;  %v19381_v32 = vmul.f32 %v18566_v14, %v19341_v3  ;;  %v7711_v52 = vsel %vm2119_vm2, %v21809_v25, %v21808_v42  ;;  %v19392_v37 = vmul.f32 %v18574_v16, %v19341_v3 }
 0xc17   : > { %v7053_v54 = vadd.f32 %v19151_v4, %v7017_v61  ;;  %v7314_v41 = vadd.f32 %v18806_v33, %v7292_v44  ;;  %v19377_v4 = vmul.f32 %v18562_v23, %v19341_v3  ;;  %v19395_v19 = vmul.f32 %v7459_v26, %v18570_v20 }
 0xc18   : > { %22334 = vst [vmem:[#allocation75_spill] sm:$0xff] %v19381_v32  ;;  %v7520_v61 = vmul.f32 %v7459_v26, %v18579_v12  ;;  %vm6714_vm15 = vcmp.gt.f32.partialorder %v6638_v45, 0.0  ;;  %v6746_v44 = vmul.f32 0.2, %v6638_v45  ;;  %v7550_v53 = vmul.f32 %v7459_v26, %v18594_v35 }
 0xc19   : > { %v7089_v63 = vadd.f32 %v19110_v13, %v7053_v54  ;;  %vm7330_vm14 = vcmp.gt.f32.partialorder %v7314_v41, 0.0  ;;  %v7346_v0 = vmul.f32 0.2, %v7314_v41  ;;  %v19400_v42 = vmul.f32 %v7711_v52, %v18583_v57 }
 0xc1a   : > { %v19403_v13 = vmul.f32 %v7711_v52, %v18588_v48  ;;  %v19408_v25 = vmul.f32 %v18659_v51, %v7711_v52  ;;  %v6778_v10 = vsel %vm6714_vm15, %v6638_v45, %v6746_v44  ;;  %v19412_v36 = vmul.f32 %v18583_v57, %v22298_v6 }
 0xc1b   : > { %v7125_v43 = vadd.f32 %v7109_v7, %v7089_v63  ;;  %22335 = vst [vmem:[#allocation103_spill] sm:$0xff] %v19400_v42  ;;  %v19405_v54 = vsel %vm7330_vm14, %v7314_v41, %v7346_v0  ;;  %v6870_v63 = vrot.slane %v6778_v10, 7  ;;  %v7146_v26 = vrot.slane %v6778_v10, 1  ;;  %v22337_v0 = vld [vmem:[#allocation86_spill] sm:$0xff] }
 0xc1c   : > { %22336 = vst [vmem:[#allocation104_spill] sm:$0xff] %v19405_v54  ;;  %v7206_v11 = vmul.f32 %v18583_v57, %v19256_v17  ;;  %v7110_v29 = vmul.f32 %v18574_v16, %v6778_v10  ;;  %v6659_v41 = vadd.f32 %v19368_v8, %v18864_v39  ;;  %v19422_v52 = vadd.f32 %v19368_v8, %v22337_v0  ;;  %v22341_v54 = vld [vmem:[#allocation34_spill] sm:$0xff] }
 0xc1d   : > { %v7221_v7 = vadd.f32 %v19282_v46, %v7125_v43  ;;  %v19426_v45 = vadd.f32 %v19368_v8, %v18881_v18  ;;  %v22338_v44 = vrot.slane %v19290_v47, 7  ;;  %v6890_v43 = vsel %vm1842_vm1, %v6870_v63, %v22296_v1 }
 0xc1e   : > { %v22339_v39 = vrot.slane %v19290_v47, 1  ;;  %v6891_v18 = vmul.f32 %v22297_v50, %v6890_v43  ;;  %v19456_v43 = vmul.f32 %v18562_v23, %v6778_v10  ;;  %vm6719_vm3 = vcmp.gt.f32.partialorder %v6659_v41, 0.0 }
 0xc1f   : > { %v7257_v46 = vadd.f32 %v19215_v2, %v7221_v7  ;;  %v6871_v17 = vsel %vm1842_vm1, %v22338_v44, %v6870_v63  ;;  %v7166_v2 = vsel %vm2119_vm2, %v7146_v26, %v22298_v6  ;;  %v22340_v44 = vrot.slane %v19274_v30, 7 }
 0xc20   : > { %v19440_v0 = vsel %vm2119_vm2, %v22339_v39, %v7146_v26  ;;  %v7002_v27 = vmul.f32 %v18594_v35, %v6871_v17  ;;  %v7488_v38 = vmul.f32 %v18570_v20, %v6871_v17  ;;  %v7518_v39 = vmul.f32 %v18579_v12, %v6871_v17 }
 0xc21   : > { %v7277_v7 = vmul.f32 %v18659_v51, %v19440_v0  ;;  %v7460_v47 = vsel %vm1842_vm1, %v6870_v63, %v22340_v44  ;;  %v6915_v50 = vmul.f32 %v18570_v20, %v6891_v18  ;;  %v7186_v51 = vmul.f32 %v22299_v40, %v7166_v2  ;;  %v22344_v44 = vld [vmem:[#allocation68_spill] sm:$0xff]  ;;  %v22351_v40 = vld [vmem:[#allocation67_spill] sm:$0xff] }
 0xc22   : > { %v7018_v1 = vadd.f32 %v7002_v27, %v19231_v31  ;;  %v7469_v42 = vmul.f32 %v22341_v54, %v7460_v47  ;;  %v7534_v60 = vadd.f32 %v7518_v39, %v22342_v15  ;;  %v19463_v21 = vadd.f32 %v7520_v61, %v7488_v38  ;;  %v22345_v38 = vld [vmem:[#allocation85_spill] sm:$0xff]  ;;  %v22346_v61 = vld [vmem:[#allocation98_spill] sm:$0xff] }
 0xc23   : > { %v7293_v6 = vadd.f32 %v7277_v7, %v7257_v46  ;;  %v22343_v63 = vrot.slane %v19274_v30, 1  ;;  %v6967_v32 = vadd.f32 %v22344_v44, %v6915_v50  ;;  %v6751_v27 = vmul.f32 0.2, %v6659_v41  ;;  %v22347_v39 = vld [vmem:[#allocation33_spill] sm:$0xff] }
 0xc24   : > { %v7054_v18 = vadd.f32 %v19240_v24, %v7018_v1  ;;  %v7549_v46 = vmul.f32 %v7469_v42, %v18594_v35  ;;  %v7566_v7 = vadd.f32 %v7550_v53, %v7534_v60  ;;  %v7614_v2 = vmul.f32 %v18566_v14, %v6778_v10  ;;  %v19482_v1 = vld [vmem:[%s21917_s3 + $0x18] ss:$0 sm:$0xff]  ;;  %v22348_v24 = vld [vmem:[#allocation99_spill] sm:$0xff] }
 0xc25   : > { %v7712_v17 = vsel %vm2119_vm2, %v7146_v26, %v22343_v63  ;;  %v7315_v31 = vadd.f32 %v18806_v33, %v7293_v6  ;;  %v7003_v15 = vadd.f32 %v22345_v38, %v6967_v32  ;;  %v7278_v50 = vmul.f32 %v19482_v1, %v7186_v51  ;;  %v22349_v53 = vld [vmem:[#allocation69_spill] sm:$0xff] }
 0xc26   : > { %v7090_v30 = vadd.f32 %v22346_v61, %v7054_v18  ;;  %v19477_v26 = vmul.f32 %v22347_v39, %v7712_v17  ;;  %v7565_v6 = vadd.f32 %v7549_v46, %v19354_v34  ;;  %v7598_v10 = vadd.f32 %v22348_v24, %v7566_v7  ;;  %v22350_v18 = vld [vmem:[#allocation79_spill] sm:$0xff] }
 0xc27   : > { %v7347_v47 = vmul.f32 0.2, %v7315_v31  ;;  %vm7331_vm4 = vcmp.gt.f32.partialorder %v7315_v31, 0.0  ;;  %v7039_v60 = vadd.f32 %v22349_v53, %v7003_v15  ;;  %v7519_v63 = vmul.f32 %v7469_v42, %v18579_v12 }
 0xc28   : > { %v7126_v32 = vadd.f32 %v7110_v29, %v7090_v30  ;;  %v19489_v44 = vsel %vm6719_vm3, %v6659_v41, %v6751_v27  ;;  %v7489_v17 = vmul.f32 %v7469_v42, %v18570_v20  ;;  %v7597_v38 = vadd.f32 %v22350_v18, %v7565_v6  ;;  %v22353_v27 = vld [vmem:[#allocation84_spill] sm:$0xff]  ;;  %v22354_v6 = vld [vmem:[#allocation101_spill] sm:$0xff] }
 0xc29   : > { %v7630_v61 = vadd.f32 %v7614_v2, %v7598_v10  ;;  %v7769_v51 = vmul.f32 %v18588_v48, %v19440_v0  ;;  %v7075_v39 = vadd.f32 %v22351_v40, %v7039_v60  ;;  %v19496_v46 = vsel %vm7331_vm4, %v7315_v31, %v7347_v47  ;;  %v22355_v10 = vld [vmem:[#allocation55_spill] sm:$0xff] }
 0xc2a   : > { %v7222_v34 = vadd.f32 %v7206_v11, %v7126_v32  ;;  %22352 = vst [vmem:[#allocation86_spill] sm:$0xff] %v19496_v46  ;;  %v7770_v29 = vmul.f32 %v19477_v26, %v18588_v48  ;;  %v7629_v7 = vadd.f32 %v19334_v9, %v7597_v38  ;;  %v21824_v42 = vrot.slane %v19489_v44, 7 }
 0xc2b   : > { %v7662_v41 = vadd.f32 %v19392_v37, %v7630_v61  ;;  %vm6717_vm5 = vcmp.gt.f32.partialorder %v19422_v52, 0.0  ;;  %v7111_v2 = vadd.f32 %v22353_v27, %v7075_v39  ;;  %v6749_v40 = vmul.f32 0.2, %v19422_v52  ;;  %v22357_v61 = vld [vmem:[#allocation70_spill] sm:$0xff] }
 0xc2c   : > { %v7258_v15 = vadd.f32 %v19348_v28, %v7222_v34  ;;  %v7535_v11 = vadd.f32 %v7519_v63, %v19351_v49  ;;  %v7661_v31 = vadd.f32 %v19306_v55, %v7629_v7  ;;  %v19512_v9 = vmul.f32 %v18562_v23, %v19489_v44 }
 0xc2d   : > { %v7754_v30 = vadd.f32 %v19373_v5, %v7662_v41  ;;  %vm6720_vm6 = vcmp.gt.f32.partialorder %v19426_v45, 0.0  ;;  %v7207_v37 = vadd.f32 %v19412_v36, %v7111_v2  ;;  %v19517_v39 = vsel %vm6717_vm5, %v19422_v52, %v6749_v40 }
 0xc2e   : > { %v7294_v47 = vadd.f32 %v7278_v50, %v7258_v15  ;;  %v6752_v28 = vmul.f32 0.2, %v19426_v45  ;;  %v7753_v49 = vadd.f32 %v22354_v6, %v7661_v31  ;;  %v19523_v55 = vmul.f32 %v18566_v14, %v19489_v44 }
 0xc2f   : > { %v7786_v24 = vadd.f32 %v7770_v29, %v7754_v30  ;;  %v21821_v5 = vrot.slane %v19517_v39, 7  ;;  %v7243_v53 = vadd.f32 %v22355_v10, %v7207_v37  ;;  %v19530_v36 = vmul.f32 %v18574_v16, %v19489_v44  ;;  %v22358_v29 = vld [vmem:[#allocation37_spill] sm:$0xff] }
 0xc30   : > { %v7316_v60 = vadd.f32 %v18806_v33, %v7294_v47  ;;  %v21823_v52 = vrot.slane %v19489_v44, 1  ;;  %v7785_v50 = vadd.f32 %v7769_v51, %v7753_v49  ;;  %v22356_v32 = vrot.slane %v19341_v3, 7  ;;  %v22360_v47 = vld [vmem:[#allocation36_spill] sm:$0xff] }
 0xc31   : > { %v21820_v18 = vrot.slane %v19517_v39, 1  ;;  %v19543_v38 = vsel %vm6720_vm6, %v19426_v45, %v6752_v28  ;;  %v7279_v34 = vadd.f32 %v22357_v61, %v7243_v53  ;;  %v19549_v51 = vmul.f32 %v18562_v23, %v19517_v39 }
 0xc32   : > { %v7458_v63 = vsel %vm1842_vm1, %v22356_v32, %v21821_v5  ;;  %v7739_v41 = vmul.f32 %v18583_v57, %v19440_v0  ;;  %v7348_v27 = vmul.f32 0.2, %v7316_v60  ;;  %v7817_v2 = vadd.f32 %v19408_v25, %v7785_v50 }
 0xc33   : > { %v7471_v7 = vmul.f32 %v22358_v29, %v7458_v63  ;;  %v22359_v15 = vrot.slane %v19341_v3, 1  ;;  %v21819_v40 = vrot.slane %v19543_v38, 7  ;;  %v7301_v31 = vadd.f32 %v18806_v33, %v7279_v34 }
 0xc34   : > { %vm7332_vm10 = vcmp.gt.f32.partialorder %v7316_v60, 0.0  ;;  %v19565_v0 = vmul.f32 %v18566_v14, %v19517_v39  ;;  %v7833_v25 = vadd.f32 %v18806_v33, %v7817_v2  ;;  %v7647_v10 = vmul.f32 %v18574_v16, %v19517_v39  ;;  %v22363_v2 = vld [vmem:[#allocation88_spill] sm:$0xff] }
 0xc35   : > { %v7710_v45 = vsel %vm2119_vm2, %v22359_v15, %v21820_v18  ;;  %v7521_v30 = vmul.f32 %v7471_v7, %v18579_v12  ;;  %v7551_v37 = vmul.f32 %v7471_v7, %v18594_v35  ;;  %v7455_v28 = vsel %vm1842_vm1, %v21824_v42, %v21819_v40  ;;  %v19608_v18 = vld [vmem:[%s21976_s16 + $0x1] ss:$0 sm:$0xff] }
 0xc36   : > { %v7722_v3 = vmul.f32 %v22360_v47, %v7710_v45  ;;  %vm7317_vm12 = vcmp.gt.f32.partialorder %v7301_v31, 0.0  ;;  %v7333_v6 = vmul.f32 0.2, %v7301_v31  ;;  %v19580_v53 = vsel %vm7332_vm10, %v7316_v60, %v7348_v27 }
 0xc37   : > { %v19576_v49 = vadd.f32 %v7521_v30, %v7489_v17  ;;  %22361 = vst [vmem:[#allocation100_spill] sm:$0xff] %v19580_v53  ;;  %v7567_v33 = vadd.f32 %v7551_v37, %v7535_v11  ;;  %v19585_v32 = vmul.f32 %v18562_v23, %v19543_v38  ;;  %v7865_v61 = vmul.f32 0.2, %v7833_v25  ;;  %v22364_v30 = vld [vmem:[#allocation87_spill] sm:$0xff]  ;;  %v22365_v37 = vld [vmem:[#allocation92_spill] sm:$0xff] }
 0xc38   : > { %v7802_v50 = vmul.f32 %v19482_v1, %v7722_v3  ;;  %v19587_v63 = vsel %vm7317_vm12, %v7301_v31, %v7333_v6  ;;  %v19590_v34 = vmul.f32 %v7471_v7, %v18570_v20  ;;  %v19593_v17 = vmul.f32 %v7455_v28, %v18570_v20 }
 0xc39   : > { %22362 = vst [vmem:[#allocation68_spill] sm:$0xff] %v19587_v63  ;;  %v7366_v60 = vadd.f32 %v22363_v2, %v19587_v63  ;;  %vm7849_vm13 = vcmp.gt.f32.partialorder %v7833_v25, 0.0  ;;  %v7599_v11 = vadd.f32 %v19330_v62, %v7567_v33  ;;  %v7524_v15 = vmul.f32 %v7455_v28, %v18579_v12 }
 0xc3a   : > { %v7818_v27 = vadd.f32 %v7802_v50, %v7786_v24  ;;  %v7554_v45 = vmul.f32 %v7455_v28, %v18594_v35  ;;  %v21822_v31 = vrot.slane %v19543_v38, 1  ;;  %v6654_v7 = vadd.f32 %v19368_v8, %v22364_v30  ;;  %v22367_v50 = vld [vmem:[#allocation93_spill] sm:$0xff] }
 0xc3b   : > { %v7367_v6 = vadd.f32 %v7366_v60, %v22365_v37  ;;  %v7631_v40 = vadd.f32 %v19297_v59, %v7599_v11  ;;  %v19613_v24 = vmul.f32 %v18566_v14, %v19543_v38  ;;  %v19615_v28 = vsel %vm7849_vm13, %v7833_v25, %v7865_v61 }
 0xc3c   : > { %v7834_v62 = vadd.f32 %v19608_v18, %v7818_v27  ;;  %22366 = vst [vmem:[#allocation85_spill] sm:$0xff] %v19615_v28  ;;  %v7707_v59 = vsel %vm2119_vm2, %v21823_v52, %v21822_v31  ;;  %vm6718_vm14 = vcmp.gt.f32.partialorder %v6654_v7, 0.0  ;;  %v6750_v33 = vmul.f32 0.2, %v6654_v7  ;;  %v22368_v31 = vld [vmem:[#allocation95_spill] sm:$0xff] }
 0xc3d   : > { %v7368_v60 = vadd.f32 %v7367_v6, %v22367_v50  ;;  %v7663_v11 = vadd.f32 %v7647_v10, %v7631_v40  ;;  %v7650_v27 = vmul.f32 %v18574_v16, %v19543_v38  ;;  %v19628_v30 = vmul.f32 %v19477_v26, %v18583_v57 }
 0xc3e   : > { %vm7850_vm15 = vcmp.gt.f32.partialorder %v7834_v62, 0.0  ;;  %v6782_v25 = vsel %vm6718_vm14, %v6654_v7, %v6750_v33  ;;  %v7742_v61 = vmul.f32 %v7722_v3, %v18583_v57  ;;  %v19632_v5 = vmul.f32 %v7722_v3, %v18588_v48  ;;  %v22369_v33 = vld [vmem:[#allocation96_spill] sm:$0xff] }
 0xc3f   : > { %v7369_v52 = vadd.f32 %v7368_v60, %v22368_v31  ;;  %v7755_v42 = vadd.f32 %v7739_v41, %v7663_v11  ;;  %v7866_v47 = vmul.f32 0.2, %v7834_v62  ;;  %v7432_v6 = vrot.slane %v6782_v25, 7  ;;  %v22372_v31 = vld [vmem:[#allocation40_spill] sm:$0xff] }
 0xc40   : > { %v19636_v40 = vmul.f32 %v7707_v59, %v18583_v57  ;;  %v19639_v10 = vmul.f32 %v7707_v59, %v18588_v48  ;;  %v19642_v26 = vmul.f32 %v19482_v1, %v7707_v59  ;;  %v7684_v7 = vrot.slane %v6782_v25, 1 }
 0xc41   : > { %v7370_v29 = vadd.f32 %v7369_v52, %v22369_v33  ;;  %v7787_v3 = vadd.f32 %v19403_v13, %v7755_v42  ;;  %v22370_v54 = vrot.slane %v19489_v44, 7  ;;  %v22371_v60 = vrot.slane %v19517_v39, 7  ;;  %v22373_v33 = vld [vmem:[#allocation53_spill] sm:$0xff] }
 0xc42   : > { %v19660_v42 = vsel %vm7850_vm15, %v7834_v62, %v7866_v47  ;;  %v7618_v47 = vmul.f32 %v18566_v14, %v6782_v25  ;;  %v22377_v62 = vld [vmem:[#allocation83_spill] sm:$0xff] }
 0xc43   : > { %v7456_v41 = vsel %vm1842_vm1, %v7432_v6, %v22370_v54  ;;  %v7457_v11 = vsel %vm1842_vm1, %v22371_v60, %v7432_v6  ;;  %v7371_v13 = vadd.f32 %v7370_v29, %v22373_v33  ;;  %22374 = vst [vmem:[#allocation98_spill] sm:$0xff] %v19660_v42  ;;  %v22375_v54 = vrot.slane %v19489_v44, 1 }
 0xc44   : > { %v7473_v50 = vmul.f32 %v22372_v31, %v7456_v41  ;;  %v7492_v59 = vmul.f32 %v7457_v11, %v18570_v20  ;;  %v7522_v37 = vmul.f32 %v7457_v11, %v18579_v12  ;;  %v7552_v52 = vmul.f32 %v7457_v11, %v18594_v35 }
 0xc45   : > { %v7708_v2 = vsel %vm2119_vm2, %v7684_v7, %v22375_v54  ;;  %v22376_v6 = vrot.slane %v19517_v39, 1  ;;  %v19676_v29 = vmul.f32 %v18562_v23, %v6782_v25  ;;  %v7372_v44 = vadd.f32 %v7371_v13, %v22377_v62  ;;  %v22380_v62 = vld [vmem:[#allocation75_spill] sm:$0xff] }
 0xc46   : > { %v7538_v60 = vadd.f32 %v7522_v37, %v19395_v19  ;;  %v19673_v31 = vadd.f32 %v7524_v15, %v7492_v59  ;;  %v7553_v11 = vmul.f32 %v7473_v50, %v18594_v35  ;;  %v7568_v54 = vadd.f32 %v7552_v52, %v19463_v21  ;;  %v22378_v15 = vld [vmem:[#allocation89_spill] sm:$0xff]  ;;  %v22379_v59 = vld [vmem:[#allocation58_spill] sm:$0xff] }
 0xc47   : > { %v19670_v41 = vsel %vm2119_vm2, %v22376_v6, %v7684_v7  ;;  %v7648_v39 = vmul.f32 %v18574_v16, %v6782_v25  ;;  %v7523_v7 = vmul.f32 %v7473_v50, %v18579_v12  ;;  %v6675_v37 = vadd.f32 %v19368_v8, %v22378_v15 }
 0xc48   : > { %v7570_v6 = vadd.f32 %v7554_v45, %v7538_v60  ;;  %v7803_v19 = vmul.f32 %v19482_v1, %v19670_v41  ;;  %v7373_v33 = vadd.f32 %v7372_v44, %v22379_v59  ;;  %v7569_v63 = vadd.f32 %v7553_v11, %v19576_v49  ;;  %v22381_v11 = vld [vmem:[#allocation38_spill] sm:$0xff] }
 0xc49   : > { %v7600_v13 = vadd.f32 %v19456_v43, %v7568_v54  ;;  %v7898_v21 = vadd.f32 %v19660_v42, %v19615_v28  ;;  %v19694_v25 = vmul.f32 %v7473_v50, %v18570_v20  ;;  %vm6723_vm3 = vcmp.gt.f32.partialorder %v6675_v37, 0.0  ;;  %v22382_v50 = vld [vmem:[#allocation39_spill] sm:$0xff] }
 0xc4a   : > { %v7602_v45 = vadd.f32 %v19377_v4, %v7570_v6  ;;  %v7819_v52 = vadd.f32 %v7803_v19, %v7787_v3  ;;  %v7374_v60 = vadd.f32 %v7373_v33, %v19279_v56  ;;  %v7601_v15 = vadd.f32 %v19288_v58, %v7569_v63  ;;  %v22383_v63 = vld [vmem:[#allocation90_spill] sm:$0xff] }
 0xc4b   : > { %v7632_v44 = vadd.f32 %v22380_v62, %v7600_v13  ;;  %v6755_v59 = vmul.f32 0.2, %v6675_v37  ;;  %v7724_v43 = vmul.f32 %v22381_v11, %v7708_v2  ;;  %v19703_v42 = vadd.f32 %v7523_v7, %v19590_v34  ;;  %v22384_v62 = vld [vmem:[#allocation54_spill] sm:$0xff] }
 0xc4c   : > { %v7634_v49 = vadd.f32 %v7618_v47, %v7602_v45  ;;  %v7835_v54 = vadd.f32 %v19608_v18, %v7819_v52  ;;  %v7375_v28 = vadd.f32 %v7374_v60, %v22382_v50  ;;  %v7633_v4 = vadd.f32 %v19565_v0, %v7601_v15  ;;  %v22386_v45 = vld [vmem:[#allocation103_spill] sm:$0xff]  ;;  %v22388_v15 = vld [vmem:[#allocation104_spill] sm:$0xff] }
 0xc4d   : > { %v7664_v3 = vadd.f32 %v7648_v39, %v7632_v44  ;;  %v19707_v6 = vsel %vm6723_vm3, %v6675_v37, %v6755_v59  ;;  %v6667_v47 = vadd.f32 %v19368_v8, %v22383_v63  ;;  %v7773_v7 = vmul.f32 %v19670_v41, %v18588_v48  ;;  %v22385_v37 = vld [vmem:[#allocation102_spill] sm:$0xff] }
 0xc4e   : > { %v7666_v33 = vadd.f32 %v7650_v27, %v7634_v49  ;;  %vm7851_vm4 = vcmp.gt.f32.partialorder %v7835_v54, 0.0  ;;  %v7867_v58 = vmul.f32 0.2, %v7835_v54  ;;  %v7376_v2 = vadd.f32 %v7375_v28, %v22384_v62 }
 0xc4f   : > { %v7665_v19 = vadd.f32 %v19530_v36, %v7633_v4  ;;  %v7756_v34 = vadd.f32 %v19628_v30, %v7664_v3  ;;  %v7774_v0 = vmul.f32 %v7724_v43, %v18588_v48  ;;  %v7804_v39 = vmul.f32 %v19482_v1, %v7724_v43 }
 0xc50   : > { %v7758_v13 = vadd.f32 %v7742_v61, %v7666_v33  ;;  %v7377_v59 = vadd.f32 %v7376_v2, %v22385_v37  ;;  %v19722_v60 = vsel %vm7851_vm4, %v7835_v54, %v7867_v58  ;;  %v19726_v30 = vmul.f32 %v18562_v23, %v19707_v6  ;;  %v22389_v58 = vld [vmem:[#allocation91_spill] sm:$0xff] }
 0xc51   : > { %v7757_v52 = vadd.f32 %v22386_v45, %v7665_v19  ;;  %v7788_v28 = vadd.f32 %v19632_v5, %v7756_v34  ;;  %22387 = vst [vmem:[#allocation99_spill] sm:$0xff] %v19722_v60  ;;  %vm6721_vm5 = vcmp.gt.f32.partialorder %v6667_v47, 0.0  ;;  %v6753_v61 = vmul.f32 0.2, %v6667_v47 }
 0xc52   : > { %v7790_v36 = vadd.f32 %v7774_v0, %v7758_v13  ;;  %v7378_v44 = vadd.f32 %v7377_v59, %v22388_v15  ;;  %v19731_v3 = vmul.f32 %v18566_v14, %v19707_v6  ;;  %v7899_v33 = vadd.f32 %v7898_v21, %v19722_v60  ;;  %v22395_v13 = vld [vmem:[#allocation41_spill] sm:$0xff] }
 0xc53   : > { %v7789_v49 = vadd.f32 %v7773_v7, %v7757_v52  ;;  %v7820_v4 = vadd.f32 %v7804_v39, %v7788_v28  ;;  %v19736_v5 = vmul.f32 %v18574_v16, %v19707_v6  ;;  %v19738_v54 = vsel %vm6721_vm5, %v6667_v47, %v6753_v61  ;;  %v22390_v47 = vld [vmem:[#allocation94_spill] sm:$0xff] }
 0xc54   : > { %v6678_v63 = vadd.f32 %v19368_v8, %v22389_v58  ;;  %v7379_v2 = vadd.f32 %v7378_v44, %v19496_v46  ;;  %v21828_v7 = vrot.slane %v19738_v54, 7  ;;  %v21829_v21 = vrot.slane %v19738_v54, 1 }
 0xc55   : > { %v7821_v19 = vadd.f32 %v19642_v26, %v7789_v49  ;;  %v7836_v34 = vadd.f32 %v19608_v18, %v7820_v4  ;;  %v19750_v0 = vmul.f32 %v19670_v41, %v18583_v57  ;;  %v6670_v39 = vadd.f32 %v19368_v8, %v22390_v47 }
 0xc56   : > { %v7380_v59 = vadd.f32 %v7379_v2, %v19580_v53  ;;  %v22391_v52 = vrot.slane %v19543_v38, 7  ;;  %v22392_v41 = vrot.slane %v19543_v38, 1  ;;  %vm6724_vm10 = vcmp.gt.f32.partialorder %v6678_v63, 0.0 }
 0xc57   : > { %v7837_v45 = vadd.f32 %v19608_v18, %v7821_v19  ;;  %vm7852_vm6 = vcmp.gt.f32.partialorder %v7836_v34, 0.0  ;;  %v7868_v26 = vmul.f32 0.2, %v7836_v34  ;;  %v6756_v44 = vmul.f32 0.2, %v6678_v63  ;;  %v22394_v19 = vld [vmem:[#allocation42_spill] sm:$0xff] }
 0xc58   : > { %v7454_v28 = vsel %vm1842_vm1, %v22391_v52, %v21828_v7  ;;  %v7706_v61 = vsel %vm2119_vm2, %v22392_v41, %v21829_v21  ;;  %v7381_v49 = vrot.slane %v7380_v59, 4  ;;  %v19777_v38 = vmul.f32 %v18562_v23, %v19738_v54 }
 0xc59   : > { %vm7853_vm12 = vcmp.gt.f32.partialorder %v7837_v45, 0.0  ;;  %v7869_v4 = vmul.f32 0.2, %v7837_v45  ;;  %v19768_v58 = vsel %vm7852_vm6, %v7836_v34, %v7868_v26  ;;  %v7475_v47 = vmul.f32 %v22394_v19, %v7454_v28 }
 0xc5a   : > { %22393 = vst [vmem:[#allocation69_spill] sm:$0xff] %v19768_v58  ;;  %v7900_v2 = vadd.f32 %v7899_v33, %v19768_v58  ;;  %v7726_v52 = vmul.f32 %v22395_v13, %v7706_v61  ;;  %v19773_v7 = vsel %vm6724_vm10, %v6678_v63, %v6756_v44  ;;  %v7382_v27 = vadd.f32 %v7381_v49, %v7380_v59 }
 0xc5b   : > { %v21832_v41 = vrot.slane %v19773_v7, 7  ;;  %v19781_v21 = vmul.f32 %v7724_v43, %v18583_v57  ;;  %v7525_v34 = vmul.f32 %v7475_v47, %v18579_v12  ;;  %v7555_v33 = vmul.f32 %v7475_v47, %v18594_v35 }
 0xc5c   : > { %v19787_v26 = vmul.f32 %v18566_v14, %v19738_v54  ;;  %v7651_v63 = vmul.f32 %v18574_v16, %v19738_v54  ;;  %v7383_v59 = vrot.slane %v7382_v27, 2  ;;  %v19792_v28 = vsel %vm7853_vm12, %v7837_v45, %v7869_v4 }
 0xc5d   : > { %v7806_v61 = vmul.f32 %v19482_v1, %v7726_v52  ;;  %v22396_v43 = vrot.slane %v19707_v6, 7  ;;  %v7901_v49 = vadd.f32 %v7900_v2, %v19792_v28  ;;  %v7541_v13 = vadd.f32 %v7525_v34, %v19694_v25 }
 0xc5e   : > { %v7571_v11 = vadd.f32 %v7555_v33, %v19703_v42  ;;  %v19806_v19 = vmul.f32 %v18562_v23, %v19773_v7  ;;  %v7384_v45 = vadd.f32 %v7383_v59, %v7382_v27  ;;  %v19809_v4 = vmul.f32 %v7475_v47, %v18570_v20  ;;  %v7365_v47 = vld [vmem:[#allocation6] sm:$0x1] }
 0xc5f   : > { %v7451_v44 = vsel %vm1842_vm1, %v22396_v43, %v21832_v41  ;;  %v7822_v58 = vadd.f32 %v7806_v61, %v7790_v36  ;;  %v19813_v60 = vmul.f32 %v18566_v14, %v19773_v7  ;;  %v21835_v2 = vrot.slane %v19773_v7, 1 }
 0xc60   : > { %v7603_v43 = vadd.f32 %v19549_v51, %v7571_v11  ;;  %vm6722_vm13 = vcmp.gt.f32.partialorder %v6670_v39, 0.0  ;;  %v6754_v25 = vmul.f32 0.2, %v6670_v39  ;;  %v7385_v42 = vrot.slane %v7384_v45, 1 }
 0xc61   : > { %v7838_v34 = vadd.f32 %v19608_v18, %v7822_v58  ;;  %v19819_v33 = vmul.f32 %v7451_v44, %v18570_v20  ;;  %v7528_v27 = vmul.f32 %v7451_v44, %v18579_v12  ;;  %v7558_v59 = vmul.f32 %v7451_v44, %v18594_v35 }
 0xc62   : > { %v7635_v36 = vadd.f32 %v19523_v55, %v7603_v43  ;;  %v22397_v51 = vrot.slane %v19707_v6, 1  ;;  %v6786_v61 = vsel %vm6722_vm13, %v6670_v39, %v6754_v25  ;;  %v7386_v41 = vadd.f32 %v7385_v42, %v7384_v45  ;;  %v22398_v39 = vld [vmem:[#allocation35_spill] sm:$0xff] }
 0xc63   : > { %vm7854_vm14 = vcmp.gt.f32.partialorder %v7838_v34, 0.0  ;;  %v7870_v58 = vmul.f32 0.2, %v7838_v34  ;;  %v7654_v53 = vmul.f32 %v18574_v16, %v19773_v7  ;;  %v7436_v15 = vrot.slane %v6786_v61, 7 }
 0xc64   : > { %v7703_v11 = vsel %vm2119_vm2, %v22397_v51, %v21835_v2  ;;  %v7667_v46 = vadd.f32 %v7651_v63, %v7635_v36  ;;  %v7746_v55 = vmul.f32 %v7726_v52, %v18583_v57  ;;  %v19834_v44 = vmul.f32 %v7726_v52, %v18588_v48  ;;  %v22401_v36 = vld [vmem:[#allocation44_spill] sm:$0xff] }
 0xc65   : > { %v7387_v43 = vadd.f32 %v7386_v41, %v7365_v47  ;;  %v19837_v37 = vmul.f32 %v7703_v11, %v18583_v57  ;;  %v19840_v51 = vmul.f32 %v7703_v11, %v18588_v48  ;;  %v6691_v45 = vadd.f32 %v19368_v8, %v22398_v39 }
 0xc66   : > { %v7759_v25 = vadd.f32 %v19750_v0, %v7667_v46  ;;  %v19845_v42 = vsel %vm7854_vm14, %v7838_v34, %v7870_v58  ;;  %v22399_v63 = vrot.slane %v19707_v6, 7  ;;  %v22400_v41 = vrot.slane %v19738_v54, 7 }
 0xc67   : > { %7388 = vst [vmem:[#allocation6] sm:$0x1] %v7387_v43  ;;  %v19861_v34 = vmul.f32 %v19482_v1, %v7703_v11  ;;  %v7688_v58 = vrot.slane %v6786_v61, 1  ;;  %v19868_v43 = vmul.f32 %v18562_v23, %v6786_v61  ;;  %vm6727_vm15 = vcmp.gt.f32.partialorder %v6691_v45, 0.0 }
 0xc68   : > { %v7452_v52 = vsel %vm1842_vm1, %v7436_v15, %v22399_v63  ;;  %v7453_v47 = vsel %vm1842_vm1, %v22400_v41, %v7436_v15  ;;  %v7791_v0 = vadd.f32 %v19639_v10, %v7759_v25  ;;  %v7902_v63 = vadd.f32 %v7901_v49, %v19845_v42 }
 0xc69   : > { %v7477_v2 = vmul.f32 %v22401_v36, %v7452_v52  ;;  %v7496_v62 = vmul.f32 %v7453_v47, %v18570_v20  ;;  %v7526_v39 = vmul.f32 %v7453_v47, %v18579_v12  ;;  %v7556_v46 = vmul.f32 %v7453_v47, %v18594_v35 }
 0xc6a   : > { %v7622_v52 = vmul.f32 %v18566_v14, %v6786_v61  ;;  %v22402_v10 = vrot.slane %v19707_v6, 1  ;;  %v22403_v49 = vrot.slane %v19738_v54, 1  ;;  %v22405_v6 = vld [vmem:[#allocation62_spill] sm:$0xff] }
 0xc6b   : > { %v7542_v50 = vadd.f32 %v7526_v39, %v19593_v17  ;;  %v19865_v15 = vadd.f32 %v7528_v27, %v7496_v62  ;;  %v7557_v41 = vmul.f32 %v7477_v2, %v18594_v35  ;;  %v7572_v47 = vadd.f32 %v7556_v46, %v19673_v31  ;;  %v22404_v27 = vld [vmem:[#allocation43_spill] sm:$0xff] }
 0xc6c   : > { %v7704_v11 = vsel %vm2119_vm2, %v7688_v58, %v22402_v10  ;;  %v7705_v17 = vsel %vm2119_vm2, %v22403_v49, %v7688_v58  ;;  %v6759_v46 = vmul.f32 0.2, %v6691_v45  ;;  %v6683_v56 = vadd.f32 %v19368_v8, %v22405_v6 }
 0xc6d   : > { %v7574_v62 = vadd.f32 %v7558_v59, %v7542_v50  ;;  %v19882_v25 = vmul.f32 %v22404_v27, %v7704_v11  ;;  %v7807_v39 = vmul.f32 %v19482_v1, %v7705_v17  ;;  %v7573_v36 = vadd.f32 %v7557_v41, %v7541_v13 }
 0xc6e   : > { %v7604_v31 = vadd.f32 %v19676_v29, %v7572_v47  ;;  %v19889_v10 = vmul.f32 %v7477_v2, %v18570_v20  ;;  %v7652_v50 = vmul.f32 %v18574_v16, %v6786_v61  ;;  %v7527_v58 = vmul.f32 %v7477_v2, %v18579_v12 }
 0xc6f   : > { %v7606_v54 = vadd.f32 %v19585_v32, %v7574_v62  ;;  %v7823_v59 = vadd.f32 %v7807_v39, %v7791_v0  ;;  %v7605_v11 = vadd.f32 %v19512_v9, %v7573_v36  ;;  %v7777_v29 = vmul.f32 %v7705_v17, %v18588_v48 }
 0xc70   : > { %v7636_v13 = vadd.f32 %v19613_v24, %v7604_v31  ;;  %v7778_v47 = vmul.f32 %v19882_v25, %v18588_v48  ;;  %v19901_v6 = vsel %vm6727_vm15, %v6691_v45, %v6759_v46  ;;  %v7808_v2 = vmul.f32 %v19482_v1, %v19882_v25  ;;  %v22406_v46 = vld [vmem:[#allocation80_spill] sm:$0xff] }
 0xc71   : > { %v7638_v41 = vadd.f32 %v7622_v52, %v7606_v54  ;;  %v7839_v49 = vadd.f32 %v19608_v18, %v7823_v59  ;;  %v7637_v32 = vadd.f32 %v19787_v26, %v7605_v11  ;;  %vm6725_vm3 = vcmp.gt.f32.partialorder %v6683_v56, 0.0 }
 0xc72   : > { %v7668_v61 = vadd.f32 %v7652_v50, %v7636_v13  ;;  %v6757_v36 = vmul.f32 0.2, %v6683_v56  ;;  %v21839_v62 = vrot.slane %v19901_v6, 7  ;;  %v7543_v45 = vadd.f32 %v7527_v58, %v19809_v4  ;;  %v22408_v13 = vld [vmem:[#allocation48_spill] sm:$0xff] }
 0xc73   : > { %v7670_v9 = vadd.f32 %v7654_v53, %v7638_v41  ;;  %vm7855_vm4 = vcmp.gt.f32.partialorder %v7839_v49, 0.0  ;;  %v7871_v24 = vmul.f32 0.2, %v7839_v49  ;;  %v7669_v0 = vadd.f32 %v19736_v5, %v7637_v32 }
 0xc74   : > { %v7760_v52 = vadd.f32 %v19781_v21, %v7668_v61  ;;  %v19912_v26 = vsel %vm6725_vm3, %v6683_v56, %v6757_v36  ;;  %v6694_v54 = vadd.f32 %v19368_v8, %v22406_v46  ;;  %v19922_v4 = vmul.f32 %v18566_v14, %v19901_v6  ;;  %v22410_v36 = vld [vmem:[#allocation47_spill] sm:$0xff] }
 0xc75   : > { %v7762_v39 = vadd.f32 %v7746_v55, %v7670_v9  ;;  %v19910_v31 = vsel %vm7855_vm4, %v7839_v49, %v7871_v24  ;;  %v7761_v53 = vadd.f32 %v19636_v40, %v7669_v0  ;;  %v21838_v21 = vrot.slane %v19912_v26, 7 }
 0xc76   : > { %v7792_v50 = vadd.f32 %v19834_v44, %v7760_v52  ;;  %v7903_v5 = vadd.f32 %v7902_v63, %v19910_v31  ;;  %v19926_v56 = vmul.f32 %v18574_v16, %v19901_v6  ;;  %v21840_v55 = vrot.slane %v19901_v6, 1 }
 0xc77   : > { %v7794_v59 = vadd.f32 %v7778_v47, %v7762_v39  ;;  %v7793_v58 = vadd.f32 %v7777_v29, %v7761_v53  ;;  %v22407_v40 = vrot.slane %v19773_v7, 7  ;;  %v21837_v63 = vrot.slane %v19912_v26, 1 }
 0xc78   : > { %v7824_v11 = vadd.f32 %v7808_v2, %v7792_v50  ;;  %v7747_v47 = vmul.f32 %v7705_v17, %v18583_v57  ;;  %vm6728_vm5 = vcmp.gt.f32.partialorder %v6694_v54, 0.0  ;;  %v6760_v49 = vmul.f32 0.2, %v6694_v54 }
 0xc79   : > { %v7450_v44 = vsel %vm1842_vm1, %v22407_v40, %v21838_v21  ;;  %v7825_v32 = vadd.f32 %v19861_v34, %v7793_v58  ;;  %v19942_v61 = vmul.f32 %v18562_v23, %v19912_v26  ;;  %v22409_v2 = vrot.slane %v19773_v7, 1  ;;  %v22411_v58 = vld [vmem:[#allocation97_spill] sm:$0xff] }
 0xc7a   : > { %v7479_v41 = vmul.f32 %v22408_v13, %v7450_v44  ;;  %v7840_v29 = vadd.f32 %v19608_v18, %v7824_v11  ;;  %v19953_v17 = vmul.f32 %v18566_v14, %v19912_v26  ;;  %v7655_v34 = vmul.f32 %v18574_v16, %v19912_v26 }
 0xc7b   : > { %v7702_v9 = vsel %vm2119_vm2, %v22409_v2, %v21837_v63  ;;  %v7841_v52 = vadd.f32 %v19608_v18, %v7825_v32  ;;  %v6792_v7 = vsel %vm6728_vm5, %v6694_v54, %v6760_v49  ;;  %v6686_v11 = vadd.f32 %v19368_v8, %v22411_v58  ;;  %v22413_v2 = vld [vmem:[#allocation29_spill] sm:$0xff] }
 0xc7c   : > { %v7559_v24 = vmul.f32 %v7479_v41, %v18594_v35  ;;  %v19958_v0 = vmul.f32 %v22410_v36, %v7702_v9  ;;  %vm7856_vm6 = vcmp.gt.f32.partialorder %v7840_v29, 0.0  ;;  %v7872_v39 = vmul.f32 0.2, %v7840_v29 }
 0xc7d   : > { %v7442_v50 = vrot.slane %v6792_v7, 7  ;;  %vm7857_vm10 = vcmp.gt.f32.partialorder %v7841_v52, 0.0  ;;  %v7873_v40 = vmul.f32 0.2, %v7841_v52  ;;  %v19969_v9 = vmul.f32 %v18594_v35, %v22413_v2 }
 0xc7e   : > { %v7575_v46 = vadd.f32 %v7559_v24, %v7543_v45  ;;  %v7810_v53 = vmul.f32 %v19482_v1, %v19958_v0  ;;  %v19965_v44 = vsel %vm7856_vm6, %v7840_v29, %v7872_v39  ;;  %v7499_v8 = vmul.f32 %v7479_v41, %v18570_v20 }
 0xc7f   : > { %22412 = vst [vmem:[#allocation79_spill] sm:$0xff] %v19965_v44  ;;  %v7904_v32 = vadd.f32 %v7903_v5, %v19965_v44  ;;  %v7446_v49 = vsel %vm1842_vm1, %v7442_v50, %v22413_v2  ;;  %v19976_v24 = vsel %vm7857_vm10, %v7841_v52, %v7873_v40  ;;  %v7447_v29 = vsel %vm1842_vm1, %v21839_v62, %v7442_v50  ;;  %v22416_v40 = vld [vmem:[#allocation32_spill] sm:$0xff] }
 0xc80   : > { %v7607_v54 = vadd.f32 %v19777_v38, %v7575_v46  ;;  %v7826_v45 = vadd.f32 %v7810_v53, %v7794_v59  ;;  %22414 = vst [vmem:[#allocation67_spill] sm:$0xff] %v19976_v24  ;;  %v7694_v39 = vrot.slane %v6792_v7, 1  ;;  %v22415_v59 = vld [vmem:[#allocation52_spill] sm:$0xff]  ;;  %v7529_v53 = vmul.f32 %v7479_v41, %v18579_v12 }
 0xc81   : > { %v7905_v58 = vadd.f32 %v7904_v32, %v19976_v24  ;;  %v7483_v46 = vmul.f32 %v22415_v59, %v7446_v49  ;;  %v19989_v52 = vmul.f32 %v18566_v14, %v6792_v7  ;;  %v7532_v49 = vmul.f32 %v7447_v29, %v18579_v12 }
 0xc82   : > { %v7639_v5 = vadd.f32 %v19731_v3, %v7607_v54  ;;  %v7842_v38 = vadd.f32 %v19608_v18, %v7826_v45  ;;  %v7698_v2 = vsel %vm2119_vm2, %v7694_v39, %v22416_v40  ;;  %v7699_v50 = vsel %vm2119_vm2, %v21840_v55, %v7694_v39  ;;  %v22417_v54 = vld [vmem:[#allocation51_spill] sm:$0xff] }
 0xc83   : > { %v7734_v45 = vmul.f32 %v22417_v54, %v7698_v2  ;;  %v20001_v41 = vmul.f32 %v18574_v16, %v6792_v7  ;;  %vm6726_vm13 = vcmp.gt.f32.partialorder %v6686_v11, 0.0  ;;  %v6758_v63 = vmul.f32 0.2, %v6686_v11 }
 0xc84   : > { %v7671_v32 = vadd.f32 %v7655_v34, %v7639_v5  ;;  %vm7858_vm12 = vcmp.gt.f32.partialorder %v7842_v38, 0.0  ;;  %v7874_v3 = vmul.f32 0.2, %v7842_v38  ;;  %v7562_v62 = vmul.f32 %v7447_v29, %v18594_v35 }
 0xc85   : > { %v7563_v36 = vmul.f32 %v7483_v46, %v18594_v35  ;;  %v20006_v27 = vmul.f32 %v7699_v50, %v18588_v48  ;;  %v20011_v39 = vmul.f32 %v19482_v1, %v7699_v50  ;;  %v6790_v5 = vsel %vm6726_vm13, %v6686_v11, %v6758_v63 }
 0xc86   : > { %v7763_v21 = vadd.f32 %v7747_v47, %v7671_v32  ;;  %v20008_v34 = vsel %vm7858_vm12, %v7842_v38, %v7874_v3  ;;  %v7545_v2 = vadd.f32 %v7529_v53, %v19889_v10  ;;  %v20016_v55 = vmul.f32 %v7734_v45, %v18588_v48  ;;  %v11956_v10 = vld [vmem:[%s22146_s13 + $0x88] sm:$0xff]  ;;  %v22421_v3 = vld [vmem:[#allocation50_spill] sm:$0xff] }
 0xc87   : > { %22418 = vst [vmem:[#allocation84_spill] sm:$0xff] %v20008_v34  ;;  %v20019_v47 = vmul.f32 %v19482_v1, %v7734_v45  ;;  %v7440_v29 = vrot.slane %v6790_v5, 7  ;;  %v7596_v46 = vmul.f32 %v18562_v23, %v6790_v5  ;;  %v20023_v38 = vmul.f32 0.0, %v18574_v16 }
 0xc88   : > { %v7795_v7 = vadd.f32 %v19840_v51, %v7763_v21  ;;  %v7692_v32 = vrot.slane %v6790_v5, 1  ;;  %v7748_v63 = vmul.f32 %v19882_v25, %v18583_v57  ;;  %v11955_v51 = vld [vmem:[%s22146_s13 + $0x80] sm:$0xff]  ;;  %v22419_v21 = vrot.slane %v19901_v6, 7 }
 0xc89   : > { %v22420_v11 = vrot.slane %v19912_v26, 7  ;;  %v7626_v25 = vmul.f32 %v18566_v14, %v6790_v5  ;;  %v20043_v50 = vadd.f32 %v7905_v58, %v20008_v34  ;;  %v7656_v14 = vmul.f32 %v18574_v16, %v6790_v5 }
 0xc8a   : > { %v7448_v23 = vsel %vm1842_vm1, %v7440_v29, %v22419_v21  ;;  %v11957_v21 = vld [vmem:[%s22146_s13 + $0x90] sm:$0xff]  ;;  %v22422_v58 = vrot.slane %v19901_v6, 1  ;;  %v7750_v6 = vmul.f32 %v19958_v0, %v18583_v57  ;;  %v7780_v5 = vmul.f32 %v19958_v0, %v18588_v48 }
 0xc8b   : > { %v7449_v53 = vsel %vm1842_vm1, %v22420_v11, %v7440_v29  ;;  %v7481_v45 = vmul.f32 %v22421_v3, %v7448_v23  ;;  %v11958_v29 = vld [vmem:[%s22146_s13 + $0x98] sm:$0xff] }
 0xc8c   : > { %v7500_v54 = vmul.f32 %v7449_v53, %v18570_v20  ;;  %v7530_v59 = vmul.f32 %v7449_v53, %v18579_v12  ;;  %v7560_v13 = vmul.f32 %v7449_v53, %v18594_v35  ;;  %v7700_v23 = vsel %vm2119_vm2, %v7692_v32, %v22422_v58 }
 0xc8d   : > { %v22423_v20 = vrot.slane %v19912_v26, 1  ;;  %v13856_v53 = vpack.c.bf16 %v11956_v10, %v11955_v51  ;;  %v7531_v3 = vmul.f32 %v7481_v45, %v18579_v12  ;;  %v7561_v44 = vmul.f32 %v7481_v45, %v18594_v35  ;;  %v11959_v35 = vld [vmem:[%s22146_s13 + $0xa0] sm:$0xff] }
 0xc8e   : > { %v7546_v34 = vadd.f32 %v7530_v59, %v19819_v33  ;;  %v7548_v24 = vadd.f32 %v7532_v49, %v7500_v54  ;;  %v7576_v16 = vadd.f32 %v7560_v13, %v19865_v15  ;;  %v13859_v26 = vpack.c.bf16 %v11958_v29, %v11957_v21  ;;  %v11960_v33 = vld [vmem:[%s22146_s13 + $0xa8] sm:$0xff]  ;;  %v22425_v13 = vld [vmem:[#allocation49_spill] sm:$0xff] }
 0xc8f   : > { %v7701_v11 = vsel %vm2119_vm2, %v22423_v20, %v7692_v32  ;;  %13857 = vmatpush3.bf16.msra.mxu1 %v13856_v53  ;;  %v7547_v58 = vadd.f32 %v7531_v3, %v7499_v8  ;;  %v7577_v32 = vadd.f32 %v7561_v44, %v7545_v2  ;;  %v22424_v10 = vmov 0.0|0.0  }
 0xc90   : > { %v7578_v51 = vadd.f32 %v7562_v62, %v7546_v34  ;;  %v7580_v12 = vadd.f32 %v19969_v9, %v7548_v24  ;;  %13858 = vmatprep.subr.bf16.mxu1 %v22424_v10  ;;  %v7608_v15 = vadd.f32 %v19868_v43, %v7576_v16  ;;  %v7732_v0 = vmul.f32 %v22425_v13, %v7700_v23 }
 0xc91   : > { %v7751_v8 = vmul.f32 %v7701_v11, %v18583_v57  ;;  %v7811_v62 = vmul.f32 %v19482_v1, %v7701_v11  ;;  %v7579_v44 = vadd.f32 %v7563_v36, %v7547_v58  ;;  %v7609_v9 = vadd.f32 %v19726_v30, %v7577_v32  ;;  %v11961_v30 = vld [vmem:[%s22146_s13 + $0xb0] sm:$0xff] }
 0xc92   : > { %v7610_v24 = vadd.f32 %v19806_v19, %v7578_v51  ;;  %v7612_v59 = vadd.f32 %v7596_v46, %v7580_v12  ;;  %v7640_v54 = vadd.f32 %v19813_v60, %v7608_v15  ;;  %v7781_v49 = vmul.f32 %v7701_v11, %v18588_v48  ;;  %v11962_v60 = vld [vmem:[%s22146_s13 + $0xb8] sm:$0xff] }
 0xc93   : > { %v7827_v34 = vadd.f32 %v7811_v62, %v7795_v7  ;;  %13860 = vmatpush3.bf16.msra.mxu1 %v13859_v26  ;;  %v13862_v2 = vpack.c.bf16 %v11960_v33, %v11959_v35  ;;  %v7611_v43 = vadd.f32 %v19942_v61, %v7579_v44  ;;  %v7641_v3 = vadd.f32 %v19953_v17, %v7609_v9 }
 0xc94   : > { %v7642_v45 = vadd.f32 %v7626_v25, %v7610_v24  ;;  %v7644_v21 = vadd.f32 %v19989_v52, %v7612_v59  ;;  %13861 = vmatprep.subr.bf16.mxu1 %v22424_v10  ;;  %v7672_v19 = vadd.f32 %v7656_v14, %v7640_v54  ;;  %v7752_v36 = vmul.f32 %v7732_v0, %v18583_v57  ;;  %v22428_v24 = vld [vmem:[#allocation67_spill] sm:$0xff]  ;;  %v22429_v59 = vld [vmem:[#allocation84_spill] sm:$0xff] }
 0xc95   : > { %v7782_v61 = vmul.f32 %v7732_v0, %v18588_v48  ;;  %v7843_v17 = vadd.f32 %v19608_v18, %v7827_v34  ;;  %v7643_v7 = vadd.f32 %v19922_v4, %v7611_v43  ;;  %v7673_v52 = vadd.f32 %v19926_v56, %v7641_v3  ;;  %v11963_v4 = vld [vmem:[%s22146_s13 + $0xc0] sm:$0xff]  ;;  %v11964_v56 = vld [vmem:[%s22146_s13 + $0xc8] sm:$0xff] }
 0xc96   : > { %v7674_v46 = vadd.f32 %v20001_v41, %v7642_v45  ;;  %v7676_v25 = vadd.f32 %v20023_v38, %v7644_v21  ;;  %v7764_v29 = vadd.f32 %v7748_v63, %v7672_v19  ;;  %v13865_v20 = vpack.c.bf16 %v11962_v60, %v11961_v30  ;;  %v11967_v34 = vld [vmem:[%s22146_s13 + $0xe0] sm:$0xff] }
 0xc97   : > { %vm7859_vm14 = vcmp.gt.f32.partialorder %v7843_v17, 0.0  ;;  %v7875_v23 = vmul.f32 0.2, %v7843_v17  ;;  %13863 = vmatpush3.bf16.msra.mxu1 %v13862_v2  ;;  %v7675_v14 = vadd.f32 %v20023_v38, %v7643_v7  ;;  %v7765_v57 = vadd.f32 %v19837_v37, %v7673_v52  ;;  %v11968_v2 = vld [vmem:[%s22146_s13 + $0xe8] sm:$0xff] }
 0xc98   : > { %v7766_v48 = vadd.f32 %v7750_v6, %v7674_v46  ;;  %v7768_v11 = vadd.f32 %v7752_v36, %v7676_v25  ;;  %13864 = vmatprep.subr.bf16.mxu1 %v22424_v10  ;;  %v7796_v41 = vadd.f32 %v7780_v5, %v7764_v29  ;;  %v7812_v63 = vmul.f32 %v19482_v1, %v7732_v0  ;;  %v11969_v46 = vld [vmem:[%s22146_s13 + $0xf0] sm:$0xff]  ;;  %v11970_v25 = vld [vmem:[%s22146_s13 + $0xf8] sm:$0xff] }
 0xc99   : > { %v7815_v38 = vmul.f32 %v19482_v1, %v22416_v40  ;;  %v20117_v53 = vsel %vm7859_vm14, %v7843_v17, %v7875_v23  ;;  %v7767_v37 = vadd.f32 %v7751_v8, %v7675_v14  ;;  %v7797_v16 = vadd.f32 %v7781_v49, %v7765_v57  ;;  %v22426_v1 = vld [vmem:[#allocation59_spill] sm:$0xff] }
 0xc9a   : > { %v7798_v6 = vadd.f32 %v7782_v61, %v7766_v48  ;;  %v7800_v26 = vadd.f32 %v20016_v55, %v7768_v11  ;;  %v7828_v58 = vadd.f32 %v7812_v63, %v7796_v41  ;;  %v7907_v32 = vadd.f32 %v20043_v50, %v20117_v53  ;;  %v11965_v55 = vld [vmem:[%s22146_s13 + $0xd0] sm:$0xff]  ;;  %v11966_v50 = vld [vmem:[%s22146_s13 + $0xd8] sm:$0xff] }
 0xc9b   : > { %13866 = vmatpush3.bf16.msra.mxu1 %v13865_v20  ;;  %v13868_v51 = vpack.c.bf16 %v11964_v56, %v11963_v4  ;;  %v7799_v5 = vadd.f32 %v20006_v27, %v7767_v37  ;;  %v7829_v12 = vadd.f32 %v20011_v39, %v7797_v16  ;;  %v7923_v27 = vpack.c.bf16 %v19845_v42, %v19792_v28  ;;  %v22427_v39 = vld [vmem:[#allocation79_spill] sm:$0xff] }
 0xc9c   : > { %v7830_v35 = vadd.f32 %v20019_v47, %v7798_v6  ;;  %v7832_v40 = vadd.f32 %v22426_v1, %v7800_v26  ;;  %13867 = vmatprep.subr.bf16.mxu1 %v22424_v10  ;;  %v7844_v33 = vadd.f32 %v19608_v18, %v7828_v58  ;;  %v7924_v47 = vpack.c.bf16 %v22427_v39, %v19910_v31  ;;  %v8032_v6 = vld [vmem:[#allocation13 + $0x20] sm:$0xff]  ;;  %v8033_v26 = vld [vmem:[#allocation13 + $0x28] sm:$0xff]  ;;  %v22438_v31 = vld [vmem:[#allocation53_spill] sm:$0xff] }
 0xc9d   : > { %v7831_v15 = vadd.f32 %v7815_v38, %v7799_v5  ;;  %v7845_v0 = vadd.f32 %v19608_v18, %v7829_v12  ;;  %v13871_v9 = vpack.c.bf16 %v11966_v50, %v11965_v55  ;;  %v7925_v54 = vpack.c.bf16 %v22429_v59, %v22428_v24  ;;  %v7897_v38 = vld [vmem:[#allocation6] sm:$0x1]  ;;  %v8034_v12 = vld [vmem:[#allocation13 + $0x30] sm:$0xff]  ;;  %v14606_v55 = vld [vmem:[%s22149_s28 + $0x48] sm:$0xff]  }
 0xc9e   : > { %v7846_v8 = vadd.f32 %v19608_v18, %v7830_v35  ;;  %v7848_v62 = vadd.f32 %v19608_v18, %v7832_v40  ;;  %vm7860_vm15 = vcmp.gt.f32.partialorder %v7844_v33, 0.0  ;;  %v7876_v44 = vmul.f32 0.2, %v7844_v33  ;;  %v8035_v35 = vld [vmem:[#allocation13 + $0x38] sm:$0xff]  ;;  %v14607_v50 = vld [vmem:[%s22149_s28 + $0x50] sm:$0xff]  }
 0xc9f   : > { %13869 = vmatpush3.bf16.msra.mxu1 %v13868_v51  ;;  %v7847_v49 = vadd.f32 %v19608_v18, %v7831_v15  ;;  %vm7861_vm3 = vcmp.gt.f32.partialorder %v7845_v0, 0.0  ;;  %v7877_v43 = vmul.f32 0.2, %v7845_v0  ;;  %v13874_v36 = vpack.c.bf16 %v11968_v2, %v11967_v34  ;;  %v14605_v40 = vld [vmem:[%s22149_s28 + $0x40] sm:$0xff]   ;;  %v14610_v34 = vld [vmem:[%s22149_s28 + $0x68] sm:$0xff]   ;;  %v14611_v2 = vld [vmem:[%s22149_s28 + $0x70] sm:$0xff]  }
 0xca0   : > { %vm7862_vm4 = vcmp.gt.f32.partialorder %v7846_v8, 0.0  ;;  %vm7864_vm5 = vcmp.gt.f32.partialorder %v7848_v62, 0.0  ;;  %13870 = vmatprep.subr.bf16.mxu1 %v22424_v10  ;;  %v7878_v3 = vmul.f32 0.2, %v7846_v8  ;;  %v7880_v45 = vmul.f32 0.2, %v7848_v62  ;;  %13381 = vmatprep.subr.bf16.mxu0 %v14605_v40 }
 0xca1   : > { %v20151_v21 = vsel %vm7860_vm15, %v7844_v33, %v7876_v44  ;;  %vm7863_vm6 = vcmp.gt.f32.partialorder %v7847_v49, 0.0  ;;  %v7879_v18 = vmul.f32 0.2, %v7847_v49  ;;  %v20154_v60 = vsel %vm7861_vm3, %v7845_v0, %v7877_v43  ;;  %13382 = vmatpush3.bf16.msra.mxu0 %v14605_v40  ;;  %v14608_v33 = vld [vmem:[%s22149_s28 + $0x58] sm:$0xff]   ;;  %v7957_v15 = vld [vmem:[#allocation12 + $0x1] sm:$0x1] }
 0xca2   : > { %v7908_v30 = vadd.f32 %v7907_v32, %v20151_v21  ;;  %v20156_v19 = vsel %vm7862_vm4, %v7846_v8, %v7878_v3  ;;  %v7926_v61 = vpack.c.bf16 %v20151_v21, %v20117_v53  ;;  %v20163_v7 = vsel %vm7864_vm5, %v7848_v62, %v7880_v45  ;;  %13383 = vmatprep.subr.bf16.mxu0 %v14606_v55  ;;  %v14612_v43 = vld [vmem:[%s22149_s28 + $0x78] sm:$0xff]   ;;  %v8037_v3 = vld [vmem:[#allocation15 + $0x1] sm:$0x1]  ;;  %v22442_v21 = vld [vmem:[#allocation39_spill] sm:$0xff] }
 0xca3   : > { %13872 = vmatpush3.bf16.msra.mxu1 %v13871_v9  ;;  %v20160_v17 = vsel %vm7863_vm6, %v7847_v49, %v7879_v18  ;;  %v7927_v29 = vpack.c.bf16 %v20156_v19, %v20154_v60  ;;  %v13877_v14 = vpack.c.bf16 %v11970_v25, %v11969_v46  ;;  %v13880_v32 = vpack.c.bf16 %v8033_v26, %v8032_v6  ;;  %v14609_v49 = vld [vmem:[%s22149_s28 + $0x60] sm:$0xff]  }
 0xca4   : > { %v7909_v52 = vadd.f32 %v7908_v30, %v20154_v60  ;;  %13873 = vmatprep.subr.bf16.mxu1 %v22424_v10  ;;  %v7928_v23 = vpack.c.bf16 %v20163_v7, %v20160_v17  ;;  %v22430_v5 = vmov 0.0   ;;  %v13883_v1 = vpack.c.bf16 %v8035_v35, %v8034_v12  ;;  %v22440_v53 = vld [vmem:[#allocation58_spill] sm:$0xff] }
 0xca5   : > { %13384 = vmatpush3.bf16.msra.mxu0 %v14606_v55  ;;  %v22443_v60 = vld [vmem:[#allocation54_spill] sm:$0xff] }
 0xca6   : > { %v7910_v20 = vadd.f32 %v7909_v52, %v20156_v19  ;;  %13385 = vmatprep.subr.bf16.mxu0 %v14607_v50  ;;  %v7394_v19 = vpack.c.bf16 %v22443_v60, %v22442_v21  ;;  %v8489_v60 = vld [vmem:[#allocation2 + $0x10] sm:$0xff] }
 0xca7   : > { %13875 = vmatpush3.bf16.msra.mxu1 %v13874_v36 }
 0xca8   : > { %v7911_v57 = vadd.f32 %v7910_v20, %v20160_v17  ;;  %13876 = vmatprep.subr.bf16.mxu1 %v22424_v10  ;;  %v22445_v17 = vld [vmem:[#allocation104_spill] sm:$0xff] }
 0xca9   : > { %13386 = vmatpush3.bf16.msra.mxu0 %v14607_v50 }
 0xcaa   : > { %v7912_v48 = vadd.f32 %v7911_v57, %v20163_v7  ;;  %13387 = vmatprep.subr.bf16.mxu0 %v14608_v33  ;;  %v22431_v57 = vld [vmem:[#allocation28_spill] sm:$0xff] }
 0xcab   : > { %13878 = vmatpush3.bf16.msra.mxu1 %v13877_v14 }
 0xcac   : > { %v7913_v11 = vrot.slane %v7912_v48, 4  ;;  %13879 = vmatprep.subr.bf16.mxu1 %v22424_v10 }
 0xcad   : > { %13388 = vmatpush3.bf16.msra.mxu0 %v14608_v33 }
 0xcae   : > { %v7914_v4 = vadd.f32 %v7913_v11, %v7912_v48  ;;  %13389 = vmatprep.subr.bf16.mxu0 %v14609_v49  ;;  %v22432_v11 = vld [vmem:[#allocation68_spill] sm:$0xff] }
 0xcb0   : > { %v7915_v56 = vrot.slane %v7914_v4, 2 }
 0xcb1   : > { %13390 = vmatpush3.bf16.msra.mxu0 %v14609_v49 }
 0xcb2   : > { %v7916_v41 = vadd.f32 %v7915_v56, %v7914_v4  ;;  %13391 = vmatprep.subr.bf16.mxu0 %v14610_v34  ;;  %v22433_v4 = vld [vmem:[#allocation88_spill] sm:$0xff] }
 0xcb3   : > { %v7389_v56 = vpack.c.bf16 %v22433_v4, %v22432_v11 }
 0xcb4   : > { %v7917_v63 = vrot.slane %v7916_v41, 1 }
 0xcb5   : > { %13392 = vmatpush3.bf16.msra.mxu0 %v14610_v34 }
 0xcb6   : > { %v7918_v37 = vadd.f32 %v7917_v63, %v7916_v41  ;;  %13393 = vmatprep.subr.bf16.mxu0 %v14611_v2  ;;  %v22434_v41 = vld [vmem:[#allocation92_spill] sm:$0xff]  ;;  %v22435_v63 = vld [vmem:[#allocation93_spill] sm:$0xff] }
 0xcb8   : > { %v7919_v16 = vadd.f32 %v7918_v37, %v7897_v38  ;;  %v7390_v38 = vpack.c.bf16 %v22435_v63, %v22434_v41  ;;  %v22436_v37 = vld [vmem:[#allocation95_spill] sm:$0xff] }
 0xcb9   : > { %13394 = vmatpush3.bf16.msra.mxu0 %v14611_v2 }
 0xcba   : > { %7920 = vst [vmem:[#allocation6] sm:$0x1] %v7919_v16  ;;  %13395 = vmatprep.subr.bf16.mxu0 %v14612_v43  ;;  %v22437_v16 = vld [vmem:[#allocation96_spill] sm:$0xff] }
 0xcbb   : > { %v7391_v6 = vpack.c.bf16 %v22437_v16, %v22436_v37 }
 0xcbd   : > { %13396 = vmatpush3.bf16.msra.mxu0 %v14612_v43 }
 0xcc1   : > { %v7937_v58 = vld [vmem:[#allocation6] sm:$0x1] }
 0xcc2   : > { %v7938_v51 = vmul.f32 0.00390625, %v7937_v58 }
 0xcc4   : > { %13368 = vmatmul.mubr.f32.vlgmr.msra.gmra.mrb[36].mxu1 %v7938_v51 }
 0xcc5   : > { %13881 = vmatpush3.bf16.msra.mxu1 %v13880_v32  ;;  %13378 = vmatprep.mubr.msk.f32.mxu1 %vm14997_vm7, %v22430_v5 }
 0xcc6   : > { %13882 = vmatprep.subr.bf16.mxu1 %v22424_v10 }
 0xcc9   : > { %13884 = vmatpush3.bf16.msra.mxu1 %v13883_v1 }
 0xcca   : > { %13897 = vmatprep.subr.bf16.mxu1 %v14605_v40 }
 0xd97   : > { %v8024_v0 = vpop.f32.mrb[36].mxu1 }
 0xd98   : > { %v8025_v8 = vadd.f32 %v8024_v0, %v7957_v15  ;;  %v13369_v62 = vpop.f32.mrb[37].mxu1  ;;  %v22449_v15 = vld [vmem:[#allocation98_spill] sm:$0xff] }
 0xd9a   : > { %vm8028_vm10 = vcmp.gt.f32.partialorder %v8025_v8, 0.0  ;;  %v8029_v44 = vmul.f32 0.2, %v8025_v8 }
 0xd9c   : > { %v8030_v9 = vsel %vm8028_vm10, %v8025_v8, %v8029_v44  ;;  %v22450_v44 = vld [vmem:[#allocation99_spill] sm:$0xff] }
 0xd9d   : > { %13379 = vmatmul.mubr.msk.f32.vlgmr.msra.gmra.mrb[38].mxu1 %vm3007_vm9, %v8030_v9  ;;  %v22451_v9 = vld [vmem:[#allocation69_spill] sm:$0xff] }
 0xd9e   : > { %13905 = vmatpush3.bf16.msra.mxu1 %v14605_v40  ;;  %v22446_v40 = vld [vmem:[#allocation86_spill] sm:$0xff] }
 0xd9f   : > { %13898 = vmatprep.subr.bf16.mxu1 %v14606_v55 }
 0xda2   : > { %13906 = vmatpush3.bf16.msra.mxu1 %v14606_v55  ;;  %v22447_v55 = vld [vmem:[#allocation100_spill] sm:$0xff] }
 0xda3   : > { %13899 = vmatprep.subr.bf16.mxu1 %v14607_v50 }
 0xda6   : > { %13907 = vmatpush3.bf16.msra.mxu1 %v14607_v50  ;;  %v7396_v50 = vpack.c.bf16 %v22447_v55, %v22446_v40  ;;  %v8490_v40 = vld [vmem:[#allocation2 + $0x18] sm:$0xff] }
 0xda7   : > { %13900 = vmatprep.subr.bf16.mxu1 %v14608_v33 }
 0xdaa   : > { %13908 = vmatpush3.bf16.msra.mxu1 %v14608_v33  ;;  %v22448_v33 = vld [vmem:[#allocation85_spill] sm:$0xff] }
 0xdab   : > { %13901 = vmatprep.subr.bf16.mxu1 %v14609_v49  ;;  %v7921_v0 = vpack.c.bf16 %v22449_v15, %v22448_v33 }
 0xdae   : > { %13909 = vmatpush3.bf16.msra.mxu1 %v14609_v49  ;;  %v7922_v49 = vpack.c.bf16 %v22451_v9, %v22450_v44 }
 0xdaf   : > { %13902 = vmatprep.subr.bf16.mxu1 %v14610_v34 }
 0xdb2   : > { %13910 = vmatpush3.bf16.msra.mxu1 %v14610_v34 }
 0xdb3   : > { %13903 = vmatprep.subr.bf16.mxu1 %v14611_v2 }
 0xdb6   : > { %13911 = vmatpush3.bf16.msra.mxu1 %v14611_v2  ;;  %v8622_v2 = vld [vmem:[#allocation16 + $0x40] sm:$0xff] }
 0xdb7   : > { %13904 = vmatprep.subr.bf16.mxu1 %v14612_v43 }
 0xdba   : > { %13912 = vmatpush3.bf16.msra.mxu1 %v14612_v43  ;;  %v8623_v43 = vld [vmem:[#allocation16 + $0x48] sm:$0xff] }
 0xdbb   : > { %13885 = vmatprep.subr.bf16.mxu1 %v22424_v10 }
 0xe70   : > { %v8107_v45 = vpop.f32.mrb[38].mxu1 }
 0xe71   : > { %v8108_v18 = vadd.f32 %v8107_v45, %v8037_v3  ;;  %v13380_v30 = vpop.f32.mrb[39].mxu1  ;;  %v8624_v3 = vld [vmem:[#allocation16 + $0x50] sm:$0xff]  ;;  %v13886_v45 = vpack.c.bf16 %v8623_v43, %v8622_v2 }
 0xe73   : > { %v11972_v36 = vmul.f32 -1.442695, %v8108_v18  ;;  %v8625_v18 = vld [vmem:[#allocation16 + $0x58] sm:$0xff] }
 0xe74   : > { %v13889_v30 = vpack.c.bf16 %v8625_v18, %v8624_v3  ;;  %v8491_v18 = vld [vmem:[#allocation2 + $0x20] sm:$0xff] }
 0xe75   : > { %14657 = vpow2.f32 %v11972_v36  ;;  %v8626_v36 = vld [vmem:[#allocation16 + $0x60] sm:$0xff] }
 0xe7f   : > { %v14658_v52 = vpop.eup %14657 }
 0xe80   : > { %v8114_v46 = vadd.f32 1.0, %v14658_v52  ;;  %v8627_v52 = vld [vmem:[#allocation16 + $0x68] sm:$0xff] }
 0xe82   : > { %14659 = vrcp.f32 %v8114_v46  ;;  %v13892_v46 = vpack.c.bf16 %v8627_v52, %v8626_v36 }
 0xe8c   : > { %v14660_v25 = vpop.eup %14659 }
 0xe8d   : > { %v8133_v20 = vpack.c.bf16 %v14660_v25, %v14660_v25  ;;  %v8628_v25 = vld [vmem:[#allocation16 + $0x70] sm:$0xff] }
 0xe8f   : > { %v8135_v14 = vpack.i.b16 %v8133_v20, %v8133_v20  ;;  %v8629_v20 = vld [vmem:[#allocation16 + $0x78] sm:$0xff] }
 0xe91   : > { %v8140_v48 = vrot.slane %v8135_v14, %v22431_v57  ;;  %v13895_v14 = vpack.c.bf16 %v8629_v20, %v8628_v25 }
 0xe93   : > { %v8141_v26 = vmul.bf16 %v8140_v48, %v7389_v56  ;;  %v8151_v58 = vmul.bf16 %v8140_v48, %v7923_v27  ;;  %v8142_v32 = vmul.bf16 %v8140_v48, %v7390_v38  ;;  %v8152_v51 = vmul.bf16 %v8140_v48, %v7924_v47  ;;  %v22439_v27 = vld [vmem:[#allocation83_spill] sm:$0xff]  ;;  %v22441_v47 = vld [vmem:[#allocation73_spill] sm:$0xff] }
 0xe94   : > { %v8153_v12 = vmul.bf16 %v8140_v48, %v7925_v54  ;;  %v8154_v35 = vmul.bf16 %v8140_v48, %v7926_v61  ;;  %v8143_v1 = vmul.bf16 %v8140_v48, %v7391_v6  ;;  %v8155_v28 = vmul.bf16 %v8140_v48, %v7927_v29  ;;  %v22444_v61 = vld [vmem:[#allocation102_spill] sm:$0xff] }
 0xe95   : > { %13397 = vmatprep.mubr.bf16.mxu0 %v8141_v26  ;;  %13417 = vmatprep.mubr.bf16.mxu1 %v8151_v58  ;;  %v8156_v42 = vmul.bf16 %v8140_v48, %v7928_v23  ;;  %v7392_v39 = vpack.c.bf16 %v22439_v27, %v22438_v31  ;;  %v7393_v24 = vpack.c.bf16 %v22441_v47, %v22440_v53  ;;  %v8487_v53 = vld [vmem:[#allocation2] sm:$0xff] }
 0xe96   : > { %13398 = vmatmul.mubr.bf16.vlgmr.msra.gmra.mrb[100].mxu0 %v8142_v32  ;;  %13418 = vmatmul.mubr.bf16.vlgmr.msra.gmra.mrb[40].mxu1 %v8152_v51  ;;  %v7395_v7 = vpack.c.bf16 %v22445_v17, %v22444_v61  ;;  %v8146_v29 = vmul.bf16 %v8140_v48, %v7394_v19  ;;  %v8148_v8 = vmul.bf16 %v8140_v48, %v7396_v50  ;;  %v8488_v17 = vld [vmem:[#allocation2 + $0x8] sm:$0xff] }
 0xe97   : > { %13401 = vmatprep.mubr.bf16.mxu0 %v8143_v1  ;;  %13421 = vmatprep.mubr.bf16.mxu1 %v8153_v12  ;;  %v8144_v59 = vmul.bf16 %v8140_v48, %v7392_v39  ;;  %v8145_v54 = vmul.bf16 %v8140_v48, %v7393_v24  ;;  %v8149_v62 = vmul.bf16 %v8140_v48, %v7921_v0 }
 0xe98   : > { %v8147_v23 = vmul.bf16 %v8140_v48, %v7395_v7  ;;  %v8150_v34 = vmul.bf16 %v8140_v48, %v7922_v49  ;;  %13887 = vmatpush3.bf16.msra.mxu1 %v13886_v45  ;;  %v20259_v48 = vld [vmem:[%s22172_s25 + $0x1] ss:$0 sm:$0xff] }
 0xe99   : > { %13888 = vmatprep.subr.bf16.mxu1 %v22424_v10 }
 0xe9c   : > { %13890 = vmatpush3.bf16.msra.mxu1 %v13889_v30 }
 0xe9d   : > { %13891 = vmatprep.subr.bf16.mxu1 %v22424_v10 }
 0xe9e   : > { %13402 = vmatmul.mubr.bf16.gmra.mrb[104].mxu0 %v8144_v59  ;;  %13422 = vmatmul.mubr.bf16.gmra.mrb[44].mxu1 %v8154_v35 }
 0xe9f   : > { %13405 = vmatprep.mubr.bf16.mxu0 %v8145_v54  ;;  %13425 = vmatprep.mubr.bf16.mxu1 %v8155_v28 }
 0xea0   : > { %13893 = vmatpush3.bf16.msra.mxu1 %v13892_v46 }
 0xea1   : > { %13894 = vmatprep.subr.bf16.mxu1 %v22424_v10 }
 0xea4   : > { %13896 = vmatpush3.bf16.msra.mxu1 %v13895_v14 }
 0xea5   : > { %13448 = vmatprep.subr.mxu1 %v22430_v5 }
 0xea6   : > { %13406 = vmatmul.mubr.bf16.gmra.mrb[108].mxu0 %v8146_v29  ;;  %13426 = vmatmul.mubr.bf16.gmra.mrb[48].mxu1 %v8156_v42 }
 0xea7   : > { %13409 = vmatprep.mubr.bf16.mxu0 %v8147_v23  ;;  %13445 = vmatprep.mubr.msk.f32.mxu1 %vm14997_vm7, %v22430_v5 }
 0xeae   : > { %13410 = vmatmul.mubr.bf16.gmra.mrb[112].mxu0 %v8148_v8 }
 0xeaf   : > { %13413 = vmatprep.mubr.bf16.mxu0 %v8149_v62 }
 0xeb6   : > { %13414 = vmatmul.mubr.bf16.gmra.mrb[116].mxu0 %v8150_v34 }
 0xf69   : > { %v13399_v11 = vpop.f32.mrb[100].mxu0  ;;  %v20261_v4 = vpop.f32.mrb[40].mxu1 }
 0xf6a   : > { %v8264_v56 = vpop.f32.mrb[101].mxu0  ;;  %v20263_v41 = vpop.f32.mrb[41].mxu1  ;;  %v8273_v10 = vadd.f32 %v13399_v11, %v20259_v48 }
 0xf6b   : > { %v8265_v63 = vadd.f32 %v20259_v48, %v8264_v56  ;;  %v13400_v38 = vpop.f32.mrb[102].mxu0  ;;  %v20266_v37 = vpop.f32.mrb[42].mxu1 }
 0xf6c   : > { %v8276_v6 = vadd.f32 %v13400_v38, %v20259_v48  ;;  %v8267_v26 = vpop.f32.mrb[103].mxu0  ;;  %v20270_v58 = vpop.f32.mrb[43].mxu1  ;;  %v8425_v32 = vmul.f32 0.2, %v8273_v10  ;;  %vm8393_vm12 = vcmp.gt.f32.partialorder %v8273_v10, 0.0 }
 0xf6d   : > { %v8423_v16 = vmul.f32 0.2, %v8265_v63  ;;  %vm8391_vm9 = vcmp.gt.f32.partialorder %v8265_v63, 0.0  ;;  %v8268_v1 = vadd.f32 %v20259_v48, %v8267_v26 }
 0xf6e   : > { %v8426_v35 = vmul.f32 0.2, %v8276_v6  ;;  %vm8394_vm13 = vcmp.gt.f32.partialorder %v8276_v6, 0.0  ;;  %v8457_v39 = vsel %vm8393_vm12, %v8273_v10, %v8425_v32 }
 0xf6f   : > { %v8455_v12 = vsel %vm8391_vm9, %v8265_v63, %v8423_v16  ;;  %vm8392_vm14 = vcmp.gt.f32.partialorder %v8268_v1, 0.0  ;;  %v8424_v47 = vmul.f32 0.2, %v8268_v1  ;;  %v20283_v7 = vadd.f32 %v8489_v60, %v8457_v39  ;;  %v8494_v60 = vld [vmem:[#allocation2 + $0x38] sm:$0xff] }
 0xf70   : > { %v20279_v54 = vadd.f32 %v8487_v53, %v8455_v12  ;;  %v8458_v19 = vsel %vm8394_vm13, %v8276_v6, %v8426_v35  ;;  %v8493_v6 = vld [vmem:[#allocation2 + $0x30] sm:$0xff] }
 0xf71   : > { %v13403_v51 = vpop.f32.mrb[104].mxu0  ;;  %v20273_v28 = vpop.f32.mrb[44].mxu1  ;;  %v8456_v61 = vsel %vm8392_vm14, %v8268_v1, %v8424_v47  ;;  %v20291_v33 = vadd.f32 %v8490_v40, %v8458_v19  ;;  %v8554_v34 = vsel %vm1333_vm0, %v20283_v7, 0.0 }
 0xf72   : > { %v8280_v42 = vpop.f32.mrb[105].mxu0  ;;  %v20275_v31 = vpop.f32.mrb[45].mxu1  ;;  %v20285_v29 = vadd.f32 %v8488_v17, %v8456_v61  ;;  %v8289_v55 = vadd.f32 %v13403_v51, %v20259_v48  ;;  %v8551_v50 = vsel %vm1333_vm0, %v20279_v54, 0.0  ;;  %v8492_v51 = vld [vmem:[#allocation2 + $0x28] sm:$0xff] }
 0xf73   : > { %v13404_v27 = vpop.f32.mrb[106].mxu0  ;;  %v20277_v24 = vpop.f32.mrb[46].mxu1  ;;  %v8281_v23 = vadd.f32 %v20259_v48, %v8280_v42  ;;  %v8556_v46 = vsel %vm1333_vm0, %v20291_v33, 0.0 }
 0xf74   : > { %v8283_v59 = vpop.f32.mrb[107].mxu0  ;;  %v20281_v21 = vpop.f32.mrb[47].mxu1  ;;  %v8552_v15 = vsel %vm1333_vm0, %v20285_v29, 0.0  ;;  %v8429_v3 = vmul.f32 0.2, %v8289_v55  ;;  %v8292_v30 = vadd.f32 %v13404_v27, %v20259_v48  ;;  %vm8397_vm3 = vcmp.gt.f32.partialorder %v8289_v55, 0.0 }
 0xf75   : > { %vm8395_vm15 = vcmp.gt.f32.partialorder %v8281_v23, 0.0  ;;  %v8553_v62 = vadd.f32 %v8552_v15, %v8551_v50  ;;  %v8427_v44 = vmul.f32 0.2, %v8281_v23  ;;  %v8284_v20 = vadd.f32 %v20259_v48, %v8283_v59  ;;  %v8495_v50 = vld [vmem:[#allocation2 + $0x40] sm:$0xff] }
 0xf76   : > { %v8461_v63 = vsel %vm8397_vm3, %v8289_v55, %v8429_v3  ;;  %v8430_v38 = vmul.f32 0.2, %v8292_v30  ;;  %vm8398_vm5 = vcmp.gt.f32.partialorder %v8292_v30, 0.0 }
 0xf77   : > { %v8555_v43 = vadd.f32 %v8554_v34, %v8553_v62  ;;  %v8459_v45 = vsel %vm8395_vm15, %v8281_v23, %v8427_v44  ;;  %vm8396_vm4 = vcmp.gt.f32.partialorder %v8284_v20, 0.0  ;;  %v8428_v10 = vmul.f32 0.2, %v8284_v20 }
 0xf78   : > { %v20306_v25 = vadd.f32 %v8491_v18, %v8459_v45  ;;  %v20313_v35 = vadd.f32 %v8493_v6, %v8461_v63  ;;  %v8462_v39 = vsel %vm8398_vm5, %v8292_v30, %v8430_v38  ;;  %v8497_v63 = vld [vmem:[#allocation2 + $0x50] sm:$0xff] }
 0xf79   : > { %v13407_v0 = vpop.f32.mrb[108].mxu0  ;;  %v20295_v8 = vpop.f32.mrb[48].mxu1  ;;  %v8557_v11 = vadd.f32 %v8556_v46, %v8555_v43  ;;  %v8460_v32 = vsel %vm8396_vm4, %v8284_v20, %v8428_v10  ;;  %v20323_v23 = vadd.f32 %v8494_v60, %v8462_v39 }
 0xf7a   : > { %v8296_v9 = vpop.f32.mrb[109].mxu0  ;;  %v20297_v49 = vpop.f32.mrb[49].mxu1  ;;  %v8558_v56 = vsel %vm1333_vm0, %v20306_v25, 0.0  ;;  %v20315_v1 = vadd.f32 %v8492_v51, %v8460_v32  ;;  %v8305_v59 = vadd.f32 %v13407_v0, %v20259_v48  ;;  %v8562_v17 = vsel %vm1333_vm0, %v20313_v35, 0.0  ;;  %v8496_v32 = vld [vmem:[#allocation2 + $0x48] sm:$0xff] }
 0xf7b   : > { %v13408_v2 = vpop.f32.mrb[110].mxu0  ;;  %v20302_v36 = vpop.f32.mrb[50].mxu1  ;;  %v8559_v26 = vadd.f32 %v8558_v56, %v8557_v11  ;;  %v8297_v42 = vadd.f32 %v20259_v48, %v8296_v9  ;;  %v8564_v34 = vsel %vm1333_vm0, %v20323_v23, 0.0 }
 0xf7c   : > { %v8299_v52 = vpop.f32.mrb[111].mxu0  ;;  %v20309_v14 = vpop.f32.mrb[51].mxu1  ;;  %v8560_v47 = vsel %vm1333_vm0, %v20315_v1, 0.0  ;;  %v8308_v15 = vadd.f32 %v13408_v2, %v20259_v48  ;;  %v8433_v62 = vmul.f32 0.2, %v8305_v59  ;;  %vm8401_vm10 = vcmp.gt.f32.partialorder %v8305_v59, 0.0 }
 0xf7d   : > { %vm8399_vm6 = vcmp.gt.f32.partialorder %v8297_v42, 0.0  ;;  %v8561_v19 = vadd.f32 %v8560_v47, %v8559_v26  ;;  %v8431_v61 = vmul.f32 0.2, %v8297_v42  ;;  %v8300_v45 = vadd.f32 %v20259_v48, %v8299_v52  ;;  %v8498_v52 = vld [vmem:[#allocation2 + $0x58] sm:$0xff] }
 0xf7e   : > { %v8434_v43 = vmul.f32 0.2, %v8308_v15  ;;  %vm8402_vm9 = vcmp.gt.f32.partialorder %v8308_v15, 0.0  ;;  %v8465_v30 = vsel %vm8401_vm10, %v8305_v59, %v8433_v62 }
 0xf7f   : > { %v8563_v40 = vadd.f32 %v8562_v17, %v8561_v19  ;;  %v8463_v55 = vsel %vm8399_vm6, %v8297_v42, %v8431_v61  ;;  %vm8400_vm12 = vcmp.gt.f32.partialorder %v8300_v45, 0.0  ;;  %v8432_v11 = vmul.f32 0.2, %v8300_v45  ;;  %v8499_v19 = vld [vmem:[#allocation2 + $0x60] sm:$0xff] }
 0xf80   : > { %v20326_v44 = vadd.f32 %v8495_v50, %v8463_v55  ;;  %v8466_v38 = vsel %vm8402_vm9, %v8308_v15, %v8434_v43  ;;  %v20335_v10 = vadd.f32 %v8497_v63, %v8465_v30  ;;  %v8501_v30 = vld [vmem:[#allocation2 + $0x70] sm:$0xff] }
 0xf81   : > { %v13411_v16 = vpop.f32.mrb[112].mxu0  ;;  %v8565_v3 = vadd.f32 %v8564_v34, %v8563_v40  ;;  %v8464_v26 = vsel %vm8400_vm12, %v8300_v45, %v8432_v11  ;;  %v20339_v39 = vadd.f32 %v8498_v52, %v8466_v38 }
 0xf82   : > { %v8312_v12 = vpop.f32.mrb[113].mxu0  ;;  %v8566_v46 = vsel %vm1333_vm0, %v20326_v44, 0.0  ;;  %v8321_v56 = vadd.f32 %v13411_v16, %v20259_v48  ;;  %v20337_v51 = vadd.f32 %v8496_v32, %v8464_v26  ;;  %v8570_v17 = vsel %vm1333_vm0, %v20335_v10, 0.0  ;;  %v8502_v32 = vld [vmem:[#allocation2 + $0x78] sm:$0xff] }
 0xf83   : > { %v13412_v27 = vpop.f32.mrb[114].mxu0  ;;  %v8313_v2 = vadd.f32 %v20259_v48, %v8312_v12  ;;  %v8567_v6 = vadd.f32 %v8566_v46, %v8565_v3  ;;  %v8500_v3 = vld [vmem:[#allocation2 + $0x68] sm:$0xff] }
 0xf84   : > { %v8315_v53 = vpop.f32.mrb[115].mxu0  ;;  %v8437_v12 = vmul.f32 0.2, %v8321_v56  ;;  %v8324_v47 = vadd.f32 %v13412_v27, %v20259_v48  ;;  %v8568_v16 = vsel %vm1333_vm0, %v20337_v51, 0.0  ;;  %vm8405_vm14 = vcmp.gt.f32.partialorder %v8321_v56, 0.0 }
 0xf85   : > { %vm8403_vm13 = vcmp.gt.f32.partialorder %v8313_v2, 0.0  ;;  %v8435_v42 = vmul.f32 0.2, %v8313_v2  ;;  %v8316_v59 = vadd.f32 %v20259_v48, %v8315_v53  ;;  %v8569_v40 = vadd.f32 %v8568_v16, %v8567_v6 }
 0xf86   : > { %vm8406_vm15 = vcmp.gt.f32.partialorder %v8324_v47, 0.0  ;;  %v8438_v50 = vmul.f32 0.2, %v8324_v47  ;;  %v8572_v53 = vsel %vm1333_vm0, %v20339_v39, 0.0  ;;  %v8469_v62 = vsel %vm8405_vm14, %v8321_v56, %v8437_v12  ;;  %v8503_v12 = vld [vmem:[#allocation2 + $0x80] sm:$0xff] }
 0xf87   : > { %v8467_v60 = vsel %vm8403_vm13, %v8313_v2, %v8435_v42  ;;  %vm8404_vm3 = vcmp.gt.f32.partialorder %v8316_v59, 0.0  ;;  %v8436_v27 = vmul.f32 0.2, %v8316_v59  ;;  %v8571_v15 = vadd.f32 %v8570_v17, %v8569_v40 }
 0xf88   : > { %v20348_v55 = vadd.f32 %v8499_v19, %v8467_v60  ;;  %v8470_v2 = vsel %vm8406_vm15, %v8324_v47, %v8438_v50  ;;  %v20357_v63 = vadd.f32 %v8501_v30, %v8469_v62 }
 0xf89   : > { %v13415_v9 = vpop.f32.mrb[116].mxu0  ;;  %v8468_v43 = vsel %vm8404_vm3, %v8316_v59, %v8436_v27  ;;  %v8573_v46 = vadd.f32 %v8572_v53, %v8571_v15  ;;  %v20365_v47 = vadd.f32 %v8502_v32, %v8470_v2  ;;  %v8504_v27 = vld [vmem:[#allocation2 + $0x88] sm:$0xff]  ;;  %v8361_v2 = vadd.f32 %v20259_v48, %v20275_v31 }
 0xf8a   : > { %v8328_v0 = vpop.f32.mrb[117].mxu0  ;;  %v8337_v34 = vadd.f32 %v13415_v9, %v20259_v48  ;;  %v20355_v11 = vadd.f32 %v8500_v3, %v8468_v43  ;;  %v8345_v9 = vadd.f32 %v20259_v48, %v20263_v41  ;;  %v8353_v41 = vadd.f32 %v20261_v4, %v20259_v48  ;;  %v8508_v31 = vld [vmem:[#allocation2 + $0xa8] sm:$0xff] }
 0xf8b   : > { %v13416_v18 = vpop.f32.mrb[118].mxu0  ;;  %v8329_v61 = vadd.f32 %v20259_v48, %v8328_v0  ;;  %v8574_v0 = vsel %vm1333_vm0, %v20348_v55, 0.0  ;;  %v8578_v19 = vsel %vm1333_vm0, %v20357_v63, 0.0  ;;  %v8580_v53 = vsel %vm1333_vm0, %v20365_v47, 0.0 }
 0xf8c   : > { %v8331_v20 = vpop.f32.mrb[119].mxu0  ;;  %v8340_v6 = vadd.f32 %v13416_v18, %v20259_v48  ;;  %v8575_v26 = vadd.f32 %v8574_v0, %v8573_v46  ;;  %v8576_v52 = vsel %vm1333_vm0, %v20355_v11, 0.0  ;;  %v8441_v42 = vmul.f32 0.2, %v8337_v34  ;;  %v8505_v0 = vld [vmem:[#allocation2 + $0x90] sm:$0xff] }
 0xf8d   : > { %vm8407_vm4 = vcmp.gt.f32.partialorder %v8329_v61, 0.0  ;;  %v8439_v45 = vmul.f32 0.2, %v8329_v61  ;;  %v8332_v56 = vadd.f32 %v20259_v48, %v8331_v20  ;;  %vm8409_vm5 = vcmp.gt.f32.partialorder %v8337_v34, 0.0 }
 0xf8e   : > { %v8348_v18 = vadd.f32 %v20259_v48, %v20270_v58  ;;  %v8577_v20 = vadd.f32 %v8576_v52, %v8575_v26  ;;  %v8442_v16 = vmul.f32 0.2, %v8340_v6  ;;  %vm8410_vm10 = vcmp.gt.f32.partialorder %v8340_v6, 0.0 }
 0xf8f   : > { %v8471_v38 = vsel %vm8407_vm4, %v8329_v61, %v8439_v45  ;;  %vm8408_vm6 = vcmp.gt.f32.partialorder %v8332_v56, 0.0  ;;  %v8440_v60 = vmul.f32 0.2, %v8332_v56  ;;  %v8443_v61 = vmul.f32 0.2, %v8345_v9 }
 0xf90   : > { %v20367_v59 = vadd.f32 %v8503_v12, %v8471_v38  ;;  %v8579_v17 = vadd.f32 %v8578_v19, %v8577_v20  ;;  %v8473_v40 = vsel %vm8409_vm5, %v8337_v34, %v8441_v42  ;;  %vm8411_vm9 = vcmp.gt.f32.partialorder %v8345_v9, 0.0 }
 0xf91   : > { %v8472_v50 = vsel %vm8408_vm6, %v8332_v56, %v8440_v60  ;;  %v8356_v4 = vadd.f32 %v20266_v37, %v20259_v48  ;;  %v8444_v62 = vmul.f32 0.2, %v8348_v18  ;;  %v8474_v3 = vsel %vm8410_vm10, %v8340_v6, %v8442_v16  ;;  %v8506_v56 = vld [vmem:[#allocation2 + $0x98] sm:$0xff]  ;;  %v8507_v37 = vld [vmem:[#allocation2 + $0xa0] sm:$0xff] }
 0xf92   : > { %v8582_v58 = vsel %vm1333_vm0, %v20367_v59, 0.0  ;;  %v20379_v15 = vadd.f32 %v8504_v27, %v8472_v50  ;;  %v8581_v43 = vadd.f32 %v8580_v53, %v8579_v17  ;;  %vm8412_vm12 = vcmp.gt.f32.partialorder %v8348_v18, 0.0  ;;  %v8510_v53 = vld [vmem:[#allocation2 + $0xb8] sm:$0xff] }
 0xf93   : > { %v20383_v34 = vadd.f32 %v8505_v0, %v8473_v40  ;;  %v8445_v30 = vmul.f32 0.2, %v8353_v41  ;;  %v8475_v46 = vsel %vm8411_vm9, %v8345_v9, %v8443_v61  ;;  %vm8413_vm13 = vcmp.gt.f32.partialorder %v8353_v41, 0.0 }
 0xf94   : > { %v8584_v45 = vsel %vm1333_vm0, %v20379_v15, 0.0  ;;  %v8583_v38 = vadd.f32 %v8582_v58, %v8581_v43  ;;  %v20389_v26 = vadd.f32 %v8506_v56, %v8474_v3  ;;  %v8446_v32 = vmul.f32 0.2, %v8356_v4 }
 0xf95   : > { %v8476_v52 = vsel %vm8412_vm12, %v8348_v18, %v8444_v62  ;;  %v8364_v6 = vadd.f32 %v20259_v48, %v20281_v21  ;;  %v20393_v12 = vadd.f32 %v8507_v37, %v8475_v46  ;;  %vm8414_vm14 = vcmp.gt.f32.partialorder %v8356_v4, 0.0  ;;  %v8509_v18 = vld [vmem:[#allocation2 + $0xb0] sm:$0xff]  ;;  %v8512_v37 = vld [vmem:[#allocation2 + $0xc8] sm:$0xff] }
 0xf96   : > { %v8585_v42 = vadd.f32 %v8584_v45, %v8583_v38  ;;  %v8586_v9 = vsel %vm1333_vm0, %v20383_v34, 0.0  ;;  %v8477_v20 = vsel %vm8413_vm13, %v8353_v41, %v8445_v30  ;;  %v8369_v16 = vadd.f32 %v20273_v28, %v20259_v48 }
 0xf97   : > { %v8447_v60 = vmul.f32 0.2, %v8361_v2  ;;  %v20399_v61 = vadd.f32 %v8508_v31, %v8476_v52  ;;  %vm8415_vm15 = vcmp.gt.f32.partialorder %v8361_v2, 0.0  ;;  %v8588_v21 = vsel %vm1333_vm0, %v20389_v26, 0.0 }
 0xf98   : > { %v8587_v19 = vadd.f32 %v8586_v9, %v8585_v42  ;;  %v8478_v17 = vsel %vm8414_vm14, %v8356_v4, %v8446_v32  ;;  %v8372_v40 = vadd.f32 %v20277_v24, %v20259_v48  ;;  %v8448_v50 = vmul.f32 0.2, %v8364_v6  ;;  %v8511_v4 = vld [vmem:[#allocation2 + $0xc0] sm:$0xff] }
 0xf99   : > { %v20405_v41 = vadd.f32 %v8509_v18, %v8477_v20  ;;  %v8590_v28 = vsel %vm1333_vm0, %v20393_v12, 0.0  ;;  %vm8416_vm3 = vcmp.gt.f32.partialorder %v8364_v6, 0.0  ;;  %v8449_v58 = vmul.f32 0.2, %v8369_v16 }
 0xf9a   : > { %v8589_v27 = vadd.f32 %v8588_v21, %v8587_v19  ;;  %v8479_v62 = vsel %vm8415_vm15, %v8361_v2, %v8447_v60  ;;  %v8377_v0 = vadd.f32 %v20259_v48, %v20297_v49  ;;  %v20411_v3 = vadd.f32 %v8510_v53, %v8478_v17  ;;  %v8514_v21 = vld [vmem:[#allocation2 + $0xd8] sm:$0xff] }
 0xf9b   : > { %v8592_v24 = vsel %vm1333_vm0, %v20399_v61, 0.0  ;;  %vm8417_vm4 = vcmp.gt.f32.partialorder %v8369_v16, 0.0  ;;  %v8450_v45 = vmul.f32 0.2, %v8372_v40  ;;  %v8480_v30 = vsel %vm8416_vm3, %v8364_v6, %v8448_v50 }
 0xf9c   : > { %v8591_v43 = vadd.f32 %v8590_v28, %v8589_v27  ;;  %v8380_v46 = vadd.f32 %v20259_v48, %v20309_v14  ;;  %v8594_v2 = vsel %vm1333_vm0, %v20405_v41, 0.0  ;;  %v20419_v56 = vadd.f32 %v8511_v4, %v8479_v62  ;;  %v8513_v14 = vld [vmem:[#allocation2 + $0xd0] sm:$0xff]  ;;  %v8515_v28 = vld [vmem:[#allocation2 + $0xe0] sm:$0xff] }
 0xf9d   : > { %vm8418_vm5 = vcmp.gt.f32.partialorder %v8372_v40, 0.0  ;;  %v8481_v49 = vsel %vm8417_vm4, %v8369_v16, %v8449_v58  ;;  %v8385_v32 = vadd.f32 %v20295_v8, %v20259_v48  ;;  %v8451_v52 = vmul.f32 0.2, %v8377_v0 }
 0xf9e   : > { %v8593_v38 = vadd.f32 %v8592_v24, %v8591_v43  ;;  %v8596_v6 = vsel %vm1333_vm0, %v20411_v3, 0.0  ;;  %v20425_v9 = vadd.f32 %v8512_v37, %v8480_v30  ;;  %vm8419_vm6 = vcmp.gt.f32.partialorder %v8377_v0, 0.0  ;;  %v8516_v24 = vld [vmem:[#allocation2 + $0xe8] sm:$0xff]  ;;  %v8517_v30 = vld [vmem:[#allocation2 + $0xf0] sm:$0xff]  ;;  %v8518_v37 = vld [vmem:[#allocation2 + $0xf8] sm:$0xff] }
 0xf9f   : > { %v8482_v20 = vsel %vm8418_vm5, %v8372_v40, %v8450_v45  ;;  %v8388_v31 = vadd.f32 %v20302_v36, %v20259_v48  ;;  %v8452_v60 = vmul.f32 0.2, %v8380_v46  ;;  %v20429_v16 = vadd.f32 %v8513_v14, %v8481_v49 }
 0xfa0   : > { %v8595_v42 = vadd.f32 %v8594_v2, %v8593_v38  ;;  %v8598_v8 = vsel %vm1333_vm0, %v20419_v56, 0.0  ;;  %vm8420_vm10 = vcmp.gt.f32.partialorder %v8380_v46, 0.0  ;;  %v8453_v18 = vmul.f32 0.2, %v8385_v32 }
 0xfa1   : > { %v8483_v17 = vsel %vm8419_vm6, %v8377_v0, %v8451_v52  ;;  %v20433_v27 = vadd.f32 %v8514_v21, %v8482_v20  ;;  %v8600_v40 = vsel %vm1333_vm0, %v20425_v9, 0.0  ;;  %vm8421_vm9 = vcmp.gt.f32.partialorder %v8385_v32, 0.0 }
 0xfa2   : > { %v8597_v19 = vadd.f32 %v8596_v6, %v8595_v42  ;;  %v8454_v48 = vmul.f32 0.2, %v8388_v31  ;;  %v8484_v36 = vsel %vm8420_vm10, %v8380_v46, %v8452_v60  ;;  %v8602_v58 = vsel %vm1333_vm0, %v20429_v16, 0.0 }
 0xfa3   : > { %v20439_v62 = vadd.f32 %v8515_v28, %v8483_v17  ;;  %vm8422_vm12 = vcmp.gt.f32.partialorder %v8388_v31, 0.0  ;;  %v8485_v43 = vsel %vm8421_vm9, %v8385_v32, %v8453_v18  ;;  %v8604_v4 = vsel %vm1333_vm0, %v20433_v27, 0.0  ;;  %v8707_v28 = vld [vmem:[#allocation18 + $0x4] sm:$0xf] }
 0xfa4   : > { %v8599_v50 = vadd.f32 %v8598_v8, %v8597_v19  ;;  %v20443_v45 = vadd.f32 %v8516_v24, %v8484_v36  ;;  %v8486_v38 = vsel %vm8422_vm12, %v8388_v31, %v8454_v48  ;;  %v20445_v49 = vadd.f32 %v8517_v30, %v8485_v43  ;;  %v14613_v43 = vld [vmem:[%s22173_s5 + $0x180] sm:$0xff]   ;;  %v14614_v24 = vld [vmem:[%s22173_s5 + $0x188] sm:$0xff]  }
 0xfa5   : > { %v8606_v46 = vsel %vm1333_vm0, %v20439_v62, 0.0  ;;  %v20449_v42 = vadd.f32 %v8518_v37, %v8486_v38 }
 0xfa6   : > { %v8601_v53 = vadd.f32 %v8600_v40, %v8599_v50  ;;  %v8608_v32 = vsel %vm1333_vm0, %v20443_v45, 0.0  ;;  %v8610_v14 = vsel %vm1333_vm0, %v20445_v49, 0.0 }
 0xfa7   : > { %v8612_v31 = vsel %vm1333_vm0, %v20449_v42, 0.0 }
 0xfa8   : > { %v8603_v0 = vadd.f32 %v8602_v58, %v8601_v53 }
 0xfaa   : > { %v8605_v2 = vadd.f32 %v8604_v4, %v8603_v0  ;;  %v14616_v0 = vld [vmem:[%s22173_s5 + $0x198] sm:$0xff]   ;;  %v20477_v4 = vld [vmem:[%s22173_s5 + $0x120] sm:$0xff]  }
 0xfac   : > { %v8607_v52 = vadd.f32 %v8606_v46, %v8605_v2 }
 0xfae   : > { %v8609_v6 = vadd.f32 %v8608_v32, %v8607_v52 }
 0xfb0   : > { %v8611_v20 = vadd.f32 %v8610_v14, %v8609_v6 }
 0xfb2   : > { %v8613_v60 = vadd.f32 %v8612_v31, %v8611_v20 }
 0xfb4   : > { %v8614_v19 = vrot.slane %v8613_v60, 4 }
 0xfb6   : > { %v8615_v8 = vadd.f32 %v8614_v19, %v8613_v60 }
 0xfb8   : > { %v8616_v21 = vrot.slane %v8615_v8, 2 }
 0xfba   : > { %v8617_v18 = vadd.f32 %v8616_v21, %v8615_v8 }
 0xfbc   : > { %v8618_v17 = vrot.slane %v8617_v18, 1 }
 0xfbe   : > { %v8619_v50 = vadd.f32 %v8618_v17, %v8617_v18 }
 0xfc0   : > { %v8620_v40 = vmul.f32 0.00390625, %v8619_v50 }
 0xfc2   : > { %13446 = vmatmul.mubr.msk.f32.vlgmr.msra.gmra.mrb[52].mxu1 %vm1333_vm0, %v8620_v40 }
 0xfc3   : > { %13450 = vmatprep.mubr.msk.f32.mxu1 %vm14997_vm7, %v22430_v5  ;;  %13449 = vmatpush3.msk.msra.mxu1 %vm3679_vm8, %v8707_v28  ;;  %v14615_v5 = vld [vmem:[%s22173_s5 + $0x190] sm:$0xff]  }
 0xfc4   : > { %13453 = vmatprep.subr.bf16.mxu1 %v14613_v43 }
0x1095   : > { %v8699_v48 = vpop.f32.mrb[52].mxu1 }
0x1096   : > { %vm8703_vm13 = vcmp.gt.f32.partialorder %v8699_v48, 0.0  ;;  %v8704_v36 = vmul.f32 0.2, %v8699_v48  ;;  %v13447_v53 = vpop.f32.mrb[53].mxu1 }
0x1098   : > { %v8705_v58 = vsel %vm8703_vm13, %v8699_v48, %v8704_v36 }
0x1099   : > { %13451 = vmatmul.mubr.msk.f32.vlgmr.msra.gmra.mrb[54].mxu1 %vm3675_vm11, %v8705_v58 }
0x109a   : > { %13454 = vmatpush3.bf16.msra.mxu1 %v14613_v43 }
0x109b   : > { %13455 = vmatprep.subr.bf16.mxu1 %v14614_v24 }
0x109e   : > { %13456 = vmatpush3.bf16.msra.mxu1 %v14614_v24 }
0x109f   : > { %13457 = vmatprep.subr.bf16.mxu1 %v14615_v5 }
0x10a2   : > { %13458 = vmatpush3.bf16.msra.mxu1 %v14615_v5  ;;  %v20582_v5 = vld [vmem:[#allocation5 + $0x118] sm:$0xff] }
0x10a3   : > { %13459 = vmatprep.subr.bf16.mxu1 %v14616_v0  ;;  %22454 = vst [vmem:[#allocation70_spill] sm:$0xff] %v20582_v5 }
0x10a6   : > { %13460 = vmatpush3.bf16.msra.mxu1 %v14616_v0 }
0x10a7   : > { %13493 = vmatprep.subr.bf16.mxu1 %v20477_v4 }
0x116c   : > { %v8780_v30 = vpop.f32.mrb[54].mxu1 }
0x116d   : > { %v12002_v38 = vmul.f32 -1.442695, %v8780_v30  ;;  %v13452_v2 = vpop.f32.mrb[55].mxu1  ;;  %v22455_v30 = vld [vmem:[#allocation31_spill] sm:$0xff] }
0x116e   : > { %v22456_v2 = vld [vmem:[#allocation34_spill] sm:$0xff] }
0x116f   : > { %14661 = vpow2.f32 %v12002_v38 }
0x1179   : > { %v14662_v46 = vpop.eup %14661 }
0x117a   : > { %v8787_v37 = vadd.f32 1.0, %v14662_v46 }
0x117c   : > { %14663 = vrcp.f32 %v8787_v37 }
0x1186   : > { %v14664_v52 = vpop.eup %14663 }
0x1187   : > { %v8793_v32 = vrot.slane %v14664_v52, %v22431_v57  ;;  %v20590_v52 = vld [vmem:[#allocation5 + $0x110] sm:$0xff] }
0x1189   : > { %v8794_v6 = vmul.f32 %v8793_v32, %v20279_v54  ;;  %v8795_v14 = vmul.f32 %v8793_v32, %v20285_v29  ;;  %v8796_v20 = vmul.f32 %v8793_v32, %v20283_v7  ;;  %v8797_v31 = vmul.f32 %v8793_v32, %v20291_v33 }
0x118a   : > { %v8798_v60 = vmul.f32 %v8793_v32, %v20306_v25  ;;  %v8799_v19 = vmul.f32 %v8793_v32, %v20315_v1  ;;  %v8800_v8 = vmul.f32 %v8793_v32, %v20313_v35  ;;  %v8801_v21 = vmul.f32 %v8793_v32, %v20323_v23 }
0x118b   : > { %v8802_v18 = vmul.f32 %v8793_v32, %v20326_v44  ;;  %v8803_v57 = vmul.f32 %v8793_v32, %v20337_v51  ;;  %v8804_v54 = vmul.f32 %v8793_v32, %v20335_v10  ;;  %v8805_v29 = vmul.f32 %v8793_v32, %v20339_v39  ;;  %8826 = vst.msk [vmem:[#allocation5 + $0x10] sm:$0xff] %vm1333_vm0, %v8794_v6  ;;  %v22457_v6 = vld [vmem:[#allocation37_spill] sm:$0xff] }
0x118c   : > { %8827 = vst.msk [vmem:[#allocation5 + $0x18] sm:$0xff] %vm1333_vm0, %v8795_v14  ;;  %8828 = vst.msk [vmem:[#allocation5 + $0x20] sm:$0xff] %vm1333_vm0, %v8796_v20  ;;  %v8806_v7 = vmul.f32 %v8793_v32, %v20348_v55  ;;  %v8807_v33 = vmul.f32 %v8793_v32, %v20355_v11  ;;  %v8808_v25 = vmul.f32 %v8793_v32, %v20357_v63  ;;  %v20521_v63 = vld [vmem:[#allocation5 + $0x8] sm:$0xff] }
0x118d   : > { %8829 = vst.msk [vmem:[#allocation5 + $0x28] sm:$0xff] %vm1333_vm0, %v8797_v31  ;;  %v8809_v35 = vmul.f32 %v8793_v32, %v20365_v47  ;;  %8830 = vst.msk [vmem:[#allocation5 + $0x30] sm:$0xff] %vm1333_vm0, %v8798_v60  ;;  %v8810_v1 = vmul.f32 %v8793_v32, %v20367_v59  ;;  %v8811_v23 = vmul.f32 %v8793_v32, %v20379_v15 }
0x118e   : > { %8831 = vst.msk [vmem:[#allocation5 + $0x38] sm:$0xff] %vm1333_vm0, %v8799_v19  ;;  %8832 = vst.msk [vmem:[#allocation5 + $0x40] sm:$0xff] %vm1333_vm0, %v8800_v8  ;;  %v8812_v44 = vmul.f32 %v8793_v32, %v20383_v34  ;;  %v8813_v10 = vmul.f32 %v8793_v32, %v20389_v26  ;;  %v8814_v51 = vmul.f32 %v8793_v32, %v20393_v12 }
0x118f   : > { %8833 = vst.msk [vmem:[#allocation5 + $0x48] sm:$0xff] %vm1333_vm0, %v8801_v21  ;;  %8834 = vst.msk [vmem:[#allocation5 + $0x50] sm:$0xff] %vm1333_vm0, %v8802_v18  ;;  %v8815_v39 = vmul.f32 %v8793_v32, %v20399_v61  ;;  %v8816_v55 = vmul.f32 %v8793_v32, %v20405_v41  ;;  %v8817_v11 = vmul.f32 %v8793_v32, %v20411_v3  ;;  %v21847_v3 = vrot.slane %v20521_v63, 7 }
0x1190   : > { %8835 = vst.msk [vmem:[#allocation5 + $0x58] sm:$0xff] %vm1333_vm0, %v8803_v57  ;;  %8836 = vst.msk [vmem:[#allocation5 + $0x60] sm:$0xff] %vm1333_vm0, %v8804_v54  ;;  %v8818_v47 = vmul.f32 %v8793_v32, %v20419_v56  ;;  %v8819_v59 = vmul.f32 %v8793_v32, %v20425_v9  ;;  %v8820_v15 = vmul.f32 %v8793_v32, %v20429_v16 }
0x1191   : > { %8837 = vst.msk [vmem:[#allocation5 + $0x68] sm:$0xff] %vm1333_vm0, %v8805_v29  ;;  %8838 = vst.msk [vmem:[#allocation5 + $0x70] sm:$0xff] %vm1333_vm0, %v8806_v7  ;;  %v8821_v34 = vmul.f32 %v8793_v32, %v20433_v27  ;;  %v8822_v26 = vmul.f32 %v8793_v32, %v20439_v62  ;;  %v8823_v12 = vmul.f32 %v8793_v32, %v20443_v45  ;;  %v21848_v29 = vrot.slane %v20582_v5, 7 }
0x1192   : > { %8839 = vst.msk [vmem:[#allocation5 + $0x78] sm:$0xff] %vm1333_vm0, %v8807_v33  ;;  %8840 = vst.msk [vmem:[#allocation5 + $0x80] sm:$0xff] %vm1333_vm0, %v8808_v25  ;;  %v8824_v61 = vmul.f32 %v8793_v32, %v20445_v49  ;;  %v8825_v41 = vmul.f32 %v8793_v32, %v20449_v42  ;;  %v20548_v56 = vld [vmem:[#allocation5 + $0x10] sm:$0xff]  ;;  %v14618_v33 = vld [vmem:[%s22173_s5 + $0x128] sm:$0xff]  }
0x1193   : > { %8841 = vst.msk [vmem:[#allocation5 + $0x88] sm:$0xff] %vm1333_vm0, %v8809_v35  ;;  %22452 = vst [vmem:[#allocation101_spill] sm:$0xff] %v20521_v63  ;;  %v20550_v9 = vld [vmem:[#allocation5 + $0x18] sm:$0xff]  ;;  %v20552_v16 = vld [vmem:[#allocation5 + $0x20] sm:$0xff]  ;;  %v8898_v27 = vrot.slane %v20548_v56, 7 }
0x1194   : > { %8842 = vst.msk [vmem:[#allocation5 + $0x90] sm:$0xff] %vm1333_vm0, %v8810_v1  ;;  %8843 = vst.msk [vmem:[#allocation5 + $0x98] sm:$0xff] %vm1333_vm0, %v8811_v23  ;;  %v8899_v62 = vrot.slane %v20550_v9, 7  ;;  %v20556_v45 = vld [vmem:[#allocation5 + $0x28] sm:$0xff]  ;;  %v8900_v49 = vrot.slane %v20552_v16, 7  ;;  %v20559_v42 = vld [vmem:[#allocation5 + $0x30] sm:$0xff]  ;;  %v20571_v36 = vpack.c.bf16 %v20550_v9, %v20548_v56 }
0x1195   : > { %8844 = vst.msk [vmem:[#allocation5 + $0xa0] sm:$0xff] %vm1333_vm0, %v8812_v44  ;;  %8845 = vst.msk [vmem:[#allocation5 + $0xa8] sm:$0xff] %vm1333_vm0, %v8813_v10  ;;  %v8901_v17 = vrot.slane %v20556_v45, 7  ;;  %v20562_v50 = vld [vmem:[#allocation5 + $0x38] sm:$0xff]  ;;  %v8902_v40 = vrot.slane %v20559_v42, 7  ;;  %v20565_v28 = vld [vmem:[#allocation5 + $0x40] sm:$0xff]  ;;  %v8965_v53 = vsel %vm1842_vm1, %v21847_v3, %v8898_v27 }
0x1196   : > { %8846 = vst.msk [vmem:[#allocation5 + $0xb0] sm:$0xff] %vm1333_vm0, %v8814_v51  ;;  %8847 = vst.msk [vmem:[#allocation5 + $0xb8] sm:$0xff] %vm1333_vm0, %v8815_v39  ;;  %v20567_v48 = vld [vmem:[#allocation5 + $0x48] sm:$0xff]  ;;  %v8963_v58 = vsel %vm1842_vm1, %v8899_v62, %v8900_v49  ;;  %v8903_v43 = vrot.slane %v20562_v50, 7  ;;  %v20580_v24 = vld [vmem:[#allocation5 + $0x50] sm:$0xff]  ;;  %v8964_v0 = vsel %vm1842_vm1, %v8898_v27, %v8899_v62  ;;  %v8970_v38 = vmul.f32 %v22455_v30, %v8965_v53 }
0x1197   : > { %8848 = vst.msk [vmem:[#allocation5 + $0xc0] sm:$0xff] %vm1333_vm0, %v8816_v55  ;;  %8849 = vst.msk [vmem:[#allocation5 + $0xc8] sm:$0xff] %vm1333_vm0, %v8817_v11  ;;  %v8972_v46 = vmul.f32 %v22456_v2, %v8963_v58  ;;  %v8961_v37 = vsel %vm1842_vm1, %v8901_v17, %v8902_v40  ;;  %v8962_v32 = vsel %vm1842_vm1, %v8900_v49, %v8901_v17  ;;  %v8904_v20 = vrot.slane %v20565_v28, 7  ;;  %v20597_v60 = vld [vmem:[#allocation5 + $0x58] sm:$0xff]  ;;  %v20599_v19 = vld [vmem:[#allocation5 + $0x60] sm:$0xff] }
0x1198   : > { %8850 = vst.msk [vmem:[#allocation5 + $0xd0] sm:$0xff] %vm1333_vm0, %v8818_v47  ;;  %8851 = vst.msk [vmem:[#allocation5 + $0xd8] sm:$0xff] %vm1333_vm0, %v8819_v59  ;;  %v8974_v14 = vmul.f32 %v22457_v6, %v8961_v37  ;;  %v8905_v31 = vrot.slane %v20567_v48, 7  ;;  %v20601_v8 = vpack.c.bf16 %v8964_v0, %v8970_v38  ;;  %v8906_v18 = vrot.slane %v20580_v24, 7  ;;  %v20606_v57 = vld [vmem:[#allocation5 + $0x68] sm:$0xff]  ;;  %v20608_v54 = vld [vmem:[#allocation5 + $0x70] sm:$0xff] }
0x1199   : > { %8852 = vst.msk [vmem:[#allocation5 + $0xe0] sm:$0xff] %vm1333_vm0, %v8820_v15  ;;  %8853 = vst.msk [vmem:[#allocation5 + $0xe8] sm:$0xff] %vm1333_vm0, %v8821_v34  ;;  %v20603_v21 = vpack.c.bf16 %v8962_v32, %v8972_v46  ;;  %v8960_v7 = vsel %vm1842_vm1, %v8902_v40, %v8903_v43  ;;  %v20616_v25 = vld [vmem:[#allocation5 + $0x78] sm:$0xff]  ;;  %v20618_v35 = vld [vmem:[#allocation5 + $0x80] sm:$0xff]  ;;  %v21849_v1 = vrot.slane %v20590_v52, 7  ;;  %v8959_v44 = vsel %vm1842_vm1, %v8903_v43, %v8904_v20 }
0x119a   : > { %8854 = vst.msk [vmem:[#allocation5 + $0xf0] sm:$0xff] %vm1333_vm0, %v8822_v26  ;;  %8855 = vst.msk [vmem:[#allocation5 + $0xf8] sm:$0xff] %vm1333_vm0, %v8823_v12  ;;  %13461 = vmatprep.mubr.msk.bf16.mxu1 %vm1333_vm0, %v20601_v8  ;;  %v20623_v23 = vpack.c.bf16 %v8960_v7, %v8974_v14  ;;  %v8907_v10 = vrot.slane %v20597_v60, 7  ;;  %v8908_v51 = vrot.slane %v20599_v19, 7  ;;  %v20629_v39 = vld [vmem:[#allocation5 + $0x88] sm:$0xff]  ;;  %v8957_v55 = vsel %vm1842_vm1, %v8905_v31, %v8906_v18  ;;  %v14619_v49 = vld [vmem:[%s22173_s5 + $0x130] sm:$0xff]  }
0x119b   : > { %8856 = vst.msk [vmem:[#allocation5 + $0x100] sm:$0xff] %vm1333_vm0, %v8824_v61  ;;  %8857 = vst.msk [vmem:[#allocation5 + $0x108] sm:$0xff] %vm1333_vm0, %v8825_v41  ;;  %13462 = vmatmul.mubr.msk.bf16.vlgmr.msra.gmra.mrb[56].mxu1 %vm1333_vm0, %v20603_v21  ;;  %v8909_v11 = vrot.slane %v20606_v57, 7  ;;  %v8910_v47 = vrot.slane %v20608_v54, 7  ;;  %v20637_v59 = vld [vmem:[#allocation5 + $0x90] sm:$0xff]  ;;  %v8911_v15 = vrot.slane %v20616_v25, 7  ;;  %v8958_v46 = vsel %vm1842_vm1, %v8904_v20, %v8905_v31 }
0x119c   : > { %22453 = vst [vmem:[#allocation55_spill] sm:$0xff] %v20571_v36  ;;  %22458 = vst [vmem:[#allocation87_spill] sm:$0xff] %v20601_v8  ;;  %13494 = vmatpush3.bf16.msra.mxu1 %v20477_v4  ;;  %13465 = vmatprep.mubr.msk.bf16.mxu1 %vm1333_vm0, %v20623_v23  ;;  %v8912_v34 = vrot.slane %v20618_v35, 7  ;;  %v20644_v26 = vld [vmem:[#allocation5 + $0x98] sm:$0xff]  ;;  %v20646_v12 = vld [vmem:[#allocation5 + $0xa0] sm:$0xff]  ;;  %v20656_v4 = vsel %vm1842_vm1, %v21849_v1, %v21848_v29  ;;  %v8913_v62 = vrot.slane %v20629_v39, 7 }
0x119d   : > { %22459 = vst [vmem:[#allocation89_spill] sm:$0xff] %v20603_v21  ;;  %22460 = vst [vmem:[#allocation75_spill] sm:$0xff] %v20623_v23  ;;  %v20648_v61 = vld [vmem:[#allocation5] sm:$0xff]  ;;  %v22462_v41 = vld [vmem:[#allocation40_spill] sm:$0xff]  ;;  %13495 = vmatprep.subr.bf16.mxu1 %v14618_v33  ;;  %v8955_v38 = vsel %vm1842_vm1, %v8907_v10, %v8908_v51  ;;  %v8914_v2 = vrot.slane %v20637_v59, 7  ;;  %v8953_v37 = vsel %vm1842_vm1, %v8909_v11, %v8910_v47  ;;  %v8915_v32 = vrot.slane %v20644_v26, 7 }
0x119e   : > { %22461 = vst [vmem:[#allocation90_spill] sm:$0xff] %v20648_v61  ;;  %v8976_v27 = vmul.f32 %v22462_v41, %v8959_v44  ;;  %v20663_v17 = vld [vmem:[#allocation5 + $0xa8] sm:$0xff]  ;;  %v20665_v40 = vld [vmem:[#allocation5 + $0xb0] sm:$0xff]  ;;  %v22463_v0 = vld [vmem:[#allocation42_spill] sm:$0xff]  ;;  %v8916_v6 = vrot.slane %v20646_v12, 7  ;;  %v8956_v7 = vsel %vm1842_vm1, %v8906_v18, %v8907_v10  ;;  %v8951_v44 = vsel %vm1842_vm1, %v8911_v15, %v8912_v34 }
0x119f   : > { %v8978_v30 = vmul.f32 %v22463_v0, %v8957_v55  ;;  %v20680_v14 = vld [vmem:[#allocation5 + $0xb8] sm:$0xff]  ;;  %v8917_v55 = vrot.slane %v20663_v17, 7  ;;  %v8918_v20 = vrot.slane %v20665_v40, 7  ;;  %v20688_v31 = vld [vmem:[#allocation5 + $0xc0] sm:$0xff]  ;;  %v20690_v41 = vld [vmem:[#allocation5 + $0xc8] sm:$0xff]  ;;  %v8949_v53 = vsel %vm1842_vm1, %v8913_v62, %v8914_v2 }
0x11a0   : > { %13496 = vmatpush3.bf16.msra.mxu1 %v14618_v33  ;;  %v20692_v0 = vpack.c.bf16 %v8958_v46, %v8976_v27  ;;  %v22465_v3 = vld [vmem:[#allocation44_spill] sm:$0xff]  ;;  %v8947_v18 = vsel %vm1842_vm1, %v8915_v32, %v8916_v6  ;;  %v14620_v10 = vld [vmem:[%s22173_s5 + $0x138] sm:$0xff]   ;;  %v8919_v46 = vrot.slane %v20680_v14, 7  ;;  %v8920_v21 = vrot.slane %v20688_v31, 7 }
0x11a1   : > { %v8980_v29 = vmul.f32 %v22465_v3, %v8955_v38  ;;  %13497 = vmatprep.subr.bf16.mxu1 %v14619_v49  ;;  %v20699_v33 = vld [vmem:[#allocation5 + $0xd0] sm:$0xff]  ;;  %v20704_v58 = vpack.c.bf16 %v8956_v7, %v8978_v30  ;;  %v8945_v3 = vsel %vm1842_vm1, %v8917_v55, %v8918_v20  ;;  %v20710_v38 = vld [vmem:[#allocation5 + $0xd8] sm:$0xff]  ;;  %v8921_v30 = vrot.slane %v20690_v41, 7  ;;  %v20718_v7 = vld [vmem:[#allocation5 + $0xe0] sm:$0xff] }
0x11a2   : > { %22464 = vst [vmem:[#allocation103_spill] sm:$0xff] %v20692_v0  ;;  %v22467_v43 = vld [vmem:[#allocation48_spill] sm:$0xff]  ;;  %v22468_v36 = vld [vmem:[#allocation50_spill] sm:$0xff]  ;;  %v22470_v1 = vld [vmem:[#allocation77_spill] sm:$0xff]  ;;  %v8943_v61 = vsel %vm1842_vm1, %v8919_v46, %v8920_v21 }
0x11a3   : > { %22466 = vst [vmem:[#allocation91_spill] sm:$0xff] %v20704_v58  ;;  %v8982_v27 = vmul.f32 %v22467_v43, %v8953_v37  ;;  %13466 = vmatmul.mubr.msk.bf16.gmra.mrb[60].mxu1 %vm1333_vm0, %v20692_v0  ;;  %v8984_v23 = vmul.f32 %v22468_v36, %v8951_v44  ;;  %v8954_v43 = vsel %vm1842_vm1, %v8908_v51, %v8909_v11  ;;  %v22469_v37 = vld [vmem:[#allocation52_spill] sm:$0xff]  ;;  %v8922_v0 = vrot.slane %v20699_v33, 7  ;;  %v20736_v51 = vld [vmem:[%s22173_s5 + $0x1e0] sm:$0xff]  }
0x11a4   : > { %13469 = vmatprep.mubr.msk.bf16.mxu1 %vm1333_vm0, %v20704_v58  ;;  %v8986_v8 = vmul.f32 %v22469_v37, %v8949_v53  ;;  %v8988_v63 = vmul.f32 %v22470_v1, %v8947_v18  ;;  %13498 = vmatpush3.bf16.msra.mxu1 %v14619_v49  ;;  %v8952_v36 = vsel %vm1842_vm1, %v8910_v47, %v8911_v15  ;;  %v22471_v44 = vld [vmem:[#allocation72_spill] sm:$0xff]  ;;  %v8923_v58 = vrot.slane %v20710_v38, 7 }
0x11a5   : > { %v8990_v5 = vmul.f32 %v22471_v44, %v8945_v3  ;;  %13499 = vmatprep.subr.bf16.mxu1 %v14620_v10  ;;  %v20738_v1 = vpack.c.bf16 %v8954_v43, %v8980_v29  ;;  %v20740_v11 = vpack.c.bf16 %v8952_v36, %v8982_v27  ;;  %v8950_v47 = vsel %vm1842_vm1, %v8912_v34, %v8913_v62  ;;  %v20745_v49 = vld [vmem:[#allocation5 + $0x108] sm:$0xff]  ;;  %v20764_v36 = vld [vmem:[#allocation5 + $0xf0] sm:$0xff] }
0x11a6   : > { %v21867_v15 = vrot.slane %v20718_v7, 7  ;;  %v20747_v53 = vpack.c.bf16 %v8950_v47, %v8984_v23  ;;  %v8948_v18 = vsel %vm1842_vm1, %v8914_v2, %v8915_v32  ;;  %v8946_v3 = vsel %vm1842_vm1, %v8916_v6, %v8917_v55  ;;  %v20755_v27 = vld [vmem:[#allocation5 + $0xe8] sm:$0xff]  ;;  %v22472_v23 = vld [vmem:[#allocation66_spill] sm:$0xff]  ;;  %v22473_v55 = vld [vmem:[#allocation57_spill] sm:$0xff] }
0x11a7   : > { %v8941_v29 = vsel %vm1842_vm1, %v8921_v30, %v8922_v0  ;;  %v20757_v43 = vpack.c.bf16 %v8948_v18, %v8986_v8  ;;  %v20759_v34 = vpack.c.bf16 %v8946_v3, %v8988_v63  ;;  %v8944_v62 = vsel %vm1842_vm1, %v8918_v20, %v8919_v46  ;;  %v20766_v2 = vld [vmem:[#allocation5 + $0xf8] sm:$0xff]  ;;  %v22475_v47 = vld [vmem:[#allocation76_spill] sm:$0xff] }
0x11a8   : > { %v8992_v37 = vmul.f32 %v22472_v23, %v8943_v61  ;;  %13500 = vmatpush3.bf16.msra.mxu1 %v14620_v10  ;;  %v20768_v32 = vpack.c.bf16 %v8944_v62, %v8990_v5  ;;  %v8942_v6 = vsel %vm1842_vm1, %v8920_v21, %v8921_v30  ;;  %v8940_v8 = vsel %vm1842_vm1, %v8922_v0, %v8923_v58  ;;  %v22477_v62 = vld [vmem:[#allocation61_spill] sm:$0xff] }
0x11a9   : > { %v21866_v63 = vrot.slane %v20745_v49, 7  ;;  %13533 = vmatprep.subr.bf16.mxu1 %v20736_v51  ;;  %v8994_v20 = vmul.f32 %v22473_v55, %v8941_v29  ;;  %v8939_v5 = vsel %vm1842_vm1, %v8923_v58, %v21867_v15  ;;  %v20784_v10 = vpack.c.bf16 %v20556_v45, %v20552_v16  ;;  %v20818_v55 = vld [vmem:[#allocation5 + $0x100] sm:$0xff] }
0x11aa   : > { %v22474_v46 = vrot.slane %v20590_v52, 7  ;;  %v20798_v58 = vpack.c.bf16 %v20562_v50, %v20559_v42  ;;  %v20802_v44 = vpack.c.bf16 %v8942_v6, %v8992_v37  ;;  %v20809_v3 = vpack.c.bf16 %v20567_v48, %v20565_v28 }
0x11ab   : > { %13470 = vmatmul.mubr.msk.bf16.gmra.mrb[64].mxu1 %vm1333_vm0, %v20738_v1  ;;  %v20813_v29 = vpack.c.bf16 %v20597_v60, %v20580_v24  ;;  %v20816_v23 = vmul.f32 %v22477_v62, %v8939_v5  ;;  %v20822_v37 = vpack.c.bf16 %v20606_v57, %v20599_v19  ;;  %v20826_v6 = vpack.c.bf16 %v20616_v25, %v20608_v54 }
0x11ac   : > { %v8933_v30 = vsel %vm1842_vm1, %v21866_v63, %v22474_v46  ;;  %13473 = vmatprep.mubr.msk.bf16.mxu1 %vm1333_vm0, %v20740_v11  ;;  %v20830_v46 = vpack.c.bf16 %v20629_v39, %v20618_v35  ;;  %v20836_v5 = vpack.c.bf16 %v20644_v26, %v20637_v59  ;;  %v20844_v62 = vpack.c.bf16 %v20680_v14, %v20665_v40 }
0x11ad   : > { %v20805_v18 = vmul.f32 %v22475_v47, %v8933_v30  ;;  %22476 = vst [vmem:[#allocation94_spill] sm:$0xff] %v20813_v29  ;;  %22478 = vst [vmem:[#allocation35_spill] sm:$0xff] %v20822_v37  ;;  %v20840_v47 = vpack.c.bf16 %v20663_v17, %v20646_v12  ;;  %v20848_v63 = vpack.c.bf16 %v20690_v41, %v20688_v31  ;;  %v22493_v37 = vrot.slane %v20548_v56, 1 }
0x11ae   : > { %22479 = vst [vmem:[#allocation62_spill] sm:$0xff] %v20826_v6  ;;  %22480 = vst [vmem:[#allocation80_spill] sm:$0xff] %v20830_v46  ;;  %v20852_v0 = vpack.c.bf16 %v20710_v38, %v20699_v33  ;;  %v20856_v30 = vpack.c.bf16 %v20755_v27, %v20718_v7  ;;  %v20860_v15 = vpack.c.bf16 %v20766_v2, %v20764_v36  ;;  %v10446_v46 = vrot.slane %v20559_v42, 1 }
0x11af   : > { %22481 = vst [vmem:[#allocation97_spill] sm:$0xff] %v20836_v5  ;;  %22482 = vst [vmem:[#allocation29_spill] sm:$0xff] %v20840_v47  ;;  %v20864_v61 = vpack.c.bf16 %v20745_v49, %v20818_v55  ;;  %v10445_v47 = vrot.slane %v20556_v45, 1  ;;  %v10448_v6 = vrot.slane %v20565_v28, 1  ;;  %v10449_v42 = vrot.slane %v20567_v48, 1 }
0x11b0   : > { %22483 = vst [vmem:[#allocation32_spill] sm:$0xff] %v20844_v62  ;;  %22484 = vst [vmem:[#allocation49_spill] sm:$0xff] %v20848_v63  ;;  %v22489_v63 = vrot.slane %v20552_v16, 1  ;;  %v22490_v62 = vrot.slane %v20550_v9, 1  ;;  %v22494_v16 = vld [vmem:[#allocation36_spill] sm:$0xff] }
0x11b1   : > { %22485 = vst [vmem:[#allocation59_spill] sm:$0xff] %v20852_v0  ;;  %22486 = vst [vmem:[#allocation79_spill] sm:$0xff] %v20856_v30  ;;  %v22491_v30 = vld [vmem:[#allocation33_spill] sm:$0xff]  ;;  %v10505_v9 = vsel %vm2119_vm2, %v10445_v47, %v10446_v46 }
0x11b2   : > { %22487 = vst [vmem:[#allocation67_spill] sm:$0xff] %v20860_v15  ;;  %22488 = vst [vmem:[#allocation84_spill] sm:$0xff] %v20864_v61  ;;  %v10507_v0 = vsel %vm2119_vm2, %v22490_v62, %v22489_v63  ;;  %v10447_v15 = vrot.slane %v20562_v50, 1  ;;  %v8928_v61 = vrot.slane %v20818_v55, 7  ;;  %v22492_v21 = vmov %v22490_v62 }
0x11b3   : > { %v10515_v5 = vmul.f32 %v22491_v30, %v10507_v0  ;;  %v10508_v29 = vsel %vm2119_vm2, %v22493_v37, %v22492_v21  ;;  %v10506_v45 = vsel %vm2119_vm2, %v22489_v63, %v10445_v47  ;;  %13474 = vmatmul.mubr.msk.bf16.gmra.mrb[68].mxu1 %vm1333_vm0, %v20747_v53  ;;  %v20892_v50 = vpack.c.bf16 %v8940_v8, %v8994_v20  ;;  %v22495_v37 = vld [vmem:[#allocation38_spill] sm:$0xff] }
0x11b4   : > { %v10503_v21 = vsel %vm2119_vm2, %v10447_v15, %v10448_v6  ;;  %13477 = vmatprep.mubr.msk.bf16.mxu1 %vm1333_vm0, %v20757_v43  ;;  %v10517_v0 = vmul.f32 %v22494_v16, %v10505_v9  ;;  %v10504_v48 = vsel %vm2119_vm2, %v10446_v46, %v10447_v15  ;;  %v10450_v8 = vrot.slane %v20580_v24, 1 }
0x11b5   : > { %v20894_v28 = vpack.c.bf16 %v10515_v5, %v10508_v29  ;;  %v10519_v30 = vmul.f32 %v22495_v37, %v10503_v21  ;;  %v22496_v20 = vrot.slane %v20764_v36, 7  ;;  %v22497_v29 = vrot.slane %v20755_v27, 7  ;;  %v22498_v21 = vld [vmem:[#allocation41_spill] sm:$0xff] }
0x11b6   : > { %v10502_v47 = vsel %vm2119_vm2, %v10448_v6, %v10449_v42  ;;  %v10451_v62 = vrot.slane %v20597_v60, 1  ;;  %v10452_v63 = vrot.slane %v20599_v19, 1  ;;  %v20919_v15 = vpack.c.bf16 %v10517_v0, %v10506_v45  ;;  %v22499_v19 = vld [vmem:[#allocation43_spill] sm:$0xff] }
0x11b7   : > { %v20913_v5 = vsel %vm1842_vm1, %v22497_v29, %v22496_v20  ;;  %v20921_v46 = vpack.c.bf16 %v10519_v30, %v10504_v48  ;;  %v10501_v24 = vsel %vm2119_vm2, %v10449_v42, %v10450_v8  ;;  %v10453_v9 = vrot.slane %v20606_v57, 1 }
0x11b8   : > { %v10521_v16 = vmul.f32 %v22498_v21, %v10501_v24  ;;  %v10499_v37 = vsel %vm2119_vm2, %v10451_v62, %v10452_v63  ;;  %v10500_v6 = vsel %vm2119_vm2, %v10450_v8, %v10451_v62  ;;  %v10454_v60 = vrot.slane %v20608_v54, 1  ;;  %v22500_v54 = vld [vmem:[#allocation47_spill] sm:$0xff] }
0x11b9   : > { %v10523_v45 = vmul.f32 %v22499_v19, %v10499_v37  ;;  %v10498_v0 = vsel %vm2119_vm2, %v10452_v63, %v10453_v9  ;;  %v10455_v48 = vrot.slane %v20616_v25, 1  ;;  %v10456_v42 = vrot.slane %v20618_v35, 1 }
0x11ba   : > { %v20937_v57 = vpack.c.bf16 %v10521_v16, %v10502_v47  ;;  %v10497_v30 = vsel %vm2119_vm2, %v10453_v9, %v10454_v60  ;;  %v10457_v20 = vrot.slane %v20629_v39, 1  ;;  %v10458_v8 = vrot.slane %v20637_v59, 1  ;;  %v22501_v9 = vld [vmem:[#allocation51_spill] sm:$0xff] }
0x11bb   : > { %v20943_v29 = vpack.c.bf16 %v10523_v45, %v10500_v6  ;;  %v10525_v62 = vmul.f32 %v22500_v54, %v10497_v30  ;;  %v10495_v63 = vsel %vm2119_vm2, %v10455_v48, %v10456_v42  ;;  %v10496_v25 = vsel %vm2119_vm2, %v10454_v60, %v10455_v48  ;;  %13478 = vmatmul.mubr.msk.bf16.gmra.mrb[72].mxu1 %vm1333_vm0, %v20759_v34  ;;  %v22503_v30 = vld [vmem:[#allocation74_spill] sm:$0xff] }
0x11bc   : > { %v10527_v35 = vmul.f32 %v22425_v13, %v10495_v63  ;;  %v10493_v39 = vsel %vm2119_vm2, %v10457_v20, %v10458_v8  ;;  %v10494_v59 = vsel %vm2119_vm2, %v10456_v42, %v10457_v20  ;;  %v10459_v47 = vrot.slane %v20644_v26, 1  ;;  %13481 = vmatprep.mubr.msk.bf16.mxu1 %vm1333_vm0, %v20768_v32  ;;  %v22504_v63 = vld [vmem:[#allocation78_spill] sm:$0xff] }
0x11bd   : > { %v20960_v24 = vpack.c.bf16 %v10525_v62, %v10498_v0  ;;  %v10529_v21 = vmul.f32 %v22501_v9, %v10493_v39  ;;  %v10460_v16 = vrot.slane %v20646_v12, 1  ;;  %v10461_v37 = vrot.slane %v20663_v17, 1  ;;  %v22502_v17 = vld [vmem:[#allocation45_spill] sm:$0xff] }
0x11be   : > { %v20965_v13 = vpack.c.bf16 %v10527_v35, %v10496_v25  ;;  %v10492_v6 = vsel %vm2119_vm2, %v10458_v8, %v10459_v47  ;;  %v10462_v60 = vrot.slane %v20665_v40, 1  ;;  %v10463_v26 = vrot.slane %v20680_v14, 1  ;;  %v22505_v9 = vld [vmem:[#allocation81_spill] sm:$0xff] }
0x11bf   : > { %v20971_v19 = vpack.c.bf16 %v10529_v21, %v10494_v59  ;;  %v10491_v45 = vsel %vm2119_vm2, %v10459_v47, %v10460_v16  ;;  %v10490_v0 = vsel %vm2119_vm2, %v10460_v16, %v10461_v37  ;;  %v10464_v12 = vrot.slane %v20688_v31, 1 }
0x11c0   : > { %v10531_v48 = vmul.f32 %v22502_v17, %v10491_v45  ;;  %v10489_v42 = vsel %vm2119_vm2, %v10461_v37, %v10462_v60  ;;  %v10488_v40 = vsel %vm2119_vm2, %v10462_v60, %v10463_v26  ;;  %v10465_v14 = vrot.slane %v20690_v41, 1 }
0x11c1   : > { %v10533_v20 = vmul.f32 %v22503_v30, %v10489_v42  ;;  %v10487_v8 = vsel %vm2119_vm2, %v10463_v26, %v10464_v12  ;;  %v10466_v54 = vrot.slane %v20699_v33, 1  ;;  %v10467_v62 = vrot.slane %v20710_v38, 1  ;;  %v22508_v30 = vld [vmem:[#allocation71_spill] sm:$0xff] }
0x11c2   : > { %v20989_v31 = vpack.c.bf16 %v10531_v48, %v10492_v6  ;;  %v10535_v25 = vmul.f32 %v22504_v63, %v10487_v8  ;;  %v10486_v35 = vsel %vm2119_vm2, %v10464_v12, %v10465_v14  ;;  %v10468_v39 = vrot.slane %v20718_v7, 1  ;;  %v22506_v6 = vld [vmem:[#allocation82_spill] sm:$0xff]  ;;  %v22507_v12 = vld [vmem:[#allocation64_spill] sm:$0xff] }
0x11c3   : > { %v20995_v59 = vpack.c.bf16 %v10533_v20, %v10490_v0  ;;  %v10485_v41 = vsel %vm2119_vm2, %v10465_v14, %v10466_v54  ;;  %v10484_v47 = vsel %vm2119_vm2, %v10466_v54, %v10467_v62  ;;  %v10469_v33 = vrot.slane %v20755_v27, 1  ;;  %13482 = vmatmul.mubr.msk.bf16.gmra.mrb[76].mxu1 %vm1333_vm0, %v20802_v44 }
0x11c4   : > { %v21004_v38 = vpack.c.bf16 %v10535_v25, %v10488_v40  ;;  %v10537_v21 = vmul.f32 %v22505_v9, %v10485_v41  ;;  %v10483_v16 = vsel %vm2119_vm2, %v10467_v62, %v10468_v39  ;;  %v10470_v37 = vrot.slane %v20764_v36, 1  ;;  %13485 = vmatprep.mubr.msk.bf16.mxu1 %vm1333_vm0, %v20892_v50  ;;  %v22509_v62 = vld [vmem:[#allocation56_spill] sm:$0xff] }
0x11c5   : > { %v10539_v60 = vmul.f32 %v22506_v6, %v10483_v16  ;;  %v10482_v26 = vsel %vm2119_vm2, %v10468_v39, %v10469_v33  ;;  %v10471_v45 = vrot.slane %v20766_v2, 1  ;;  %v10472_v0 = vrot.slane %v20818_v55, 1  ;;  %v22513_v9 = vld [vmem:[#allocation60_spill] sm:$0xff]  ;;  %v14624_v55 = vld [vmem:[%s22173_s5 + $0x1f8] sm:$0xff]  }
0x11c6   : > { %v8998_v17 = vmul.f32 %v22507_v12, %v20913_v5  ;;  %v21019_v48 = vpack.c.bf16 %v10537_v21, %v10486_v35  ;;  %v10481_v42 = vsel %vm2119_vm2, %v10469_v33, %v10470_v37  ;;  %v10473_v40 = vrot.slane %v20745_v49, 1 }
0x11c7   : > { %v21024_v14 = vpack.c.bf16 %v10539_v60, %v10484_v47  ;;  %v10541_v20 = vmul.f32 %v22508_v30, %v10481_v42  ;;  %v10479_v8 = vsel %vm2119_vm2, %v10471_v45, %v10472_v0  ;;  %v10480_v54 = vsel %vm2119_vm2, %v10470_v37, %v10471_v45  ;;  %v22521_v30 = vld [vmem:[#allocation46_spill] sm:$0xff] }
0x11c8   : > { %v10543_v63 = vmul.f32 %v22509_v62, %v10479_v8  ;;  %v22510_v5 = vrot.slane %v20590_v52, 1  ;;  %v10478_v35 = vsel %vm2119_vm2, %v10472_v0, %v10473_v40  ;;  %v22511_v39 = vrot.slane %v20755_v27, 7  ;;  %v22516_v27 = vld [vmem:[#allocation90_spill] sm:$0xff]  ;;  %v22522_v8 = vld [vmem:[#allocation63_spill] sm:$0xff] }
0x11c9   : > { %v22512_v41 = vrot.slane %v20718_v7, 7  ;;  %v21044_v33 = vpack.c.bf16 %v10541_v20, %v10482_v26  ;;  %v22514_v37 = vrot.slane %v20766_v2, 7  ;;  %v22515_v6 = vrot.slane %v20764_v36, 7  ;;  %v22518_v7 = vld [vmem:[#allocation70_spill] sm:$0xff] }
0x11ca   : > { %v10477_v25 = vsel %vm2119_vm2, %v10473_v40, %v22510_v5  ;;  %v22517_v45 = vrot.slane %v22516_v27, 7  ;;  %v22519_v0 = vrot.slane %v22518_v7, 7  ;;  %v21062_v12 = vpack.c.bf16 %v10543_v63, %v10480_v54  ;;  %v22523_v54 = vld [vmem:[#allocation101_spill] sm:$0xff] }
0x11cb   : > { %v8938_v47 = vsel %vm1842_vm1, %v22512_v41, %v22511_v39  ;;  %v10545_v21 = vmul.f32 %v22513_v9, %v10477_v25  ;;  %v8936_v60 = vsel %vm1842_vm1, %v22515_v6, %v22514_v37  ;;  %v22524_v62 = vrot.slane %v22523_v54, 7  ;;  %v14622_v41 = vld [vmem:[%s22173_s5 + $0x1e8] sm:$0xff]  }
0x11cc   : > { %v21048_v16 = vpack.c.bf16 %v8938_v47, %v20816_v23  ;;  %v8967_v26 = vsel %vm1842_vm1, %v22519_v0, %v22517_v45  ;;  %v21064_v42 = vpack.c.bf16 %v8936_v60, %v8998_v17  ;;  %v22520_v23 = vmov %v22514_v37  ;;  %v22527_v47 = vld [vmem:[#allocation87_spill] sm:$0xff]  ;;  %v14627_v60 = vld [vmem:[%s22173_s5 + $0x150] sm:$0xff]  }
0x11cd   : > { %v8935_v36 = vsel %vm1842_vm1, %v22520_v23, %v8928_v61  ;;  %v21072_v40 = vpack.c.bf16 %v10545_v21, %v10478_v35  ;;  %v8968_v20 = vmul.f32 %v22521_v30, %v8967_v26  ;;  %v22525_v63 = vmov %v22517_v45  ;;  %v22529_v9 = vld [vmem:[#allocation75_spill] sm:$0xff]  ;;  %v14628_v45 = vld [vmem:[%s22173_s5 + $0x158] sm:$0xff]   ;;  %v22540_v23 = vld [vmem:[#allocation32_spill] sm:$0xff] }
0x11ce   : > { %13486 = vmatmul.mubr.msk.bf16.gmra.mrb[80].mxu1 %vm1333_vm0, %v21048_v16  ;;  %v9000_v17 = vmul.f32 %v22522_v8, %v8935_v36  ;;  %v8966_v2 = vsel %vm1842_vm1, %v22525_v63, %v22524_v62  ;;  %v22526_v5 = vrot.slane %v20745_v49, 7  ;;  %v22528_v49 = vld [vmem:[#allocation89_spill] sm:$0xff]  ;;  %v22530_v21 = vld [vmem:[#allocation103_spill] sm:$0xff] }
0x11cf   : > { %13489 = vmatprep.mubr.msk.bf16.mxu1 %vm1333_vm0, %v21064_v42  ;;  %v9004_v35 = vpack.c.bf16 %v8966_v2, %v8968_v20  ;;  %v22531_v37 = vld [vmem:[#allocation91_spill] sm:$0xff]  ;;  %v22538_v26 = vld [vmem:[#allocation97_spill] sm:$0xff] }
0x11d0   : > { %v8934_v25 = vsel %vm1842_vm1, %v8928_v61, %v22526_v5  ;;  %v14623_v61 = vld [vmem:[%s22173_s5 + $0x1f0] sm:$0xff]   ;;  %v14626_v6 = vld [vmem:[%s22173_s5 + $0x148] sm:$0xff]   ;;  %v14629_v0 = vld [vmem:[%s22173_s5 + $0x1a0] sm:$0xff]  }
0x11d1   : > { %v9020_v39 = vpack.c.bf16 %v8934_v25, %v9000_v17  ;;  %v22541_v36 = vld [vmem:[#allocation49_spill] sm:$0xff]  ;;  %v22542_v30 = vld [vmem:[#allocation59_spill] sm:$0xff]  ;;  %v22545_v5 = vld [vmem:[#allocation84_spill] sm:$0xff] }
0x11d2   : > { %v22543_v20 = vld [vmem:[#allocation79_spill] sm:$0xff]  ;;  %v14635_v62 = vld [vmem:[%s22173_s5 + $0x210] sm:$0xff]   ;;  %v14636_v63 = vld [vmem:[%s22173_s5 + $0x218] sm:$0xff]  }
0x11d3   : > { %v22544_v8 = vld [vmem:[#allocation67_spill] sm:$0xff] }
0x11d4   : > { %v14634_v17 = vld [vmem:[%s22173_s5 + $0x208] sm:$0xff]   ;;  %v14637_v2 = vld [vmem:[%s22173_s5 + $0x160] sm:$0xff]  }
0x11d5   : > { %v14638_v25 = vld [vmem:[%s22173_s5 + $0x168] sm:$0xff]  }
0x11d6   : > { %13490 = vmatmul.mubr.msk.bf16.gmra.mrb[84].mxu1 %vm1333_vm0, %v9020_v39 }
0x11d7   : > { %13501 = vmatprep.mubr.msk.bf16.mxu1 %vm1333_vm0, %v9004_v35  ;;  %v14639_v35 = vld [vmem:[%s22173_s5 + $0x170] sm:$0xff]  }
0x11de   : > { %13502 = vmatmul.mubr.msk.bf16.vlgmr.msra.gmra.mrb[56].mxu1 %vm1333_vm0, %v22527_v47 }
0x11df   : > { %13534 = vmatpush3.bf16.msra.mxu1 %v20736_v51  ;;  %13505 = vmatprep.mubr.msk.bf16.mxu1 %vm1333_vm0, %v22528_v49  ;;  %v14625_v51 = vld [vmem:[%s22173_s5 + $0x140] sm:$0xff]  }
0x11e0   : > { %13535 = vmatprep.subr.bf16.mxu1 %v14622_v41 }
0x11e3   : > { %13536 = vmatpush3.bf16.msra.mxu1 %v14622_v41  ;;  %v22546_v41 = vrot.slane %v20548_v56, 1  ;;  %v14642_v56 = vld [vmem:[%s22173_s5 + $0x1c8] sm:$0xff]  }
0x11e4   : > { %13537 = vmatprep.subr.bf16.mxu1 %v14623_v61 }
0x11e6   : > { %13506 = vmatmul.mubr.msk.bf16.gmra.mrb[60].mxu1 %vm1333_vm0, %v22529_v9 }
0x11e7   : > { %13509 = vmatprep.mubr.msk.bf16.mxu1 %vm1333_vm0, %v22530_v21  ;;  %13538 = vmatpush3.bf16.msra.mxu1 %v14623_v61 }
0x11e8   : > { %13539 = vmatprep.subr.bf16.mxu1 %v14624_v55 }
0x11eb   : > { %13540 = vmatpush3.bf16.msra.mxu1 %v14624_v55  ;;  %v9707_v55 = vpack.c.bf16 %v22518_v7, %v20590_v52 }
0x11ec   : > { %13573 = vmatprep.subr.bf16.mxu1 %v14625_v51 }
0x11ee   : > { %13510 = vmatmul.mubr.msk.bf16.gmra.mrb[64].mxu1 %vm1333_vm0, %v22531_v37 }
0x11ef   : > { %13513 = vmatprep.mubr.msk.bf16.mxu1 %vm1333_vm0, %v20738_v1 }
0x11f6   : > { %13514 = vmatmul.mubr.msk.bf16.gmra.mrb[68].mxu1 %vm1333_vm0, %v20740_v11 }
0x11f7   : > { %13517 = vmatprep.mubr.msk.bf16.mxu1 %vm1333_vm0, %v20747_v53 }
0x11fe   : > { %13518 = vmatmul.mubr.msk.bf16.gmra.mrb[72].mxu1 %vm1333_vm0, %v20757_v43 }
0x11ff   : > { %13521 = vmatprep.mubr.msk.bf16.mxu1 %vm1333_vm0, %v20759_v34 }
0x1206   : > { %13522 = vmatmul.mubr.msk.bf16.gmra.mrb[76].mxu1 %vm1333_vm0, %v20768_v32 }
0x1207   : > { %13525 = vmatprep.mubr.msk.bf16.mxu1 %vm1333_vm0, %v20802_v44 }
0x120e   : > { %13526 = vmatmul.mubr.msk.bf16.gmra.mrb[80].mxu1 %vm1333_vm0, %v20892_v50 }
0x120f   : > { %13529 = vmatprep.mubr.msk.bf16.mxu1 %vm1333_vm0, %v21048_v16 }
0x1216   : > { %13530 = vmatmul.mubr.msk.bf16.gmra.mrb[84].mxu1 %vm1333_vm0, %v21064_v42 }
0x1217   : > { %13541 = vmatprep.mubr.msk.bf16.mxu1 %vm1333_vm0, %v22528_v49  ;;  %v22547_v49 = vld [vmem:[#allocation30_spill] sm:$0xff] }
0x121e   : > { %13542 = vmatmul.mubr.msk.bf16.vlgmr.msra.gmra.mrb[56].mxu1 %vm1333_vm0, %v22529_v9 }
0x121f   : > { %13574 = vmatpush3.bf16.msra.mxu1 %v14625_v51  ;;  %13545 = vmatprep.mubr.msk.bf16.mxu1 %vm1333_vm0, %v22530_v21  ;;  %v14643_v21 = vld [vmem:[%s22173_s5 + $0x1d0] sm:$0xff]   ;;  %v14644_v51 = vld [vmem:[%s22173_s5 + $0x1d8] sm:$0xff]  }
0x1220   : > { %13575 = vmatprep.subr.bf16.mxu1 %v14626_v6 }
0x1223   : > { %13576 = vmatpush3.bf16.msra.mxu1 %v14626_v6  ;;  %v14646_v6 = vld [vmem:[%s22173_s5 + $0x228] sm:$0xff]  }
0x1224   : > { %13577 = vmatprep.subr.bf16.mxu1 %v14627_v60 }
0x1226   : > { %13546 = vmatmul.mubr.msk.bf16.gmra.mrb[60].mxu1 %vm1333_vm0, %v22531_v37  ;;  %v14645_v37 = vld [vmem:[%s22173_s5 + $0x220] sm:$0xff]  }
0x1227   : > { %13549 = vmatprep.mubr.msk.bf16.mxu1 %vm1333_vm0, %v20738_v1  ;;  %13578 = vmatpush3.bf16.msra.mxu1 %v14627_v60  ;;  %v9690_v1 = vpack.c.bf16 %v22523_v54, %v22516_v27  ;;  %v14647_v60 = vld [vmem:[%s22173_s5 + $0x230] sm:$0xff]  }
0x1228   : > { %13579 = vmatprep.subr.bf16.mxu1 %v14628_v45 }
0x122b   : > { %13580 = vmatpush3.bf16.msra.mxu1 %v14628_v45  ;;  %v11339_v45 = vld [vmem:[#allocation2 + $0x18] sm:$0xff] }
0x122c   : > { %13613 = vmatprep.subr.bf16.mxu1 %v14629_v0 }
0x122e   : > { %13550 = vmatmul.mubr.msk.bf16.gmra.mrb[64].mxu1 %vm1333_vm0, %v20740_v11  ;;  %v22532_v11 = vpack.c.bf16 %v20656_v4, %v20805_v18  ;;  %v14631_v4 = vld [vmem:[%s22173_s5 + $0x1b0] sm:$0xff]   ;;  %v22535_v18 = vld [vmem:[#allocation35_spill] sm:$0xff] }
0x122f   : > { %13553 = vmatprep.mubr.msk.bf16.mxu1 %vm1333_vm0, %v20747_v53  ;;  %v14630_v53 = vld [vmem:[%s22173_s5 + $0x1a8] sm:$0xff]  }
0x1236   : > { %13554 = vmatmul.mubr.msk.bf16.gmra.mrb[68].mxu1 %vm1333_vm0, %v20757_v43  ;;  %v22533_v43 = vld [vmem:[#allocation55_spill] sm:$0xff] }
0x1237   : > { %13557 = vmatprep.mubr.msk.bf16.mxu1 %vm1333_vm0, %v20759_v34  ;;  %v14632_v34 = vld [vmem:[%s22173_s5 + $0x1b8] sm:$0xff]  }
0x123e   : > { %13558 = vmatmul.mubr.msk.bf16.gmra.mrb[72].mxu1 %vm1333_vm0, %v20768_v32  ;;  %v14633_v32 = vld [vmem:[%s22173_s5 + $0x200] sm:$0xff]  }
0x123f   : > { %13561 = vmatprep.mubr.msk.bf16.mxu1 %vm1333_vm0, %v20802_v44  ;;  %v22534_v44 = vld [vmem:[#allocation94_spill] sm:$0xff] }
0x1246   : > { %13562 = vmatmul.mubr.msk.bf16.gmra.mrb[76].mxu1 %vm1333_vm0, %v20892_v50  ;;  %v22536_v50 = vld [vmem:[#allocation62_spill] sm:$0xff] }
0x1247   : > { %13565 = vmatprep.mubr.msk.bf16.mxu1 %vm1333_vm0, %v21048_v16  ;;  %v22537_v16 = vld [vmem:[#allocation80_spill] sm:$0xff] }
0x124e   : > { %13566 = vmatmul.mubr.msk.bf16.gmra.mrb[80].mxu1 %vm1333_vm0, %v21064_v42  ;;  %v22539_v42 = vld [vmem:[#allocation29_spill] sm:$0xff] }
0x124f   : > { %13569 = vmatprep.mubr.msk.bf16.mxu1 %vm1333_vm0, %v9020_v39  ;;  %v10440_v39 = vrot.slane %v22516_v27, 1 }
0x1256   : > { %13570 = vmatmul.mubr.msk.bf16.gmra.mrb[84].mxu1 %vm1333_vm0, %v22532_v11  ;;  %v11337_v11 = vld [vmem:[#allocation2 + $0x8] sm:$0xff] }
0x1257   : > { %13581 = vmatprep.mubr.msk.bf16.mxu1 %vm1333_vm0, %v9690_v1 }
0x125e   : > { %13582 = vmatmul.mubr.msk.bf16.vlgmr.msra.gmra.mrb[56].mxu1 %vm1333_vm0, %v22533_v43 }
0x125f   : > { %13614 = vmatpush3.bf16.msra.mxu1 %v14629_v0  ;;  %13585 = vmatprep.mubr.msk.bf16.mxu1 %vm1333_vm0, %v20784_v10 }
0x1260   : > { %13615 = vmatprep.subr.bf16.mxu1 %v14630_v53 }
0x1263   : > { %13616 = vmatpush3.bf16.msra.mxu1 %v14630_v53 }
0x1264   : > { %13617 = vmatprep.subr.bf16.mxu1 %v14631_v4 }
0x1266   : > { %13586 = vmatmul.mubr.msk.bf16.gmra.mrb[60].mxu1 %vm1333_vm0, %v20798_v58 }
0x1267   : > { %13589 = vmatprep.mubr.msk.bf16.mxu1 %vm1333_vm0, %v20809_v3  ;;  %13618 = vmatpush3.bf16.msra.mxu1 %v14631_v4 }
0x1268   : > { %13619 = vmatprep.subr.bf16.mxu1 %v14632_v34 }
0x126b   : > { %13620 = vmatpush3.bf16.msra.mxu1 %v14632_v34 }
0x126c   : > { %13653 = vmatprep.subr.bf16.mxu1 %v14633_v32 }
0x126e   : > { %13590 = vmatmul.mubr.msk.bf16.gmra.mrb[64].mxu1 %vm1333_vm0, %v22534_v44 }
0x126f   : > { %13593 = vmatprep.mubr.msk.bf16.mxu1 %vm1333_vm0, %v22535_v18 }
0x1276   : > { %13594 = vmatmul.mubr.msk.bf16.gmra.mrb[68].mxu1 %vm1333_vm0, %v22536_v50 }
0x1277   : > { %13597 = vmatprep.mubr.msk.bf16.mxu1 %vm1333_vm0, %v22537_v16 }
0x127e   : > { %13598 = vmatmul.mubr.msk.bf16.gmra.mrb[72].mxu1 %vm1333_vm0, %v22538_v26 }
0x127f   : > { %13601 = vmatprep.mubr.msk.bf16.mxu1 %vm1333_vm0, %v22539_v42 }
0x1286   : > { %13602 = vmatmul.mubr.msk.bf16.gmra.mrb[76].mxu1 %vm1333_vm0, %v22540_v23 }
0x1287   : > { %13605 = vmatprep.mubr.msk.bf16.mxu1 %vm1333_vm0, %v22541_v36 }
0x128e   : > { %13606 = vmatmul.mubr.msk.bf16.gmra.mrb[80].mxu1 %vm1333_vm0, %v22542_v30 }
0x128f   : > { %13609 = vmatprep.mubr.msk.bf16.mxu1 %vm1333_vm0, %v22543_v20 }
0x1296   : > { %13610 = vmatmul.mubr.msk.bf16.gmra.mrb[84].mxu1 %vm1333_vm0, %v22544_v8 }
0x1297   : > { %13621 = vmatprep.mubr.msk.bf16.mxu1 %vm1333_vm0, %v22533_v43 }
0x129e   : > { %13622 = vmatmul.mubr.msk.bf16.vlgmr.msra.gmra.mrb[56].mxu1 %vm1333_vm0, %v20784_v10 }
0x129f   : > { %13654 = vmatpush3.bf16.msra.mxu1 %v14633_v32  ;;  %13625 = vmatprep.mubr.msk.bf16.mxu1 %vm1333_vm0, %v20798_v58  ;;  %v11342_v32 = vld [vmem:[#allocation2 + $0x30] sm:$0xff] }
0x12a0   : > { %13655 = vmatprep.subr.bf16.mxu1 %v14634_v17 }
0x12a3   : > { %13656 = vmatpush3.bf16.msra.mxu1 %v14634_v17 }
0x12a4   : > { %13657 = vmatprep.subr.bf16.mxu1 %v14635_v62 }
0x12a6   : > { %13626 = vmatmul.mubr.msk.bf16.gmra.mrb[60].mxu1 %vm1333_vm0, %v20809_v3 }
0x12a7   : > { %13629 = vmatprep.mubr.msk.bf16.mxu1 %vm1333_vm0, %v22534_v44  ;;  %13658 = vmatpush3.bf16.msra.mxu1 %v14635_v62 }
0x12a8   : > { %13659 = vmatprep.subr.bf16.mxu1 %v14636_v63 }
0x12ab   : > { %13660 = vmatpush3.bf16.msra.mxu1 %v14636_v63 }
0x12ac   : > { %13693 = vmatprep.subr.bf16.mxu1 %v14637_v2 }
0x12ae   : > { %13630 = vmatmul.mubr.msk.bf16.gmra.mrb[64].mxu1 %vm1333_vm0, %v22535_v18 }
0x12af   : > { %13633 = vmatprep.mubr.msk.bf16.mxu1 %vm1333_vm0, %v22536_v50 }
0x12b6   : > { %13634 = vmatmul.mubr.msk.bf16.gmra.mrb[68].mxu1 %vm1333_vm0, %v22537_v16 }
0x12b7   : > { %13637 = vmatprep.mubr.msk.bf16.mxu1 %vm1333_vm0, %v22538_v26 }
0x12be   : > { %13638 = vmatmul.mubr.msk.bf16.gmra.mrb[72].mxu1 %vm1333_vm0, %v22539_v42 }
0x12bf   : > { %13641 = vmatprep.mubr.msk.bf16.mxu1 %vm1333_vm0, %v22540_v23 }
0x12c6   : > { %13642 = vmatmul.mubr.msk.bf16.gmra.mrb[76].mxu1 %vm1333_vm0, %v22541_v36 }
0x12c7   : > { %13645 = vmatprep.mubr.msk.bf16.mxu1 %vm1333_vm0, %v22542_v30 }
0x12ce   : > { %13646 = vmatmul.mubr.msk.bf16.gmra.mrb[80].mxu1 %vm1333_vm0, %v22543_v20 }
0x12cf   : > { %13649 = vmatprep.mubr.msk.bf16.mxu1 %vm1333_vm0, %v22544_v8 }
0x12d6   : > { %13650 = vmatmul.mubr.msk.bf16.gmra.mrb[84].mxu1 %vm1333_vm0, %v22545_v5 }
0x12d7   : > { %13661 = vmatprep.mubr.msk.bf16.mxu1 %vm1333_vm0, %v20784_v10  ;;  %v14640_v10 = vld [vmem:[%s22173_s5 + $0x178] sm:$0xff]  }
0x12de   : > { %13662 = vmatmul.mubr.msk.bf16.vlgmr.msra.gmra.mrb[56].mxu1 %vm1333_vm0, %v20798_v58  ;;  %v14641_v58 = vld [vmem:[%s22173_s5 + $0x1c0] sm:$0xff]  }
0x12df   : > { %13694 = vmatpush3.bf16.msra.mxu1 %v14637_v2  ;;  %13665 = vmatprep.mubr.msk.bf16.mxu1 %vm1333_vm0, %v20809_v3  ;;  %v10441_v3 = vrot.slane %v22523_v54, 1 }
0x12e0   : > { %13695 = vmatprep.subr.bf16.mxu1 %v14638_v25 }
0x12e1   : > { %v10509_v47 = vsel %vm2119_vm2, %v10441_v3, %v22546_v41  ;;  %v10510_v54 = vsel %vm2119_vm2, %v10440_v39, %v10441_v3 }
0x12e2   : > { %v10513_v61 = vmul.f32 %v22547_v49, %v10509_v47  ;;  %v11347_v47 = vld [vmem:[#allocation2 + $0x58] sm:$0xff] }
0x12e3   : > { %13696 = vmatpush3.bf16.msra.mxu1 %v14638_v25 }
0x12e4   : > { %13697 = vmatprep.subr.bf16.mxu1 %v14639_v35  ;;  %v10548_v9 = vpack.c.bf16 %v10513_v61, %v10510_v54 }
0x12e6   : > { %13666 = vmatmul.mubr.msk.bf16.gmra.mrb[60].mxu1 %vm1333_vm0, %v22534_v44 }
0x12e7   : > { %13669 = vmatprep.mubr.msk.bf16.mxu1 %vm1333_vm0, %v22535_v18  ;;  %13698 = vmatpush3.bf16.msra.mxu1 %v14639_v35 }
0x12e8   : > { %13699 = vmatprep.subr.bf16.mxu1 %v14640_v10 }
0x12eb   : > { %13700 = vmatpush3.bf16.msra.mxu1 %v14640_v10 }
0x12ec   : > { %13733 = vmatprep.subr.bf16.mxu1 %v14641_v58 }
0x12ee   : > { %13670 = vmatmul.mubr.msk.bf16.gmra.mrb[64].mxu1 %vm1333_vm0, %v22536_v50 }
0x12ef   : > { %13673 = vmatprep.mubr.msk.bf16.mxu1 %vm1333_vm0, %v22537_v16  ;;  %v11340_v16 = vld [vmem:[#allocation2 + $0x20] sm:$0xff] }
0x12f6   : > { %13674 = vmatmul.mubr.msk.bf16.gmra.mrb[68].mxu1 %vm1333_vm0, %v22538_v26 }
0x12f7   : > { %13677 = vmatprep.mubr.msk.bf16.mxu1 %vm1333_vm0, %v22539_v42 }
0x12fe   : > { %13678 = vmatmul.mubr.msk.bf16.gmra.mrb[72].mxu1 %vm1333_vm0, %v22540_v23 }
0x12ff   : > { %13681 = vmatprep.mubr.msk.bf16.mxu1 %vm1333_vm0, %v22541_v36  ;;  %v11343_v36 = vld [vmem:[#allocation2 + $0x38] sm:$0xff] }
0x1306   : > { %13682 = vmatmul.mubr.msk.bf16.gmra.mrb[76].mxu1 %vm1333_vm0, %v22542_v30 }
0x1307   : > { %13685 = vmatprep.mubr.msk.bf16.mxu1 %vm1333_vm0, %v22543_v20 }
0x130e   : > { %13686 = vmatmul.mubr.msk.bf16.gmra.mrb[80].mxu1 %vm1333_vm0, %v22544_v8  ;;  %v11341_v8 = vld [vmem:[#allocation2 + $0x28] sm:$0xff] }
0x130f   : > { %13689 = vmatprep.mubr.msk.bf16.mxu1 %vm1333_vm0, %v22545_v5  ;;  %v11346_v5 = vld [vmem:[#allocation2 + $0x50] sm:$0xff] }
0x1316   : > { %13690 = vmatmul.mubr.msk.bf16.gmra.mrb[84].mxu1 %vm1333_vm0, %v9707_v55  ;;  %v11345_v55 = vld [vmem:[#allocation2 + $0x48] sm:$0xff] }
0x1317   : > { %13701 = vmatprep.mubr.msk.bf16.mxu1 %vm1333_vm0, %v10548_v9 }
0x131e   : > { %13702 = vmatmul.mubr.msk.bf16.vlgmr.msra.gmra.mrb[56].mxu1 %vm1333_vm0, %v20894_v28 }
0x131f   : > { %13734 = vmatpush3.bf16.msra.mxu1 %v14641_v58  ;;  %13705 = vmatprep.mubr.msk.bf16.mxu1 %vm1333_vm0, %v20919_v15  ;;  %v11344_v58 = vld [vmem:[#allocation2 + $0x40] sm:$0xff] }
0x1320   : > { %13735 = vmatprep.subr.bf16.mxu1 %v14642_v56 }
0x1323   : > { %13736 = vmatpush3.bf16.msra.mxu1 %v14642_v56 }
0x1324   : > { %13737 = vmatprep.subr.bf16.mxu1 %v14643_v21 }
0x1326   : > { %13706 = vmatmul.mubr.msk.bf16.gmra.mrb[60].mxu1 %vm1333_vm0, %v20921_v46 }
0x1327   : > { %13709 = vmatprep.mubr.msk.bf16.mxu1 %vm1333_vm0, %v20937_v57  ;;  %13738 = vmatpush3.bf16.msra.mxu1 %v14643_v21 }
0x1328   : > { %13739 = vmatprep.subr.bf16.mxu1 %v14644_v51 }
0x132b   : > { %13740 = vmatpush3.bf16.msra.mxu1 %v14644_v51  ;;  %v11350_v51 = vld [vmem:[#allocation2 + $0x70] sm:$0xff] }
0x132c   : > { %13773 = vmatprep.subr.bf16.mxu1 %v14645_v37 }
0x132e   : > { %13710 = vmatmul.mubr.msk.bf16.gmra.mrb[64].mxu1 %vm1333_vm0, %v20943_v29 }
0x132f   : > { %13713 = vmatprep.mubr.msk.bf16.mxu1 %vm1333_vm0, %v20960_v24 }
0x1336   : > { %13714 = vmatmul.mubr.msk.bf16.gmra.mrb[68].mxu1 %vm1333_vm0, %v20965_v13 }
0x1337   : > { %13717 = vmatprep.mubr.msk.bf16.mxu1 %vm1333_vm0, %v20971_v19 }
0x133e   : > { %13718 = vmatmul.mubr.msk.bf16.gmra.mrb[72].mxu1 %vm1333_vm0, %v20989_v31 }
0x133f   : > { %13721 = vmatprep.mubr.msk.bf16.mxu1 %vm1333_vm0, %v20995_v59 }
0x1346   : > { %13722 = vmatmul.mubr.msk.bf16.gmra.mrb[76].mxu1 %vm1333_vm0, %v21004_v38 }
0x1347   : > { %13725 = vmatprep.mubr.msk.bf16.mxu1 %vm1333_vm0, %v21019_v48 }
0x134e   : > { %13726 = vmatmul.mubr.msk.bf16.gmra.mrb[80].mxu1 %vm1333_vm0, %v21024_v14 }
0x134f   : > { %13729 = vmatprep.mubr.msk.bf16.mxu1 %vm1333_vm0, %v21044_v33 }
0x1356   : > { %13730 = vmatmul.mubr.msk.bf16.gmra.mrb[84].mxu1 %vm1333_vm0, %v21062_v12 }
0x1357   : > { %13741 = vmatprep.mubr.msk.bf16.mxu1 %vm1333_vm0, %v20894_v28  ;;  %v14648_v28 = vld [vmem:[%s22173_s5 + $0x238] sm:$0xff]  }
0x135e   : > { %13742 = vmatmul.mubr.msk.bf16.vlgmr.msra.gmra.mrb[56].mxu1 %vm1333_vm0, %v20919_v15 }
0x135f   : > { %13774 = vmatpush3.bf16.msra.mxu1 %v14645_v37  ;;  %13745 = vmatprep.mubr.msk.bf16.mxu1 %vm1333_vm0, %v20921_v46 }
0x1360   : > { %13775 = vmatprep.subr.bf16.mxu1 %v14646_v6 }
0x1363   : > { %13776 = vmatpush3.bf16.msra.mxu1 %v14646_v6 }
0x1364   : > { %13777 = vmatprep.subr.bf16.mxu1 %v14647_v60 }
0x1366   : > { %13746 = vmatmul.mubr.msk.bf16.gmra.mrb[60].mxu1 %vm1333_vm0, %v20937_v57 }
0x1367   : > { %13749 = vmatprep.mubr.msk.bf16.mxu1 %vm1333_vm0, %v20943_v29  ;;  %13778 = vmatpush3.bf16.msra.mxu1 %v14647_v60 }
0x1368   : > { %13779 = vmatprep.subr.bf16.mxu1 %v14648_v28 }
0x136b   : > { %13780 = vmatpush3.bf16.msra.mxu1 %v14648_v28  ;;  %v11348_v28 = vld [vmem:[#allocation2 + $0x60] sm:$0xff] }
0x136e   : > { %13750 = vmatmul.mubr.msk.bf16.gmra.mrb[64].mxu1 %vm1333_vm0, %v20960_v24 }
0x136f   : > { %13753 = vmatprep.mubr.msk.bf16.mxu1 %vm1333_vm0, %v20965_v13 }
0x1376   : > { %13754 = vmatmul.mubr.msk.bf16.gmra.mrb[68].mxu1 %vm1333_vm0, %v20971_v19 }
0x1377   : > { %13757 = vmatprep.mubr.msk.bf16.mxu1 %vm1333_vm0, %v20989_v31 }
0x137e   : > { %13758 = vmatmul.mubr.msk.bf16.gmra.mrb[72].mxu1 %vm1333_vm0, %v20995_v59 }
0x137f   : > { %13761 = vmatprep.mubr.msk.bf16.mxu1 %vm1333_vm0, %v21004_v38 }
0x1386   : > { %13762 = vmatmul.mubr.msk.bf16.gmra.mrb[76].mxu1 %vm1333_vm0, %v21019_v48 }
0x1387   : > { %13765 = vmatprep.mubr.msk.bf16.mxu1 %vm1333_vm0, %v21024_v14 }
0x138e   : > { %13766 = vmatmul.mubr.msk.bf16.gmra.mrb[80].mxu1 %vm1333_vm0, %v21044_v33 }
0x138f   : > { %13769 = vmatprep.mubr.msk.bf16.mxu1 %vm1333_vm0, %v21062_v12 }
0x1396   : > { %13770 = vmatmul.mubr.msk.bf16.gmra.mrb[84].mxu1 %vm1333_vm0, %v21072_v40 }
0x1397   : > { %13781 = vmatprep.mubr.msk.bf16.mxu1 %vm1333_vm0, %v20919_v15  ;;  %v10475_v15 = vrot.slane %v22518_v7, 1 }
0x139e   : > { %13782 = vmatmul.mubr.msk.bf16.vlgmr.msra.gmra.mrb[56].mxu1 %vm1333_vm0, %v20921_v46  ;;  %v10511_v46 = vsel %vm2119_vm2, %v10475_v15, %v10440_v39 }
0x139f   : > { %13785 = vmatprep.mubr.msk.bf16.mxu1 %vm1333_vm0, %v20937_v57  ;;  %v22548_v57 = vld [vmem:[#allocation65_spill] sm:$0xff] }
0x13a6   : > { %13786 = vmatmul.mubr.msk.bf16.gmra.mrb[60].mxu1 %vm1333_vm0, %v20943_v29  ;;  %v10547_v29 = vmul.f32 %v22548_v57, %v10511_v46 }
0x13a7   : > { %13789 = vmatprep.mubr.msk.bf16.mxu1 %vm1333_vm0, %v20960_v24  ;;  %v22549_v24 = vrot.slane %v20590_v52, 1 }
0x13ae   : > { %13790 = vmatmul.mubr.msk.bf16.gmra.mrb[64].mxu1 %vm1333_vm0, %v20965_v13  ;;  %v10476_v13 = vsel %vm2119_vm2, %v22549_v24, %v10475_v15 }
0x13af   : > { %13793 = vmatprep.mubr.msk.bf16.mxu1 %vm1333_vm0, %v20971_v19  ;;  %v10565_v19 = vpack.c.bf16 %v10547_v29, %v10476_v13  ;;  %v11351_v29 = vld [vmem:[#allocation2 + $0x78] sm:$0xff] }
0x13b6   : > { %13794 = vmatmul.mubr.msk.bf16.gmra.mrb[68].mxu1 %vm1333_vm0, %v20989_v31  ;;  %v21452_v31 = vld [vmem:[#allocation19 + $0x1] ss:$0 sm:$0xff] }
0x13b7   : > { %13797 = vmatprep.mubr.msk.bf16.mxu1 %vm1333_vm0, %v20995_v59 }
0x13be   : > { %13798 = vmatmul.mubr.msk.bf16.gmra.mrb[72].mxu1 %vm1333_vm0, %v21004_v38 }
0x13bf   : > { %13801 = vmatprep.mubr.msk.bf16.mxu1 %vm1333_vm0, %v21019_v48 }
0x13c6   : > { %13802 = vmatmul.mubr.msk.bf16.gmra.mrb[76].mxu1 %vm1333_vm0, %v21024_v14  ;;  %v11338_v14 = vld [vmem:[#allocation2 + $0x10] sm:$0xff] }
0x13c7   : > { %13805 = vmatprep.mubr.msk.bf16.mxu1 %vm1333_vm0, %v21044_v33 }
0x13ce   : > { %13806 = vmatmul.mubr.msk.bf16.gmra.mrb[80].mxu1 %vm1333_vm0, %v21062_v12  ;;  %v11336_v12 = vld [vmem:[#allocation2] sm:$0xff] }
0x13cf   : > { %13809 = vmatprep.mubr.msk.bf16.mxu1 %vm1333_vm0, %v21072_v40 }
0x13d6   : > { %13810 = vmatmul.mubr.msk.bf16.gmra.mrb[84].mxu1 %vm1333_vm0, %v10565_v19  ;;  %v11349_v19 = vld [vmem:[#allocation2 + $0x68] sm:$0xff] }
0x1471   : > { %v13783_v59 = vpop.f32.mrb[56].mxu1 }
0x1472   : > { %v11306_v38 = vadd.f32 %v13783_v59, %v21452_v31  ;;  %v11139_v48 = vpop.f32.mrb[57].mxu1 }
0x1473   : > { %v11304_v33 = vadd.f32 %v21452_v31, %v11139_v48  ;;  %v13784_v27 = vpop.f32.mrb[58].mxu1 }
0x1474   : > { %v11370_v7 = vadd.f32 %v11338_v14, %v11306_v38  ;;  %v11307_v52 = vadd.f32 %v13784_v27, %v21452_v31  ;;  %v11142_v22 = vpop.f32.mrb[59].mxu1 }
0x1475   : > { %v11368_v40 = vadd.f32 %v11336_v12, %v11304_v33  ;;  %v11305_v0 = vadd.f32 %v21452_v31, %v11142_v22  ;;  %v11354_v33 = vld [vmem:[#allocation2 + $0x90] sm:$0xff] }
0x1476   : > { %11402 = vst.msk [vmem:[%s21460_s4 + $0x10] sm:$0xff] %vm1333_vm0, %v11370_v7  ;;  %v11371_v1 = vadd.f32 %v11339_v45, %v11307_v52  ;;  %v11352_v52 = vld [vmem:[#allocation2 + $0x80] sm:$0xff] }
0x1477   : > { %11400 = vst.msk [vmem:[%s21460_s4] sm:$0xff] %vm1333_vm0, %v11368_v40  ;;  %v11369_v53 = vadd.f32 %v11337_v11, %v11305_v0  ;;  %v11355_v0 = vld [vmem:[#allocation2 + $0x98] sm:$0xff] }
0x1478   : > { %11403 = vst.msk [vmem:[%s21460_s4 + $0x18] sm:$0xff] %vm1333_vm0, %v11371_v1 }
0x1479   : > { %11401 = vst.msk [vmem:[%s21460_s4 + $0x8] sm:$0xff] %vm1333_vm0, %v11369_v53  ;;  %v13787_v43 = vpop.f32.mrb[60].mxu1  ;;  %v11353_v53 = vld [vmem:[#allocation2 + $0x88] sm:$0xff] }
0x147a   : > { %v11310_v4 = vadd.f32 %v13787_v43, %v21452_v31  ;;  %v11155_v34 = vpop.f32.mrb[61].mxu1 }
0x147b   : > { %v11308_v44 = vadd.f32 %v21452_v31, %v11155_v34  ;;  %v13788_v18 = vpop.f32.mrb[62].mxu1 }
0x147c   : > { %v11374_v50 = vadd.f32 %v11342_v32, %v11310_v4  ;;  %v11311_v26 = vadd.f32 %v13788_v18, %v21452_v31  ;;  %v11158_v42 = vpop.f32.mrb[63].mxu1 }
0x147d   : > { %v11372_v23 = vadd.f32 %v11340_v16, %v11308_v44  ;;  %v11309_v30 = vadd.f32 %v21452_v31, %v11158_v42  ;;  %v11358_v44 = vld [vmem:[#allocation2 + $0xb0] sm:$0xff] }
0x147e   : > { %11406 = vst.msk [vmem:[%s21460_s4 + $0x30] sm:$0xff] %vm1333_vm0, %v11374_v50  ;;  %v11375_v20 = vadd.f32 %v11343_v36, %v11311_v26  ;;  %v11356_v26 = vld [vmem:[#allocation2 + $0xa0] sm:$0xff] }
0x147f   : > { %11404 = vst.msk [vmem:[%s21460_s4 + $0x20] sm:$0xff] %vm1333_vm0, %v11372_v23  ;;  %v11373_v17 = vadd.f32 %v11341_v8, %v11309_v30  ;;  %v11359_v30 = vld [vmem:[#allocation2 + $0xb8] sm:$0xff] }
0x1480   : > { %11407 = vst.msk [vmem:[%s21460_s4 + $0x38] sm:$0xff] %vm1333_vm0, %v11375_v20 }
0x1481   : > { %11405 = vst.msk [vmem:[%s21460_s4 + $0x28] sm:$0xff] %vm1333_vm0, %v11373_v17  ;;  %v13791_v62 = vpop.f32.mrb[64].mxu1  ;;  %v11357_v17 = vld [vmem:[#allocation2 + $0xa8] sm:$0xff] }
0x1482   : > { %v11314_v63 = vadd.f32 %v13791_v62, %v21452_v31  ;;  %v11171_v2 = vpop.f32.mrb[65].mxu1 }
0x1483   : > { %v11312_v25 = vadd.f32 %v21452_v31, %v11171_v2  ;;  %v13792_v35 = vpop.f32.mrb[66].mxu1 }
0x1484   : > { %v11378_v10 = vadd.f32 %v11346_v5, %v11314_v63  ;;  %v11315_v3 = vadd.f32 %v13792_v35, %v21452_v31  ;;  %v11174_v39 = vpop.f32.mrb[67].mxu1 }
0x1485   : > { %v11376_v41 = vadd.f32 %v11344_v58, %v11312_v25  ;;  %v11313_v49 = vadd.f32 %v21452_v31, %v11174_v39  ;;  %v11362_v25 = vld [vmem:[#allocation2 + $0xd0] sm:$0xff] }
0x1486   : > { %11410 = vst.msk [vmem:[%s21460_s4 + $0x50] sm:$0xff] %vm1333_vm0, %v11378_v10  ;;  %v11379_v61 = vadd.f32 %v11347_v47, %v11315_v3  ;;  %v11360_v3 = vld [vmem:[#allocation2 + $0xc0] sm:$0xff] }
0x1487   : > { %11408 = vst.msk [vmem:[%s21460_s4 + $0x40] sm:$0xff] %vm1333_vm0, %v11376_v41  ;;  %v11377_v54 = vadd.f32 %v11345_v55, %v11313_v49  ;;  %v11363_v49 = vld [vmem:[#allocation2 + $0xd8] sm:$0xff] }
0x1488   : > { %11411 = vst.msk [vmem:[%s21460_s4 + $0x58] sm:$0xff] %vm1333_vm0, %v11379_v61 }
0x1489   : > { %11409 = vst.msk [vmem:[%s21460_s4 + $0x48] sm:$0xff] %vm1333_vm0, %v11377_v54  ;;  %v13795_v9 = vpop.f32.mrb[68].mxu1  ;;  %v11361_v54 = vld [vmem:[#allocation2 + $0xc8] sm:$0xff] }
0x148a   : > { %v11318_v56 = vadd.f32 %v13795_v9, %v21452_v31  ;;  %v11187_v21 = vpop.f32.mrb[69].mxu1 }
0x148b   : > { %v11316_v37 = vadd.f32 %v21452_v31, %v11187_v21  ;;  %v13796_v6 = vpop.f32.mrb[70].mxu1 }
0x148c   : > { %v11382_v60 = vadd.f32 %v11350_v51, %v11318_v56  ;;  %v11319_v15 = vadd.f32 %v13796_v6, %v21452_v31  ;;  %v11190_v46 = vpop.f32.mrb[71].mxu1 }
0x148d   : > { %v11380_v57 = vadd.f32 %v11348_v28, %v11316_v37  ;;  %v11317_v24 = vadd.f32 %v21452_v31, %v11190_v46  ;;  %v11366_v37 = vld [vmem:[#allocation2 + $0xf0] sm:$0xff] }
0x148e   : > { %11414 = vst.msk [vmem:[%s21460_s4 + $0x70] sm:$0xff] %vm1333_vm0, %v11382_v60  ;;  %v11383_v13 = vadd.f32 %v11351_v29, %v11319_v15  ;;  %v11364_v15 = vld [vmem:[#allocation2 + $0xe0] sm:$0xff] }
0x148f   : > { %11412 = vst.msk [vmem:[%s21460_s4 + $0x60] sm:$0xff] %vm1333_vm0, %v11380_v57  ;;  %v11381_v59 = vadd.f32 %v11349_v19, %v11317_v24  ;;  %v11367_v24 = vld [vmem:[#allocation2 + $0xf8] sm:$0xff] }
0x1490   : > { %11415 = vst.msk [vmem:[%s21460_s4 + $0x78] sm:$0xff] %vm1333_vm0, %v11383_v13 }
0x1491   : > { %11413 = vst.msk [vmem:[%s21460_s4 + $0x68] sm:$0xff] %vm1333_vm0, %v11381_v59  ;;  %v13799_v38 = vpop.f32.mrb[72].mxu1  ;;  %v11365_v59 = vld [vmem:[#allocation2 + $0xe8] sm:$0xff] }
0x1492   : > { %v11322_v48 = vadd.f32 %v13799_v38, %v21452_v31  ;;  %v11203_v14 = vpop.f32.mrb[73].mxu1 }
0x1493   : > { %v11320_v27 = vadd.f32 %v21452_v31, %v11203_v14  ;;  %v13800_v7 = vpop.f32.mrb[74].mxu1 }
0x1494   : > { %v11386_v12 = vadd.f32 %v11354_v33, %v11322_v48  ;;  %v11323_v22 = vadd.f32 %v13800_v7, %v21452_v31  ;;  %v11206_v40 = vpop.f32.mrb[75].mxu1 }
0x1495   : > { %v11384_v45 = vadd.f32 %v11352_v52, %v11320_v27  ;;  %v11321_v1 = vadd.f32 %v21452_v31, %v11206_v40 }
0x1496   : > { %11418 = vst.msk [vmem:[%s21460_s4 + $0x90] sm:$0xff] %vm1333_vm0, %v11386_v12  ;;  %v11387_v11 = vadd.f32 %v11355_v0, %v11323_v22 }
0x1497   : > { %11416 = vst.msk [vmem:[%s21460_s4 + $0x80] sm:$0xff] %vm1333_vm0, %v11384_v45  ;;  %v11385_v43 = vadd.f32 %v11353_v53, %v11321_v1 }
0x1498   : > { %11419 = vst.msk [vmem:[%s21460_s4 + $0x98] sm:$0xff] %vm1333_vm0, %v11387_v11 }
0x1499   : > { %11417 = vst.msk [vmem:[%s21460_s4 + $0x88] sm:$0xff] %vm1333_vm0, %v11385_v43  ;;  %v13803_v4 = vpop.f32.mrb[76].mxu1 }
0x149a   : > { %v11326_v34 = vadd.f32 %v13803_v4, %v21452_v31  ;;  %v11219_v32 = vpop.f32.mrb[77].mxu1 }
0x149b   : > { %v11324_v18 = vadd.f32 %v21452_v31, %v11219_v32  ;;  %v13804_v50 = vpop.f32.mrb[78].mxu1 }
0x149c   : > { %v11390_v16 = vadd.f32 %v11358_v44, %v11326_v34  ;;  %v11327_v42 = vadd.f32 %v13804_v50, %v21452_v31  ;;  %v11222_v23 = vpop.f32.mrb[79].mxu1 }
0x149d   : > { %v11388_v36 = vadd.f32 %v11356_v26, %v11324_v18  ;;  %v11325_v20 = vadd.f32 %v21452_v31, %v11222_v23 }
0x149e   : > { %11422 = vst.msk [vmem:[%s21460_s4 + $0xb0] sm:$0xff] %vm1333_vm0, %v11390_v16  ;;  %v11391_v8 = vadd.f32 %v11359_v30, %v11327_v42 }
0x149f   : > { %11420 = vst.msk [vmem:[%s21460_s4 + $0xa0] sm:$0xff] %vm1333_vm0, %v11388_v36  ;;  %v11389_v62 = vadd.f32 %v11357_v17, %v11325_v20 }
0x14a0   : > { %11423 = vst.msk [vmem:[%s21460_s4 + $0xb8] sm:$0xff] %vm1333_vm0, %v11391_v8 }
0x14a1   : > { %11421 = vst.msk [vmem:[%s21460_s4 + $0xa8] sm:$0xff] %vm1333_vm0, %v11389_v62  ;;  %v13807_v63 = vpop.f32.mrb[80].mxu1 }
0x14a2   : > { %v11330_v2 = vadd.f32 %v13807_v63, %v21452_v31  ;;  %v11235_v5 = vpop.f32.mrb[81].mxu1 }
0x14a3   : > { %v11328_v35 = vadd.f32 %v21452_v31, %v11235_v5  ;;  %v13808_v10 = vpop.f32.mrb[82].mxu1 }
0x14a4   : > { %v11394_v58 = vadd.f32 %v11362_v25, %v11330_v2  ;;  %v11331_v39 = vadd.f32 %v13808_v10, %v21452_v31  ;;  %v11238_v41 = vpop.f32.mrb[83].mxu1 }
0x14a5   : > { %v11392_v47 = vadd.f32 %v11360_v3, %v11328_v35  ;;  %v11329_v61 = vadd.f32 %v21452_v31, %v11238_v41 }
0x14a6   : > { %11426 = vst.msk [vmem:[%s21460_s4 + $0xd0] sm:$0xff] %vm1333_vm0, %v11394_v58  ;;  %v11395_v55 = vadd.f32 %v11363_v49, %v11331_v39 }
0x14a7   : > { %11424 = vst.msk [vmem:[%s21460_s4 + $0xc0] sm:$0xff] %vm1333_vm0, %v11392_v47  ;;  %v11393_v9 = vadd.f32 %v11361_v54, %v11329_v61 }
0x14a8   : > { %11427 = vst.msk [vmem:[%s21460_s4 + $0xd8] sm:$0xff] %vm1333_vm0, %v11395_v55 }
0x14a9   : > { %11425 = vst.msk [vmem:[%s21460_s4 + $0xc8] sm:$0xff] %vm1333_vm0, %v11393_v9  ;;  %v13811_v56 = vpop.f32.mrb[84].mxu1 }
0x14aa   : > { %v11334_v21 = vadd.f32 %v13811_v56, %v21452_v31  ;;  %v11251_v51 = vpop.f32.mrb[85].mxu1 }
0x14ab   : > { %v11332_v6 = vadd.f32 %v21452_v31, %v11251_v51  ;;  %v13812_v60 = vpop.f32.mrb[86].mxu1 }
0x14ac   : > { %v11398_v28 = vadd.f32 %v11366_v37, %v11334_v21  ;;  %v11335_v46 = vadd.f32 %v13812_v60, %v21452_v31  ;;  %v11254_v57 = vpop.f32.mrb[87].mxu1 }
0x14ad   : > { %v11396_v29 = vadd.f32 %v11364_v15, %v11332_v6  ;;  %v11333_v13 = vadd.f32 %v21452_v31, %v11254_v57 }
0x14ae   : > { %11430 = vst.msk [vmem:[%s21460_s4 + $0xf0] sm:$0xff] %vm1333_vm0, %v11398_v28  ;;  %v11399_v19 = vadd.f32 %v11367_v24, %v11335_v46 }
0x14af   : > { %11428 = vst.msk [vmem:[%s21460_s4 + $0xe0] sm:$0xff] %vm1333_vm0, %v11396_v29  ;;  %v11397_v38 = vadd.f32 %v11365_v59, %v11333_v13 }
0x14b0   : > { %11431 = vst.msk [vmem:[%s21460_s4 + $0xf8] sm:$0xff] %vm1333_vm0, %v11399_v19 }
0x14b1   : > { %11429 = vst.msk [vmem:[%s21460_s4 + $0xe8] sm:$0xff] %vm1333_vm0, %v11397_v38 }
0x14b2   : > { %14910 = shalt.err (!%p14907_p9)
}
0x14b3   : > { %s14911_s4 = scalar_lea.hbm %s21553_s9, 4096  ;;  %s14915_s0 = scalar_lea.hbm %s22551_s22, 8192 }
0x14b4   : > { %p14912_p4 = scmp.ne.s32.totalorder %s21553_s9, %s14911_s4  ;;  %p14916_p5 = scmp.lt.u32.totalorder %s21553_s9, %s22551_s22 }
0x14b5   : > { %p14917_p2 = scmp.lt.u32.totalorder %s14915_s0, %s14911_s4  ;;  %p14919_p10 = scmp.lt.u32.totalorder %s14911_s4, %s21553_s9 }
0x14b6   : > { %p14913_p3 = pnand %p14912_p4, %p22552_p1 }
0x14b7   : > { %p14918_p7 = por %p14917_p2, %p14916_p5 }
0x14b8   : > { %p14914_p0 = pneg %p14913_p3 }
0x14b9   : > { %p14920_p11 = por %p14919_p10, %p14918_p7 }
0x14bb   : > { %p14921_p12 = pnand %p14920_p11, %p14914_p0 }
0x14bd   : > { %14924 = shalt.err (!%p14921_p12)
}
0x14be   : > { %s14999_s30 = smov 128   ;;  %s15000_s24 = smov 8  }
0x14bf   : > { %s22553_s5 = scalar_lea.sflag [#allocation9], %s15375_s27 }
0x14c0   : > { %14455 = dma.vmem_to_hbm [thread:$0]  (%p22552_p1), %s21555_s1, 4096, %s21553_s9, %s22553_s5, %s14999_s30, %s14999_s30, %s15000_s24  }
0x14c1 PF: > { %s11461_s3 = sand.u32 1, %s14967_s18   ;;  %p22554_p13 = scmp.ne.s32.totalorder %s21903_s10, 0 }
0x14c2   : > { %p22555_p8 = scmp.ge.s32.totalorder %s14979_s21, 2  ;;  %s11462_s2 = scalar_lea.sflag [#allocation9], %s11461_s3 }
0x14c4   : > { %p14484_p6 = pnand %p22555_p8, %p22554_p13 }
0x14c6   : > { %14962 = dma.done.wait (!%p14484_p6), %s11462_s2, 4096  }
0x14c7   : > { %14964 = vsyncadd (!%p14484_p6), %s11462_s2, 4294963200  ;;  %p32_p9 = scmp.ge.s32.totalorder %s15299_s26, 4   ;;  %s22556_s18 = smov %s14971_s19 }
0x14c8   : > { %s22557_s19 = smov %s14975_s20  ;;  %s22558_s20 = smov %s15311_s29 }
0x14c9   : > { %s22559_s21 = smov %s15299_s26  ;;  %34 = sbr.rel (!%p32_p9) target bundleno = 20 (0x14), region = 183 }
0x14d0   :  { %11467 = vsyncpa [#allocation8], 1 }
0x14d1   :  { %11469 = vsyncpa [#allocation8 + $0x1], 1 }
0x14d2   :  { %11470 = vsyncpa [#allocation11], 1 }
0x14d3   :  { %11471 = vsyncpa [#allocation14], 1 }
0x14d4   :  { %11472 = vsyncpa [#allocation17], 1 }
0x14d5   :  { %11473 = vsyncpa [#allocation20], 1 }
0x14d6   :  { %11474 = vsyncpa [#allocation9], 1 }
0x14d7   :  { %11476 = vsyncpa [#allocation9 + $0x1], 1 }

</bundles_post_ra>
